<compile_context>
chip_gen: v6e
topology: v6e:2x2x1
jax: 0.10.0
libtpu: 0.0.40
codegen_flags: <defaults>
</compile_context>

<pallas_src>
import functools

import jax
import jax.numpy as jnp
from jax.experimental import pallas as pl
from jax.experimental.pallas import tpu as pltpu


# ---------------------------------------------------------------------------
# Pallas kernels
# ---------------------------------------------------------------------------

def _mm_bias_act_kernel(a_ref, b_ref, bias_ref, o_ref, acc_ref, *, act, nsteps):
    """Tiled GEMM (bf16 in, f32 acc) with fused bias + activation epilogue."""
    k = pl.program_id(2)

    @pl.when(k == 0)
    def _():
        acc_ref[...] = jnp.zeros_like(acc_ref)

    acc_ref[...] += jnp.dot(a_ref[...], b_ref[...],
                            preferred_element_type=jnp.float32)

    @pl.when(k == nsteps - 1)
    def _():
        y = acc_ref[...] + bias_ref[...]          # (tm, tn) + (1, tn) broadcast
        if act == "relu":
            y = jnp.maximum(y, 0.0)
        elif act == "sigmoid":
            y = jax.nn.sigmoid(y)
        o_ref[...] = y.astype(o_ref.dtype)


def _encode_head_kernel(a_ref, b_ref, bias_ref, eps_ref, ml_ref, z_ref, acc_ref,
                        *, nsteps, latent):
    """Fused fc_mu||fc_logvar GEMM + reparameterization epilogue."""
    k = pl.program_id(0)

    @pl.when(k == 0)
    def _():
        acc_ref[...] = jnp.zeros_like(acc_ref)

    acc_ref[...] += jnp.dot(a_ref[...], b_ref[...],
                            preferred_element_type=jnp.float32)

    @pl.when(k == nsteps - 1)
    def _():
        y = acc_ref[...] + bias_ref[...]          # (tm, 2*latent)
        mu = y[:, :latent]
        logvar = y[:, latent:]
        ml_ref[...] = y
        z_ref[...] = mu + eps_ref[...] * jnp.exp(0.5 * logvar)


# ---------------------------------------------------------------------------
# GEMM wrappers
# ---------------------------------------------------------------------------

def _round_up(x, m):
    return ((x + m - 1) // m) * m


def _pick_tk(Kp):
    for cand in (1024, 512, 256, 128):
        if Kp % cand == 0:
            return cand
    return 128


def matmul_bias_act(a, b, bias, act="none", out_dtype=jnp.float32):
    """act(a @ b + bias).  a:(M,K), b:(K,N), bias:(N,) -> (M,N)."""
    M, K = a.shape
    K2, N = b.shape
    assert K == K2

    if M >= 256:
        tm = 256
    elif M >= 128:
        tm = 128
    else:
        tm = _round_up(max(M, 1), 8)
    Mp = _round_up(M, tm)

    Np = _round_up(N, 128)
    tn = 256 if (Np >= 256 and Np % 256 == 0) else 128

    Kp = _round_up(K, 128)
    tk = _pick_tk(Kp)
    nk = Kp // tk

    a = a.astype(jnp.bfloat16)
    b = b.astype(jnp.bfloat16)
    if (Mp, Kp) != (M, K):
        a = jnp.zeros((Mp, Kp), jnp.bfloat16).at[:M, :K].set(a)
    if (Kp, Np) != (K, N):
        b = jnp.zeros((Kp, Np), jnp.bfloat16).at[:K, :N].set(b)
    bias2 = bias.astype(jnp.float32).reshape(1, N)
    if Np != N:
        bias2 = jnp.zeros((1, Np), jnp.float32).at[:, :N].set(bias2)

    kernel = functools.partial(_mm_bias_act_kernel, act=act, nsteps=nk)
    out = pl.pallas_call(
        kernel,
        out_shape=jax.ShapeDtypeStruct((Mp, Np), out_dtype),
        grid_spec=pltpu.PrefetchScalarGridSpec(
            num_scalar_prefetch=0,
            grid=(Mp // tm, Np // tn, nk),
            in_specs=[
                pl.BlockSpec((tm, tk), lambda i, j, k: (i, k)),
                pl.BlockSpec((tk, tn), lambda i, j, k: (k, j)),
                pl.BlockSpec((1, tn), lambda i, j, k: (0, j)),
            ],
            out_specs=pl.BlockSpec((tm, tn), lambda i, j, k: (i, j)),
            scratch_shapes=[pltpu.VMEM((tm, tn), jnp.float32)],
        ),
        compiler_params=pltpu.CompilerParams(
            dimension_semantics=("parallel", "parallel", "arbitrary")),
    )(a, b, bias2)
    if (Mp, Np) != (M, N):
        out = out[:M, :N]
    return out


def encode_head(h_flat, w_cat, b_cat, eps, latent):
    """Fused fc_mu/fc_logvar + reparameterize.

    h_flat:(B,K), w_cat:(K,2*latent) bf16, b_cat:(2*latent,), eps:(B,latent)
    -> mu:(B,latent), logvar:(B,latent), z:(B,latent)
    """
    B, K = h_flat.shape
    Bp = _round_up(max(B, 1), 8)
    Kp = _round_up(K, 128)
    tk = _pick_tk(Kp)
    nk = Kp // tk

    a = h_flat.astype(jnp.bfloat16)
    if (Bp, Kp) != (B, K):
        a = jnp.zeros((Bp, Kp), jnp.bfloat16).at[:B, :K].set(a)
    w = w_cat.astype(jnp.bfloat16)
    if Kp != K:
        w = jnp.zeros((Kp, 2 * latent), jnp.bfloat16).at[:K, :].set(w)
    bias2 = b_cat.astype(jnp.float32).reshape(1, 2 * latent)
    epsp = eps.astype(jnp.float32)
    if Bp != B:
        epsp = jnp.zeros((Bp, latent), jnp.float32).at[:B, :].set(epsp)

    kernel = functools.partial(_encode_head_kernel, nsteps=nk, latent=latent)
    ml, z = pl.pallas_call(
        kernel,
        out_shape=(jax.ShapeDtypeStruct((Bp, 2 * latent), jnp.float32),
                   jax.ShapeDtypeStruct((Bp, latent), jnp.float32)),
        grid_spec=pltpu.PrefetchScalarGridSpec(
            num_scalar_prefetch=0,
            grid=(nk,),
            in_specs=[
                pl.BlockSpec((Bp, tk), lambda k: (0, k)),
                pl.BlockSpec((tk, 2 * latent), lambda k: (k, 0)),
                pl.BlockSpec((1, 2 * latent), lambda k: (0, 0)),
                pl.BlockSpec((Bp, latent), lambda k: (0, 0)),
            ],
            out_specs=[pl.BlockSpec((Bp, 2 * latent), lambda k: (0, 0)),
                       pl.BlockSpec((Bp, latent), lambda k: (0, 0))],
            scratch_shapes=[pltpu.VMEM((Bp, 2 * latent), jnp.float32)],
        ),
        compiler_params=pltpu.CompilerParams(
            dimension_semantics=("arbitrary",)),
    )(a, w, bias2, epsp)
    return ml[:B, :latent], ml[:B, latent:], z[:B]


# ---------------------------------------------------------------------------
# NHWC conv / conv-transpose built on the Pallas GEMM
# ---------------------------------------------------------------------------

def _im2col_nhwc(x, k, stride, pad):
    """x:(N,H,W,C) -> cols:(N*Ho*Wo, k*k*C), ordering (kh, kw, c) with c innermost."""
    N, H, W, C = x.shape
    xp = jnp.pad(x, ((0, 0), (pad, pad), (pad, pad), (0, 0)))
    Ho = (H + 2 * pad - k) // stride + 1
    Wo = (W + 2 * pad - k) // stride + 1
    patches = []
    for i in range(k):
        for j in range(k):
            patches.append(xp[:, i:i + stride * Ho:stride,
                              j:j + stride * Wo:stride, :])
    cols = jnp.stack(patches, axis=3)                  # (N, Ho, Wo, k*k, C)
    return cols.reshape(N * Ho * Wo, k * k * C), Ho, Wo


def conv2d_nhwc(x, w_mat, bias, k, stride, pad, act, out_dtype=jnp.bfloat16):
    """x:(N,H,W,Cin), w_mat:(k*k*Cin, Cout) -> (N,Ho,Wo,Cout)."""
    N = x.shape[0]
    Cout = w_mat.shape[1]
    cols, Ho, Wo = _im2col_nhwc(x, k, stride, pad)
    y = matmul_bias_act(cols, w_mat, bias, act=act, out_dtype=out_dtype)
    return y.reshape(N, Ho, Wo, Cout)


def conv_transpose2d_nhwc(x, w_mat, bias4, cout, act, out_dtype=jnp.bfloat16):
    """ConvTranspose2d(k=4,s=2,p=1) via sub-pixel (parity) decomposition.

    x:(N,H,W,Cin), w_mat:(9*Cin, 4*Cout) sub-pixel weight, bias4:(4*Cout,)
    -> (N, 2H, 2W, Cout)
    """
    N, H, W, _ = x.shape
    cols, _, _ = _im2col_nhwc(x, 3, 1, 1)              # (N*H*W, 9*Cin)
    y = matmul_bias_act(cols, w_mat, bias4, act=act, out_dtype=out_dtype)
    y = y.reshape(N, H, W, 2, 2, cout)                 # (..., r, c, Cout)
    y = y.transpose(0, 1, 3, 2, 4, 5).reshape(N, 2 * H, 2 * W, cout)
    return y


# ---------------------------------------------------------------------------
# Weight preparation (once, outside the jitted forward)
# ---------------------------------------------------------------------------

def _build_subpixel_weight(wt):
    """wt:(Cin,Cout,4,4) PyTorch ConvTranspose2d weight -> (9*Cin, 4*Cout).

    For output parity (r,c), out[2a+r, 2b+c] only uses a 2x2 input window and a 2x2
    subset of the 4x4 kernel; embed the four sub-kernels into a common 3x3 window
    (pad=1) so a single GEMM produces all four parities (pixel-shuffled afterwards).
    """
    Cin, Cout = wt.shape[0], wt.shape[1]
    km = [[3, 1, None], [None, 2, 0]]   # km[parity][window_pos] -> kernel tap (or unused)
    w3 = jnp.zeros((3, 3, Cin, 2, 2, Cout), jnp.float32)
    for r in range(2):
        for c in range(2):
            for wy in range(3):
                kh = km[r][wy]
                if kh is None:
                    continue
                for wx in range(3):
                    kw = km[c][wx]
                    if kw is None:
                        continue
                    w3 = w3.at[wy, wx, :, r, c, :].set(wt[:, :, kh, kw])
    return w3.reshape(9 * Cin, 4 * Cout)


def prepare_gemm_params(p, latent_dim=128):
    """Convert PyTorch-layout params to GEMM-ready bf16 matrices (NHWC ordering)."""
    g = {}
    # encoder convs: (Cout,Cin,4,4) -> (kh,kw,Cin,Cout) -> (16*Cin, Cout)
    for idx in range(4):
        w = p[f"enc{idx}_w"]
        cin = w.shape[1]
        g[f"enc{idx}_w"] = (w.transpose(2, 3, 1, 0)
                            .reshape(16 * cin, -1).astype(jnp.bfloat16))
        g[f"enc{idx}_b"] = p[f"enc{idx}_b"].astype(jnp.float32)

    # fc_mu / fc_logvar fused: permute K from NCHW-flat (c,h,w) to NHWC-flat (h,w,c)
    def perm_in(w):                                     # (latent, 4096)
        return (w.reshape(-1, 256, 4, 4).transpose(0, 2, 3, 1)
                 .reshape(-1, 256 * 4 * 4))
    w_cat = jnp.concatenate([perm_in(p["fc_mu_w"]),
                             perm_in(p["fc_logvar_w"])], axis=0)   # (2*latent, 4096)
    g["fc_head_w"] = w_cat.T.astype(jnp.bfloat16)                  # (4096, 2*latent)
    g["fc_head_b"] = jnp.concatenate([p["fc_mu_b"],
                                      p["fc_logvar_b"]]).astype(jnp.float32)

    # fc_decode: permute output dim (c,h,w) -> (h,w,c) so its reshape is NHWC
    wd = (p["fc_decode_w"].reshape(256, 4, 4, latent_dim)
          .transpose(1, 2, 0, 3).reshape(256 * 4 * 4, latent_dim))
    g["fc_decode_w"] = wd.T.astype(jnp.bfloat16)                   # (latent, 4096)
    g["fc_decode_b"] = (p["fc_decode_b"].reshape(256, 4, 4)
                        .transpose(1, 2, 0).reshape(-1).astype(jnp.float32))

    # decoder conv-transposes -> sub-pixel weights
    for idx in range(4):
        g[f"dec{idx}_w"] = _build_subpixel_weight(p[f"dec{idx}_w"]).astype(jnp.bfloat16)
        g[f"dec{idx}_b"] = jnp.tile(p[f"dec{idx}_b"], 4).astype(jnp.float32)
    return g


# ---------------------------------------------------------------------------
# Parameter construction (deterministic, synthetic, PyTorch layouts)
# ---------------------------------------------------------------------------

def _init(key, shape, fan_in):
    return jax.random.normal(key, shape, jnp.float32) / jnp.sqrt(fan_in)


def make_params(seed=42, latent_dim=128):
    keys = iter(jax.random.split(jax.random.PRNGKey(seed), 32))
    p = {}
    enc = [(3, 32), (32, 64), (64, 128), (128, 256)]
    for idx, (cin, cout) in enumerate(enc):
        p[f"enc{idx}_w"] = _init(next(keys), (cout, cin, 4, 4), cin * 16)
        p[f"enc{idx}_b"] = _init(next(keys), (cout,), cin * 16)
    flat = 256 * 4 * 4
    p["fc_mu_w"] = _init(next(keys), (latent_dim, flat), flat)
    p["fc_mu_b"] = _init(next(keys), (latent_dim,), flat)
    p["fc_logvar_w"] = _init(next(keys), (latent_dim, flat), flat)
    p["fc_logvar_b"] = _init(next(keys), (latent_dim,), flat)
    p["fc_decode_w"] = _init(next(keys), (flat, latent_dim), latent_dim)
    p["fc_decode_b"] = _init(next(keys), (flat,), latent_dim)
    dec = [(256, 128), (128, 64), (64, 32), (32, 3)]
    for idx, (cin, cout) in enumerate(dec):
        p[f"dec{idx}_w"] = _init(next(keys), (cin, cout, 4, 4), cin * 16)
        p[f"dec{idx}_b"] = _init(next(keys), (cout,), cin * 16)
    return p


# ---------------------------------------------------------------------------
# VAE forward
# ---------------------------------------------------------------------------

def vae_forward(gp, x_nchw, eps, latent_dim=128):
    x = x_nchw.transpose(0, 2, 3, 1)                   # -> NHWC once at the boundary
    B = x.shape[0]

    # ---- encode ----
    h = x
    for idx in range(4):
        h = conv2d_nhwc(h, gp[f"enc{idx}_w"], gp[f"enc{idx}_b"],
                        k=4, stride=2, pad=1, act="relu", out_dtype=jnp.bfloat16)
    h_flat = h.reshape(B, -1)                          # (B, 4*4*256), NHWC flatten

    # ---- fused fc_mu/fc_logvar + reparameterize ----
    mu, logvar, z = encode_head(h_flat, gp["fc_head_w"], gp["fc_head_b"],
                                eps, latent_dim)

    # ---- decode ----
    d = matmul_bias_act(z, gp["fc_decode_w"], gp["fc_decode_b"],
                        act="none", out_dtype=jnp.bfloat16)
    d = d.reshape(B, 4, 4, 256)                        # NHWC
    acts = ["relu", "relu", "relu", "sigmoid"]
    couts = [128, 64, 32, 3]
    for idx in range(4):
        od = jnp.float32 if idx == 3 else jnp.bfloat16
        d = conv_transpose2d_nhwc(d, gp[f"dec{idx}_w"], gp[f"dec{idx}_b"],
                                  couts[idx], act=acts[idx], out_dtype=od)
    recon = d.transpose(0, 3, 1, 2)                    # back to NCHW for the interface
    return recon, mu, logvar


# ---------------------------------------------------------------------------

if __name__ == "__main__":
    latent_dim = 128
    B = 2
    # fc layers require the encoder output to be 256x4x4 => input 3x64x64.
    key = jax.random.PRNGKey(0)
    kx, keps = jax.random.split(key)
    x = jax.random.normal(kx, (B, 3, 64, 64), jnp.float32)
    eps = jax.random.normal(keps, (B, latent_dim), jnp.float32)  # randn_like(std)

    params = make_params(seed=42, latent_dim=latent_dim)
    gparams = prepare_gemm_params(params, latent_dim=latent_dim)

    fwd = jax.jit(functools.partial(vae_forward, latent_dim=latent_dim))
    recon_x, mu, logvar = fwd(gparams, x, eps)
    jax.block_until_ready((recon_x, mu, logvar))

    assert recon_x.shape == (B, 3, 64, 64)
    assert mu.shape == (B, latent_dim)
    assert logvar.shape == (B, latent_dim)
    assert bool(jnp.all(jnp.isfinite(recon_x)))
    assert bool(jnp.all((recon_x >= 0.0) & (recon_x <= 1.0)))  # sigmoid output

    print("KERNEL_OK")
</pallas_src>

<mosaic_0001>
module attributes {stable_mosaic.version = 11 : i64} {
  func.func @_mm_bias_act_kernel(%arg0: i32, %arg1: i32, %arg2: i32, %arg3: memref<256x128xbf16, #tpu.memory_space<vmem>>, %arg4: memref<128x128xbf16, #tpu.memory_space<vmem>>, %arg5: memref<1x128xf32, #tpu.memory_space<vmem>>, %arg6: memref<256x128xbf16, #tpu.memory_space<vmem>>, %arg7: memref<256x128xf32, #tpu.memory_space<vmem>>) attributes {dimension_semantics = [#tpu.dimension_semantics<parallel>, #tpu.dimension_semantics<parallel>, #tpu.dimension_semantics<arbitrary>], iteration_bounds = array<i64: 8, 1, 1>, scalar_prefetch = 0 : i64, scratch_operands = 1 : i64, tpu.core_type = #tpu.core_type<tc>, window_params = [{transform_indices = @transform_0, window_bounds = array<i64: 256, 128>}, {transform_indices = @transform_1, window_bounds = array<i64: 128, 128>}, {transform_indices = @transform_2, window_bounds = array<i64: 1, 128>}, {transform_indices = @transform_3, window_bounds = array<i64: 256, 128>}]} {
    %c0_i32 = arith.constant 0 : i32
    %0 = arith.cmpi eq, %arg2, %c0_i32 : i32
    %1 = arith.extui %0 : i1 to i32
    %c0_i32_0 = arith.constant 0 : i32
    %2 = arith.cmpi ne, %1, %c0_i32_0 : i32
    scf.if %2 {
      %cst_10 = arith.constant 0.000000e+00 : f32
      %12 = vector.broadcast %cst_10 : f32 to vector<256x128xf32>
      %c0_11 = arith.constant 0 : index
      %c0_12 = arith.constant 0 : index
      %13 = vector.load %arg7[%c0_11, %c0_12] : memref<256x128xf32, #tpu.memory_space<vmem>>, vector<256x128xf32>
      tpu.vector_store %arg7[%c0_11, %c0_12], %12 {strides = array<i32>} : memref<256x128xf32, #tpu.memory_space<vmem>>, vector<256x128xf32>,
    } else {
    }
    %c0 = arith.constant 0 : index
    %c0_1 = arith.constant 0 : index
    %3 = vector.load %arg7[%c0, %c0_1] : memref<256x128xf32, #tpu.memory_space<vmem>>, vector<256x128xf32>
    %c0_2 = arith.constant 0 : index
    %c0_3 = arith.constant 0 : index
    %4 = vector.load %arg3[%c0_2, %c0_3] : memref<256x128xbf16, #tpu.memory_space<vmem>>, vector<256x128xbf16>
    %c0_4 = arith.constant 0 : index
    %c0_5 = arith.constant 0 : index
    %5 = vector.load %arg4[%c0_4, %c0_5] : memref<128x128xbf16, #tpu.memory_space<vmem>>, vector<128x128xbf16>
    %cst = arith.constant dense<0.000000e+00> : vector<256x128xf32>
    %6 = tpu.matmul %4, %5, %cst {dimension_numbers = #tpu.dot_dimension_numbers<[1], [0], [0], [1], [0, 0, 1, 1], [], []>} : vector<256x128xbf16>, vector<128x128xbf16>, vector<256x128xf32> -> vector<256x128xf32>
    %7 = arith.addf %3, %6 : vector<256x128xf32>
    %c0_6 = arith.constant 0 : index
    %c0_7 = arith.constant 0 : index
    %8 = vector.load %arg7[%c0_6, %c0_7] : memref<256x128xf32, #tpu.memory_space<vmem>>, vector<256x128xf32>
    tpu.vector_store %arg7[%c0_6, %c0_7], %7 {strides = array<i32>} : memref<256x128xf32, #tpu.memory_space<vmem>>, vector<256x128xf32>,
    %c0_i32_8 = arith.constant 0 : i32
    %9 = arith.cmpi eq, %arg2, %c0_i32_8 : i32
    %10 = arith.extui %9 : i1 to i32
    %c0_i32_9 = arith.constant 0 : i32
    %11 = arith.cmpi ne, %10, %c0_i32_9 : i32
    scf.if %11 {
      %c0_10 = arith.constant 0 : index
      %c0_11 = arith.constant 0 : index
      %12 = vector.load %arg7[%c0_10, %c0_11] : memref<256x128xf32, #tpu.memory_space<vmem>>, vector<256x128xf32>
      %c0_12 = arith.constant 0 : index
      %c0_13 = arith.constant 0 : index
      %13 = vector.load %arg5[%c0_12, %c0_13] : memref<1x128xf32, #tpu.memory_space<vmem>>, vector<1x128xf32>
      %14 = vector.broadcast %13 : vector<1x128xf32> to vector<256x128xf32>
      %15 = arith.addf %12, %14 : vector<256x128xf32>
      %cst_14 = arith.constant 0.000000e+00 : f32
      %16 = vector.broadcast %cst_14 : f32 to vector<256x128xf32>
      %17 = arith.maximumf %15, %16 : vector<256x128xf32>
      %18 = arith.truncf %17 : vector<256x128xf32> to vector<256x128xbf16>
      %c0_15 = arith.constant 0 : index
      %c0_16 = arith.constant 0 : index
      %19 = vector.load %arg6[%c0_15, %c0_16] : memref<256x128xbf16, #tpu.memory_space<vmem>>, vector<256x128xbf16>
      tpu.vector_store %arg6[%c0_15, %c0_16], %18 {strides = array<i32>} : memref<256x128xbf16, #tpu.memory_space<vmem>>, vector<256x128xbf16>,
    } else {
    }
    return
  }
  func.func @transform_0(%arg0: i32, %arg1: i32, %arg2: i32) -> (i32, i32) {
    %c0_i32 = arith.constant 0 : i32
    return %arg0, %arg2 : i32, i32
  }
  func.func @transform_1(%arg0: i32, %arg1: i32, %arg2: i32) -> (i32, i32) {
    %c0_i32 = arith.constant 0 : i32
    return %arg2, %arg1 : i32, i32
  }
  func.func @transform_2(%arg0: i32, %arg1: i32, %arg2: i32) -> (i32, i32) {
    %c0_i32 = arith.constant 0 : i32
    %c0_i32_0 = arith.constant 0 : i32
    return %c0_i32, %arg1 : i32, i32
  }
  func.func @transform_3(%arg0: i32, %arg1: i32, %arg2: i32) -> (i32, i32) {
    %c0_i32 = arith.constant 0 : i32
    return %arg0, %arg1 : i32, i32
  }
}

module attributes {stable_mosaic.version = 11 : i64} {
  func.func @_mm_bias_act_kernel(%arg0: i32, %arg1: i32, %arg2: i32, %arg3: memref<256x512xbf16, #tpu.memory_space<vmem>>, %arg4: memref<512x128xbf16, #tpu.memory_space<vmem>>, %arg5: memref<1x128xf32, #tpu.memory_space<vmem>>, %arg6: memref<256x128xbf16, #tpu.memory_space<vmem>>, %arg7: memref<256x128xf32, #tpu.memory_space<vmem>>) attributes {dimension_semantics = [#tpu.dimension_semantics<parallel>, #tpu.dimension_semantics<parallel>, #tpu.dimension_semantics<arbitrary>], iteration_bounds = array<i64: 2, 1, 1>, scalar_prefetch = 0 : i64, scratch_operands = 1 : i64, tpu.core_type = #tpu.core_type<tc>, window_params = [{transform_indices = @transform_0, window_bounds = array<i64: 256, 512>}, {transform_indices = @transform_1, window_bounds = array<i64: 512, 128>}, {transform_indices = @transform_2, window_bounds = array<i64: 1, 128>}, {transform_indices = @transform_3, window_bounds = array<i64: 256, 128>}]} {
    %c0_i32 = arith.constant 0 : i32
    %0 = arith.cmpi eq, %arg2, %c0_i32 : i32
    %1 = arith.extui %0 : i1 to i32
    %c0_i32_0 = arith.constant 0 : i32
    %2 = arith.cmpi ne, %1, %c0_i32_0 : i32
    scf.if %2 {
      %cst_10 = arith.constant 0.000000e+00 : f32
      %12 = vector.broadcast %cst_10 : f32 to vector<256x128xf32>
      %c0_11 = arith.constant 0 : index
      %c0_12 = arith.constant 0 : index
      %13 = vector.load %arg7[%c0_11, %c0_12] : memref<256x128xf32, #tpu.memory_space<vmem>>, vector<256x128xf32>
      tpu.vector_store %arg7[%c0_11, %c0_12], %12 {strides = array<i32>} : memref<256x128xf32, #tpu.memory_space<vmem>>, vector<256x128xf32>,
    } else {
    }
    %c0 = arith.constant 0 : index
    %c0_1 = arith.constant 0 : index
    %3 = vector.load %arg7[%c0, %c0_1] : memref<256x128xf32, #tpu.memory_space<vmem>>, vector<256x128xf32>
    %c0_2 = arith.constant 0 : index
    %c0_3 = arith.constant 0 : index
    %4 = vector.load %arg3[%c0_2, %c0_3] : memref<256x512xbf16, #tpu.memory_space<vmem>>, vector<256x512xbf16>
    %c0_4 = arith.constant 0 : index
    %c0_5 = arith.constant 0 : index
    %5 = vector.load %arg4[%c0_4, %c0_5] : memref<512x128xbf16, #tpu.memory_space<vmem>>, vector<512x128xbf16>
    %cst = arith.constant dense<0.000000e+00> : vector<256x128xf32>
    %6 = tpu.matmul %4, %5, %cst {dimension_numbers = #tpu.dot_dimension_numbers<[1], [0], [0], [1], [0, 0, 1, 1], [], []>} : vector<256x512xbf16>, vector<512x128xbf16>, vector<256x128xf32> -> vector<256x128xf32>
    %7 = arith.addf %3, %6 : vector<256x128xf32>
    %c0_6 = arith.constant 0 : index
    %c0_7 = arith.constant 0 : index
    %8 = vector.load %arg7[%c0_6, %c0_7] : memref<256x128xf32, #tpu.memory_space<vmem>>, vector<256x128xf32>
    tpu.vector_store %arg7[%c0_6, %c0_7], %7 {strides = array<i32>} : memref<256x128xf32, #tpu.memory_space<vmem>>, vector<256x128xf32>,
    %c0_i32_8 = arith.constant 0 : i32
    %9 = arith.cmpi eq, %arg2, %c0_i32_8 : i32
    %10 = arith.extui %9 : i1 to i32
    %c0_i32_9 = arith.constant 0 : i32
    %11 = arith.cmpi ne, %10, %c0_i32_9 : i32
    scf.if %11 {
      %c0_10 = arith.constant 0 : index
      %c0_11 = arith.constant 0 : index
      %12 = vector.load %arg7[%c0_10, %c0_11] : memref<256x128xf32, #tpu.memory_space<vmem>>, vector<256x128xf32>
      %c0_12 = arith.constant 0 : index
      %c0_13 = arith.constant 0 : index
      %13 = vector.load %arg5[%c0_12, %c0_13] : memref<1x128xf32, #tpu.memory_space<vmem>>, vector<1x128xf32>
      %14 = vector.broadcast %13 : vector<1x128xf32> to vector<256x128xf32>
      %15 = arith.addf %12, %14 : vector<256x128xf32>
      %cst_14 = arith.constant 0.000000e+00 : f32
      %16 = vector.broadcast %cst_14 : f32 to vector<256x128xf32>
      %17 = arith.maximumf %15, %16 : vector<256x128xf32>
      %18 = arith.truncf %17 : vector<256x128xf32> to vector<256x128xbf16>
      %c0_15 = arith.constant 0 : index
      %c0_16 = arith.constant 0 : index
      %19 = vector.load %arg6[%c0_15, %c0_16] : memref<256x128xbf16, #tpu.memory_space<vmem>>, vector<256x128xbf16>
      tpu.vector_store %arg6[%c0_15, %c0_16], %18 {strides = array<i32>} : memref<256x128xbf16, #tpu.memory_space<vmem>>, vector<256x128xbf16>,
    } else {
    }
    return
  }
  func.func @transform_0(%arg0: i32, %arg1: i32, %arg2: i32) -> (i32, i32) {
    %c0_i32 = arith.constant 0 : i32
    return %arg0, %arg2 : i32, i32
  }
  func.func @transform_1(%arg0: i32, %arg1: i32, %arg2: i32) -> (i32, i32) {
    %c0_i32 = arith.constant 0 : i32
    return %arg2, %arg1 : i32, i32
  }
  func.func @transform_2(%arg0: i32, %arg1: i32, %arg2: i32) -> (i32, i32) {
    %c0_i32 = arith.constant 0 : i32
    %c0_i32_0 = arith.constant 0 : i32
    return %c0_i32, %arg1 : i32, i32
  }
  func.func @transform_3(%arg0: i32, %arg1: i32, %arg2: i32) -> (i32, i32) {
    %c0_i32 = arith.constant 0 : i32
    return %arg0, %arg1 : i32, i32
  }
}

module attributes {stable_mosaic.version = 11 : i64} {
  func.func @_mm_bias_act_kernel(%arg0: i32, %arg1: i32, %arg2: i32, %arg3: memref<128x1024xbf16, #tpu.memory_space<vmem>>, %arg4: memref<1024x128xbf16, #tpu.memory_space<vmem>>, %arg5: memref<1x128xf32, #tpu.memory_space<vmem>>, %arg6: memref<128x128xbf16, #tpu.memory_space<vmem>>, %arg7: memref<128x128xf32, #tpu.memory_space<vmem>>) attributes {dimension_semantics = [#tpu.dimension_semantics<parallel>, #tpu.dimension_semantics<parallel>, #tpu.dimension_semantics<arbitrary>], iteration_bounds = array<i64: 1, 1, 1>, scalar_prefetch = 0 : i64, scratch_operands = 1 : i64, tpu.core_type = #tpu.core_type<tc>, window_params = [{transform_indices = @transform_0, window_bounds = array<i64: 128, 1024>}, {transform_indices = @transform_1, window_bounds = array<i64: 1024, 128>}, {transform_indices = @transform_2, window_bounds = array<i64: 1, 128>}, {transform_indices = @transform_3, window_bounds = array<i64: 128, 128>}]} {
    %c0_i32 = arith.constant 0 : i32
    %0 = arith.cmpi eq, %arg2, %c0_i32 : i32
    %1 = arith.extui %0 : i1 to i32
    %c0_i32_0 = arith.constant 0 : i32
    %2 = arith.cmpi ne, %1, %c0_i32_0 : i32
    scf.if %2 {
      %cst_10 = arith.constant 0.000000e+00 : f32
      %12 = vector.broadcast %cst_10 : f32 to vector<128x128xf32>
      %c0_11 = arith.constant 0 : index
      %c0_12 = arith.constant 0 : index
      %13 = vector.load %arg7[%c0_11, %c0_12] : memref<128x128xf32, #tpu.memory_space<vmem>>, vector<128x128xf32>
      tpu.vector_store %arg7[%c0_11, %c0_12], %12 {strides = array<i32>} : memref<128x128xf32, #tpu.memory_space<vmem>>, vector<128x128xf32>,
    } else {
    }
    %c0 = arith.constant 0 : index
    %c0_1 = arith.constant 0 : index
    %3 = vector.load %arg7[%c0, %c0_1] : memref<128x128xf32, #tpu.memory_space<vmem>>, vector<128x128xf32>
    %c0_2 = arith.constant 0 : index
    %c0_3 = arith.constant 0 : index
    %4 = vector.load %arg3[%c0_2, %c0_3] : memref<128x1024xbf16, #tpu.memory_space<vmem>>, vector<128x1024xbf16>
    %c0_4 = arith.constant 0 : index
    %c0_5 = arith.constant 0 : index
    %5 = vector.load %arg4[%c0_4, %c0_5] : memref<1024x128xbf16, #tpu.memory_space<vmem>>, vector<1024x128xbf16>
    %cst = arith.constant dense<0.000000e+00> : vector<128x128xf32>
    %6 = tpu.matmul %4, %5, %cst {dimension_numbers = #tpu.dot_dimension_numbers<[1], [0], [0], [1], [0, 0, 1, 1], [], []>} : vector<128x1024xbf16>, vector<1024x128xbf16>, vector<128x128xf32> -> vector<128x128xf32>
    %7 = arith.addf %3, %6 : vector<128x128xf32>
    %c0_6 = arith.constant 0 : index
    %c0_7 = arith.constant 0 : index
    %8 = vector.load %arg7[%c0_6, %c0_7] : memref<128x128xf32, #tpu.memory_space<vmem>>, vector<128x128xf32>
    tpu.vector_store %arg7[%c0_6, %c0_7], %7 {strides = array<i32>} : memref<128x128xf32, #tpu.memory_space<vmem>>, vector<128x128xf32>,
    %c0_i32_8 = arith.constant 0 : i32
    %9 = arith.cmpi eq, %arg2, %c0_i32_8 : i32
    %10 = arith.extui %9 : i1 to i32
    %c0_i32_9 = arith.constant 0 : i32
    %11 = arith.cmpi ne, %10, %c0_i32_9 : i32
    scf.if %11 {
      %c0_10 = arith.constant 0 : index
      %c0_11 = arith.constant 0 : index
      %12 = vector.load %arg7[%c0_10, %c0_11] : memref<128x128xf32, #tpu.memory_space<vmem>>, vector<128x128xf32>
      %c0_12 = arith.constant 0 : index
      %c0_13 = arith.constant 0 : index
      %13 = vector.load %arg5[%c0_12, %c0_13] : memref<1x128xf32, #tpu.memory_space<vmem>>, vector<1x128xf32>
      %14 = vector.broadcast %13 : vector<1x128xf32> to vector<128x128xf32>
      %15 = arith.addf %12, %14 : vector<128x128xf32>
      %cst_14 = arith.constant 0.000000e+00 : f32
      %16 = vector.broadcast %cst_14 : f32 to vector<128x128xf32>
      %17 = arith.maximumf %15, %16 : vector<128x128xf32>
      %18 = arith.truncf %17 : vector<128x128xf32> to vector<128x128xbf16>
      %c0_15 = arith.constant 0 : index
      %c0_16 = arith.constant 0 : index
      %19 = vector.load %arg6[%c0_15, %c0_16] : memref<128x128xbf16, #tpu.memory_space<vmem>>, vector<128x128xbf16>
      tpu.vector_store %arg6[%c0_15, %c0_16], %18 {strides = array<i32>} : memref<128x128xbf16, #tpu.memory_space<vmem>>, vector<128x128xbf16>,
    } else {
    }
    return
  }
  func.func @transform_0(%arg0: i32, %arg1: i32, %arg2: i32) -> (i32, i32) {
    %c0_i32 = arith.constant 0 : i32
    return %arg0, %arg2 : i32, i32
  }
  func.func @transform_1(%arg0: i32, %arg1: i32, %arg2: i32) -> (i32, i32) {
    %c0_i32 = arith.constant 0 : i32
    return %arg2, %arg1 : i32, i32
  }
  func.func @transform_2(%arg0: i32, %arg1: i32, %arg2: i32) -> (i32, i32) {
    %c0_i32 = arith.constant 0 : i32
    %c0_i32_0 = arith.constant 0 : i32
    return %c0_i32, %arg1 : i32, i32
  }
  func.func @transform_3(%arg0: i32, %arg1: i32, %arg2: i32) -> (i32, i32) {
    %c0_i32 = arith.constant 0 : i32
    return %arg0, %arg1 : i32, i32
  }
}

module attributes {stable_mosaic.version = 11 : i64} {
  func.func @_mm_bias_act_kernel(%arg0: i32, %arg1: i32, %arg2: i32, %arg3: memref<32x1024xbf16, #tpu.memory_space<vmem>>, %arg4: memref<1024x256xbf16, #tpu.memory_space<vmem>>, %arg5: memref<1x256xf32, #tpu.memory_space<vmem>>, %arg6: memref<32x256xbf16, #tpu.memory_space<vmem>>, %arg7: memref<32x256xf32, #tpu.memory_space<vmem>>) attributes {dimension_semantics = [#tpu.dimension_semantics<parallel>, #tpu.dimension_semantics<parallel>, #tpu.dimension_semantics<arbitrary>], iteration_bounds = array<i64: 1, 1, 2>, scalar_prefetch = 0 : i64, scratch_operands = 1 : i64, tpu.core_type = #tpu.core_type<tc>, window_params = [{transform_indices = @transform_0, window_bounds = array<i64: 32, 1024>}, {transform_indices = @transform_1, window_bounds = array<i64: 1024, 256>}, {transform_indices = @transform_2, window_bounds = array<i64: 1, 256>}, {transform_indices = @transform_3, window_bounds = array<i64: 32, 256>}]} {
    %c0_i32 = arith.constant 0 : i32
    %0 = arith.cmpi eq, %arg2, %c0_i32 : i32
    %1 = arith.extui %0 : i1 to i32
    %c0_i32_0 = arith.constant 0 : i32
    %2 = arith.cmpi ne, %1, %c0_i32_0 : i32
    scf.if %2 {
      %cst_9 = arith.constant 0.000000e+00 : f32
      %12 = vector.broadcast %cst_9 : f32 to vector<32x256xf32>
      %c0_10 = arith.constant 0 : index
      %c0_11 = arith.constant 0 : index
      %13 = vector.load %arg7[%c0_10, %c0_11] : memref<32x256xf32, #tpu.memory_space<vmem>>, vector<32x256xf32>
      tpu.vector_store %arg7[%c0_10, %c0_11], %12 {strides = array<i32>} : memref<32x256xf32, #tpu.memory_space<vmem>>, vector<32x256xf32>,
    } else {
    }
    %c0 = arith.constant 0 : index
    %c0_1 = arith.constant 0 : index
    %3 = vector.load %arg7[%c0, %c0_1] : memref<32x256xf32, #tpu.memory_space<vmem>>, vector<32x256xf32>
    %c0_2 = arith.constant 0 : index
    %c0_3 = arith.constant 0 : index
    %4 = vector.load %arg3[%c0_2, %c0_3] : memref<32x1024xbf16, #tpu.memory_space<vmem>>, vector<32x1024xbf16>
    %c0_4 = arith.constant 0 : index
    %c0_5 = arith.constant 0 : index
    %5 = vector.load %arg4[%c0_4, %c0_5] : memref<1024x256xbf16, #tpu.memory_space<vmem>>, vector<1024x256xbf16>
    %cst = arith.constant dense<0.000000e+00> : vector<32x256xf32>
    %6 = tpu.matmul %4, %5, %cst {dimension_numbers = #tpu.dot_dimension_numbers<[1], [0], [0], [1], [0, 0, 1, 1], [], []>} : vector<32x1024xbf16>, vector<1024x256xbf16>, vector<32x256xf32> -> vector<32x256xf32>
    %7 = arith.addf %3, %6 : vector<32x256xf32>
    %c0_6 = arith.constant 0 : index
    %c0_7 = arith.constant 0 : index
    %8 = vector.load %arg7[%c0_6, %c0_7] : memref<32x256xf32, #tpu.memory_space<vmem>>, vector<32x256xf32>
    tpu.vector_store %arg7[%c0_6, %c0_7], %7 {strides = array<i32>} : memref<32x256xf32, #tpu.memory_space<vmem>>, vector<32x256xf32>,
    %c1_i32 = arith.constant 1 : i32
    %9 = arith.cmpi eq, %arg2, %c1_i32 : i32
    %10 = arith.extui %9 : i1 to i32
    %c0_i32_8 = arith.constant 0 : i32
    %11 = arith.cmpi ne, %10, %c0_i32_8 : i32
    scf.if %11 {
      %c0_9 = arith.constant 0 : index
      %c0_10 = arith.constant 0 : index
      %12 = vector.load %arg7[%c0_9, %c0_10] : memref<32x256xf32, #tpu.memory_space<vmem>>, vector<32x256xf32>
      %c0_11 = arith.constant 0 : index
      %c0_12 = arith.constant 0 : index
      %13 = vector.load %arg5[%c0_11, %c0_12] : memref<1x256xf32, #tpu.memory_space<vmem>>, vector<1x256xf32>
      %14 = vector.broadcast %13 : vector<1x256xf32> to vector<32x256xf32>
      %15 = arith.addf %12, %14 : vector<32x256xf32>
      %cst_13 = arith.constant 0.000000e+00 : f32
      %16 = vector.broadcast %cst_13 : f32 to vector<32x256xf32>
      %17 = arith.maximumf %15, %16 : vector<32x256xf32>
      %18 = arith.truncf %17 : vector<32x256xf32> to vector<32x256xbf16>
      %c0_14 = arith.constant 0 : index
      %c0_15 = arith.constant 0 : index
      %19 = vector.load %arg6[%c0_14, %c0_15] : memref<32x256xbf16, #tpu.memory_space<vmem>>, vector<32x256xbf16>
      tpu.vector_store %arg6[%c0_14, %c0_15], %18 {strides = array<i32>} : memref<32x256xbf16, #tpu.memory_space<vmem>>, vector<32x256xbf16>,
    } else {
    }
    return
  }
  func.func @transform_0(%arg0: i32, %arg1: i32, %arg2: i32) -> (i32, i32) {
    %c0_i32 = arith.constant 0 : i32
    return %arg0, %arg2 : i32, i32
  }
  func.func @transform_1(%arg0: i32, %arg1: i32, %arg2: i32) -> (i32, i32) {
    %c0_i32 = arith.constant 0 : i32
    return %arg2, %arg1 : i32, i32
  }
  func.func @transform_2(%arg0: i32, %arg1: i32, %arg2: i32) -> (i32, i32) {
    %c0_i32 = arith.constant 0 : i32
    %c0_i32_0 = arith.constant 0 : i32
    return %c0_i32, %arg1 : i32, i32
  }
  func.func @transform_3(%arg0: i32, %arg1: i32, %arg2: i32) -> (i32, i32) {
    %c0_i32 = arith.constant 0 : i32
    return %arg0, %arg1 : i32, i32
  }
}

module attributes {stable_mosaic.version = 11 : i64} {
  func.func @_encode_head_kernel(%arg0: i32, %arg1: memref<8x1024xbf16, #tpu.memory_space<vmem>>, %arg2: memref<1024x256xbf16, #tpu.memory_space<vmem>>, %arg3: memref<1x256xf32, #tpu.memory_space<vmem>>, %arg4: memref<8x128xf32, #tpu.memory_space<vmem>>, %arg5: memref<8x256xf32, #tpu.memory_space<vmem>>, %arg6: memref<8x128xf32, #tpu.memory_space<vmem>>, %arg7: memref<8x256xf32, #tpu.memory_space<vmem>>) attributes {dimension_semantics = [#tpu.dimension_semantics<arbitrary>], iteration_bounds = array<i64: 4>, scalar_prefetch = 0 : i64, scratch_operands = 1 : i64, tpu.core_type = #tpu.core_type<tc>, window_params = [{transform_indices = @transform_0, window_bounds = array<i64: 8, 1024>}, {transform_indices = @transform_1, window_bounds = array<i64: 1024, 256>}, {pipeline_mode = #tpu.pipeline_mode<synchronous>, transform_indices = @transform_2, window_bounds = array<i64: 1, 256>}, {pipeline_mode = #tpu.pipeline_mode<synchronous>, transform_indices = @transform_3, window_bounds = array<i64: 8, 128>}, {pipeline_mode = #tpu.pipeline_mode<synchronous>, transform_indices = @transform_4, window_bounds = array<i64: 8, 256>}, {pipeline_mode = #tpu.pipeline_mode<synchronous>, transform_indices = @transform_5, window_bounds = array<i64: 8, 128>}]} {
    %c0_i32 = arith.constant 0 : i32
    %0 = arith.cmpi eq, %arg0, %c0_i32 : i32
    %1 = arith.extui %0 : i1 to i32
    %c0_i32_0 = arith.constant 0 : i32
    %2 = arith.cmpi ne, %1, %c0_i32_0 : i32
    scf.if %2 {
      %cst_9 = arith.constant 0.000000e+00 : f32
      %12 = vector.broadcast %cst_9 : f32 to vector<8x256xf32>
      %c0_10 = arith.constant 0 : index
      %c0_11 = arith.constant 0 : index
      %13 = vector.load %arg7[%c0_10, %c0_11] : memref<8x256xf32, #tpu.memory_space<vmem>>, vector<8x256xf32>
      tpu.vector_store %arg7[%c0_10, %c0_11], %12 {strides = array<i32>} : memref<8x256xf32, #tpu.memory_space<vmem>>, vector<8x256xf32>,
    } else {
    }
    %c0 = arith.constant 0 : index
    %c0_1 = arith.constant 0 : index
    %3 = vector.load %arg7[%c0, %c0_1] : memref<8x256xf32, #tpu.memory_space<vmem>>, vector<8x256xf32>
    %c0_2 = arith.constant 0 : index
    %c0_3 = arith.constant 0 : index
    %4 = vector.load %arg1[%c0_2, %c0_3] : memref<8x1024xbf16, #tpu.memory_space<vmem>>, vector<8x1024xbf16>
    %c0_4 = arith.constant 0 : index
    %c0_5 = arith.constant 0 : index
    %5 = vector.load %arg2[%c0_4, %c0_5] : memref<1024x256xbf16, #tpu.memory_space<vmem>>, vector<1024x256xbf16>
    %cst = arith.constant dense<0.000000e+00> : vector<8x256xf32>
    %6 = tpu.matmul %4, %5, %cst {dimension_numbers = #tpu.dot_dimension_numbers<[1], [0], [0], [1], [0, 0, 1, 1], [], []>} : vector<8x1024xbf16>, vector<1024x256xbf16>, vector<8x256xf32> -> vector<8x256xf32>
    %7 = arith.addf %3, %6 : vector<8x256xf32>
    %c0_6 = arith.constant 0 : index
    %c0_7 = arith.constant 0 : index
    %8 = vector.load %arg7[%c0_6, %c0_7] : memref<8x256xf32, #tpu.memory_space<vmem>>, vector<8x256xf32>
    tpu.vector_store %arg7[%c0_6, %c0_7], %7 {strides = array<i32>} : memref<8x256xf32, #tpu.memory_space<vmem>>, vector<8x256xf32>,
    %c3_i32 = arith.constant 3 : i32
    %9 = arith.cmpi eq, %arg0, %c3_i32 : i32
    %10 = arith.extui %9 : i1 to i32
    %c0_i32_8 = arith.constant 0 : i32
    %11 = arith.cmpi ne, %10, %c0_i32_8 : i32
    scf.if %11 {
      %c0_9 = arith.constant 0 : index
      %c0_10 = arith.constant 0 : index
      %12 = vector.load %arg7[%c0_9, %c0_10] : memref<8x256xf32, #tpu.memory_space<vmem>>, vector<8x256xf32>
      %c0_11 = arith.constant 0 : index
      %c0_12 = arith.constant 0 : index
      %13 = vector.load %arg3[%c0_11, %c0_12] : memref<1x256xf32, #tpu.memory_space<vmem>>, vector<1x256xf32>
      %14 = vector.broadcast %13 : vector<1x256xf32> to vector<8x256xf32>
      %15 = arith.addf %12, %14 : vector<8x256xf32>
      %16 = vector.extract_strided_slice %15 {offsets = [0, 0], sizes = [8, 128], strides = [1, 1]} : vector<8x256xf32> to vector<8x128xf32>
      %17 = vector.extract_strided_slice %15 {offsets = [0, 128], sizes = [8, 128], strides = [1, 1]} : vector<8x256xf32> to vector<8x128xf32>
      %c0_13 = arith.constant 0 : index
      %c0_14 = arith.constant 0 : index
      %18 = vector.load %arg5[%c0_13, %c0_14] : memref<8x256xf32, #tpu.memory_space<vmem>>, vector<8x256xf32>
      tpu.vector_store %arg5[%c0_13, %c0_14], %15 {strides = array<i32>} : memref<8x256xf32, #tpu.memory_space<vmem>>, vector<8x256xf32>,
      %c0_15 = arith.constant 0 : index
      %c0_16 = arith.constant 0 : index
      %19 = vector.load %arg4[%c0_15, %c0_16] : memref<8x128xf32, #tpu.memory_space<vmem>>, vector<8x128xf32>
      %cst_17 = arith.constant 5.000000e-01 : f32
      %20 = vector.broadcast %cst_17 : f32 to vector<8x128xf32>
      %21 = arith.mulf %20, %17 : vector<8x128xf32>
      %22 = math.exp %21 : vector<8x128xf32>
      %23 = arith.mulf %19, %22 : vector<8x128xf32>
      %24 = arith.addf %16, %23 : vector<8x128xf32>
      %c0_18 = arith.constant 0 : index
      %c0_19 = arith.constant 0 : index
      %25 = vector.load %arg6[%c0_18, %c0_19] : memref<8x128xf32, #tpu.memory_space<vmem>>, vector<8x128xf32>
      tpu.vector_store %arg6[%c0_18, %c0_19], %24 {strides = array<i32>} : memref<8x128xf32, #tpu.memory_space<vmem>>, vector<8x128xf32>,
    } else {
    }
    return
  }
  func.func @transform_0(%arg0: i32) -> (i32, i32) {
    %c0_i32 = arith.constant 0 : i32
    %c0_i32_0 = arith.constant 0 : i32
    return %c0_i32, %arg0 : i32, i32
  }
  func.func @transform_1(%arg0: i32) -> (i32, i32) {
    %c0_i32 = arith.constant 0 : i32
    %c0_i32_0 = arith.constant 0 : i32
    return %arg0, %c0_i32 : i32, i32
  }
  func.func @transform_2(%arg0: i32) -> (i32, i32) {
    %c0_i32 = arith.constant 0 : i32
    %c0_i32_0 = arith.constant 0 : i32
    %c0_i32_1 = arith.constant 0 : i32
    return %c0_i32, %c0_i32_0 : i32, i32
  }
  func.func @transform_3(%arg0: i32) -> (i32, i32) {
    %c0_i32 = arith.constant 0 : i32
    %c0_i32_0 = arith.constant 0 : i32
    %c0_i32_1 = arith.constant 0 : i32
    return %c0_i32, %c0_i32_0 : i32, i32
  }
  func.func @transform_4(%arg0: i32) -> (i32, i32) {
    %c0_i32 = arith.constant 0 : i32
    %c0_i32_0 = arith.constant 0 : i32
    %c0_i32_1 = arith.constant 0 : i32
    return %c0_i32, %c0_i32_0 : i32, i32
  }
  func.func @transform_5(%arg0: i32) -> (i32, i32) {
    %c0_i32 = arith.constant 0 : i32
    %c0_i32_0 = arith.constant 0 : i32
    %c0_i32_1 = arith.constant 0 : i32
    return %c0_i32, %c0_i32_0 : i32, i32
  }
}

module attributes {stable_mosaic.version = 11 : i64} {
  func.func @_mm_bias_act_kernel(%arg0: i32, %arg1: i32, %arg2: i32, %arg3: memref<8x128xbf16, #tpu.memory_space<vmem>>, %arg4: memref<128x256xbf16, #tpu.memory_space<vmem>>, %arg5: memref<1x256xf32, #tpu.memory_space<vmem>>, %arg6: memref<8x256xbf16, #tpu.memory_space<vmem>>, %arg7: memref<8x256xf32, #tpu.memory_space<vmem>>) attributes {dimension_semantics = [#tpu.dimension_semantics<parallel>, #tpu.dimension_semantics<parallel>, #tpu.dimension_semantics<arbitrary>], iteration_bounds = array<i64: 1, 16, 1>, scalar_prefetch = 0 : i64, scratch_operands = 1 : i64, tpu.core_type = #tpu.core_type<tc>, window_params = [{transform_indices = @transform_0, window_bounds = array<i64: 8, 128>}, {transform_indices = @transform_1, window_bounds = array<i64: 128, 256>}, {transform_indices = @transform_2, window_bounds = array<i64: 1, 256>}, {transform_indices = @transform_3, window_bounds = array<i64: 8, 256>}]} {
    %c0_i32 = arith.constant 0 : i32
    %0 = arith.cmpi eq, %arg2, %c0_i32 : i32
    %1 = arith.extui %0 : i1 to i32
    %c0_i32_0 = arith.constant 0 : i32
    %2 = arith.cmpi ne, %1, %c0_i32_0 : i32
    scf.if %2 {
      %cst_10 = arith.constant 0.000000e+00 : f32
      %12 = vector.broadcast %cst_10 : f32 to vector<8x256xf32>
      %c0_11 = arith.constant 0 : index
      %c0_12 = arith.constant 0 : index
      %13 = vector.load %arg7[%c0_11, %c0_12] : memref<8x256xf32, #tpu.memory_space<vmem>>, vector<8x256xf32>
      tpu.vector_store %arg7[%c0_11, %c0_12], %12 {strides = array<i32>} : memref<8x256xf32, #tpu.memory_space<vmem>>, vector<8x256xf32>,
    } else {
    }
    %c0 = arith.constant 0 : index
    %c0_1 = arith.constant 0 : index
    %3 = vector.load %arg7[%c0, %c0_1] : memref<8x256xf32, #tpu.memory_space<vmem>>, vector<8x256xf32>
    %c0_2 = arith.constant 0 : index
    %c0_3 = arith.constant 0 : index
    %4 = vector.load %arg3[%c0_2, %c0_3] : memref<8x128xbf16, #tpu.memory_space<vmem>>, vector<8x128xbf16>
    %c0_4 = arith.constant 0 : index
    %c0_5 = arith.constant 0 : index
    %5 = vector.load %arg4[%c0_4, %c0_5] : memref<128x256xbf16, #tpu.memory_space<vmem>>, vector<128x256xbf16>
    %cst = arith.constant dense<0.000000e+00> : vector<8x256xf32>
    %6 = tpu.matmul %4, %5, %cst {dimension_numbers = #tpu.dot_dimension_numbers<[1], [0], [0], [1], [0, 0, 1, 1], [], []>} : vector<8x128xbf16>, vector<128x256xbf16>, vector<8x256xf32> -> vector<8x256xf32>
    %7 = arith.addf %3, %6 : vector<8x256xf32>
    %c0_6 = arith.constant 0 : index
    %c0_7 = arith.constant 0 : index
    %8 = vector.load %arg7[%c0_6, %c0_7] : memref<8x256xf32, #tpu.memory_space<vmem>>, vector<8x256xf32>
    tpu.vector_store %arg7[%c0_6, %c0_7], %7 {strides = array<i32>} : memref<8x256xf32, #tpu.memory_space<vmem>>, vector<8x256xf32>,
    %c0_i32_8 = arith.constant 0 : i32
    %9 = arith.cmpi eq, %arg2, %c0_i32_8 : i32
    %10 = arith.extui %9 : i1 to i32
    %c0_i32_9 = arith.constant 0 : i32
    %11 = arith.cmpi ne, %10, %c0_i32_9 : i32
    scf.if %11 {
      %c0_10 = arith.constant 0 : index
      %c0_11 = arith.constant 0 : index
      %12 = vector.load %arg7[%c0_10, %c0_11] : memref<8x256xf32, #tpu.memory_space<vmem>>, vector<8x256xf32>
      %c0_12 = arith.constant 0 : index
      %c0_13 = arith.constant 0 : index
      %13 = vector.load %arg5[%c0_12, %c0_13] : memref<1x256xf32, #tpu.memory_space<vmem>>, vector<1x256xf32>
      %14 = vector.broadcast %13 : vector<1x256xf32> to vector<8x256xf32>
      %15 = arith.addf %12, %14 : vector<8x256xf32>
      %16 = arith.truncf %15 : vector<8x256xf32> to vector<8x256xbf16>
      %c0_14 = arith.constant 0 : index
      %c0_15 = arith.constant 0 : index
      %17 = vector.load %arg6[%c0_14, %c0_15] : memref<8x256xbf16, #tpu.memory_space<vmem>>, vector<8x256xbf16>
      tpu.vector_store %arg6[%c0_14, %c0_15], %16 {strides = array<i32>} : memref<8x256xbf16, #tpu.memory_space<vmem>>, vector<8x256xbf16>,
    } else {
    }
    return
  }
  func.func @transform_0(%arg0: i32, %arg1: i32, %arg2: i32) -> (i32, i32) {
    %c0_i32 = arith.constant 0 : i32
    return %arg0, %arg2 : i32, i32
  }
  func.func @transform_1(%arg0: i32, %arg1: i32, %arg2: i32) -> (i32, i32) {
    %c0_i32 = arith.constant 0 : i32
    return %arg2, %arg1 : i32, i32
  }
  func.func @transform_2(%arg0: i32, %arg1: i32, %arg2: i32) -> (i32, i32) {
    %c0_i32 = arith.constant 0 : i32
    %c0_i32_0 = arith.constant 0 : i32
    return %c0_i32, %arg1 : i32, i32
  }
  func.func @transform_3(%arg0: i32, %arg1: i32, %arg2: i32) -> (i32, i32) {
    %c0_i32 = arith.constant 0 : i32
    return %arg0, %arg1 : i32, i32
  }
}

module attributes {stable_mosaic.version = 11 : i64} {
  func.func @_mm_bias_act_kernel(%arg0: i32, %arg1: i32, %arg2: i32, %arg3: memref<32x256xbf16, #tpu.memory_space<vmem>>, %arg4: memref<256x256xbf16, #tpu.memory_space<vmem>>, %arg5: memref<1x256xf32, #tpu.memory_space<vmem>>, %arg6: memref<32x256xbf16, #tpu.memory_space<vmem>>, %arg7: memref<32x256xf32, #tpu.memory_space<vmem>>) attributes {dimension_semantics = [#tpu.dimension_semantics<parallel>, #tpu.dimension_semantics<parallel>, #tpu.dimension_semantics<arbitrary>], iteration_bounds = array<i64: 1, 2, 9>, scalar_prefetch = 0 : i64, scratch_operands = 1 : i64, tpu.core_type = #tpu.core_type<tc>, window_params = [{transform_indices = @transform_0, window_bounds = array<i64: 32, 256>}, {transform_indices = @transform_1, window_bounds = array<i64: 256, 256>}, {transform_indices = @transform_2, window_bounds = array<i64: 1, 256>}, {transform_indices = @transform_3, window_bounds = array<i64: 32, 256>}]} {
    %c0_i32 = arith.constant 0 : i32
    %0 = arith.cmpi eq, %arg2, %c0_i32 : i32
    %1 = arith.extui %0 : i1 to i32
    %c0_i32_0 = arith.constant 0 : i32
    %2 = arith.cmpi ne, %1, %c0_i32_0 : i32
    scf.if %2 {
      %cst_9 = arith.constant 0.000000e+00 : f32
      %12 = vector.broadcast %cst_9 : f32 to vector<32x256xf32>
      %c0_10 = arith.constant 0 : index
      %c0_11 = arith.constant 0 : index
      %13 = vector.load %arg7[%c0_10, %c0_11] : memref<32x256xf32, #tpu.memory_space<vmem>>, vector<32x256xf32>
      tpu.vector_store %arg7[%c0_10, %c0_11], %12 {strides = array<i32>} : memref<32x256xf32, #tpu.memory_space<vmem>>, vector<32x256xf32>,
    } else {
    }
    %c0 = arith.constant 0 : index
    %c0_1 = arith.constant 0 : index
    %3 = vector.load %arg7[%c0, %c0_1] : memref<32x256xf32, #tpu.memory_space<vmem>>, vector<32x256xf32>
    %c0_2 = arith.constant 0 : index
    %c0_3 = arith.constant 0 : index
    %4 = vector.load %arg3[%c0_2, %c0_3] : memref<32x256xbf16, #tpu.memory_space<vmem>>, vector<32x256xbf16>
    %c0_4 = arith.constant 0 : index
    %c0_5 = arith.constant 0 : index
    %5 = vector.load %arg4[%c0_4, %c0_5] : memref<256x256xbf16, #tpu.memory_space<vmem>>, vector<256x256xbf16>
    %cst = arith.constant dense<0.000000e+00> : vector<32x256xf32>
    %6 = tpu.matmul %4, %5, %cst {dimension_numbers = #tpu.dot_dimension_numbers<[1], [0], [0], [1], [0, 0, 1, 1], [], []>} : vector<32x256xbf16>, vector<256x256xbf16>, vector<32x256xf32> -> vector<32x256xf32>
    %7 = arith.addf %3, %6 : vector<32x256xf32>
    %c0_6 = arith.constant 0 : index
    %c0_7 = arith.constant 0 : index
    %8 = vector.load %arg7[%c0_6, %c0_7] : memref<32x256xf32, #tpu.memory_space<vmem>>, vector<32x256xf32>
    tpu.vector_store %arg7[%c0_6, %c0_7], %7 {strides = array<i32>} : memref<32x256xf32, #tpu.memory_space<vmem>>, vector<32x256xf32>,
    %c8_i32 = arith.constant 8 : i32
    %9 = arith.cmpi eq, %arg2, %c8_i32 : i32
    %10 = arith.extui %9 : i1 to i32
    %c0_i32_8 = arith.constant 0 : i32
    %11 = arith.cmpi ne, %10, %c0_i32_8 : i32
    scf.if %11 {
      %c0_9 = arith.constant 0 : index
      %c0_10 = arith.constant 0 : index
      %12 = vector.load %arg7[%c0_9, %c0_10] : memref<32x256xf32, #tpu.memory_space<vmem>>, vector<32x256xf32>
      %c0_11 = arith.constant 0 : index
      %c0_12 = arith.constant 0 : index
      %13 = vector.load %arg5[%c0_11, %c0_12] : memref<1x256xf32, #tpu.memory_space<vmem>>, vector<1x256xf32>
      %14 = vector.broadcast %13 : vector<1x256xf32> to vector<32x256xf32>
      %15 = arith.addf %12, %14 : vector<32x256xf32>
      %cst_13 = arith.constant 0.000000e+00 : f32
      %16 = vector.broadcast %cst_13 : f32 to vector<32x256xf32>
      %17 = arith.maximumf %15, %16 : vector<32x256xf32>
      %18 = arith.truncf %17 : vector<32x256xf32> to vector<32x256xbf16>
      %c0_14 = arith.constant 0 : index
      %c0_15 = arith.constant 0 : index
      %19 = vector.load %arg6[%c0_14, %c0_15] : memref<32x256xbf16, #tpu.memory_space<vmem>>, vector<32x256xbf16>
      tpu.vector_store %arg6[%c0_14, %c0_15], %18 {strides = array<i32>} : memref<32x256xbf16, #tpu.memory_space<vmem>>, vector<32x256xbf16>,
    } else {
    }
    return
  }
  func.func @transform_0(%arg0: i32, %arg1: i32, %arg2: i32) -> (i32, i32) {
    %c0_i32 = arith.constant 0 : i32
    return %arg0, %arg2 : i32, i32
  }
  func.func @transform_1(%arg0: i32, %arg1: i32, %arg2: i32) -> (i32, i32) {
    %c0_i32 = arith.constant 0 : i32
    return %arg2, %arg1 : i32, i32
  }
  func.func @transform_2(%arg0: i32, %arg1: i32, %arg2: i32) -> (i32, i32) {
    %c0_i32 = arith.constant 0 : i32
    %c0_i32_0 = arith.constant 0 : i32
    return %c0_i32, %arg1 : i32, i32
  }
  func.func @transform_3(%arg0: i32, %arg1: i32, %arg2: i32) -> (i32, i32) {
    %c0_i32 = arith.constant 0 : i32
    return %arg0, %arg1 : i32, i32
  }
}

module attributes {stable_mosaic.version = 11 : i64} {
  func.func @_mm_bias_act_kernel(%arg0: i32, %arg1: i32, %arg2: i32, %arg3: memref<128x128xbf16, #tpu.memory_space<vmem>>, %arg4: memref<128x256xbf16, #tpu.memory_space<vmem>>, %arg5: memref<1x256xf32, #tpu.memory_space<vmem>>, %arg6: memref<128x256xbf16, #tpu.memory_space<vmem>>, %arg7: memref<128x256xf32, #tpu.memory_space<vmem>>) attributes {dimension_semantics = [#tpu.dimension_semantics<parallel>, #tpu.dimension_semantics<parallel>, #tpu.dimension_semantics<arbitrary>], iteration_bounds = array<i64: 1, 1, 9>, scalar_prefetch = 0 : i64, scratch_operands = 1 : i64, tpu.core_type = #tpu.core_type<tc>, window_params = [{transform_indices = @transform_0, window_bounds = array<i64: 128, 128>}, {transform_indices = @transform_1, window_bounds = array<i64: 128, 256>}, {transform_indices = @transform_2, window_bounds = array<i64: 1, 256>}, {transform_indices = @transform_3, window_bounds = array<i64: 128, 256>}]} {
    %c0_i32 = arith.constant 0 : i32
    %0 = arith.cmpi eq, %arg2, %c0_i32 : i32
    %1 = arith.extui %0 : i1 to i32
    %c0_i32_0 = arith.constant 0 : i32
    %2 = arith.cmpi ne, %1, %c0_i32_0 : i32
    scf.if %2 {
      %cst_9 = arith.constant 0.000000e+00 : f32
      %12 = vector.broadcast %cst_9 : f32 to vector<128x256xf32>
      %c0_10 = arith.constant 0 : index
      %c0_11 = arith.constant 0 : index
      %13 = vector.load %arg7[%c0_10, %c0_11] : memref<128x256xf32, #tpu.memory_space<vmem>>, vector<128x256xf32>
      tpu.vector_store %arg7[%c0_10, %c0_11], %12 {strides = array<i32>} : memref<128x256xf32, #tpu.memory_space<vmem>>, vector<128x256xf32>,
    } else {
    }
    %c0 = arith.constant 0 : index
    %c0_1 = arith.constant 0 : index
    %3 = vector.load %arg7[%c0, %c0_1] : memref<128x256xf32, #tpu.memory_space<vmem>>, vector<128x256xf32>
    %c0_2 = arith.constant 0 : index
    %c0_3 = arith.constant 0 : index
    %4 = vector.load %arg3[%c0_2, %c0_3] : memref<128x128xbf16, #tpu.memory_space<vmem>>, vector<128x128xbf16>
    %c0_4 = arith.constant 0 : index
    %c0_5 = arith.constant 0 : index
    %5 = vector.load %arg4[%c0_4, %c0_5] : memref<128x256xbf16, #tpu.memory_space<vmem>>, vector<128x256xbf16>
    %cst = arith.constant dense<0.000000e+00> : vector<128x256xf32>
    %6 = tpu.matmul %4, %5, %cst {dimension_numbers = #tpu.dot_dimension_numbers<[1], [0], [0], [1], [0, 0, 1, 1], [], []>} : vector<128x128xbf16>, vector<128x256xbf16>, vector<128x256xf32> -> vector<128x256xf32>
    %7 = arith.addf %3, %6 : vector<128x256xf32>
    %c0_6 = arith.constant 0 : index
    %c0_7 = arith.constant 0 : index
    %8 = vector.load %arg7[%c0_6, %c0_7] : memref<128x256xf32, #tpu.memory_space<vmem>>, vector<128x256xf32>
    tpu.vector_store %arg7[%c0_6, %c0_7], %7 {strides = array<i32>} : memref<128x256xf32, #tpu.memory_space<vmem>>, vector<128x256xf32>,
    %c8_i32 = arith.constant 8 : i32
    %9 = arith.cmpi eq, %arg2, %c8_i32 : i32
    %10 = arith.extui %9 : i1 to i32
    %c0_i32_8 = arith.constant 0 : i32
    %11 = arith.cmpi ne, %10, %c0_i32_8 : i32
    scf.if %11 {
      %c0_9 = arith.constant 0 : index
      %c0_10 = arith.constant 0 : index
      %12 = vector.load %arg7[%c0_9, %c0_10] : memref<128x256xf32, #tpu.memory_space<vmem>>, vector<128x256xf32>
      %c0_11 = arith.constant 0 : index
      %c0_12 = arith.constant 0 : index
      %13 = vector.load %arg5[%c0_11, %c0_12] : memref<1x256xf32, #tpu.memory_space<vmem>>, vector<1x256xf32>
      %14 = vector.broadcast %13 : vector<1x256xf32> to vector<128x256xf32>
      %15 = arith.addf %12, %14 : vector<128x256xf32>
      %cst_13 = arith.constant 0.000000e+00 : f32
      %16 = vector.broadcast %cst_13 : f32 to vector<128x256xf32>
      %17 = arith.maximumf %15, %16 : vector<128x256xf32>
      %18 = arith.truncf %17 : vector<128x256xf32> to vector<128x256xbf16>
      %c0_14 = arith.constant 0 : index
      %c0_15 = arith.constant 0 : index
      %19 = vector.load %arg6[%c0_14, %c0_15] : memref<128x256xbf16, #tpu.memory_space<vmem>>, vector<128x256xbf16>
      tpu.vector_store %arg6[%c0_14, %c0_15], %18 {strides = array<i32>} : memref<128x256xbf16, #tpu.memory_space<vmem>>, vector<128x256xbf16>,
    } else {
    }
    return
  }
  func.func @transform_0(%arg0: i32, %arg1: i32, %arg2: i32) -> (i32, i32) {
    %c0_i32 = arith.constant 0 : i32
    return %arg0, %arg2 : i32, i32
  }
  func.func @transform_1(%arg0: i32, %arg1: i32, %arg2: i32) -> (i32, i32) {
    %c0_i32 = arith.constant 0 : i32
    return %arg2, %arg1 : i32, i32
  }
  func.func @transform_2(%arg0: i32, %arg1: i32, %arg2: i32) -> (i32, i32) {
    %c0_i32 = arith.constant 0 : i32
    %c0_i32_0 = arith.constant 0 : i32
    return %c0_i32, %arg1 : i32, i32
  }
  func.func @transform_3(%arg0: i32, %arg1: i32, %arg2: i32) -> (i32, i32) {
    %c0_i32 = arith.constant 0 : i32
    return %arg0, %arg1 : i32, i32
  }
}

module attributes {stable_mosaic.version = 11 : i64} {
  func.func @_mm_bias_act_kernel(%arg0: i32, %arg1: i32, %arg2: i32, %arg3: memref<256x128xbf16, #tpu.memory_space<vmem>>, %arg4: memref<128x128xbf16, #tpu.memory_space<vmem>>, %arg5: memref<1x128xf32, #tpu.memory_space<vmem>>, %arg6: memref<256x128xbf16, #tpu.memory_space<vmem>>, %arg7: memref<256x128xf32, #tpu.memory_space<vmem>>) attributes {dimension_semantics = [#tpu.dimension_semantics<parallel>, #tpu.dimension_semantics<parallel>, #tpu.dimension_semantics<arbitrary>], iteration_bounds = array<i64: 2, 1, 5>, scalar_prefetch = 0 : i64, scratch_operands = 1 : i64, tpu.core_type = #tpu.core_type<tc>, window_params = [{transform_indices = @transform_0, window_bounds = array<i64: 256, 128>}, {transform_indices = @transform_1, window_bounds = array<i64: 128, 128>}, {transform_indices = @transform_2, window_bounds = array<i64: 1, 128>}, {transform_indices = @transform_3, window_bounds = array<i64: 256, 128>}]} {
    %c0_i32 = arith.constant 0 : i32
    %0 = arith.cmpi eq, %arg2, %c0_i32 : i32
    %1 = arith.extui %0 : i1 to i32
    %c0_i32_0 = arith.constant 0 : i32
    %2 = arith.cmpi ne, %1, %c0_i32_0 : i32
    scf.if %2 {
      %cst_9 = arith.constant 0.000000e+00 : f32
      %12 = vector.broadcast %cst_9 : f32 to vector<256x128xf32>
      %c0_10 = arith.constant 0 : index
      %c0_11 = arith.constant 0 : index
      %13 = vector.load %arg7[%c0_10, %c0_11] : memref<256x128xf32, #tpu.memory_space<vmem>>, vector<256x128xf32>
      tpu.vector_store %arg7[%c0_10, %c0_11], %12 {strides = array<i32>} : memref<256x128xf32, #tpu.memory_space<vmem>>, vector<256x128xf32>,
    } else {
    }
    %c0 = arith.constant 0 : index
    %c0_1 = arith.constant 0 : index
    %3 = vector.load %arg7[%c0, %c0_1] : memref<256x128xf32, #tpu.memory_space<vmem>>, vector<256x128xf32>
    %c0_2 = arith.constant 0 : index
    %c0_3 = arith.constant 0 : index
    %4 = vector.load %arg3[%c0_2, %c0_3] : memref<256x128xbf16, #tpu.memory_space<vmem>>, vector<256x128xbf16>
    %c0_4 = arith.constant 0 : index
    %c0_5 = arith.constant 0 : index
    %5 = vector.load %arg4[%c0_4, %c0_5] : memref<128x128xbf16, #tpu.memory_space<vmem>>, vector<128x128xbf16>
    %cst = arith.constant dense<0.000000e+00> : vector<256x128xf32>
    %6 = tpu.matmul %4, %5, %cst {dimension_numbers = #tpu.dot_dimension_numbers<[1], [0], [0], [1], [0, 0, 1, 1], [], []>} : vector<256x128xbf16>, vector<128x128xbf16>, vector<256x128xf32> -> vector<256x128xf32>
    %7 = arith.addf %3, %6 : vector<256x128xf32>
    %c0_6 = arith.constant 0 : index
    %c0_7 = arith.constant 0 : index
    %8 = vector.load %arg7[%c0_6, %c0_7] : memref<256x128xf32, #tpu.memory_space<vmem>>, vector<256x128xf32>
    tpu.vector_store %arg7[%c0_6, %c0_7], %7 {strides = array<i32>} : memref<256x128xf32, #tpu.memory_space<vmem>>, vector<256x128xf32>,
    %c4_i32 = arith.constant 4 : i32
    %9 = arith.cmpi eq, %arg2, %c4_i32 : i32
    %10 = arith.extui %9 : i1 to i32
    %c0_i32_8 = arith.constant 0 : i32
    %11 = arith.cmpi ne, %10, %c0_i32_8 : i32
    scf.if %11 {
      %c0_9 = arith.constant 0 : index
      %c0_10 = arith.constant 0 : index
      %12 = vector.load %arg7[%c0_9, %c0_10] : memref<256x128xf32, #tpu.memory_space<vmem>>, vector<256x128xf32>
      %c0_11 = arith.constant 0 : index
      %c0_12 = arith.constant 0 : index
      %13 = vector.load %arg5[%c0_11, %c0_12] : memref<1x128xf32, #tpu.memory_space<vmem>>, vector<1x128xf32>
      %14 = vector.broadcast %13 : vector<1x128xf32> to vector<256x128xf32>
      %15 = arith.addf %12, %14 : vector<256x128xf32>
      %cst_13 = arith.constant 0.000000e+00 : f32
      %16 = vector.broadcast %cst_13 : f32 to vector<256x128xf32>
      %17 = arith.maximumf %15, %16 : vector<256x128xf32>
      %18 = arith.truncf %17 : vector<256x128xf32> to vector<256x128xbf16>
      %c0_14 = arith.constant 0 : index
      %c0_15 = arith.constant 0 : index
      %19 = vector.load %arg6[%c0_14, %c0_15] : memref<256x128xbf16, #tpu.memory_space<vmem>>, vector<256x128xbf16>
      tpu.vector_store %arg6[%c0_14, %c0_15], %18 {strides = array<i32>} : memref<256x128xbf16, #tpu.memory_space<vmem>>, vector<256x128xbf16>,
    } else {
    }
    return
  }
  func.func @transform_0(%arg0: i32, %arg1: i32, %arg2: i32) -> (i32, i32) {
    %c0_i32 = arith.constant 0 : i32
    return %arg0, %arg2 : i32, i32
  }
  func.func @transform_1(%arg0: i32, %arg1: i32, %arg2: i32) -> (i32, i32) {
    %c0_i32 = arith.constant 0 : i32
    return %arg2, %arg1 : i32, i32
  }
  func.func @transform_2(%arg0: i32, %arg1: i32, %arg2: i32) -> (i32, i32) {
    %c0_i32 = arith.constant 0 : i32
    %c0_i32_0 = arith.constant 0 : i32
    return %c0_i32, %arg1 : i32, i32
  }
  func.func @transform_3(%arg0: i32, %arg1: i32, %arg2: i32) -> (i32, i32) {
    %c0_i32 = arith.constant 0 : i32
    return %arg0, %arg1 : i32, i32
  }
}

module attributes {stable_mosaic.version = 11 : i64} {
  func.func @_mm_bias_act_kernel(%arg0: i32, %arg1: i32, %arg2: i32, %arg3: memref<256x128xbf16, #tpu.memory_space<vmem>>, %arg4: memref<128x128xbf16, #tpu.memory_space<vmem>>, %arg5: memref<1x128xf32, #tpu.memory_space<vmem>>, %arg6: memref<256x128xf32, #tpu.memory_space<vmem>>, %arg7: memref<256x128xf32, #tpu.memory_space<vmem>>) attributes {dimension_semantics = [#tpu.dimension_semantics<parallel>, #tpu.dimension_semantics<parallel>, #tpu.dimension_semantics<arbitrary>], iteration_bounds = array<i64: 8, 1, 3>, scalar_prefetch = 0 : i64, scratch_operands = 1 : i64, tpu.core_type = #tpu.core_type<tc>, window_params = [{transform_indices = @transform_0, window_bounds = array<i64: 256, 128>}, {transform_indices = @transform_1, window_bounds = array<i64: 128, 128>}, {transform_indices = @transform_2, window_bounds = array<i64: 1, 128>}, {transform_indices = @transform_3, window_bounds = array<i64: 256, 128>}]} {
    %c0_i32 = arith.constant 0 : i32
    %0 = arith.cmpi eq, %arg2, %c0_i32 : i32
    %1 = arith.extui %0 : i1 to i32
    %c0_i32_0 = arith.constant 0 : i32
    %2 = arith.cmpi ne, %1, %c0_i32_0 : i32
    scf.if %2 {
      %cst_9 = arith.constant 0.000000e+00 : f32
      %12 = vector.broadcast %cst_9 : f32 to vector<256x128xf32>
      %c0_10 = arith.constant 0 : index
      %c0_11 = arith.constant 0 : index
      %13 = vector.load %arg7[%c0_10, %c0_11] : memref<256x128xf32, #tpu.memory_space<vmem>>, vector<256x128xf32>
      tpu.vector_store %arg7[%c0_10, %c0_11], %12 {strides = array<i32>} : memref<256x128xf32, #tpu.memory_space<vmem>>, vector<256x128xf32>,
    } else {
    }
    %c0 = arith.constant 0 : index
    %c0_1 = arith.constant 0 : index
    %3 = vector.load %arg7[%c0, %c0_1] : memref<256x128xf32, #tpu.memory_space<vmem>>, vector<256x128xf32>
    %c0_2 = arith.constant 0 : index
    %c0_3 = arith.constant 0 : index
    %4 = vector.load %arg3[%c0_2, %c0_3] : memref<256x128xbf16, #tpu.memory_space<vmem>>, vector<256x128xbf16>
    %c0_4 = arith.constant 0 : index
    %c0_5 = arith.constant 0 : index
    %5 = vector.load %arg4[%c0_4, %c0_5] : memref<128x128xbf16, #tpu.memory_space<vmem>>, vector<128x128xbf16>
    %cst = arith.constant dense<0.000000e+00> : vector<256x128xf32>
    %6 = tpu.matmul %4, %5, %cst {dimension_numbers = #tpu.dot_dimension_numbers<[1], [0], [0], [1], [0, 0, 1, 1], [], []>} : vector<256x128xbf16>, vector<128x128xbf16>, vector<256x128xf32> -> vector<256x128xf32>
    %7 = arith.addf %3, %6 : vector<256x128xf32>
    %c0_6 = arith.constant 0 : index
    %c0_7 = arith.constant 0 : index
    %8 = vector.load %arg7[%c0_6, %c0_7] : memref<256x128xf32, #tpu.memory_space<vmem>>, vector<256x128xf32>
    tpu.vector_store %arg7[%c0_6, %c0_7], %7 {strides = array<i32>} : memref<256x128xf32, #tpu.memory_space<vmem>>, vector<256x128xf32>,
    %c2_i32 = arith.constant 2 : i32
    %9 = arith.cmpi eq, %arg2, %c2_i32 : i32
    %10 = arith.extui %9 : i1 to i32
    %c0_i32_8 = arith.constant 0 : i32
    %11 = arith.cmpi ne, %10, %c0_i32_8 : i32
    scf.if %11 {
      %c0_9 = arith.constant 0 : index
      %c0_10 = arith.constant 0 : index
      %12 = vector.load %arg7[%c0_9, %c0_10] : memref<256x128xf32, #tpu.memory_space<vmem>>, vector<256x128xf32>
      %c0_11 = arith.constant 0 : index
      %c0_12 = arith.constant 0 : index
      %13 = vector.load %arg5[%c0_11, %c0_12] : memref<1x128xf32, #tpu.memory_space<vmem>>, vector<1x128xf32>
      %14 = vector.broadcast %13 : vector<1x128xf32> to vector<256x128xf32>
      %15 = arith.addf %12, %14 : vector<256x128xf32>
      %16 = arith.negf %15 : vector<256x128xf32>
      %17 = math.exp %16 : vector<256x128xf32>
      %cst_13 = arith.constant 1.000000e+00 : f32
      %18 = vector.broadcast %cst_13 : f32 to vector<256x128xf32>
      %19 = arith.addf %18, %17 : vector<256x128xf32>
      %20 = arith.divf %18, %19 : vector<256x128xf32>
      %c0_14 = arith.constant 0 : index
      %c0_15 = arith.constant 0 : index
      %21 = vector.load %arg6[%c0_14, %c0_15] : memref<256x128xf32, #tpu.memory_space<vmem>>, vector<256x128xf32>
      tpu.vector_store %arg6[%c0_14, %c0_15], %20 {strides = array<i32>} : memref<256x128xf32, #tpu.memory_space<vmem>>, vector<256x128xf32>,
    } else {
    }
    return
  }
  func.func @transform_0(%arg0: i32, %arg1: i32, %arg2: i32) -> (i32, i32) {
    %c0_i32 = arith.constant 0 : i32
    return %arg0, %arg2 : i32, i32
  }
  func.func @transform_1(%arg0: i32, %arg1: i32, %arg2: i32) -> (i32, i32) {
    %c0_i32 = arith.constant 0 : i32
    return %arg2, %arg1 : i32, i32
  }
  func.func @transform_2(%arg0: i32, %arg1: i32, %arg2: i32) -> (i32, i32) {
    %c0_i32 = arith.constant 0 : i32
    %c0_i32_0 = arith.constant 0 : i32
    return %c0_i32, %arg1 : i32, i32
  }
  func.func @transform_3(%arg0: i32, %arg1: i32, %arg2: i32) -> (i32, i32) {
    %c0_i32 = arith.constant 0 : i32
    return %arg0, %arg1 : i32, i32
  }
}

</mosaic_0001>

<bundles_post_ra>
// kernel: vae_forward.10
= control target key start
LH: loop header
LB: loop body
LE: loop exit
PB: predicated region body
PF: predicated region fallthrough
CT: control target
= control target key end

     0   :  { %s1499_s12 = smov 0   ;;  %s1501_s13 = smov 0   ;;  %s1636_s0 = inlined_call_operand.vmem [shape: bf16[2048,128], index: 0, kind: input, shape index: {}]   ;;  %s1637_s1 = inlined_call_operand.vmem [shape: bf16[128,128], index: 1, kind: input, shape index: {}]   ;;  %s1638_s2 = inlined_call_operand.vmem [shape: f32[1,128], index: 2, kind: input, shape index: {}]   ;;  %s1639_s3 = inlined_call_operand.vmem [shape: bf16[2048,128], index: 3, kind: output, shape index: {}]  }
   0x1   :  { %s1503_s14 = smov 0  }
   0x2 LB: > { %s32_s15 = sadd.s32 1, %s1473_s13  ;;  %p1128_p0 = scmp.ge.s32.totalorder %s1477_s14, 1  ;;  %s1477_s14 = sphi %s1503_s14, %s13_s14   ;;  %s1473_s13 = sphi %s1501_s13, %s1641_s13   ;;  %s1469_s12 = sphi %s1499_s12, %s1640_s12  }
   0x3   : > { %p34_p1 = scmp.ge.s32.totalorder %s32_s15, 8  ;;  %p188_p2 = scmp.lt.s32.totalorder %s1477_s14, 9 }
   0x5   : > { %s1643_s15 = smov (%p34_p1, %s32_s15), 0  ;;  %p189_p3 = pnand %p1128_p0, %p188_p2 }
   0x6   : > { %s1129_s18 = sshll.u32 (!%p189_p3), %s1469_s12, 5 }
   0x7   : > { %192 = sbr.rel (%p189_p3) target bundleno = 275 (0x113), region = 32  ;;  %p230_p4 = scmp.lt.s32.totalorder (!%p189_p3), %s1129_s18, 255 }
   0xc   : > { %v1431_v0 = vld [vmem:[%s1637_s1 + $0x38] sm:$0xff]   ;;  %v1432_v1 = vld [vmem:[%s1637_s1 + $0x30] sm:$0xff]   ;;  %s1645_s18 = smov (!%p230_p4, %s1129_s18), 255  ;;  %v1433_v2 = vld [vmem:[%s1637_s1 + $0x28] sm:$0xff]  }
   0xd   : > { %1343 = vmatprep.subr.bf16.mxu0 %v1431_v0  ;;  %1391 = vmatprep.subr.bf16.mxu1 %v1431_v0  ;;  %s1130_s23 = sshll.u32 %s1645_s18, 2  ;;  %v1434_v3 = vld [vmem:[%s1637_s1 + $0x20] sm:$0xff]   ;;  %v1435_v6 = vld [vmem:[%s1637_s1 + $0x18] sm:$0xff]   ;;  %v1436_v7 = vld [vmem:[%s1637_s1 + $0x10] sm:$0xff]  }
   0xe   : > { %1344 = vmatpush3.bf16.msra.mxu0 %v1431_v0  ;;  %1399 = vmatpush3.bf16.msra.mxu1 %v1431_v0  ;;  %s1534_s26 = scalar_lea.vmem %s1636_s0, %s1130_s23  ;;  %v1437_v8 = vld [vmem:[%s1637_s1 + $0x8] sm:$0xff]   ;;  %v1438_v9 = vld [vmem:[%s1637_s1] sm:$0xff]   ;;  %s1585_s17 = scalar_lea.vmem %s1639_s3, %s1130_s23 }
   0xf   : > { %1345 = vmatprep.subr.bf16.mxu0 %v1432_v1  ;;  %1392 = vmatprep.subr.bf16.mxu1 %v1432_v1  ;;  %v1439_v4 = vld [vmem:[%s1534_s26] sm:$0xff]   ;;  %v1441_v10 = vld [vmem:[%s1534_s26 + $0x8] sm:$0xff]   ;;  %v1443_v12 = vld [vmem:[%s1534_s26 + $0x10] sm:$0xff]  }
  0x10   : > { %v1440_v5 = vld [vmem:[%s1534_s26 + $0x40] sm:$0xff]   ;;  %1359 = vmatprep.mubr.bf16.mxu0 %v1439_v4  ;;  %v1442_v11 = vld [vmem:[%s1534_s26 + $0x48] sm:$0xff]   ;;  %v1444_v13 = vld [vmem:[%s1534_s26 + $0x50] sm:$0xff]  }
  0x11   : > { %1375 = vmatprep.mubr.bf16.mxu1 %v1440_v5  ;;  %v1445_v14 = vld [vmem:[%s1534_s26 + $0x18] sm:$0xff]   ;;  %v1447_v16 = vld [vmem:[%s1534_s26 + $0x20] sm:$0xff]   ;;  %v1449_v18 = vld [vmem:[%s1534_s26 + $0x28] sm:$0xff]  }
  0x12   : > { %1346 = vmatpush3.bf16.msra.mxu0 %v1432_v1  ;;  %1400 = vmatpush3.bf16.msra.mxu1 %v1432_v1  ;;  %v1446_v15 = vld [vmem:[%s1534_s26 + $0x58] sm:$0xff]   ;;  %v1448_v17 = vld [vmem:[%s1534_s26 + $0x60] sm:$0xff]   ;;  %v1450_v19 = vld [vmem:[%s1534_s26 + $0x68] sm:$0xff]  }
  0x13   : > { %1347 = vmatprep.subr.bf16.mxu0 %v1433_v2  ;;  %1393 = vmatprep.subr.bf16.mxu1 %v1433_v2  ;;  %v1451_v20 = vld [vmem:[%s1534_s26 + $0x30] sm:$0xff]   ;;  %v1453_v22 = vld [vmem:[%s1534_s26 + $0x38] sm:$0xff]   ;;  %v1570_v24 = vld [vmem:[%s1638_s2] ss:$0 sm:$0xff] }
  0x14   : > { %v1452_v21 = vld [vmem:[%s1534_s26 + $0x70] sm:$0xff]   ;;  %v1454_v23 = vld [vmem:[%s1534_s26 + $0x78] sm:$0xff]  }
  0x16   : > { %1348 = vmatpush3.bf16.msra.mxu0 %v1433_v2  ;;  %1401 = vmatpush3.bf16.msra.mxu1 %v1433_v2 }
  0x17   : > { %1349 = vmatprep.subr.bf16.mxu0 %v1434_v3  ;;  %1394 = vmatprep.subr.bf16.mxu1 %v1434_v3 }
  0x1a   : > { %1350 = vmatpush3.bf16.msra.mxu0 %v1434_v3  ;;  %1402 = vmatpush3.bf16.msra.mxu1 %v1434_v3 }
  0x1b   : > { %1351 = vmatprep.subr.bf16.mxu0 %v1435_v6  ;;  %1395 = vmatprep.subr.bf16.mxu1 %v1435_v6 }
  0x1e   : > { %1352 = vmatpush3.bf16.msra.mxu0 %v1435_v6  ;;  %1403 = vmatpush3.bf16.msra.mxu1 %v1435_v6 }
  0x1f   : > { %1353 = vmatprep.subr.bf16.mxu0 %v1436_v7  ;;  %1396 = vmatprep.subr.bf16.mxu1 %v1436_v7 }
  0x22   : > { %1354 = vmatpush3.bf16.msra.mxu0 %v1436_v7  ;;  %1404 = vmatpush3.bf16.msra.mxu1 %v1436_v7 }
  0x23   : > { %1355 = vmatprep.subr.bf16.mxu0 %v1437_v8  ;;  %1397 = vmatprep.subr.bf16.mxu1 %v1437_v8 }
  0x26   : > { %1356 = vmatpush3.bf16.msra.mxu0 %v1437_v8  ;;  %1405 = vmatpush3.bf16.msra.mxu1 %v1437_v8 }
  0x27   : > { %1357 = vmatprep.subr.bf16.mxu0 %v1438_v9  ;;  %1398 = vmatprep.subr.bf16.mxu1 %v1438_v9 }
  0x2a   : > { %1358 = vmatpush3.bf16.msra.mxu0 %v1438_v9  ;;  %1406 = vmatpush3.bf16.msra.mxu1 %v1438_v9 }
  0x2d   : > { %1360 = vmatmul.mubr.bf16.vlgmr.msra.gmra.mxu0 %v1441_v10  ;;  %1376 = vmatmul.mubr.bf16.vlgmr.msra.gmra.mxu1 %v1442_v11 }
  0x2e   : > { %1363 = vmatprep.mubr.bf16.mxu0 %v1443_v12  ;;  %1379 = vmatprep.mubr.bf16.mxu1 %v1444_v13 }
  0x35   : > { %1364 = vmatmul.mubr.bf16.gmra.mxu0 %v1445_v14  ;;  %1380 = vmatmul.mubr.bf16.gmra.mxu1 %v1446_v15 }
  0x36   : > { %1367 = vmatprep.mubr.bf16.mxu0 %v1447_v16  ;;  %1383 = vmatprep.mubr.bf16.mxu1 %v1448_v17 }
  0x3d   : > { %1368 = vmatmul.mubr.bf16.gmra.mxu0 %v1449_v18  ;;  %1384 = vmatmul.mubr.bf16.gmra.mxu1 %v1450_v19 }
  0x3e   : > { %1371 = vmatprep.mubr.bf16.mxu0 %v1451_v20  ;;  %1387 = vmatprep.mubr.bf16.mxu1 %v1452_v21 }
  0x45   : > { %1372 = vmatmul.mubr.bf16.gmra.mxu0 %v1453_v22  ;;  %1388 = vmatmul.mubr.bf16.gmra.mxu1 %v1454_v23 }
  0xed   : > { %v1361_v25 = vpop.f32.mrf.mxu0  ;;  %v1377_v26 = vpop.f32.mrf.mxu1 }
  0xee   : > { %v789_v27 = vadd.f32 %v1361_v25, %v1570_v24  ;;  %v805_v28 = vadd.f32 %v1377_v26, %v1570_v24 }
  0xef   : > { %v554_v29 = vpop.f32.mrf.mxu0  ;;  %v618_v30 = vpop.f32.mrf.mxu1 }
  0xf0   : > { %v787_v31 = vadd.f32 %v1570_v24, %v554_v29  ;;  %v803_v32 = vadd.f32 %v1570_v24, %v618_v30  ;;  %v821_v37 = vmax.f32 %v789_v27, 0.0  ;;  %v837_v38 = vmax.f32 %v805_v28, 0.0 }
  0xf1   : > { %v1362_v33 = vpop.f32.mrf.mxu0  ;;  %v1378_v34 = vpop.f32.mrf.mxu1 }
  0xf2   : > { %v790_v35 = vadd.f32 %v1362_v33, %v1570_v24  ;;  %v806_v36 = vadd.f32 %v1378_v34, %v1570_v24  ;;  %v819_v45 = vmax.f32 %v787_v31, 0.0  ;;  %v835_v46 = vmax.f32 %v803_v32, 0.0 }
  0xf3   : > { %v557_v39 = vpop.f32.mrf.mxu0  ;;  %v621_v40 = vpop.f32.mrf.mxu1 }
  0xf4   : > { %v822_v41 = vmax.f32 %v790_v35, 0.0  ;;  %v838_v42 = vmax.f32 %v806_v36, 0.0  ;;  %v788_v43 = vadd.f32 %v1570_v24, %v557_v39  ;;  %v804_v44 = vadd.f32 %v1570_v24, %v621_v40 }
  0xf5   : > { %v1365_v47 = vpop.f32.mrf.mxu0  ;;  %v1381_v48 = vpop.f32.mrf.mxu1 }
  0xf6   : > { %v1232_v49 = vpack.c.bf16 %v822_v41, %v821_v37  ;;  %v1272_v50 = vpack.c.bf16 %v838_v42, %v837_v38  ;;  %v820_v51 = vmax.f32 %v788_v43, 0.0  ;;  %v836_v52 = vmax.f32 %v804_v44, 0.0 }
  0xf7   : > { %v793_v53 = vadd.f32 %v1365_v47, %v1570_v24  ;;  %v809_v54 = vadd.f32 %v1381_v48, %v1570_v24  ;;  %v570_v55 = vpop.f32.mrf.mxu0  ;;  %v634_v56 = vpop.f32.mrf.mxu1 }
  0xf8   : > { %1304 = vst [vmem:[%s1585_s17 + $0x8] sm:$0xff] %v1232_v49   ;;  %1312 = vst [vmem:[%s1585_s17 + $0x48] sm:$0xff] %v1272_v50   ;;  %v1227_v57 = vpack.c.bf16 %v820_v51, %v819_v45  ;;  %v1267_v58 = vpack.c.bf16 %v836_v52, %v835_v46  ;;  %v791_v59 = vadd.f32 %v1570_v24, %v570_v55 }
  0xf9   : > { %v807_v60 = vadd.f32 %v1570_v24, %v634_v56  ;;  %v1366_v61 = vpop.f32.mrf.mxu0  ;;  %v1382_v62 = vpop.f32.mrf.mxu1  ;;  %v825_v1 = vmax.f32 %v793_v53, 0.0  ;;  %v841_v2 = vmax.f32 %v809_v54, 0.0 }
  0xfa   : > { %1228 = vst [vmem:[%s1585_s17] sm:$0xff] %v1227_v57   ;;  %1311 = vst [vmem:[%s1585_s17 + $0x40] sm:$0xff] %v1267_v58   ;;  %v794_v63 = vadd.f32 %v1366_v61, %v1570_v24  ;;  %v810_v0 = vadd.f32 %v1382_v62, %v1570_v24  ;;  %v823_v9 = vmax.f32 %v791_v59, 0.0 }
  0xfb   : > { %v573_v3 = vpop.f32.mrf.mxu0  ;;  %v637_v4 = vpop.f32.mrf.mxu1  ;;  %v839_v10 = vmax.f32 %v807_v60, 0.0 }
  0xfc   : > { %v826_v5 = vmax.f32 %v794_v63, 0.0  ;;  %v842_v6 = vmax.f32 %v810_v0, 0.0  ;;  %v792_v7 = vadd.f32 %v1570_v24, %v573_v3  ;;  %v808_v8 = vadd.f32 %v1570_v24, %v637_v4 }
  0xfd   : > { %v1369_v11 = vpop.f32.mrf.mxu0  ;;  %v1385_v12 = vpop.f32.mrf.mxu1 }
  0xfe   : > { %v1242_v13 = vpack.c.bf16 %v826_v5, %v825_v1  ;;  %v1282_v14 = vpack.c.bf16 %v842_v6, %v841_v2  ;;  %v824_v15 = vmax.f32 %v792_v7, 0.0  ;;  %v840_v16 = vmax.f32 %v808_v8, 0.0 }
  0xff   : > { %v797_v17 = vadd.f32 %v1369_v11, %v1570_v24  ;;  %v813_v18 = vadd.f32 %v1385_v12, %v1570_v24  ;;  %v586_v19 = vpop.f32.mrf.mxu0  ;;  %v650_v20 = vpop.f32.mrf.mxu1 }
 0x100   : > { %1306 = vst [vmem:[%s1585_s17 + $0x18] sm:$0xff] %v1242_v13   ;;  %1314 = vst [vmem:[%s1585_s17 + $0x58] sm:$0xff] %v1282_v14   ;;  %v1237_v21 = vpack.c.bf16 %v824_v15, %v823_v9  ;;  %v1277_v22 = vpack.c.bf16 %v840_v16, %v839_v10  ;;  %v795_v23 = vadd.f32 %v1570_v24, %v586_v19 }
 0x101   : > { %v811_v25 = vadd.f32 %v1570_v24, %v650_v20  ;;  %v1370_v26 = vpop.f32.mrf.mxu0  ;;  %v1386_v27 = vpop.f32.mrf.mxu1  ;;  %v829_v30 = vmax.f32 %v797_v17, 0.0  ;;  %v845_v31 = vmax.f32 %v813_v18, 0.0 }
 0x102   : > { %1305 = vst [vmem:[%s1585_s17 + $0x10] sm:$0xff] %v1237_v21   ;;  %1313 = vst [vmem:[%s1585_s17 + $0x50] sm:$0xff] %v1277_v22   ;;  %v798_v28 = vadd.f32 %v1370_v26, %v1570_v24  ;;  %v814_v29 = vadd.f32 %v1386_v27, %v1570_v24  ;;  %v827_v38 = vmax.f32 %v795_v23, 0.0 }
 0x103   : > { %v589_v32 = vpop.f32.mrf.mxu0  ;;  %v653_v33 = vpop.f32.mrf.mxu1  ;;  %v843_v39 = vmax.f32 %v811_v25, 0.0 }
 0x104   : > { %v830_v34 = vmax.f32 %v798_v28, 0.0  ;;  %v846_v35 = vmax.f32 %v814_v29, 0.0  ;;  %v796_v36 = vadd.f32 %v1570_v24, %v589_v32  ;;  %v812_v37 = vadd.f32 %v1570_v24, %v653_v33 }
 0x105   : > { %v1373_v40 = vpop.f32.mrf.mxu0  ;;  %v1389_v41 = vpop.f32.mrf.mxu1 }
 0x106   : > { %v1252_v42 = vpack.c.bf16 %v830_v34, %v829_v30  ;;  %v1292_v43 = vpack.c.bf16 %v846_v35, %v845_v31  ;;  %v828_v44 = vmax.f32 %v796_v36, 0.0  ;;  %v844_v45 = vmax.f32 %v812_v37, 0.0 }
 0x107   : > { %v801_v46 = vadd.f32 %v1373_v40, %v1570_v24  ;;  %v817_v47 = vadd.f32 %v1389_v41, %v1570_v24  ;;  %v602_v48 = vpop.f32.mrf.mxu0  ;;  %v666_v49 = vpop.f32.mrf.mxu1 }
 0x108   : > { %1308 = vst [vmem:[%s1585_s17 + $0x28] sm:$0xff] %v1252_v42   ;;  %1316 = vst [vmem:[%s1585_s17 + $0x68] sm:$0xff] %v1292_v43   ;;  %v1247_v50 = vpack.c.bf16 %v828_v44, %v827_v38  ;;  %v1287_v51 = vpack.c.bf16 %v844_v45, %v843_v39  ;;  %v799_v52 = vadd.f32 %v1570_v24, %v602_v48 }
 0x109   : > { %v815_v53 = vadd.f32 %v1570_v24, %v666_v49  ;;  %v1374_v54 = vpop.f32.mrf.mxu0  ;;  %v1390_v55 = vpop.f32.mrf.mxu1  ;;  %v833_v58 = vmax.f32 %v801_v46, 0.0  ;;  %v849_v59 = vmax.f32 %v817_v47, 0.0 }
 0x10a   : > { %1307 = vst [vmem:[%s1585_s17 + $0x20] sm:$0xff] %v1247_v50   ;;  %1315 = vst [vmem:[%s1585_s17 + $0x60] sm:$0xff] %v1287_v51   ;;  %v802_v56 = vadd.f32 %v1374_v54, %v1570_v24  ;;  %v818_v57 = vadd.f32 %v1390_v55, %v1570_v24  ;;  %v831_v2 = vmax.f32 %v799_v52, 0.0 }
 0x10b   : > { %v605_v60 = vpop.f32.mrf.mxu0  ;;  %v669_v61 = vpop.f32.mrf.mxu1  ;;  %v847_v3 = vmax.f32 %v815_v53, 0.0 }
 0x10c   : > { %v834_v62 = vmax.f32 %v802_v56, 0.0  ;;  %v850_v63 = vmax.f32 %v818_v57, 0.0  ;;  %v800_v0 = vadd.f32 %v1570_v24, %v605_v60  ;;  %v816_v1 = vadd.f32 %v1570_v24, %v669_v61 }
 0x10e   : > { %v1262_v4 = vpack.c.bf16 %v834_v62, %v833_v58  ;;  %v1302_v5 = vpack.c.bf16 %v850_v63, %v849_v59  ;;  %v832_v6 = vmax.f32 %v800_v0, 0.0  ;;  %v848_v7 = vmax.f32 %v816_v1, 0.0 }
 0x110   : > { %1310 = vst [vmem:[%s1585_s17 + $0x38] sm:$0xff] %v1262_v4   ;;  %1318 = vst [vmem:[%s1585_s17 + $0x78] sm:$0xff] %v1302_v5   ;;  %v1257_v8 = vpack.c.bf16 %v832_v6, %v831_v2  ;;  %v1297_v9 = vpack.c.bf16 %v848_v7, %v847_v3 }
 0x112   : > { %1309 = vst [vmem:[%s1585_s17 + $0x30] sm:$0xff] %v1257_v8   ;;  %1317 = vst [vmem:[%s1585_s17 + $0x70] sm:$0xff] %v1297_v9  }
 0x113 PF: > { %s13_s14 = sadd.s32 1, %s1477_s14   ;;  %s1640_s12 = smov %s1473_s13 }
 0x114   : > { %p10_p5 = scmp.ge.s32.totalorder %s13_s14, 10   ;;  %s1641_s13 = smov %s1643_s15 }
 0x116   :  { %12 = sbr.rel (!%p10_p5) target bundleno = 2 (0x2), region = 76 }

// kernel: vae_forward.11
= control target key start
LH: loop header
LB: loop body
LE: loop exit
PB: predicated region body
PF: predicated region fallthrough
CT: control target
= control target key end

     0   :  { %s2433_s12 = smov 0   ;;  %s2435_s13 = smov 0   ;;  %s2690_s0 = inlined_call_operand.vmem [shape: bf16[512,512], index: 0, kind: input, shape index: {}]   ;;  %s2691_s1 = inlined_call_operand.vmem [shape: bf16[512,128], index: 1, kind: input, shape index: {}]   ;;  %s2692_s2 = inlined_call_operand.vmem [shape: f32[1,128], index: 2, kind: input, shape index: {}]   ;;  %s2693_s3 = inlined_call_operand.vmem [shape: bf16[512,128], index: 3, kind: output, shape index: {}]  }
   0x1   :  { %s2437_s14 = smov 0  }
   0x2 LB: > { %s32_s15 = sadd.s32 1, %s2407_s13  ;;  %p1748_p0 = scmp.ge.s32.totalorder %s2411_s14, 1  ;;  %s2411_s14 = sphi %s2437_s14, %s13_s14   ;;  %s2407_s13 = sphi %s2435_s13, %s2695_s13   ;;  %s2403_s12 = sphi %s2433_s12, %s2694_s12  }
   0x3   : > { %p34_p1 = scmp.ge.s32.totalorder %s32_s15, 2  ;;  %p191_p2 = scmp.lt.s32.totalorder %s2411_s14, 3 }
   0x5   : > { %s2697_s15 = smov (%p34_p1, %s32_s15), 0  ;;  %p192_p3 = pnand %p1748_p0, %p191_p2 }
   0x6   : > { %s1749_s25 = sshll.u32 (!%p192_p3), %s2403_s12, 5 }
   0x7   : > { %195 = sbr.rel (%p192_p3) target bundleno = 377 (0x179), region = 32  ;;  %p236_p4 = scmp.lt.s32.totalorder (!%p192_p3), %s1749_s25, 63 }
   0xc   : > { %v2261_v0 = vld [vmem:[%s2691_s1 + $0x78] sm:$0xff]   ;;  %v2265_v4 = vld [vmem:[%s2691_s1 + $0x70] sm:$0xff]   ;;  %v2269_v8 = vld [vmem:[%s2691_s1 + $0x68] sm:$0xff]   ;;  %s2699_s25 = smov (!%p236_p4, %s1749_s25), 63 }
   0xd   : > { %v2262_v1 = vld [vmem:[%s2691_s1 + $0xf8] sm:$0xff]   ;;  %2013 = vmatprep.subr.bf16.mxu0 %v2261_v0  ;;  %v2266_v5 = vld [vmem:[%s2691_s1 + $0xf0] sm:$0xff]   ;;  %v2270_v9 = vld [vmem:[%s2691_s1 + $0xe8] sm:$0xff]   ;;  %s1885_s24 = sshll.u32 %s2699_s25, 4  ;;  %s1753_s17 = sshll.u32 %s2699_s25, 2 }
   0xe   : > { %v2263_v2 = vld [vmem:[%s2691_s1 + $0x38] sm:$0xff]   ;;  %2125 = vmatprep.subr.bf16.mxu1 %v2262_v1  ;;  %v2267_v6 = vld [vmem:[%s2691_s1 + $0x30] sm:$0xff]   ;;  %v2271_v10 = vld [vmem:[%s2691_s1 + $0x28] sm:$0xff]   ;;  %s2550_s12 = scalar_lea.vmem %s2690_s0, %s1885_s24  ;;  %s2633_s20 = scalar_lea.vmem %s2693_s3, %s1753_s17 }
   0xf   : > { %v2264_v3 = vld [vmem:[%s2691_s1 + $0xb8] sm:$0xff]   ;;  %2014 = vmatpush3.bf16.msra.mxu0 %v2263_v2  ;;  %v2268_v7 = vld [vmem:[%s2691_s1 + $0xb0] sm:$0xff]   ;;  %v2272_v11 = vld [vmem:[%s2691_s1 + $0xa8] sm:$0xff]  }
  0x10   : > { %2126 = vmatpush3.bf16.msra.mxu1 %v2264_v3  ;;  %2015 = vmatprep.subr.bf16.mxu0 %v2265_v4  ;;  %v2273_v12 = vld [vmem:[%s2691_s1 + $0x60] sm:$0xff]   ;;  %v2277_v16 = vld [vmem:[%s2691_s1 + $0x58] sm:$0xff]   ;;  %v2281_v20 = vld [vmem:[%s2691_s1 + $0x50] sm:$0xff]  }
  0x11   : > { %2127 = vmatprep.subr.bf16.mxu1 %v2266_v5  ;;  %v2274_v13 = vld [vmem:[%s2691_s1 + $0xe0] sm:$0xff]   ;;  %v2278_v17 = vld [vmem:[%s2691_s1 + $0xd8] sm:$0xff]   ;;  %v2282_v21 = vld [vmem:[%s2691_s1 + $0xd0] sm:$0xff]  }
  0x12   : > { %v2275_v14 = vld [vmem:[%s2691_s1 + $0x20] sm:$0xff]   ;;  %v2279_v18 = vld [vmem:[%s2691_s1 + $0x18] sm:$0xff]   ;;  %v2283_v22 = vld [vmem:[%s2691_s1 + $0x10] sm:$0xff]  }
  0x13   : > { %2016 = vmatpush3.bf16.msra.mxu0 %v2267_v6  ;;  %v2276_v15 = vld [vmem:[%s2691_s1 + $0xa0] sm:$0xff]   ;;  %v2280_v19 = vld [vmem:[%s2691_s1 + $0x98] sm:$0xff]   ;;  %v2284_v23 = vld [vmem:[%s2691_s1 + $0x90] sm:$0xff]  }
  0x14   : > { %2128 = vmatpush3.bf16.msra.mxu1 %v2268_v7  ;;  %2017 = vmatprep.subr.bf16.mxu0 %v2269_v8  ;;  %v2285_v24 = vld [vmem:[%s2691_s1 + $0x48] sm:$0xff]   ;;  %v2289_v28 = vld [vmem:[%s2691_s1 + $0x40] sm:$0xff]  }
  0x15   : > { %2129 = vmatprep.subr.bf16.mxu1 %v2270_v9  ;;  %v2286_v25 = vld [vmem:[%s2691_s1 + $0xc8] sm:$0xff]   ;;  %v2290_v29 = vld [vmem:[%s2691_s1 + $0xc0] sm:$0xff]  }
  0x16   : > { %v2287_v26 = vld [vmem:[%s2691_s1 + $0x8] sm:$0xff]   ;;  %v2291_v30 = vld [vmem:[%s2691_s1] sm:$0xff]  }
  0x17   : > { %2018 = vmatpush3.bf16.msra.mxu0 %v2271_v10  ;;  %v2288_v27 = vld [vmem:[%s2691_s1 + $0x88] sm:$0xff]   ;;  %v2292_v31 = vld [vmem:[%s2691_s1 + $0x80] sm:$0xff]  }
  0x18   : > { %2130 = vmatpush3.bf16.msra.mxu1 %v2272_v11  ;;  %2019 = vmatprep.subr.bf16.mxu0 %v2273_v12  ;;  %v2293_v32 = vld [vmem:[%s2550_s12] ss:$16 sps:$4 sm:$0xff]   ;;  %v2295_v33 = vld [vmem:[%s2550_s12 + $0x4] ss:$16 sps:$4 sm:$0xff]   ;;  %v2296_v34 = vld [vmem:[%s2550_s12 + $0x8] ss:$16 sps:$4 sm:$0xff]  }
  0x19   : > { %2131 = vmatprep.subr.bf16.mxu1 %v2274_v13  ;;  %v2298_v35 = vld [vmem:[%s2550_s12 + $0xc] ss:$16 sps:$4 sm:$0xff]   ;;  %1008 = vmatprep.mubr.bf16.mxu0 %v2295_v33  ;;  %v2299_v36 = vld [vmem:[%s2550_s12 + $0x24] ss:$16 sps:$4 sm:$0xff]   ;;  %v2303_v38 = vld [vmem:[%s2550_s12 + $0x20] ss:$16 sps:$4 sm:$0xff]  }
  0x1a   : > { %1169 = vmatprep.mubr.bf16.mxu1 %v2298_v35  ;;  %v2301_v37 = vld [vmem:[%s2550_s12 + $0x2c] ss:$16 sps:$4 sm:$0xff]   ;;  %v2304_v39 = vld [vmem:[%s2550_s12 + $0x28] ss:$16 sps:$4 sm:$0xff]   ;;  %v2305_v40 = vld [vmem:[%s2550_s12 + $0x44] ss:$16 sps:$4 sm:$0xff]  }
  0x1b   : > { %2020 = vmatpush3.bf16.msra.mxu0 %v2275_v14  ;;  %v2307_v41 = vld [vmem:[%s2550_s12 + $0x4c] ss:$16 sps:$4 sm:$0xff]   ;;  %v2309_v42 = vld [vmem:[%s2550_s12 + $0x40] ss:$16 sps:$4 sm:$0xff]   ;;  %v2310_v43 = vld [vmem:[%s2550_s12 + $0x48] ss:$16 sps:$4 sm:$0xff]  }
  0x1c   : > { %2132 = vmatpush3.bf16.msra.mxu1 %v2276_v15  ;;  %2021 = vmatprep.subr.bf16.mxu0 %v2277_v16  ;;  %v2311_v44 = vld [vmem:[%s2550_s12 + $0x64] ss:$16 sps:$4 sm:$0xff]   ;;  %v2313_v45 = vld [vmem:[%s2550_s12 + $0x6c] ss:$16 sps:$4 sm:$0xff]   ;;  %v2315_v46 = vld [vmem:[%s2550_s12 + $0x60] ss:$16 sps:$4 sm:$0xff]  }
  0x1d   : > { %2133 = vmatprep.subr.bf16.mxu1 %v2278_v17  ;;  %v2316_v47 = vld [vmem:[%s2550_s12 + $0x68] ss:$16 sps:$4 sm:$0xff]   ;;  %v2317_v48 = vld [vmem:[%s2550_s12 + $0x84] ss:$16 sps:$4 sm:$0xff]   ;;  %v2319_v49 = vld [vmem:[%s2550_s12 + $0x8c] ss:$16 sps:$4 sm:$0xff]  }
  0x1e   : > { %v2321_v50 = vld [vmem:[%s2550_s12 + $0x80] ss:$16 sps:$4 sm:$0xff]   ;;  %v2322_v51 = vld [vmem:[%s2550_s12 + $0x88] ss:$16 sps:$4 sm:$0xff]   ;;  %v2323_v52 = vld [vmem:[%s2550_s12 + $0xa4] ss:$16 sps:$4 sm:$0xff]  }
  0x1f   : > { %2022 = vmatpush3.bf16.msra.mxu0 %v2279_v18  ;;  %v2325_v53 = vld [vmem:[%s2550_s12 + $0xac] ss:$16 sps:$4 sm:$0xff]   ;;  %v2327_v54 = vld [vmem:[%s2550_s12 + $0xa0] ss:$16 sps:$4 sm:$0xff]   ;;  %v2328_v55 = vld [vmem:[%s2550_s12 + $0xa8] ss:$16 sps:$4 sm:$0xff]  }
  0x20   : > { %2134 = vmatpush3.bf16.msra.mxu1 %v2280_v19  ;;  %2023 = vmatprep.subr.bf16.mxu0 %v2281_v20  ;;  %v2329_v56 = vld [vmem:[%s2550_s12 + $0xc4] ss:$16 sps:$4 sm:$0xff]   ;;  %v2331_v57 = vld [vmem:[%s2550_s12 + $0xcc] ss:$16 sps:$4 sm:$0xff]   ;;  %v2333_v58 = vld [vmem:[%s2550_s12 + $0xc0] ss:$16 sps:$4 sm:$0xff]  }
  0x21   : > { %2135 = vmatprep.subr.bf16.mxu1 %v2282_v21  ;;  %v2334_v59 = vld [vmem:[%s2550_s12 + $0xc8] ss:$16 sps:$4 sm:$0xff]   ;;  %v2335_v60 = vld [vmem:[%s2550_s12 + $0xe4] ss:$16 sps:$4 sm:$0xff]   ;;  %v2337_v61 = vld [vmem:[%s2550_s12 + $0xec] ss:$16 sps:$4 sm:$0xff]  }
  0x22   : > { %v2339_v62 = vld [vmem:[%s2550_s12 + $0xe0] ss:$16 sps:$4 sm:$0xff]   ;;  %v2340_v63 = vld [vmem:[%s2550_s12 + $0xe8] ss:$16 sps:$4 sm:$0xff]   ;;  %v2341_v0 = vld [vmem:[%s2550_s12 + $0x104] ss:$16 sps:$4 sm:$0xff]  }
  0x23   : > { %2024 = vmatpush3.bf16.msra.mxu0 %v2283_v22  ;;  %v2343_v1 = vld [vmem:[%s2550_s12 + $0x10c] ss:$16 sps:$4 sm:$0xff]   ;;  %v2345_v2 = vld [vmem:[%s2550_s12 + $0x100] ss:$16 sps:$4 sm:$0xff]   ;;  %v2346_v3 = vld [vmem:[%s2550_s12 + $0x108] ss:$16 sps:$4 sm:$0xff]  }
  0x24   : > { %2136 = vmatpush3.bf16.msra.mxu1 %v2284_v23  ;;  %2025 = vmatprep.subr.bf16.mxu0 %v2285_v24  ;;  %v2347_v4 = vld [vmem:[%s2550_s12 + $0x124] ss:$16 sps:$4 sm:$0xff]   ;;  %v2349_v5 = vld [vmem:[%s2550_s12 + $0x12c] ss:$16 sps:$4 sm:$0xff]   ;;  %v2351_v6 = vld [vmem:[%s2550_s12 + $0x120] ss:$16 sps:$4 sm:$0xff]  }
  0x25   : > { %2137 = vmatprep.subr.bf16.mxu1 %v2286_v25  ;;  %v2352_v7 = vld [vmem:[%s2550_s12 + $0x128] ss:$16 sps:$4 sm:$0xff]   ;;  %v2353_v8 = vld [vmem:[%s2550_s12 + $0x144] ss:$16 sps:$4 sm:$0xff]   ;;  %v2355_v9 = vld [vmem:[%s2550_s12 + $0x14c] ss:$16 sps:$4 sm:$0xff]  }
  0x26   : > { %v2357_v10 = vld [vmem:[%s2550_s12 + $0x140] ss:$16 sps:$4 sm:$0xff]   ;;  %v2358_v11 = vld [vmem:[%s2550_s12 + $0x148] ss:$16 sps:$4 sm:$0xff]   ;;  %v2359_v12 = vld [vmem:[%s2550_s12 + $0x164] ss:$16 sps:$4 sm:$0xff]  }
  0x27   : > { %2026 = vmatpush3.bf16.msra.mxu0 %v2287_v26  ;;  %v2361_v13 = vld [vmem:[%s2550_s12 + $0x16c] ss:$16 sps:$4 sm:$0xff]   ;;  %v2363_v14 = vld [vmem:[%s2550_s12 + $0x160] ss:$16 sps:$4 sm:$0xff]   ;;  %v2364_v15 = vld [vmem:[%s2550_s12 + $0x168] ss:$16 sps:$4 sm:$0xff]  }
  0x28   : > { %2138 = vmatpush3.bf16.msra.mxu1 %v2288_v27  ;;  %2027 = vmatprep.subr.bf16.mxu0 %v2289_v28  ;;  %v2365_v16 = vld [vmem:[%s2550_s12 + $0x184] ss:$16 sps:$4 sm:$0xff]   ;;  %v2367_v17 = vld [vmem:[%s2550_s12 + $0x18c] ss:$16 sps:$4 sm:$0xff]   ;;  %v2369_v18 = vld [vmem:[%s2550_s12 + $0x180] ss:$16 sps:$4 sm:$0xff]  }
  0x29   : > { %2139 = vmatprep.subr.bf16.mxu1 %v2290_v29  ;;  %v2370_v19 = vld [vmem:[%s2550_s12 + $0x188] ss:$16 sps:$4 sm:$0xff]   ;;  %v2371_v20 = vld [vmem:[%s2550_s12 + $0x1a4] ss:$16 sps:$4 sm:$0xff]   ;;  %v2373_v21 = vld [vmem:[%s2550_s12 + $0x1ac] ss:$16 sps:$4 sm:$0xff]  }
  0x2a   : > { %v2375_v22 = vld [vmem:[%s2550_s12 + $0x1a0] ss:$16 sps:$4 sm:$0xff]   ;;  %v2376_v23 = vld [vmem:[%s2550_s12 + $0x1a8] ss:$16 sps:$4 sm:$0xff]   ;;  %v2377_v24 = vld [vmem:[%s2550_s12 + $0x1c4] ss:$16 sps:$4 sm:$0xff]  }
  0x2b   : > { %2028 = vmatpush3.bf16.msra.mxu0 %v2291_v30  ;;  %v2379_v25 = vld [vmem:[%s2550_s12 + $0x1cc] ss:$16 sps:$4 sm:$0xff]   ;;  %v2381_v26 = vld [vmem:[%s2550_s12 + $0x1c0] ss:$16 sps:$4 sm:$0xff]   ;;  %v2382_v27 = vld [vmem:[%s2550_s12 + $0x1c8] ss:$16 sps:$4 sm:$0xff]  }
  0x2c   : > { %2140 = vmatpush3.bf16.msra.mxu1 %v2292_v31  ;;  %v2383_v28 = vld [vmem:[%s2550_s12 + $0x1e4] ss:$16 sps:$4 sm:$0xff]   ;;  %v2385_v29 = vld [vmem:[%s2550_s12 + $0x1ec] ss:$16 sps:$4 sm:$0xff]   ;;  %v2387_v30 = vld [vmem:[%s2550_s12 + $0x1e0] ss:$16 sps:$4 sm:$0xff]  }
  0x2d   : > { %v2388_v31 = vld [vmem:[%s2550_s12 + $0x1e8] ss:$16 sps:$4 sm:$0xff]  }
  0x2e   : > { %1009 = vmatmul.mubr.bf16.vlgmr.msra.gmra.mxu0 %v2293_v32 }
  0x2f   : > { %1170 = vmatmul.mubr.bf16.vlgmr.msra.gmra.mxu1 %v2296_v34  ;;  %1016 = vmatprep.mubr.bf16.mxu0 %v2299_v36 }
  0x30   : > { %1177 = vmatprep.mubr.bf16.mxu1 %v2301_v37 }
  0x36   : > { %1017 = vmatmul.mubr.bf16.gmra.mxu0 %v2303_v38 }
  0x37   : > { %1178 = vmatmul.mubr.bf16.gmra.mxu1 %v2304_v39  ;;  %1024 = vmatprep.mubr.bf16.mxu0 %v2305_v40 }
  0x38   : > { %1185 = vmatprep.mubr.bf16.mxu1 %v2307_v41 }
  0x3e   : > { %1025 = vmatmul.mubr.bf16.gmra.mxu0 %v2309_v42  ;;  %v2625_v42 = vld [vmem:[%s2692_s2] ss:$0 sm:$0xff] }
  0x3f   : > { %1186 = vmatmul.mubr.bf16.gmra.mxu1 %v2310_v43  ;;  %1032 = vmatprep.mubr.bf16.mxu0 %v2311_v44 }
  0x40   : > { %1193 = vmatprep.mubr.bf16.mxu1 %v2313_v45 }
  0x46   : > { %1033 = vmatmul.mubr.bf16.gmra.mxu0 %v2315_v46 }
  0x47   : > { %1194 = vmatmul.mubr.bf16.gmra.mxu1 %v2316_v47  ;;  %1040 = vmatprep.mubr.bf16.mxu0 %v2317_v48 }
  0x48   : > { %1201 = vmatprep.mubr.bf16.mxu1 %v2319_v49 }
  0x4e   : > { %1041 = vmatmul.mubr.bf16.gmra.mxu0 %v2321_v50 }
  0x4f   : > { %1202 = vmatmul.mubr.bf16.gmra.mxu1 %v2322_v51  ;;  %1048 = vmatprep.mubr.bf16.mxu0 %v2323_v52 }
  0x50   : > { %1209 = vmatprep.mubr.bf16.mxu1 %v2325_v53 }
  0x56   : > { %1049 = vmatmul.mubr.bf16.gmra.mxu0 %v2327_v54 }
  0x57   : > { %1210 = vmatmul.mubr.bf16.gmra.mxu1 %v2328_v55  ;;  %1056 = vmatprep.mubr.bf16.mxu0 %v2329_v56 }
  0x58   : > { %1217 = vmatprep.mubr.bf16.mxu1 %v2331_v57 }
  0x5e   : > { %1057 = vmatmul.mubr.bf16.gmra.mxu0 %v2333_v58 }
  0x5f   : > { %1218 = vmatmul.mubr.bf16.gmra.mxu1 %v2334_v59  ;;  %1064 = vmatprep.mubr.bf16.mxu0 %v2335_v60 }
  0x60   : > { %1225 = vmatprep.mubr.bf16.mxu1 %v2337_v61 }
  0x66   : > { %1065 = vmatmul.mubr.bf16.gmra.mxu0 %v2339_v62 }
  0x67   : > { %1226 = vmatmul.mubr.bf16.gmra.mxu1 %v2340_v63  ;;  %1072 = vmatprep.mubr.bf16.mxu0 %v2341_v0 }
  0x68   : > { %1233 = vmatprep.mubr.bf16.mxu1 %v2343_v1 }
  0x6e   : > { %1073 = vmatmul.mubr.bf16.gmra.mxu0 %v2345_v2 }
  0x6f   : > { %1234 = vmatmul.mubr.bf16.gmra.mxu1 %v2346_v3  ;;  %1080 = vmatprep.mubr.bf16.mxu0 %v2347_v4 }
  0x70   : > { %1241 = vmatprep.mubr.bf16.mxu1 %v2349_v5 }
  0x76   : > { %1081 = vmatmul.mubr.bf16.gmra.mxu0 %v2351_v6 }
  0x77   : > { %1242 = vmatmul.mubr.bf16.gmra.mxu1 %v2352_v7  ;;  %1088 = vmatprep.mubr.bf16.mxu0 %v2353_v8 }
  0x78   : > { %1249 = vmatprep.mubr.bf16.mxu1 %v2355_v9 }
  0x7e   : > { %1089 = vmatmul.mubr.bf16.gmra.mxu0 %v2357_v10 }
  0x7f   : > { %1250 = vmatmul.mubr.bf16.gmra.mxu1 %v2358_v11  ;;  %1096 = vmatprep.mubr.bf16.mxu0 %v2359_v12 }
  0x80   : > { %1257 = vmatprep.mubr.bf16.mxu1 %v2361_v13 }
  0x86   : > { %1097 = vmatmul.mubr.bf16.gmra.mxu0 %v2363_v14 }
  0x87   : > { %1258 = vmatmul.mubr.bf16.gmra.mxu1 %v2364_v15  ;;  %1104 = vmatprep.mubr.bf16.mxu0 %v2365_v16 }
  0x88   : > { %1265 = vmatprep.mubr.bf16.mxu1 %v2367_v17 }
  0x8e   : > { %1105 = vmatmul.mubr.bf16.gmra.mxu0 %v2369_v18 }
  0x8f   : > { %1266 = vmatmul.mubr.bf16.gmra.mxu1 %v2370_v19  ;;  %1112 = vmatprep.mubr.bf16.mxu0 %v2371_v20 }
  0x90   : > { %1273 = vmatprep.mubr.bf16.mxu1 %v2373_v21 }
  0x96   : > { %1113 = vmatmul.mubr.bf16.gmra.mxu0 %v2375_v22 }
  0x97   : > { %1274 = vmatmul.mubr.bf16.gmra.mxu1 %v2376_v23  ;;  %1120 = vmatprep.mubr.bf16.mxu0 %v2377_v24 }
  0x98   : > { %1281 = vmatprep.mubr.bf16.mxu1 %v2379_v25 }
  0x9e   : > { %1121 = vmatmul.mubr.bf16.gmra.mxu0 %v2381_v26 }
  0x9f   : > { %1282 = vmatmul.mubr.bf16.gmra.mxu1 %v2382_v27  ;;  %1128 = vmatprep.mubr.bf16.mxu0 %v2383_v28 }
  0xa0   : > { %1289 = vmatprep.mubr.bf16.mxu1 %v2385_v29 }
  0xa6   : > { %1129 = vmatmul.mubr.bf16.gmra.mxu0 %v2387_v30 }
  0xa7   : > { %1290 = vmatmul.mubr.bf16.gmra.mxu1 %v2388_v31 }
  0xee   : > { %v2029_v32 = vpop.f32.mrf.mxu0 }
  0xef   : > { %v2141_v33 = vpop.f32.mrf.mxu1 }
  0xf0   : > { %v2030_v34 = vpop.f32.mrf.mxu0 }
  0xf1   : > { %v2031_v35 = vadd.f32 %v2030_v34, %v2029_v32  ;;  %v2142_v36 = vpop.f32.mrf.mxu1 }
  0xf2   : > { %v2143_v37 = vadd.f32 %v2142_v36, %v2141_v33  ;;  %v2032_v38 = vpop.f32.mrf.mxu0 }
  0xf3   : > { %v2144_v39 = vpop.f32.mrf.mxu1 }
  0xf4   : > { %v1172_v40 = vadd.f32 %v2143_v37, %v2031_v35  ;;  %v2033_v41 = vpop.f32.mrf.mxu0 }
  0xf5   : > { %v2034_v43 = vadd.f32 %v2033_v41, %v2032_v38  ;;  %v2145_v44 = vpop.f32.mrf.mxu1 }
  0xf6   : > { %v2146_v45 = vadd.f32 %v2145_v44, %v2144_v39  ;;  %v2035_v46 = vpop.f32.mrf.mxu0  ;;  %v1404_v48 = vadd.f32 %v2625_v42, %v1172_v40 }
  0xf7   : > { %v2147_v47 = vpop.f32.mrf.mxu1 }
  0xf8   : > { %v1175_v49 = vadd.f32 %v2146_v45, %v2034_v43  ;;  %v2036_v50 = vpop.f32.mrf.mxu0  ;;  %v1436_v57 = vmax.f32 %v1404_v48, 0.0 }
  0xf9   : > { %v2037_v51 = vadd.f32 %v2036_v50, %v2035_v46  ;;  %v2148_v52 = vpop.f32.mrf.mxu1 }
  0xfa   : > { %v1405_v53 = vadd.f32 %v2625_v42, %v1175_v49  ;;  %v2149_v54 = vadd.f32 %v2148_v52, %v2147_v47  ;;  %v2038_v55 = vpop.f32.mrf.mxu0 }
  0xfb   : > { %v2150_v56 = vpop.f32.mrf.mxu1 }
  0xfc   : > { %v1437_v58 = vmax.f32 %v1405_v53, 0.0  ;;  %v1180_v59 = vadd.f32 %v2149_v54, %v2037_v51  ;;  %v2039_v60 = vpop.f32.mrf.mxu0 }
  0xfd   : > { %v2040_v61 = vadd.f32 %v2039_v60, %v2038_v55  ;;  %v2151_v62 = vpop.f32.mrf.mxu1 }
  0xfe   : > { %v1921_v63 = vpack.c.bf16 %v1437_v58, %v1436_v57  ;;  %v2152_v0 = vadd.f32 %v2151_v62, %v2150_v56  ;;  %v2041_v1 = vpop.f32.mrf.mxu0  ;;  %v1406_v3 = vadd.f32 %v2625_v42, %v1180_v59 }
  0xff   : > { %v2153_v2 = vpop.f32.mrf.mxu1 }
 0x100   : > { %1922 = vst [vmem:[%s2633_s20] sm:$0xff] %v1921_v63   ;;  %v1183_v4 = vadd.f32 %v2152_v0, %v2040_v61  ;;  %v2042_v5 = vpop.f32.mrf.mxu0  ;;  %v1438_v12 = vmax.f32 %v1406_v3, 0.0 }
 0x101   : > { %v2043_v6 = vadd.f32 %v2042_v5, %v2041_v1  ;;  %v2154_v7 = vpop.f32.mrf.mxu1 }
 0x102   : > { %v1407_v8 = vadd.f32 %v2625_v42, %v1183_v4  ;;  %v2155_v9 = vadd.f32 %v2154_v7, %v2153_v2  ;;  %v2044_v10 = vpop.f32.mrf.mxu0 }
 0x103   : > { %v2156_v11 = vpop.f32.mrf.mxu1 }
 0x104   : > { %v1439_v13 = vmax.f32 %v1407_v8, 0.0  ;;  %v1188_v14 = vadd.f32 %v2155_v9, %v2043_v6  ;;  %v2045_v15 = vpop.f32.mrf.mxu0 }
 0x105   : > { %v2046_v16 = vadd.f32 %v2045_v15, %v2044_v10  ;;  %v2157_v17 = vpop.f32.mrf.mxu1 }
 0x106   : > { %v1926_v18 = vpack.c.bf16 %v1439_v13, %v1438_v12  ;;  %v2158_v19 = vadd.f32 %v2157_v17, %v2156_v11  ;;  %v2047_v20 = vpop.f32.mrf.mxu0  ;;  %v1408_v22 = vadd.f32 %v2625_v42, %v1188_v14 }
 0x107   : > { %v2159_v21 = vpop.f32.mrf.mxu1 }
 0x108   : > { %1998 = vst [vmem:[%s2633_s20 + $0x8] sm:$0xff] %v1926_v18   ;;  %v1191_v23 = vadd.f32 %v2158_v19, %v2046_v16  ;;  %v2048_v24 = vpop.f32.mrf.mxu0  ;;  %v1440_v31 = vmax.f32 %v1408_v22, 0.0 }
 0x109   : > { %v2049_v25 = vadd.f32 %v2048_v24, %v2047_v20  ;;  %v2160_v26 = vpop.f32.mrf.mxu1 }
 0x10a   : > { %v1409_v27 = vadd.f32 %v2625_v42, %v1191_v23  ;;  %v2161_v28 = vadd.f32 %v2160_v26, %v2159_v21  ;;  %v2050_v29 = vpop.f32.mrf.mxu0 }
 0x10b   : > { %v2162_v30 = vpop.f32.mrf.mxu1 }
 0x10c   : > { %v1441_v32 = vmax.f32 %v1409_v27, 0.0  ;;  %v1196_v33 = vadd.f32 %v2161_v28, %v2049_v25  ;;  %v2051_v34 = vpop.f32.mrf.mxu0 }
 0x10d   : > { %v2052_v35 = vadd.f32 %v2051_v34, %v2050_v29  ;;  %v2163_v36 = vpop.f32.mrf.mxu1 }
 0x10e   : > { %v1931_v37 = vpack.c.bf16 %v1441_v32, %v1440_v31  ;;  %v2164_v38 = vadd.f32 %v2163_v36, %v2162_v30  ;;  %v2053_v39 = vpop.f32.mrf.mxu0  ;;  %v1410_v41 = vadd.f32 %v2625_v42, %v1196_v33 }
 0x10f   : > { %v2165_v40 = vpop.f32.mrf.mxu1 }
 0x110   : > { %1999 = vst [vmem:[%s2633_s20 + $0x10] sm:$0xff] %v1931_v37   ;;  %v1199_v43 = vadd.f32 %v2164_v38, %v2052_v35  ;;  %v2054_v44 = vpop.f32.mrf.mxu0  ;;  %v1442_v51 = vmax.f32 %v1410_v41, 0.0 }
 0x111   : > { %v2055_v45 = vadd.f32 %v2054_v44, %v2053_v39  ;;  %v2166_v46 = vpop.f32.mrf.mxu1 }
 0x112   : > { %v1411_v47 = vadd.f32 %v2625_v42, %v1199_v43  ;;  %v2167_v48 = vadd.f32 %v2166_v46, %v2165_v40  ;;  %v2056_v49 = vpop.f32.mrf.mxu0 }
 0x113   : > { %v2168_v50 = vpop.f32.mrf.mxu1 }
 0x114   : > { %v1443_v52 = vmax.f32 %v1411_v47, 0.0  ;;  %v1204_v53 = vadd.f32 %v2167_v48, %v2055_v45  ;;  %v2057_v54 = vpop.f32.mrf.mxu0 }
 0x115   : > { %v2058_v55 = vadd.f32 %v2057_v54, %v2056_v49  ;;  %v2169_v56 = vpop.f32.mrf.mxu1 }
 0x116   : > { %v1936_v57 = vpack.c.bf16 %v1443_v52, %v1442_v51  ;;  %v2170_v58 = vadd.f32 %v2169_v56, %v2168_v50  ;;  %v2059_v59 = vpop.f32.mrf.mxu0  ;;  %v1412_v61 = vadd.f32 %v2625_v42, %v1204_v53 }
 0x117   : > { %v2171_v60 = vpop.f32.mrf.mxu1 }
 0x118   : > { %2000 = vst [vmem:[%s2633_s20 + $0x18] sm:$0xff] %v1936_v57   ;;  %v1207_v62 = vadd.f32 %v2170_v58, %v2058_v55  ;;  %v2060_v63 = vpop.f32.mrf.mxu0  ;;  %v1444_v6 = vmax.f32 %v1412_v61, 0.0 }
 0x119   : > { %v2061_v0 = vadd.f32 %v2060_v63, %v2059_v59  ;;  %v2172_v1 = vpop.f32.mrf.mxu1 }
 0x11a   : > { %v1413_v2 = vadd.f32 %v2625_v42, %v1207_v62  ;;  %v2173_v3 = vadd.f32 %v2172_v1, %v2171_v60  ;;  %v2062_v4 = vpop.f32.mrf.mxu0 }
 0x11b   : > { %v2174_v5 = vpop.f32.mrf.mxu1 }
 0x11c   : > { %v1445_v7 = vmax.f32 %v1413_v2, 0.0  ;;  %v1212_v8 = vadd.f32 %v2173_v3, %v2061_v0  ;;  %v2063_v9 = vpop.f32.mrf.mxu0 }
 0x11d   : > { %v2064_v10 = vadd.f32 %v2063_v9, %v2062_v4  ;;  %v2175_v11 = vpop.f32.mrf.mxu1 }
 0x11e   : > { %v1941_v12 = vpack.c.bf16 %v1445_v7, %v1444_v6  ;;  %v2176_v13 = vadd.f32 %v2175_v11, %v2174_v5  ;;  %v2065_v14 = vpop.f32.mrf.mxu0  ;;  %v1414_v16 = vadd.f32 %v2625_v42, %v1212_v8 }
 0x11f   : > { %v2177_v15 = vpop.f32.mrf.mxu1 }
 0x120   : > { %2001 = vst [vmem:[%s2633_s20 + $0x20] sm:$0xff] %v1941_v12   ;;  %v1215_v17 = vadd.f32 %v2176_v13, %v2064_v10  ;;  %v2066_v18 = vpop.f32.mrf.mxu0  ;;  %v1446_v25 = vmax.f32 %v1414_v16, 0.0 }
 0x121   : > { %v2067_v19 = vadd.f32 %v2066_v18, %v2065_v14  ;;  %v2178_v20 = vpop.f32.mrf.mxu1 }
 0x122   : > { %v1415_v21 = vadd.f32 %v2625_v42, %v1215_v17  ;;  %v2179_v22 = vadd.f32 %v2178_v20, %v2177_v15  ;;  %v2068_v23 = vpop.f32.mrf.mxu0 }
 0x123   : > { %v2180_v24 = vpop.f32.mrf.mxu1 }
 0x124   : > { %v1447_v26 = vmax.f32 %v1415_v21, 0.0  ;;  %v1220_v27 = vadd.f32 %v2179_v22, %v2067_v19  ;;  %v2069_v28 = vpop.f32.mrf.mxu0 }
 0x125   : > { %v2070_v29 = vadd.f32 %v2069_v28, %v2068_v23  ;;  %v2181_v30 = vpop.f32.mrf.mxu1 }
 0x126   : > { %v1946_v31 = vpack.c.bf16 %v1447_v26, %v1446_v25  ;;  %v2182_v32 = vadd.f32 %v2181_v30, %v2180_v24  ;;  %v2071_v33 = vpop.f32.mrf.mxu0  ;;  %v1416_v35 = vadd.f32 %v2625_v42, %v1220_v27 }
 0x127   : > { %v2183_v34 = vpop.f32.mrf.mxu1 }
 0x128   : > { %2002 = vst [vmem:[%s2633_s20 + $0x28] sm:$0xff] %v1946_v31   ;;  %v1223_v36 = vadd.f32 %v2182_v32, %v2070_v29  ;;  %v2072_v37 = vpop.f32.mrf.mxu0  ;;  %v1448_v45 = vmax.f32 %v1416_v35, 0.0 }
 0x129   : > { %v2073_v38 = vadd.f32 %v2072_v37, %v2071_v33  ;;  %v2184_v39 = vpop.f32.mrf.mxu1 }
 0x12a   : > { %v1417_v40 = vadd.f32 %v2625_v42, %v1223_v36  ;;  %v2185_v41 = vadd.f32 %v2184_v39, %v2183_v34  ;;  %v2074_v43 = vpop.f32.mrf.mxu0 }
 0x12b   : > { %v2186_v44 = vpop.f32.mrf.mxu1 }
 0x12c   : > { %v1449_v46 = vmax.f32 %v1417_v40, 0.0  ;;  %v1228_v47 = vadd.f32 %v2185_v41, %v2073_v38  ;;  %v2075_v48 = vpop.f32.mrf.mxu0 }
 0x12d   : > { %v2076_v49 = vadd.f32 %v2075_v48, %v2074_v43  ;;  %v2187_v50 = vpop.f32.mrf.mxu1 }
 0x12e   : > { %v1951_v51 = vpack.c.bf16 %v1449_v46, %v1448_v45  ;;  %v2188_v52 = vadd.f32 %v2187_v50, %v2186_v44  ;;  %v2077_v53 = vpop.f32.mrf.mxu0  ;;  %v1418_v55 = vadd.f32 %v2625_v42, %v1228_v47 }
 0x12f   : > { %v2189_v54 = vpop.f32.mrf.mxu1 }
 0x130   : > { %2003 = vst [vmem:[%s2633_s20 + $0x30] sm:$0xff] %v1951_v51   ;;  %v1231_v56 = vadd.f32 %v2188_v52, %v2076_v49  ;;  %v2078_v57 = vpop.f32.mrf.mxu0  ;;  %v1450_v0 = vmax.f32 %v1418_v55, 0.0 }
 0x131   : > { %v2079_v58 = vadd.f32 %v2078_v57, %v2077_v53  ;;  %v2190_v59 = vpop.f32.mrf.mxu1 }
 0x132   : > { %v1419_v60 = vadd.f32 %v2625_v42, %v1231_v56  ;;  %v2191_v61 = vadd.f32 %v2190_v59, %v2189_v54  ;;  %v2080_v62 = vpop.f32.mrf.mxu0 }
 0x133   : > { %v2192_v63 = vpop.f32.mrf.mxu1 }
 0x134   : > { %v1451_v1 = vmax.f32 %v1419_v60, 0.0  ;;  %v1236_v2 = vadd.f32 %v2191_v61, %v2079_v58  ;;  %v2081_v3 = vpop.f32.mrf.mxu0 }
 0x135   : > { %v2082_v4 = vadd.f32 %v2081_v3, %v2080_v62  ;;  %v2193_v5 = vpop.f32.mrf.mxu1 }
 0x136   : > { %v1956_v6 = vpack.c.bf16 %v1451_v1, %v1450_v0  ;;  %v2194_v7 = vadd.f32 %v2193_v5, %v2192_v63  ;;  %v2083_v8 = vpop.f32.mrf.mxu0  ;;  %v1420_v10 = vadd.f32 %v2625_v42, %v1236_v2 }
 0x137   : > { %v2195_v9 = vpop.f32.mrf.mxu1 }
 0x138   : > { %2004 = vst [vmem:[%s2633_s20 + $0x38] sm:$0xff] %v1956_v6   ;;  %v1239_v11 = vadd.f32 %v2194_v7, %v2082_v4  ;;  %v2084_v12 = vpop.f32.mrf.mxu0  ;;  %v1452_v19 = vmax.f32 %v1420_v10, 0.0 }
 0x139   : > { %v2085_v13 = vadd.f32 %v2084_v12, %v2083_v8  ;;  %v2196_v14 = vpop.f32.mrf.mxu1 }
 0x13a   : > { %v1421_v15 = vadd.f32 %v2625_v42, %v1239_v11  ;;  %v2197_v16 = vadd.f32 %v2196_v14, %v2195_v9  ;;  %v2086_v17 = vpop.f32.mrf.mxu0 }
 0x13b   : > { %v2198_v18 = vpop.f32.mrf.mxu1 }
 0x13c   : > { %v1453_v20 = vmax.f32 %v1421_v15, 0.0  ;;  %v1244_v21 = vadd.f32 %v2197_v16, %v2085_v13  ;;  %v2087_v22 = vpop.f32.mrf.mxu0 }
 0x13d   : > { %v2088_v23 = vadd.f32 %v2087_v22, %v2086_v17  ;;  %v2199_v24 = vpop.f32.mrf.mxu1 }
 0x13e   : > { %v1961_v25 = vpack.c.bf16 %v1453_v20, %v1452_v19  ;;  %v2200_v26 = vadd.f32 %v2199_v24, %v2198_v18  ;;  %v2089_v27 = vpop.f32.mrf.mxu0  ;;  %v1422_v29 = vadd.f32 %v2625_v42, %v1244_v21 }
 0x13f   : > { %v2201_v28 = vpop.f32.mrf.mxu1 }
 0x140   : > { %2005 = vst [vmem:[%s2633_s20 + $0x40] sm:$0xff] %v1961_v25   ;;  %v1247_v30 = vadd.f32 %v2200_v26, %v2088_v23  ;;  %v2090_v31 = vpop.f32.mrf.mxu0  ;;  %v1454_v38 = vmax.f32 %v1422_v29, 0.0 }
 0x141   : > { %v2091_v32 = vadd.f32 %v2090_v31, %v2089_v27  ;;  %v2202_v33 = vpop.f32.mrf.mxu1 }
 0x142   : > { %v1423_v34 = vadd.f32 %v2625_v42, %v1247_v30  ;;  %v2203_v35 = vadd.f32 %v2202_v33, %v2201_v28  ;;  %v2092_v36 = vpop.f32.mrf.mxu0 }
 0x143   : > { %v2204_v37 = vpop.f32.mrf.mxu1 }
 0x144   : > { %v1455_v39 = vmax.f32 %v1423_v34, 0.0  ;;  %v1252_v40 = vadd.f32 %v2203_v35, %v2091_v32  ;;  %v2093_v41 = vpop.f32.mrf.mxu0 }
 0x145   : > { %v2094_v43 = vadd.f32 %v2093_v41, %v2092_v36  ;;  %v2205_v44 = vpop.f32.mrf.mxu1 }
 0x146   : > { %v1966_v45 = vpack.c.bf16 %v1455_v39, %v1454_v38  ;;  %v2206_v46 = vadd.f32 %v2205_v44, %v2204_v37  ;;  %v2095_v47 = vpop.f32.mrf.mxu0  ;;  %v1424_v49 = vadd.f32 %v2625_v42, %v1252_v40 }
 0x147   : > { %v2207_v48 = vpop.f32.mrf.mxu1 }
 0x148   : > { %2006 = vst [vmem:[%s2633_s20 + $0x48] sm:$0xff] %v1966_v45   ;;  %v1255_v50 = vadd.f32 %v2206_v46, %v2094_v43  ;;  %v2096_v51 = vpop.f32.mrf.mxu0  ;;  %v1456_v58 = vmax.f32 %v1424_v49, 0.0 }
 0x149   : > { %v2097_v52 = vadd.f32 %v2096_v51, %v2095_v47  ;;  %v2208_v53 = vpop.f32.mrf.mxu1 }
 0x14a   : > { %v1425_v54 = vadd.f32 %v2625_v42, %v1255_v50  ;;  %v2209_v55 = vadd.f32 %v2208_v53, %v2207_v48  ;;  %v2098_v56 = vpop.f32.mrf.mxu0 }
 0x14b   : > { %v2210_v57 = vpop.f32.mrf.mxu1 }
 0x14c   : > { %v1457_v59 = vmax.f32 %v1425_v54, 0.0  ;;  %v1260_v60 = vadd.f32 %v2209_v55, %v2097_v52  ;;  %v2099_v61 = vpop.f32.mrf.mxu0 }
 0x14d   : > { %v2100_v62 = vadd.f32 %v2099_v61, %v2098_v56  ;;  %v2211_v63 = vpop.f32.mrf.mxu1 }
 0x14e   : > { %v1971_v0 = vpack.c.bf16 %v1457_v59, %v1456_v58  ;;  %v2212_v1 = vadd.f32 %v2211_v63, %v2210_v57  ;;  %v2101_v2 = vpop.f32.mrf.mxu0  ;;  %v1426_v4 = vadd.f32 %v2625_v42, %v1260_v60 }
 0x14f   : > { %v2213_v3 = vpop.f32.mrf.mxu1 }
 0x150   : > { %2007 = vst [vmem:[%s2633_s20 + $0x50] sm:$0xff] %v1971_v0   ;;  %v1263_v5 = vadd.f32 %v2212_v1, %v2100_v62  ;;  %v2102_v6 = vpop.f32.mrf.mxu0  ;;  %v1458_v13 = vmax.f32 %v1426_v4, 0.0 }
 0x151   : > { %v2103_v7 = vadd.f32 %v2102_v6, %v2101_v2  ;;  %v2214_v8 = vpop.f32.mrf.mxu1 }
 0x152   : > { %v1427_v9 = vadd.f32 %v2625_v42, %v1263_v5  ;;  %v2215_v10 = vadd.f32 %v2214_v8, %v2213_v3  ;;  %v2104_v11 = vpop.f32.mrf.mxu0 }
 0x153   : > { %v2216_v12 = vpop.f32.mrf.mxu1 }
 0x154   : > { %v1459_v14 = vmax.f32 %v1427_v9, 0.0  ;;  %v1268_v15 = vadd.f32 %v2215_v10, %v2103_v7  ;;  %v2105_v16 = vpop.f32.mrf.mxu0 }
 0x155   : > { %v2106_v17 = vadd.f32 %v2105_v16, %v2104_v11  ;;  %v2217_v18 = vpop.f32.mrf.mxu1 }
 0x156   : > { %v1976_v19 = vpack.c.bf16 %v1459_v14, %v1458_v13  ;;  %v2218_v20 = vadd.f32 %v2217_v18, %v2216_v12  ;;  %v2107_v21 = vpop.f32.mrf.mxu0  ;;  %v1428_v23 = vadd.f32 %v2625_v42, %v1268_v15 }
 0x157   : > { %v2219_v22 = vpop.f32.mrf.mxu1 }
 0x158   : > { %2008 = vst [vmem:[%s2633_s20 + $0x58] sm:$0xff] %v1976_v19   ;;  %v1271_v24 = vadd.f32 %v2218_v20, %v2106_v17  ;;  %v2108_v25 = vpop.f32.mrf.mxu0  ;;  %v1460_v32 = vmax.f32 %v1428_v23, 0.0 }
 0x159   : > { %v2109_v26 = vadd.f32 %v2108_v25, %v2107_v21  ;;  %v2220_v27 = vpop.f32.mrf.mxu1 }
 0x15a   : > { %v1429_v28 = vadd.f32 %v2625_v42, %v1271_v24  ;;  %v2221_v29 = vadd.f32 %v2220_v27, %v2219_v22  ;;  %v2110_v30 = vpop.f32.mrf.mxu0 }
 0x15b   : > { %v2222_v31 = vpop.f32.mrf.mxu1 }
 0x15c   : > { %v1461_v33 = vmax.f32 %v1429_v28, 0.0  ;;  %v1276_v34 = vadd.f32 %v2221_v29, %v2109_v26  ;;  %v2111_v35 = vpop.f32.mrf.mxu0 }
 0x15d   : > { %v2112_v36 = vadd.f32 %v2111_v35, %v2110_v30  ;;  %v2223_v37 = vpop.f32.mrf.mxu1 }
 0x15e   : > { %v1981_v38 = vpack.c.bf16 %v1461_v33, %v1460_v32  ;;  %v2224_v39 = vadd.f32 %v2223_v37, %v2222_v31  ;;  %v2113_v40 = vpop.f32.mrf.mxu0  ;;  %v1430_v43 = vadd.f32 %v2625_v42, %v1276_v34 }
 0x15f   : > { %v2225_v41 = vpop.f32.mrf.mxu1 }
 0x160   : > { %2009 = vst [vmem:[%s2633_s20 + $0x60] sm:$0xff] %v1981_v38   ;;  %v1279_v44 = vadd.f32 %v2224_v39, %v2112_v36  ;;  %v2114_v45 = vpop.f32.mrf.mxu0  ;;  %v1462_v52 = vmax.f32 %v1430_v43, 0.0 }
 0x161   : > { %v2115_v46 = vadd.f32 %v2114_v45, %v2113_v40  ;;  %v2226_v47 = vpop.f32.mrf.mxu1 }
 0x162   : > { %v1431_v48 = vadd.f32 %v2625_v42, %v1279_v44  ;;  %v2227_v49 = vadd.f32 %v2226_v47, %v2225_v41  ;;  %v2116_v50 = vpop.f32.mrf.mxu0 }
 0x163   : > { %v2228_v51 = vpop.f32.mrf.mxu1 }
 0x164   : > { %v1463_v53 = vmax.f32 %v1431_v48, 0.0  ;;  %v1284_v54 = vadd.f32 %v2227_v49, %v2115_v46  ;;  %v2117_v55 = vpop.f32.mrf.mxu0 }
 0x165   : > { %v2118_v56 = vadd.f32 %v2117_v55, %v2116_v50  ;;  %v2229_v57 = vpop.f32.mrf.mxu1 }
 0x166   : > { %v1986_v58 = vpack.c.bf16 %v1463_v53, %v1462_v52  ;;  %v2230_v59 = vadd.f32 %v2229_v57, %v2228_v51  ;;  %v2119_v60 = vpop.f32.mrf.mxu0  ;;  %v1432_v62 = vadd.f32 %v2625_v42, %v1284_v54 }
 0x167   : > { %v2231_v61 = vpop.f32.mrf.mxu1 }
 0x168   : > { %2010 = vst [vmem:[%s2633_s20 + $0x68] sm:$0xff] %v1986_v58   ;;  %v1287_v63 = vadd.f32 %v2230_v59, %v2118_v56  ;;  %v2120_v0 = vpop.f32.mrf.mxu0  ;;  %v1464_v7 = vmax.f32 %v1432_v62, 0.0 }
 0x169   : > { %v2121_v1 = vadd.f32 %v2120_v0, %v2119_v60  ;;  %v2232_v2 = vpop.f32.mrf.mxu1 }
 0x16a   : > { %v1433_v3 = vadd.f32 %v2625_v42, %v1287_v63  ;;  %v2233_v4 = vadd.f32 %v2232_v2, %v2231_v61  ;;  %v2122_v5 = vpop.f32.mrf.mxu0 }
 0x16b   : > { %v2234_v6 = vpop.f32.mrf.mxu1 }
 0x16c   : > { %v1465_v8 = vmax.f32 %v1433_v3, 0.0  ;;  %v1292_v9 = vadd.f32 %v2233_v4, %v2121_v1  ;;  %v2123_v10 = vpop.f32.mrf.mxu0 }
 0x16d   : > { %v2124_v11 = vadd.f32 %v2123_v10, %v2122_v5  ;;  %v2235_v12 = vpop.f32.mrf.mxu1 }
 0x16e   : > { %v1991_v13 = vpack.c.bf16 %v1465_v8, %v1464_v7  ;;  %v2236_v14 = vadd.f32 %v2235_v12, %v2234_v6  ;;  %v1434_v15 = vadd.f32 %v2625_v42, %v1292_v9 }
 0x170   : > { %2011 = vst [vmem:[%s2633_s20 + $0x70] sm:$0xff] %v1991_v13   ;;  %v1295_v16 = vadd.f32 %v2236_v14, %v2124_v11  ;;  %v1466_v18 = vmax.f32 %v1434_v15, 0.0 }
 0x172   : > { %v1435_v17 = vadd.f32 %v2625_v42, %v1295_v16 }
 0x174   : > { %v1467_v19 = vmax.f32 %v1435_v17, 0.0 }
 0x176   : > { %v1996_v20 = vpack.c.bf16 %v1467_v19, %v1466_v18 }
 0x178   : > { %2012 = vst [vmem:[%s2633_s20 + $0x78] sm:$0xff] %v1996_v20  }
 0x179 PF: > { %s13_s14 = sadd.s32 1, %s2411_s14   ;;  %s2694_s12 = smov %s2407_s13 }
 0x17a   : > { %p10_p5 = scmp.ge.s32.totalorder %s13_s14, 4   ;;  %s2695_s13 = smov %s2697_s15 }
 0x17c   :  { %12 = sbr.rel (!%p10_p5) target bundleno = 2 (0x2), region = 76 }

// kernel: vae_forward.12
= control target key start
LH: loop header
LB: loop body
LE: loop exit
PB: predicated region body
PF: predicated region fallthrough
CT: control target
= control target key end

     0   :  { %s2606_s1 = inlined_call_operand.vmem [shape: bf16[1024,128], index: 1, kind: input, shape index: {}]   ;;  %s2607_s0 = inlined_call_operand.vmem [shape: bf16[128,1024], index: 0, kind: input, shape index: {}]   ;;  %s2608_s2 = inlined_call_operand.vmem [shape: f32[1,128], index: 2, kind: input, shape index: {}]   ;;  %s2609_s3 = inlined_call_operand.vmem [shape: bf16[128,128], index: 3, kind: output, shape index: {}]  }
   0x1   :  { %v1973_v0 = vld [vmem:[%s2606_s1 + $0x78] sm:$0xff]   ;;  %v1977_v4 = vld [vmem:[%s2606_s1 + $0x70] sm:$0xff]   ;;  %v1981_v8 = vld [vmem:[%s2606_s1 + $0x68] sm:$0xff]  }
   0x2   :  { %v1974_v1 = vld [vmem:[%s2606_s1 + $0xf8] sm:$0xff]   ;;  %1717 = vmatprep.subr.bf16.mxu0 %v1973_v0  ;;  %v1978_v5 = vld [vmem:[%s2606_s1 + $0xf0] sm:$0xff]   ;;  %v1982_v9 = vld [vmem:[%s2606_s1 + $0xe8] sm:$0xff]  }
   0x3   :  { %v1975_v2 = vld [vmem:[%s2606_s1 + $0x38] sm:$0xff]   ;;  %1781 = vmatprep.subr.bf16.mxu1 %v1974_v1  ;;  %v1979_v6 = vld [vmem:[%s2606_s1 + $0x30] sm:$0xff]   ;;  %v1983_v10 = vld [vmem:[%s2606_s1 + $0x28] sm:$0xff]  }
   0x4   :  { %v1976_v3 = vld [vmem:[%s2606_s1 + $0xb8] sm:$0xff]   ;;  %1718 = vmatpush3.bf16.msra.mxu0 %v1975_v2  ;;  %v1980_v7 = vld [vmem:[%s2606_s1 + $0xb0] sm:$0xff]   ;;  %v1984_v11 = vld [vmem:[%s2606_s1 + $0xa8] sm:$0xff]  }
   0x5   :  { %1782 = vmatpush3.bf16.msra.mxu1 %v1976_v3  ;;  %1719 = vmatprep.subr.bf16.mxu0 %v1977_v4  ;;  %v1985_v12 = vld [vmem:[%s2606_s1 + $0x60] sm:$0xff]   ;;  %v1989_v16 = vld [vmem:[%s2606_s1 + $0x58] sm:$0xff]   ;;  %v1993_v20 = vld [vmem:[%s2606_s1 + $0x50] sm:$0xff]  }
   0x6   :  { %1783 = vmatprep.subr.bf16.mxu1 %v1978_v5  ;;  %v1986_v13 = vld [vmem:[%s2606_s1 + $0xe0] sm:$0xff]   ;;  %v1990_v17 = vld [vmem:[%s2606_s1 + $0xd8] sm:$0xff]   ;;  %v1994_v21 = vld [vmem:[%s2606_s1 + $0xd0] sm:$0xff]  }
   0x7   :  { %v1987_v14 = vld [vmem:[%s2606_s1 + $0x20] sm:$0xff]   ;;  %v1991_v18 = vld [vmem:[%s2606_s1 + $0x18] sm:$0xff]   ;;  %v1995_v22 = vld [vmem:[%s2606_s1 + $0x10] sm:$0xff]  }
   0x8   :  { %1720 = vmatpush3.bf16.msra.mxu0 %v1979_v6  ;;  %v1988_v15 = vld [vmem:[%s2606_s1 + $0xa0] sm:$0xff]   ;;  %v1992_v19 = vld [vmem:[%s2606_s1 + $0x98] sm:$0xff]   ;;  %v1996_v23 = vld [vmem:[%s2606_s1 + $0x90] sm:$0xff]  }
   0x9   :  { %1784 = vmatpush3.bf16.msra.mxu1 %v1980_v7  ;;  %1721 = vmatprep.subr.bf16.mxu0 %v1981_v8  ;;  %v1997_v24 = vld [vmem:[%s2606_s1 + $0x48] sm:$0xff]   ;;  %v2001_v28 = vld [vmem:[%s2606_s1 + $0x40] sm:$0xff]   ;;  %v2005_v40 = vld [vmem:[%s2606_s1 + $0x178] sm:$0xff]  }
   0xa   :  { %1785 = vmatprep.subr.bf16.mxu1 %v1982_v9  ;;  %v1998_v25 = vld [vmem:[%s2606_s1 + $0xc8] sm:$0xff]   ;;  %v2002_v29 = vld [vmem:[%s2606_s1 + $0xc0] sm:$0xff]   ;;  %v2006_v41 = vld [vmem:[%s2606_s1 + $0x138] sm:$0xff]  }
   0xb   :  { %v1999_v26 = vld [vmem:[%s2606_s1 + $0x8] sm:$0xff]   ;;  %v2003_v30 = vld [vmem:[%s2606_s1] sm:$0xff]   ;;  %v2007_v42 = vld [vmem:[%s2606_s1 + $0x1f8] sm:$0xff]  }
   0xc   :  { %1722 = vmatpush3.bf16.msra.mxu0 %v1983_v10  ;;  %v2000_v27 = vld [vmem:[%s2606_s1 + $0x88] sm:$0xff]   ;;  %v2004_v31 = vld [vmem:[%s2606_s1 + $0x80] sm:$0xff]   ;;  %v2008_v43 = vld [vmem:[%s2606_s1 + $0x1b8] sm:$0xff]  }
   0xd   :  { %1786 = vmatpush3.bf16.msra.mxu1 %v1984_v11  ;;  %1723 = vmatprep.subr.bf16.mxu0 %v1985_v12  ;;  %v51_v32 = vld [vmem:[%s2607_s0] sm:$0xff]  ;;  %v52_v34 = vld [vmem:[%s2607_s0 + $0x8] sm:$0xff]  ;;  %v2009_v50 = vld [vmem:[%s2606_s1 + $0x170] sm:$0xff]  }
   0xe   :  { %1787 = vmatprep.subr.bf16.mxu1 %v1986_v13  ;;  %v55_v33 = vld [vmem:[%s2607_s0 + $0x20] sm:$0xff]  ;;  %v56_v37 = vld [vmem:[%s2607_s0 + $0x28] sm:$0xff]  ;;  %v2010_v52 = vld [vmem:[%s2606_s1 + $0x130] sm:$0xff]  }
   0xf   :  { %v1509_v35 = vcombine.low %v51_v32, %v55_v33  ;;  %v1510_v36 = vcombine.high %v51_v32, %v55_v33  ;;  %v1511_v38 = vcombine.low %v52_v34, %v56_v37  ;;  %v1512_v39 = vcombine.high %v52_v34, %v56_v37  ;;  %v59_v44 = vld [vmem:[%s2607_s0 + $0x40] sm:$0xff]  ;;  %v60_v47 = vld [vmem:[%s2607_s0 + $0x48] sm:$0xff]  ;;  %v2011_v54 = vld [vmem:[%s2606_s1 + $0x1f0] sm:$0xff]  }
  0x10   :  { %1724 = vmatpush3.bf16.msra.mxu0 %v1987_v14  ;;  %v63_v45 = vld [vmem:[%s2607_s0 + $0x60] sm:$0xff]  ;;  %v64_v48 = vld [vmem:[%s2607_s0 + $0x68] sm:$0xff]  ;;  %v2012_v55 = vld [vmem:[%s2606_s1 + $0x1b0] sm:$0xff]  }
  0x11   :  { %1788 = vmatpush3.bf16.msra.mxu1 %v1988_v15  ;;  %1725 = vmatprep.subr.bf16.mxu0 %v1989_v16  ;;  %v1518_v46 = vcombine.high %v59_v44, %v63_v45  ;;  %v1520_v49 = vcombine.high %v60_v47, %v64_v48  ;;  %v1517_v51 = vcombine.low %v59_v44, %v63_v45  ;;  %v67_v56 = vld [vmem:[%s2607_s0 + $0x80] sm:$0xff]  ;;  %v68_v58 = vld [vmem:[%s2607_s0 + $0x88] sm:$0xff]  ;;  %v2027_v32 = vld [vmem:[%s2606_s1 + $0x1d0] sm:$0xff]  }
  0x12   :  { %1789 = vmatprep.subr.bf16.mxu1 %v1990_v17  ;;  %979 = vmatprep.mubr.bf16.mxu0 %v1510_v36  ;;  %v1519_v53 = vcombine.low %v60_v47, %v64_v48  ;;  %v71_v57 = vld [vmem:[%s2607_s0 + $0xa0] sm:$0xff]  ;;  %v72_v59 = vld [vmem:[%s2607_s0 + $0xa8] sm:$0xff]  ;;  %v2028_v33 = vld [vmem:[%s2606_s1 + $0x190] sm:$0xff]  }
  0x13   :  { %1076 = vmatprep.mubr.bf16.mxu1 %v1512_v39  ;;  %v1526_v60 = vcombine.high %v67_v56, %v71_v57  ;;  %v1528_v61 = vcombine.high %v68_v58, %v72_v59  ;;  %v2013_v62 = vld [vmem:[%s2606_s1 + $0x168] sm:$0xff]   ;;  %v1525_v2 = vcombine.low %v67_v56, %v71_v57  ;;  %v75_v3 = vld [vmem:[%s2607_s0 + $0xc0] sm:$0xff]  ;;  %v1527_v6 = vcombine.low %v68_v58, %v72_v59 }
  0x14   :  { %1726 = vmatpush3.bf16.msra.mxu0 %v1991_v18  ;;  %v2014_v63 = vld [vmem:[%s2606_s1 + $0x128] sm:$0xff]   ;;  %v79_v4 = vld [vmem:[%s2607_s0 + $0xe0] sm:$0xff]  ;;  %v2021_v18 = vld [vmem:[%s2606_s1 + $0x158] sm:$0xff]  }
  0x15   :  { %1790 = vmatpush3.bf16.msra.mxu1 %v1992_v19  ;;  %1727 = vmatprep.subr.bf16.mxu0 %v1993_v20  ;;  %v2015_v0 = vld [vmem:[%s2606_s1 + $0x1e8] sm:$0xff]   ;;  %v1534_v7 = vcombine.high %v75_v3, %v79_v4  ;;  %v2017_v10 = vld [vmem:[%s2606_s1 + $0x160] sm:$0xff]   ;;  %v1533_v19 = vcombine.low %v75_v3, %v79_v4  ;;  %v2022_v20 = vld [vmem:[%s2606_s1 + $0x118] sm:$0xff]  }
  0x16   :  { %1791 = vmatprep.subr.bf16.mxu1 %v1994_v21  ;;  %v2016_v1 = vld [vmem:[%s2606_s1 + $0x1a8] sm:$0xff]   ;;  %v2018_v11 = vld [vmem:[%s2606_s1 + $0x120] sm:$0xff]  }
  0x17   :  { %v76_v5 = vld [vmem:[%s2607_s0 + $0xc8] sm:$0xff]  ;;  %v2019_v12 = vld [vmem:[%s2606_s1 + $0x1e0] sm:$0xff]  }
  0x18   :  { %1728 = vmatpush3.bf16.msra.mxu0 %v1995_v22  ;;  %v80_v8 = vld [vmem:[%s2607_s0 + $0xe8] sm:$0xff]  ;;  %v2020_v13 = vld [vmem:[%s2606_s1 + $0x1a0] sm:$0xff]  }
  0x19   :  { %1792 = vmatpush3.bf16.msra.mxu1 %v1996_v23  ;;  %1729 = vmatprep.subr.bf16.mxu0 %v1997_v24  ;;  %v1536_v9 = vcombine.high %v76_v5, %v80_v8  ;;  %v83_v14 = vld [vmem:[%s2607_s0 + $0x100] sm:$0xff]  ;;  %v84_v16 = vld [vmem:[%s2607_s0 + $0x108] sm:$0xff]  ;;  %v1535_v21 = vcombine.low %v76_v5, %v80_v8  ;;  %v2023_v23 = vld [vmem:[%s2606_s1 + $0x1d8] sm:$0xff]  }
  0x1a   :  { %1793 = vmatprep.subr.bf16.mxu1 %v1998_v25  ;;  %v87_v15 = vld [vmem:[%s2607_s0 + $0x120] sm:$0xff]  ;;  %v88_v17 = vld [vmem:[%s2607_s0 + $0x128] sm:$0xff]  ;;  %v2024_v25 = vld [vmem:[%s2606_s1 + $0x198] sm:$0xff]  }
  0x1b   :  { %v1542_v22 = vcombine.high %v83_v14, %v87_v15  ;;  %v1544_v24 = vcombine.high %v84_v16, %v88_v17  ;;  %v1541_v34 = vcombine.low %v83_v14, %v87_v15  ;;  %v2030_v39 = vld [vmem:[%s2606_s1 + $0x108] sm:$0xff]   ;;  %v2034_v48 = vld [vmem:[%s2606_s1 + $0x100] sm:$0xff]   ;;  %v62_v8 = vld [vmem:[%s2607_s0 + $0x58] sm:$0xff] }
  0x1c   :  { %1730 = vmatpush3.bf16.msra.mxu0 %v1999_v26  ;;  %v91_v26 = vld [vmem:[%s2607_s0 + $0x140] sm:$0xff]  ;;  %v100_v44 = vld [vmem:[%s2607_s0 + $0x188] sm:$0xff]  ;;  %v69_v14 = vld [vmem:[%s2607_s0 + $0x90] sm:$0xff] }
  0x1d   :  { %1794 = vmatpush3.bf16.msra.mxu1 %v2000_v27  ;;  %1731 = vmatprep.subr.bf16.mxu0 %v2001_v28  ;;  %v95_v27 = vld [vmem:[%s2607_s0 + $0x160] sm:$0xff]  ;;  %v2025_v28 = vld [vmem:[%s2606_s1 + $0x150] sm:$0xff]   ;;  %v104_v45 = vld [vmem:[%s2607_s0 + $0x1a8] sm:$0xff] }
  0x1e   :  { %1795 = vmatprep.subr.bf16.mxu1 %v2002_v29  ;;  %v92_v29 = vld [vmem:[%s2607_s0 + $0x148] sm:$0xff]  ;;  %v1550_v36 = vcombine.high %v91_v26, %v95_v27  ;;  %v1549_v47 = vcombine.low %v91_v26, %v95_v27  ;;  %v1559_v59 = vcombine.low %v100_v44, %v104_v45  ;;  %v73_v15 = vld [vmem:[%s2607_s0 + $0xb0] sm:$0xff] }
  0x1f   :  { %v108_v56 = vld [vmem:[%s2607_s0 + $0x1c8] sm:$0xff]  ;;  %v1529_v26 = vcombine.low %v69_v14, %v73_v15 }
  0x20   :  { %1732 = vmatpush3.bf16.msra.mxu0 %v2003_v30  ;;  %v96_v30 = vld [vmem:[%s2607_s0 + $0x168] sm:$0xff] }
  0x21   :  { %1796 = vmatpush3.bf16.msra.mxu1 %v2004_v31  ;;  %1845 = vmatprep.subr.bf16.mxu0 %v2005_v40  ;;  %v2026_v31 = vld [vmem:[%s2606_s1 + $0x110] sm:$0xff]   ;;  %v1552_v37 = vcombine.high %v92_v29, %v96_v30  ;;  %v2031_v40 = vld [vmem:[%s2606_s1 + $0x1c8] sm:$0xff]  }
  0x22   :  { %1909 = vmatprep.subr.bf16.mxu1 %v2007_v42  ;;  %v103_v42 = vld [vmem:[%s2607_s0 + $0x1a0] sm:$0xff]  ;;  %v112_v57 = vld [vmem:[%s2607_s0 + $0x1e8] sm:$0xff] }
  0x23   :  { %980 = vmatmul.mubr.bf16.vlgmr.msra.gmra.mxu0 %v1509_v35  ;;  %v1543_v35 = vcombine.low %v84_v16, %v88_v17  ;;  %v1567_v3 = vcombine.low %v108_v56, %v112_v57  ;;  %v70_v16 = vld [vmem:[%s2607_s0 + $0x98] sm:$0xff] }
  0x24   :  { %1077 = vmatmul.mubr.bf16.vlgmr.msra.gmra.mxu1 %v1511_v38  ;;  %1846 = vmatpush3.bf16.msra.mxu0 %v2006_v41  ;;  %v2029_v38 = vld [vmem:[%s2606_s1 + $0x148] sm:$0xff]   ;;  %v99_v41 = vld [vmem:[%s2607_s0 + $0x180] sm:$0xff]  ;;  %v74_v17 = vld [vmem:[%s2607_s0 + $0xb8] sm:$0xff] }
  0x25   :  { %1910 = vmatpush3.bf16.msra.mxu1 %v2008_v43  ;;  %987 = vmatprep.mubr.bf16.mxu0 %v1518_v46  ;;  %v2032_v43 = vld [vmem:[%s2606_s1 + $0x188] sm:$0xff]   ;;  %v2033_v46 = vld [vmem:[%s2606_s1 + $0x140] sm:$0xff]   ;;  %v1557_v58 = vcombine.low %v99_v41, %v103_v42  ;;  %v1531_v27 = vcombine.low %v70_v16, %v74_v17 }
  0x26   :  { %1084 = vmatprep.mubr.bf16.mxu1 %v1520_v49  ;;  %1847 = vmatprep.subr.bf16.mxu0 %v2009_v50  ;;  %v1551_v49 = vcombine.low %v92_v29, %v96_v30  ;;  %v1558_v50 = vcombine.high %v99_v41, %v103_v42  ;;  %v85_v30 = vld [vmem:[%s2607_s0 + $0x110] sm:$0xff]  ;;  %v98_v41 = vld [vmem:[%s2607_s0 + $0x178] sm:$0xff] }
  0x27   :  { %1911 = vmatprep.subr.bf16.mxu1 %v2011_v54  ;;  %v107_v54 = vld [vmem:[%s2607_s0 + $0x1c0] sm:$0xff] }
  0x28   :  { %1848 = vmatpush3.bf16.msra.mxu0 %v2010_v52  ;;  %v1560_v52 = vcombine.high %v100_v44, %v104_v45 }
  0x29   :  { %1912 = vmatpush3.bf16.msra.mxu1 %v2012_v55  ;;  %1849 = vmatprep.subr.bf16.mxu0 %v2013_v62  ;;  %v111_v55 = vld [vmem:[%s2607_s0 + $0x1e0] sm:$0xff]  ;;  %v53_v62 = vld [vmem:[%s2607_s0 + $0x10] sm:$0xff] }
  0x2a   :  { %1913 = vmatprep.subr.bf16.mxu1 %v2015_v0  ;;  %v54_v0 = vld [vmem:[%s2607_s0 + $0x18] sm:$0xff] }
  0x2b   :  { %988 = vmatmul.mubr.bf16.gmra.mxu0 %v1517_v51  ;;  %v2035_v51 = vld [vmem:[%s2606_s1 + $0x1c0] sm:$0xff]  }
  0x2c   :  { %1085 = vmatmul.mubr.bf16.gmra.mxu1 %v1519_v53  ;;  %995 = vmatprep.mubr.bf16.mxu0 %v1526_v60  ;;  %v2036_v53 = vld [vmem:[%s2606_s1 + $0x180] sm:$0xff]   ;;  %v1566_v60 = vcombine.high %v107_v54, %v111_v55 }
  0x2d   :  { %1092 = vmatprep.mubr.bf16.mxu1 %v1528_v61  ;;  %1850 = vmatpush3.bf16.msra.mxu0 %v2014_v63  ;;  %v1568_v61 = vcombine.high %v108_v56, %v112_v57  ;;  %v57_v63 = vld [vmem:[%s2607_s0 + $0x30] sm:$0xff]  ;;  %v110_v56 = vld [vmem:[%s2607_s0 + $0x1d8] sm:$0xff] }
  0x2e   :  { %1914 = vmatpush3.bf16.msra.mxu1 %v2016_v1  ;;  %1851 = vmatprep.subr.bf16.mxu0 %v2017_v10  ;;  %v58_v1 = vld [vmem:[%s2607_s0 + $0x38] sm:$0xff]  ;;  %v1514_v4 = vcombine.high %v53_v62, %v57_v63  ;;  %v1513_v10 = vcombine.low %v53_v62, %v57_v63 }
  0x2f   :  { %1915 = vmatprep.subr.bf16.mxu1 %v2019_v12  ;;  %v1516_v5 = vcombine.high %v54_v0, %v58_v1  ;;  %v114_v57 = vld [vmem:[%s2607_s0 + $0x1f8] sm:$0xff] }
  0x30   :  { %v1571_v63 = vcombine.low %v110_v56, %v114_v57 }
  0x31   :  { %1852 = vmatpush3.bf16.msra.mxu0 %v2018_v11  ;;  %v1515_v11 = vcombine.low %v54_v0, %v58_v1 }
  0x32   :  { %1916 = vmatpush3.bf16.msra.mxu1 %v2020_v13  ;;  %1853 = vmatprep.subr.bf16.mxu0 %v2021_v18 }
  0x33   :  { %996 = vmatmul.mubr.bf16.gmra.mxu0 %v1525_v2  ;;  %1917 = vmatprep.subr.bf16.mxu1 %v2023_v23  ;;  %v1565_v2 = vcombine.low %v107_v54, %v111_v55  ;;  %v81_v23 = vld [vmem:[%s2607_s0 + $0xf0] sm:$0xff] }
  0x34   :  { %1093 = vmatmul.mubr.bf16.gmra.mxu1 %v1527_v6  ;;  %1003 = vmatprep.mubr.bf16.mxu0 %v1534_v7  ;;  %v61_v6 = vld [vmem:[%s2607_s0 + $0x50] sm:$0xff] }
  0x35   :  { %1100 = vmatprep.mubr.bf16.mxu1 %v1536_v9  ;;  %1854 = vmatpush3.bf16.msra.mxu0 %v2022_v20  ;;  %v65_v7 = vld [vmem:[%s2607_s0 + $0x70] sm:$0xff]  ;;  %v66_v9 = vld [vmem:[%s2607_s0 + $0x78] sm:$0xff]  ;;  %v1530_v20 = vcombine.high %v69_v14, %v73_v15 }
  0x36   :  { %1918 = vmatpush3.bf16.msra.mxu1 %v2024_v25  ;;  %1855 = vmatprep.subr.bf16.mxu0 %v2025_v28  ;;  %v1522_v12 = vcombine.high %v61_v6, %v65_v7  ;;  %v1524_v13 = vcombine.high %v62_v8, %v66_v9  ;;  %v1521_v18 = vcombine.low %v61_v6, %v65_v7  ;;  %v82_v25 = vld [vmem:[%s2607_s0 + $0xf8] sm:$0xff]  ;;  %v109_v54 = vld [vmem:[%s2607_s0 + $0x1d0] sm:$0xff] }
  0x37   :  { %1919 = vmatprep.subr.bf16.mxu1 %v2027_v32  ;;  %v86_v32 = vld [vmem:[%s2607_s0 + $0x118] sm:$0xff]  ;;  %v113_v55 = vld [vmem:[%s2607_s0 + $0x1f0] sm:$0xff] }
  0x38   :  { %v1569_v62 = vcombine.low %v109_v54, %v113_v55 }
  0x39   :  { %1856 = vmatpush3.bf16.msra.mxu0 %v2026_v31  ;;  %v89_v31 = vld [vmem:[%s2607_s0 + $0x130] sm:$0xff] }
  0x3a   :  { %1920 = vmatpush3.bf16.msra.mxu1 %v2028_v33  ;;  %1857 = vmatprep.subr.bf16.mxu0 %v2029_v38  ;;  %v90_v33 = vld [vmem:[%s2607_s0 + $0x138] sm:$0xff]  ;;  %v93_v38 = vld [vmem:[%s2607_s0 + $0x150] sm:$0xff]  ;;  %v1545_v42 = vcombine.low %v85_v30, %v89_v31 }
  0x3b   :  { %1004 = vmatmul.mubr.bf16.gmra.mxu0 %v1533_v19  ;;  %1921 = vmatprep.subr.bf16.mxu1 %v2031_v40  ;;  %v1523_v19 = vcombine.low %v62_v8, %v66_v9  ;;  %v94_v40 = vld [vmem:[%s2607_s0 + $0x158] sm:$0xff] }
  0x3c   :  { %1101 = vmatmul.mubr.bf16.gmra.mxu1 %v1535_v21  ;;  %1011 = vmatprep.mubr.bf16.mxu0 %v1542_v22  ;;  %v1532_v21 = vcombine.high %v70_v16, %v74_v17  ;;  %v77_v22 = vld [vmem:[%s2607_s0 + $0xd0] sm:$0xff]  ;;  %v1556_v45 = vcombine.high %v94_v40, %v98_v41 }
  0x3d   :  { %1108 = vmatprep.mubr.bf16.mxu1 %v1544_v24  ;;  %1858 = vmatpush3.bf16.msra.mxu0 %v2030_v39  ;;  %v78_v24 = vld [vmem:[%s2607_s0 + $0xd8] sm:$0xff]  ;;  %v1538_v28 = vcombine.high %v77_v22, %v81_v23  ;;  %v97_v39 = vld [vmem:[%s2607_s0 + $0x170] sm:$0xff] }
  0x3e   :  { %1922 = vmatpush3.bf16.msra.mxu1 %v2032_v43  ;;  %1859 = vmatprep.subr.bf16.mxu0 %v2033_v46  ;;  %v1540_v29 = vcombine.high %v78_v24, %v82_v25  ;;  %v1547_v43 = vcombine.low %v86_v32, %v90_v33  ;;  %v1554_v44 = vcombine.high %v93_v38, %v97_v39  ;;  %v101_v46 = vld [vmem:[%s2607_s0 + $0x190] sm:$0xff] }
  0x3f   :  { %1923 = vmatprep.subr.bf16.mxu1 %v2035_v51  ;;  %v1555_v51 = vcombine.low %v94_v40, %v98_v41 }
  0x41   :  { %1860 = vmatpush3.bf16.msra.mxu0 %v2034_v48  ;;  %v102_v48 = vld [vmem:[%s2607_s0 + $0x198] sm:$0xff] }
  0x42   :  { %1924 = vmatpush3.bf16.msra.mxu1 %v2036_v53 }
  0x43   :  { %1012 = vmatmul.mubr.bf16.gmra.mxu0 %v1541_v34  ;;  %v1537_v34 = vcombine.low %v77_v22, %v81_v23 }
  0x44   :  { %1109 = vmatmul.mubr.bf16.gmra.mxu1 %v1543_v35  ;;  %1019 = vmatprep.mubr.bf16.mxu0 %v1550_v36  ;;  %v1539_v35 = vcombine.low %v78_v24, %v82_v25  ;;  %v1546_v36 = vcombine.high %v85_v30, %v89_v31 }
  0x45   :  { %1116 = vmatprep.mubr.bf16.mxu1 %v1552_v37  ;;  %v1548_v37 = vcombine.high %v86_v32, %v90_v33 }
  0x4b   :  { %1020 = vmatmul.mubr.bf16.gmra.mxu0 %v1549_v47  ;;  %v105_v47 = vld [vmem:[%s2607_s0 + $0x1b0] sm:$0xff] }
  0x4c   :  { %1117 = vmatmul.mubr.bf16.gmra.mxu1 %v1551_v49  ;;  %1027 = vmatprep.mubr.bf16.mxu0 %v1558_v50  ;;  %v106_v49 = vld [vmem:[%s2607_s0 + $0x1b8] sm:$0xff]  ;;  %v1553_v50 = vcombine.low %v93_v38, %v97_v39 }
  0x4d   :  { %1124 = vmatprep.mubr.bf16.mxu1 %v1560_v52  ;;  %v1562_v52 = vcombine.high %v101_v46, %v105_v47  ;;  %v1564_v53 = vcombine.high %v102_v48, %v106_v49 }
  0x53   :  { %1028 = vmatmul.mubr.bf16.gmra.mxu0 %v1557_v58  ;;  %v1561_v58 = vcombine.low %v101_v46, %v105_v47 }
  0x54   :  { %1125 = vmatmul.mubr.bf16.gmra.mxu1 %v1559_v59  ;;  %1035 = vmatprep.mubr.bf16.mxu0 %v1566_v60  ;;  %v1563_v59 = vcombine.low %v102_v48, %v106_v49  ;;  %v1570_v60 = vcombine.high %v109_v54, %v113_v55 }
  0x55   :  { %1132 = vmatprep.mubr.bf16.mxu1 %v1568_v61  ;;  %v1572_v61 = vcombine.high %v110_v56, %v114_v57 }
  0x5b   :  { %1036 = vmatmul.mubr.bf16.gmra.mxu0 %v1565_v2 }
  0x5c   :  { %1133 = vmatmul.mubr.bf16.gmra.mxu1 %v1567_v3  ;;  %1173 = vmatprep.mubr.bf16.mxu0 %v1514_v4 }
  0x5d   :  { %1270 = vmatprep.mubr.bf16.mxu1 %v1516_v5 }
  0x63   :  { %1174 = vmatmul.mubr.bf16.vlgmr.msra.gmra.mxu0 %v1513_v10 }
  0x64   :  { %1271 = vmatmul.mubr.bf16.vlgmr.msra.gmra.mxu1 %v1515_v11  ;;  %1181 = vmatprep.mubr.bf16.mxu0 %v1522_v12 }
  0x65   :  { %1278 = vmatprep.mubr.bf16.mxu1 %v1524_v13 }
  0x6b   :  { %1182 = vmatmul.mubr.bf16.gmra.mxu0 %v1521_v18 }
  0x6c   :  { %1279 = vmatmul.mubr.bf16.gmra.mxu1 %v1523_v19  ;;  %1189 = vmatprep.mubr.bf16.mxu0 %v1530_v20 }
  0x6d   :  { %1286 = vmatprep.mubr.bf16.mxu1 %v1532_v21 }
  0x73   :  { %1190 = vmatmul.mubr.bf16.gmra.mxu0 %v1529_v26 }
  0x74   :  { %1287 = vmatmul.mubr.bf16.gmra.mxu1 %v1531_v27  ;;  %1197 = vmatprep.mubr.bf16.mxu0 %v1538_v28 }
  0x75   :  { %1294 = vmatprep.mubr.bf16.mxu1 %v1540_v29 }
  0x7b   :  { %1198 = vmatmul.mubr.bf16.gmra.mxu0 %v1537_v34 }
  0x7c   :  { %1295 = vmatmul.mubr.bf16.gmra.mxu1 %v1539_v35  ;;  %1205 = vmatprep.mubr.bf16.mxu0 %v1546_v36 }
  0x7d   :  { %1302 = vmatprep.mubr.bf16.mxu1 %v1548_v37 }
  0x83   :  { %1206 = vmatmul.mubr.bf16.gmra.mxu0 %v1545_v42 }
  0x84   :  { %1303 = vmatmul.mubr.bf16.gmra.mxu1 %v1547_v43  ;;  %1213 = vmatprep.mubr.bf16.mxu0 %v1554_v44 }
  0x85   :  { %1310 = vmatprep.mubr.bf16.mxu1 %v1556_v45 }
  0x8b   :  { %1214 = vmatmul.mubr.bf16.gmra.mxu0 %v1553_v50 }
  0x8c   :  { %1311 = vmatmul.mubr.bf16.gmra.mxu1 %v1555_v51  ;;  %1221 = vmatprep.mubr.bf16.mxu0 %v1562_v52 }
  0x8d   :  { %1318 = vmatprep.mubr.bf16.mxu1 %v1564_v53 }
  0x93   :  { %1222 = vmatmul.mubr.bf16.gmra.mxu0 %v1561_v58 }
  0x94   :  { %1319 = vmatmul.mubr.bf16.gmra.mxu1 %v1563_v59  ;;  %1229 = vmatprep.mubr.bf16.mxu0 %v1570_v60 }
  0x95   :  { %1326 = vmatprep.mubr.bf16.mxu1 %v1572_v61 }
  0x9b   :  { %1230 = vmatmul.mubr.bf16.gmra.mxu0 %v1569_v62 }
  0x9c   :  { %1327 = vmatmul.mubr.bf16.gmra.mxu1 %v1571_v63 }
  0xe3   :  { %v1733_v0 = vpop.f32.mrf.mxu0 }
  0xe4   :  { %v1797_v1 = vpop.f32.mrf.mxu1 }
  0xe5   :  { %v1734_v2 = vpop.f32.mrf.mxu0 }
  0xe6   :  { %v1735_v3 = vadd.f32 %v1734_v2, %v1733_v0  ;;  %v1798_v4 = vpop.f32.mrf.mxu1 }
  0xe7   :  { %v1799_v5 = vadd.f32 %v1798_v4, %v1797_v1  ;;  %v2441_v6 = vpop.f32.mrf.mxu0 }
  0xe8   :  { %v2443_v7 = vpop.f32.mrf.mxu1 }
  0xe9   :  { %v2445_v8 = vadd.f32 %v1799_v5, %v1735_v3  ;;  %v2447_v9 = vpop.f32.mrf.mxu0 }
  0xea   :  { %v2449_v10 = vpop.f32.mrf.mxu1 }
  0xeb   :  { %v1739_v11 = vpop.f32.mrf.mxu0 }
  0xec   :  { %v1803_v12 = vpop.f32.mrf.mxu1 }
  0xed   :  { %v1740_v13 = vpop.f32.mrf.mxu0 }
  0xee   :  { %v1741_v14 = vadd.f32 %v1740_v13, %v1739_v11  ;;  %v1804_v15 = vpop.f32.mrf.mxu1 }
  0xef   :  { %v1805_v16 = vadd.f32 %v1804_v15, %v1803_v12  ;;  %v2451_v17 = vpop.f32.mrf.mxu0 }
  0xf0   :  { %v2453_v18 = vpop.f32.mrf.mxu1 }
  0xf1   :  { %v2455_v19 = vadd.f32 %v1805_v16, %v1741_v14  ;;  %v2457_v20 = vpop.f32.mrf.mxu0 }
  0xf2   :  { %v2459_v21 = vpop.f32.mrf.mxu1 }
  0xf3   :  { %v1745_v22 = vpop.f32.mrf.mxu0 }
  0xf4   :  { %v1809_v23 = vpop.f32.mrf.mxu1 }
  0xf5   :  { %v1746_v24 = vpop.f32.mrf.mxu0 }
  0xf6   :  { %v1747_v25 = vadd.f32 %v1746_v24, %v1745_v22  ;;  %v1810_v26 = vpop.f32.mrf.mxu1 }
  0xf7   :  { %v1811_v27 = vadd.f32 %v1810_v26, %v1809_v23  ;;  %v2461_v28 = vpop.f32.mrf.mxu0 }
  0xf8   :  { %v2463_v29 = vpop.f32.mrf.mxu1 }
  0xf9   :  { %v2465_v30 = vadd.f32 %v1811_v27, %v1747_v25  ;;  %v2467_v31 = vpop.f32.mrf.mxu0 }
  0xfa   :  { %v2469_v32 = vpop.f32.mrf.mxu1 }
  0xfb   :  { %v1751_v33 = vpop.f32.mrf.mxu0 }
  0xfc   :  { %v1815_v34 = vpop.f32.mrf.mxu1 }
  0xfd   :  { %v1752_v35 = vpop.f32.mrf.mxu0 }
  0xfe   :  { %v1753_v36 = vadd.f32 %v1752_v35, %v1751_v33  ;;  %v1816_v37 = vpop.f32.mrf.mxu1 }
  0xff   :  { %v1817_v38 = vadd.f32 %v1816_v37, %v1815_v34  ;;  %v2471_v39 = vpop.f32.mrf.mxu0 }
 0x100   :  { %v2473_v40 = vpop.f32.mrf.mxu1 }
 0x101   :  { %v2475_v41 = vadd.f32 %v1817_v38, %v1753_v36  ;;  %v2477_v42 = vpop.f32.mrf.mxu0 }
 0x102   :  { %v2479_v43 = vpop.f32.mrf.mxu1 }
 0x103   :  { %v1757_v44 = vpop.f32.mrf.mxu0 }
 0x104   :  { %v1821_v45 = vpop.f32.mrf.mxu1 }
 0x105   :  { %v1758_v46 = vpop.f32.mrf.mxu0 }
 0x106   :  { %v1759_v47 = vadd.f32 %v1758_v46, %v1757_v44  ;;  %v1822_v48 = vpop.f32.mrf.mxu1 }
 0x107   :  { %v1823_v49 = vadd.f32 %v1822_v48, %v1821_v45  ;;  %v2481_v50 = vpop.f32.mrf.mxu0  ;;  %v1802_v48 = vadd.f32 %v2449_v10, %v2443_v7 }
 0x108   :  { %v2483_v51 = vpop.f32.mrf.mxu1 }
 0x109   :  { %v2485_v52 = vadd.f32 %v1823_v49, %v1759_v47  ;;  %v2487_v53 = vpop.f32.mrf.mxu0  ;;  %v1738_v47 = vadd.f32 %v2447_v9, %v2441_v6 }
 0x10a   :  { %v2489_v54 = vpop.f32.mrf.mxu1 }
 0x10b   :  { %v1763_v55 = vpop.f32.mrf.mxu0 }
 0x10c   :  { %v1827_v56 = vpop.f32.mrf.mxu1 }
 0x10d   :  { %v1764_v57 = vpop.f32.mrf.mxu0 }
 0x10e   :  { %v1765_v58 = vadd.f32 %v1764_v57, %v1763_v55  ;;  %v1828_v59 = vpop.f32.mrf.mxu1 }
 0x10f   :  { %v1829_v60 = vadd.f32 %v1828_v59, %v1827_v56  ;;  %v2491_v61 = vpop.f32.mrf.mxu0 }
 0x110   :  { %v2493_v62 = vpop.f32.mrf.mxu1 }
 0x111   :  { %v2495_v63 = vadd.f32 %v1829_v60, %v1765_v58  ;;  %v2497_v0 = vpop.f32.mrf.mxu0 }
 0x112   :  { %v2499_v1 = vpop.f32.mrf.mxu1 }
 0x113   :  { %v1769_v2 = vpop.f32.mrf.mxu0 }
 0x114   :  { %v1833_v3 = vpop.f32.mrf.mxu1 }
 0x115   :  { %v1770_v4 = vpop.f32.mrf.mxu0 }
 0x116   :  { %v1771_v5 = vadd.f32 %v1770_v4, %v1769_v2  ;;  %v1834_v11 = vpop.f32.mrf.mxu1  ;;  %v1082_v2 = vadd.f32 %v1802_v48, %v1738_v47 }
 0x117   :  { %v1835_v12 = vadd.f32 %v1834_v11, %v1833_v3  ;;  %v2501_v13 = vpop.f32.mrf.mxu0  ;;  %v2529_v11 = vld [vmem:[%s2608_s2] ss:$0 sm:$0xff] }
 0x118   :  { %v2503_v14 = vpop.f32.mrf.mxu1 }
 0x119   :  { %v2505_v15 = vadd.f32 %v1835_v12, %v1771_v5  ;;  %v2507_v16 = vpop.f32.mrf.mxu0  ;;  %v1744_v12 = vadd.f32 %v2457_v20, %v2451_v17 }
 0x11a   :  { %v2509_v22 = vpop.f32.mrf.mxu1 }
 0x11b   :  { %v1775_v23 = vpop.f32.mrf.mxu0 }
 0x11c   :  { %v1839_v24 = vpop.f32.mrf.mxu1 }
 0x11d   :  { %v1776_v25 = vpop.f32.mrf.mxu0 }
 0x11e   :  { %v1777_v26 = vadd.f32 %v1776_v25, %v1775_v23  ;;  %v1840_v27 = vpop.f32.mrf.mxu1 }
 0x11f   :  { %v1841_v33 = vadd.f32 %v1840_v27, %v1839_v24  ;;  %v2511_v34 = vpop.f32.mrf.mxu0 }
 0x120   :  { %v2513_v35 = vpop.f32.mrf.mxu1 }
 0x121   :  { %v2515_v36 = vadd.f32 %v1841_v33, %v1777_v26  ;;  %v2517_v37 = vpop.f32.mrf.mxu0 }
 0x122   :  { %v2519_v38 = vpop.f32.mrf.mxu1 }
 0x123   :  { %v1861_v44 = vpop.f32.mrf.mxu0 }
 0x124   :  { %v1925_v45 = vpop.f32.mrf.mxu1 }
 0x125   :  { %v1862_v46 = vpop.f32.mrf.mxu0 }
 0x126   :  { %v1863_v49 = vadd.f32 %v1862_v46, %v1861_v44  ;;  %v1926_v55 = vpop.f32.mrf.mxu1 }
 0x127   :  { %v1864_v56 = vpop.f32.mrf.mxu0  ;;  %v1927_v58 = vadd.f32 %v1926_v55, %v1925_v45 }
 0x128   :  { %v1176_v57 = vadd.f32 %v1863_v49, %v2445_v8  ;;  %v1928_v59 = vpop.f32.mrf.mxu1  ;;  %v1808_v8 = vadd.f32 %v2459_v21, %v2453_v18 }
 0x129   :  { %v1865_v60 = vpop.f32.mrf.mxu0 }
 0x12a   :  { %v1273_v3 = vadd.f32 %v1927_v58, %v1176_v57  ;;  %v1866_v4 = vadd.f32 %v1865_v60, %v1864_v56  ;;  %v1929_v5 = vpop.f32.mrf.mxu1  ;;  %v1090_v48 = vadd.f32 %v1808_v8, %v1744_v12 }
 0x12b   :  { %v1867_v6 = vpop.f32.mrf.mxu0  ;;  %v1930_v7 = vadd.f32 %v1929_v5, %v1928_v59 }
 0x12c   :  { %v1179_v9 = vadd.f32 %v1866_v4, %v1082_v2  ;;  %v1931_v10 = vpop.f32.mrf.mxu1  ;;  %v1393_v24 = vadd.f32 %v2529_v11, %v1273_v3  ;;  %v1750_v2 = vadd.f32 %v2467_v31, %v2461_v28 }
 0x12d   :  { %v1868_v23 = vpop.f32.mrf.mxu0 }
 0x12e   :  { %v1276_v25 = vadd.f32 %v1930_v7, %v1179_v9  ;;  %v1869_v26 = vadd.f32 %v1868_v23, %v1867_v6  ;;  %v1932_v27 = vpop.f32.mrf.mxu1  ;;  %v1409_v55 = vmax.f32 %v1393_v24, 0.0 }
 0x12f   :  { %v1870_v33 = vpop.f32.mrf.mxu0  ;;  %v1933_v46 = vadd.f32 %v1932_v27, %v1931_v10 }
 0x130   :  { %v1394_v44 = vadd.f32 %v2529_v11, %v1276_v25  ;;  %v1184_v45 = vadd.f32 %v1869_v26, %v2455_v19  ;;  %v1934_v47 = vpop.f32.mrf.mxu1  ;;  %v1814_v19 = vadd.f32 %v2469_v32, %v2463_v29 }
 0x131   :  { %v1871_v49 = vpop.f32.mrf.mxu0 }
 0x132   :  { %v1410_v17 = vmax.f32 %v1394_v44, 0.0  ;;  %v1281_v20 = vadd.f32 %v1933_v46, %v1184_v45  ;;  %v1872_v56 = vadd.f32 %v1871_v49, %v1870_v33  ;;  %v1935_v18 = vpop.f32.mrf.mxu1  ;;  %v1098_v31 = vadd.f32 %v1814_v19, %v1750_v2 }
 0x133   :  { %v1873_v21 = vpop.f32.mrf.mxu0  ;;  %v1936_v59 = vadd.f32 %v1935_v18, %v1934_v47  ;;  %v1756_v47 = vadd.f32 %v2477_v42, %v2471_v39 }
 0x134   :  { %v1673_v57 = vpack.c.bf16 %v1410_v17, %v1409_v55  ;;  %v1187_v58 = vadd.f32 %v1872_v56, %v1090_v48  ;;  %v1937_v60 = vpop.f32.mrf.mxu1  ;;  %v1395_v4 = vadd.f32 %v2529_v11, %v1281_v20 }
 0x135   :  { %v1874_v3 = vpop.f32.mrf.mxu0 }
 0x136   :  { %1674 = vst [vmem:[%s2609_s3] sm:$0xff] %v1673_v57   ;;  %v1284_v5 = vadd.f32 %v1936_v59, %v1187_v58  ;;  %v1875_v6 = vadd.f32 %v1874_v3, %v1873_v21  ;;  %v1938_v9 = vpop.f32.mrf.mxu1  ;;  %v1411_v29 = vmax.f32 %v1395_v4, 0.0 }
 0x137   :  { %v1876_v7 = vpop.f32.mrf.mxu0  ;;  %v1939_v8 = vadd.f32 %v1938_v9, %v1937_v60  ;;  %v1762_v9 = vadd.f32 %v2487_v53, %v2481_v50 }
 0x138   :  { %v1396_v10 = vadd.f32 %v2529_v11, %v1284_v5  ;;  %v1192_v12 = vadd.f32 %v1875_v6, %v2465_v30  ;;  %v1940_v28 = vpop.f32.mrf.mxu1  ;;  %v1820_v30 = vadd.f32 %v2479_v43, %v2473_v40 }
 0x139   :  { %v1877_v23 = vpop.f32.mrf.mxu0 }
 0x13a   :  { %v1412_v32 = vmax.f32 %v1396_v10, 0.0  ;;  %v1289_v24 = vadd.f32 %v1939_v8, %v1192_v12  ;;  %v1878_v25 = vadd.f32 %v1877_v23, %v1876_v7  ;;  %v1941_v26 = vpop.f32.mrf.mxu1  ;;  %v1106_v42 = vadd.f32 %v1820_v30, %v1756_v47 }
 0x13b   :  { %v1879_v27 = vpop.f32.mrf.mxu0  ;;  %v1942_v45 = vadd.f32 %v1941_v26, %v1940_v28  ;;  %v1768_v30 = vadd.f32 %v2497_v0, %v2491_v61 }
 0x13c   :  { %v1678_v33 = vpack.c.bf16 %v1412_v32, %v1411_v29  ;;  %v1195_v44 = vadd.f32 %v1878_v25, %v1098_v31  ;;  %v1943_v46 = vpop.f32.mrf.mxu1  ;;  %v1397_v49 = vadd.f32 %v2529_v11, %v1289_v24 }
 0x13d   :  { %v1880_v48 = vpop.f32.mrf.mxu0 }
 0x13e   :  { %1710 = vst [vmem:[%s2609_s3 + $0x8] sm:$0xff] %v1678_v33   ;;  %v1292_v55 = vadd.f32 %v1942_v45, %v1195_v44  ;;  %v1881_v17 = vadd.f32 %v1880_v48, %v1879_v27  ;;  %v1944_v20 = vpop.f32.mrf.mxu1  ;;  %v1413_v40 = vmax.f32 %v1397_v49, 0.0 }
 0x13f   :  { %v1882_v56 = vpop.f32.mrf.mxu0  ;;  %v1945_v57 = vadd.f32 %v1944_v20, %v1943_v46 }
 0x140   :  { %v1398_v18 = vadd.f32 %v2529_v11, %v1292_v55  ;;  %v1200_v21 = vadd.f32 %v1881_v17, %v2475_v41  ;;  %v1946_v39 = vpop.f32.mrf.mxu1  ;;  %v1826_v41 = vadd.f32 %v2489_v54, %v2483_v51 }
 0x141   :  { %v1883_v58 = vpop.f32.mrf.mxu0 }
 0x142   :  { %v1414_v43 = vmax.f32 %v1398_v18, 0.0  ;;  %v1297_v59 = vadd.f32 %v1945_v57, %v1200_v21  ;;  %v1884_v60 = vadd.f32 %v1883_v58, %v1882_v56  ;;  %v1947_v2 = vpop.f32.mrf.mxu1  ;;  %v1114_v53 = vadd.f32 %v1826_v41, %v1762_v9 }
 0x143   :  { %v1885_v19 = vpop.f32.mrf.mxu0  ;;  %v1948_v5 = vadd.f32 %v1947_v2, %v1946_v39 }
 0x144   :  { %v1683_v3 = vpack.c.bf16 %v1414_v43, %v1413_v40  ;;  %v1203_v4 = vadd.f32 %v1884_v60, %v1106_v42  ;;  %v1949_v6 = vpop.f32.mrf.mxu1  ;;  %v1399_v10 = vadd.f32 %v2529_v11, %v1297_v59 }
 0x145   :  { %v1886_v7 = vpop.f32.mrf.mxu0 }
 0x146   :  { %1711 = vst [vmem:[%s2609_s3 + $0x10] sm:$0xff] %v1683_v3   ;;  %v1300_v12 = vadd.f32 %v1948_v5, %v1203_v4  ;;  %v1887_v8 = vadd.f32 %v1886_v7, %v1885_v19  ;;  %v1950_v28 = vpop.f32.mrf.mxu1  ;;  %v1415_v51 = vmax.f32 %v1399_v10, 0.0  ;;  %v1774_v3 = vadd.f32 %v2507_v16, %v2501_v13 }
 0x147   :  { %v1888_v31 = vpop.f32.mrf.mxu0  ;;  %v1951_v32 = vadd.f32 %v1950_v28, %v1949_v6 }
 0x148   :  { %v1400_v23 = vadd.f32 %v2529_v11, %v1300_v12  ;;  %v1208_v29 = vadd.f32 %v1887_v8, %v2485_v52  ;;  %v1952_v50 = vpop.f32.mrf.mxu1  ;;  %v1832_v52 = vadd.f32 %v2499_v1, %v2493_v62 }
 0x149   :  { %v1889_v24 = vpop.f32.mrf.mxu0 }
 0x14a   :  { %v1416_v54 = vmax.f32 %v1400_v23, 0.0  ;;  %v1305_v25 = vadd.f32 %v1951_v32, %v1208_v29  ;;  %v1890_v26 = vadd.f32 %v1889_v24, %v1888_v31  ;;  %v1953_v27 = vpop.f32.mrf.mxu1  ;;  %v1122_v0 = vadd.f32 %v1832_v52, %v1768_v30 }
 0x14b   :  { %v1891_v33 = vpop.f32.mrf.mxu0  ;;  %v1954_v46 = vadd.f32 %v1953_v27, %v1952_v50 }
 0x14c   :  { %v1688_v44 = vpack.c.bf16 %v1416_v54, %v1415_v51  ;;  %v1211_v45 = vadd.f32 %v1890_v26, %v1114_v53  ;;  %v1955_v47 = vpop.f32.mrf.mxu1  ;;  %v1401_v49 = vadd.f32 %v2529_v11, %v1305_v25  ;;  %v1780_v54 = vadd.f32 %v2517_v37, %v2511_v34 }
 0x14d   :  { %v1892_v48 = vpop.f32.mrf.mxu0 }
 0x14e   :  { %1712 = vst [vmem:[%s2609_s3 + $0x18] sm:$0xff] %v1688_v44   ;;  %v1308_v55 = vadd.f32 %v1954_v46, %v1211_v45  ;;  %v1893_v17 = vadd.f32 %v1892_v48, %v1891_v33  ;;  %v1956_v20 = vpop.f32.mrf.mxu1  ;;  %v1417_v62 = vmax.f32 %v1401_v49, 0.0 }
 0x14f   :  { %v1894_v56 = vpop.f32.mrf.mxu0  ;;  %v1957_v57 = vadd.f32 %v1956_v20, %v1955_v47 }
 0x150   :  { %v1402_v18 = vadd.f32 %v2529_v11, %v1308_v55  ;;  %v1216_v21 = vadd.f32 %v1893_v17, %v2495_v63  ;;  %v1958_v61 = vpop.f32.mrf.mxu1  ;;  %v1838_v63 = vadd.f32 %v2509_v22, %v2503_v14 }
 0x151   :  { %v1895_v39 = vpop.f32.mrf.mxu0 }
 0x152   :  { %v1418_v1 = vmax.f32 %v1402_v18, 0.0  ;;  %v1313_v42 = vadd.f32 %v1957_v57, %v1216_v21  ;;  %v1896_v58 = vadd.f32 %v1895_v39, %v1894_v56  ;;  %v1959_v40 = vpop.f32.mrf.mxu1  ;;  %v1130_v16 = vadd.f32 %v1838_v63, %v1774_v3 }
 0x153   :  { %v1897_v43 = vpop.f32.mrf.mxu0  ;;  %v1960_v2 = vadd.f32 %v1959_v40, %v1958_v61 }
 0x154   :  { %v1693_v59 = vpack.c.bf16 %v1418_v1, %v1417_v62  ;;  %v1219_v60 = vadd.f32 %v1896_v58, %v1122_v0  ;;  %v1961_v19 = vpop.f32.mrf.mxu1  ;;  %v1403_v5 = vadd.f32 %v2529_v11, %v1313_v42 }
 0x155   :  { %v1898_v4 = vpop.f32.mrf.mxu0 }
 0x156   :  { %1713 = vst [vmem:[%s2609_s3 + $0x20] sm:$0xff] %v1693_v59   ;;  %v1316_v6 = vadd.f32 %v1960_v2, %v1219_v60  ;;  %v1899_v9 = vadd.f32 %v1898_v4, %v1897_v43  ;;  %v1962_v41 = vpop.f32.mrf.mxu1  ;;  %v1419_v14 = vmax.f32 %v1403_v5, 0.0 }
 0x157   :  { %v1900_v7 = vpop.f32.mrf.mxu0  ;;  %v1963_v8 = vadd.f32 %v1962_v41, %v1961_v19 }
 0x158   :  { %v1404_v10 = vadd.f32 %v2529_v11, %v1316_v6  ;;  %v1224_v12 = vadd.f32 %v1899_v9, %v2505_v15  ;;  %v1964_v13 = vpop.f32.mrf.mxu1  ;;  %v1844_v15 = vadd.f32 %v2519_v38, %v2513_v35 }
 0x159   :  { %v1901_v28 = vpop.f32.mrf.mxu0 }
 0x15a   :  { %v1420_v22 = vmax.f32 %v1404_v10, 0.0  ;;  %v1321_v31 = vadd.f32 %v1963_v8, %v1224_v12  ;;  %v1902_v23 = vadd.f32 %v1901_v28, %v1900_v7  ;;  %v1965_v29 = vpop.f32.mrf.mxu1  ;;  %v1138_v37 = vadd.f32 %v1844_v15, %v1780_v54 }
 0x15b   :  { %v1903_v32 = vpop.f32.mrf.mxu0  ;;  %v1966_v24 = vadd.f32 %v1965_v29, %v1964_v13 }
 0x15c   :  { %v1698_v50 = vpack.c.bf16 %v1420_v22, %v1419_v14  ;;  %v1227_v53 = vadd.f32 %v1902_v23, %v1130_v16  ;;  %v1967_v51 = vpop.f32.mrf.mxu1  ;;  %v1405_v26 = vadd.f32 %v2529_v11, %v1321_v31 }
 0x15d   :  { %v1904_v25 = vpop.f32.mrf.mxu0 }
 0x15e   :  { %1714 = vst [vmem:[%s2609_s3 + $0x28] sm:$0xff] %v1698_v50   ;;  %v1324_v27 = vadd.f32 %v1966_v24, %v1227_v53  ;;  %v1905_v33 = vadd.f32 %v1904_v25, %v1903_v32  ;;  %v1968_v44 = vpop.f32.mrf.mxu1  ;;  %v1421_v35 = vmax.f32 %v1405_v26, 0.0 }
 0x15f   :  { %v1906_v45 = vpop.f32.mrf.mxu0  ;;  %v1969_v30 = vadd.f32 %v1968_v44, %v1967_v51 }
 0x160   :  { %v1406_v46 = vadd.f32 %v2529_v11, %v1324_v27  ;;  %v1232_v47 = vadd.f32 %v1905_v33, %v2515_v36  ;;  %v1970_v34 = vpop.f32.mrf.mxu1 }
 0x161   :  { %v1907_v52 = vpop.f32.mrf.mxu0 }
 0x162   :  { %v1422_v38 = vmax.f32 %v1406_v46, 0.0  ;;  %v1329_v48 = vadd.f32 %v1969_v30, %v1232_v47  ;;  %v1908_v49 = vadd.f32 %v1907_v52, %v1906_v45  ;;  %v1971_v55 = vpop.f32.mrf.mxu1 }
 0x163   :  { %v1972_v56 = vadd.f32 %v1971_v55, %v1970_v34 }
 0x164   :  { %v1703_v17 = vpack.c.bf16 %v1422_v38, %v1421_v35  ;;  %v1235_v20 = vadd.f32 %v1908_v49, %v1138_v37  ;;  %v1407_v18 = vadd.f32 %v2529_v11, %v1329_v48 }
 0x166   :  { %1715 = vst [vmem:[%s2609_s3 + $0x30] sm:$0xff] %v1703_v17   ;;  %v1332_v21 = vadd.f32 %v1972_v56, %v1235_v20  ;;  %v1423_v57 = vmax.f32 %v1407_v18, 0.0 }
 0x168   :  { %v1408_v36 = vadd.f32 %v2529_v11, %v1332_v21 }
 0x16a   :  { %v1424_v61 = vmax.f32 %v1408_v36, 0.0 }
 0x16c   :  { %v1708_v0 = vpack.c.bf16 %v1424_v61, %v1423_v57 }
 0x16e   :  { %1716 = vst [vmem:[%s2609_s3 + $0x38] sm:$0xff] %v1708_v0  }

// kernel: vae_forward.13
= control target key start
LH: loop header
LB: loop body
LE: loop exit
PB: predicated region body
PF: predicated region fallthrough
CT: control target
= control target key end

     0   :  { %s2090_s12 = smov 0   ;;  %s2092_s13 = smov 0   ;;  %s2354_s0 = inlined_call_operand.vmem [shape: bf16[32,2048], index: 0, kind: input, shape index: {}]   ;;  %s2355_s1 = inlined_call_operand.vmem [shape: bf16[2048,256], index: 1, kind: input, shape index: {}]   ;;  %s2356_s2 = inlined_call_operand.vmem [shape: f32[1,256], index: 2, kind: input, shape index: {}]   ;;  %s2357_s3 = inlined_call_operand.vmem [shape: bf16[32,256], index: 3, kind: output, shape index: {}]  }
   0x1   :  { %s2094_s14 = smov 0   ;;  %s2096_s15 = smov 0  }
   0x2   :  { %s2098_s16 = smov 0  }
   0x3 LB: > { %s25_s17 = sadd.s32 1, %s2063_s15  ;;  %p48_p1 = scmp.ne.s32.totalorder %s2055_s13, %s2051_s12  ;;  %s2067_s16 = sphi %s2098_s16, %s13_s16   ;;  %s2063_s15 = sphi %s2096_s15, %s2361_s15   ;;  %s2059_s14 = sphi %s2094_s14, %s2360_s14   ;;  %s2055_s13 = sphi %s2092_s13, %s2359_s13   ;;  %s2051_s12 = sphi %s2090_s12, %s2358_s12  }
   0x4   : > { %p26_p0 = scmp.ge.s32.totalorder %s25_s17, 2  ;;  %p49_p2 = scmp.eq.s32.totalorder %s2067_s16, 0 }
   0x5   : > { %s41_s19 = sadd.s32 1, %s2055_s13  ;;  %p1627_p5 = scmp.ge.s32.totalorder %s2067_s16, 2 }
   0x6   : > { %s2363_s17 = smov (%p26_p0, %s25_s17), 0  ;;  %p50_p3 = por %p49_p2, %p48_p1 }
   0x7   : > { %s37_s18 = ssub.s32 %s2063_s15, %s2363_s17  ;;  %164 = sbr.rel (%p1627_p5) target bundleno = 24 (0x18), region = 20 }
   0x8   : > { %p39_p4 = scmp.eq.s32.totalorder %s37_s18, 0 }
   0xa   : > { %s2125_s20 = scalar_select %p39_p4, %s2055_s13, %s41_s19  }
   0xc   : > { %167 = sbr.rel (!%p50_p3) target bundleno = 24 (0x18), region = 24  ;;  %s169_s21 = sand.u32 (%p50_p3), 1, %s2055_s13  }
   0xd   : > { %s1790_s22 = sshll.u32 (%p50_p3), %s2063_s15, 5  ;;  %s1628_s23 = sshll.u32 (%p50_p3), %s169_s21, 7 }
   0xe   : > { %s2133_s26 = scalar_lea.vmem (%p50_p3), %s2354_s0, %s1790_s22  ;;  %s171_s27 = scalar_lea.vmem (%p50_p3), [#allocation3], %s1628_s23 }
   0xf   : > { %v190_v0 = vld [vmem:[%s2133_s26] sm:$0xff] (%p50_p3)  ;;  %v192_v1 = vld [vmem:[%s2133_s26 + $0x8] sm:$0xff] (%p50_p3)  ;;  %v194_v2 = vld [vmem:[%s2133_s26 + $0x10] sm:$0xff] (%p50_p3) }
  0x10   : > { %191 = vst [vmem:[%s171_s27] sm:$0xff] (%p50_p3), %v190_v0  ;;  %193 = vst [vmem:[%s171_s27 + $0x8] sm:$0xff] (%p50_p3), %v192_v1  ;;  %v196_v3 = vld [vmem:[%s2133_s26 + $0x18] sm:$0xff] (%p50_p3)  ;;  %v198_v4 = vld [vmem:[%s2133_s26 + $0x40] sm:$0xff] (%p50_p3) }
  0x11   : > { %195 = vst [vmem:[%s171_s27 + $0x10] sm:$0xff] %v194_v2  ;;  %v200_v5 = vld [vmem:[%s2133_s26 + $0x48] sm:$0xff]  ;;  %197 = vst [vmem:[%s171_s27 + $0x18] sm:$0xff] %v196_v3  ;;  %v202_v6 = vld [vmem:[%s2133_s26 + $0x50] sm:$0xff] }
  0x12   : > { %199 = vst [vmem:[%s171_s27 + $0x20] sm:$0xff] %v198_v4  ;;  %201 = vst [vmem:[%s171_s27 + $0x28] sm:$0xff] %v200_v5  ;;  %v204_v7 = vld [vmem:[%s2133_s26 + $0x58] sm:$0xff]  ;;  %v206_v8 = vld [vmem:[%s2133_s26 + $0x80] sm:$0xff] }
  0x13   : > { %203 = vst [vmem:[%s171_s27 + $0x30] sm:$0xff] %v202_v6  ;;  %205 = vst [vmem:[%s171_s27 + $0x38] sm:$0xff] %v204_v7  ;;  %v208_v9 = vld [vmem:[%s2133_s26 + $0x88] sm:$0xff]  ;;  %v210_v10 = vld [vmem:[%s2133_s26 + $0x90] sm:$0xff] }
  0x14   : > { %207 = vst [vmem:[%s171_s27 + $0x40] sm:$0xff] %v206_v8  ;;  %v212_v11 = vld [vmem:[%s2133_s26 + $0x98] sm:$0xff]  ;;  %209 = vst [vmem:[%s171_s27 + $0x48] sm:$0xff] %v208_v9  ;;  %v214_v12 = vld [vmem:[%s2133_s26 + $0xc0] sm:$0xff] }
  0x15   : > { %211 = vst [vmem:[%s171_s27 + $0x50] sm:$0xff] %v210_v10  ;;  %213 = vst [vmem:[%s171_s27 + $0x58] sm:$0xff] %v212_v11  ;;  %v216_v13 = vld [vmem:[%s2133_s26 + $0xc8] sm:$0xff]  ;;  %v218_v14 = vld [vmem:[%s2133_s26 + $0xd0] sm:$0xff] }
  0x16   : > { %215 = vst [vmem:[%s171_s27 + $0x60] sm:$0xff] %v214_v12  ;;  %217 = vst [vmem:[%s171_s27 + $0x68] sm:$0xff] %v216_v13  ;;  %v220_v15 = vld [vmem:[%s2133_s26 + $0xd8] sm:$0xff] }
  0x17   : > { %219 = vst [vmem:[%s171_s27 + $0x70] sm:$0xff] %v218_v14  ;;  %221 = vst [vmem:[%s171_s27 + $0x78] sm:$0xff] %v220_v15 }
  0x18 PF: > { %p1631_p6 = scmp.ge.s32.totalorder %s2067_s16, 1  ;;  %p241_p7 = scmp.lt.s32.totalorder %s2067_s16, 3 }
  0x1a   : > { %p242_p8 = pnand %p1631_p6, %p241_p7 }
  0x1b   : > { %s248_s28 = sand.u32 (!%p242_p8), 1, %s2051_s12   ;;  %s1633_s29 = sshll.u32 (!%p242_p8), %s2059_s14, 7 }
  0x1c   : > { %245 = sbr.rel (%p242_p8) target bundleno = 402 (0x192), region = 51  ;;  %s1632_s30 = sshll.u32 (!%p242_p8), %s248_s28, 7 }
  0x1d   : > { %p294_p9 = scmp.lt.s32.totalorder (!%p242_p8), %s1633_s29, 255  ;;  %s2160_s8 = scalar_lea.vmem (!%p242_p8), [#allocation3], %s1632_s30 }
  0x1e   : > { %p1636_p10 = scmp.ne.s32.totalorder (!%p242_p8), %s2059_s14, 0 }
  0x21   : > { %s2365_s29 = smov (!%p294_p9, %s1633_s29), 255  ;;  %324 = sbr.rel (%p1636_p10) target bundleno = 43 (0x2b), region = 59 }
  0x22   : > { %s1791_s4 = sshll.u32 %s2365_s29, 3 }
  0x23   : > { %s2158_s7 = scalar_lea.vmem %s2355_s1, %s1791_s4 }
  0x26   : > { %v2069_v16 = vmov 0.0  }
  0x27   : > { %325 = vst [vmem:[#allocation2 + $0x30] sm:$0xff] %v2069_v16  ;;  %326 = vst [vmem:[#allocation2] sm:$0xff] %v2069_v16 }
  0x28   : > { %327 = vst [vmem:[#allocation2 + $0x18] sm:$0xff] %v2069_v16  ;;  %328 = vst [vmem:[#allocation2 + $0x10] sm:$0xff] %v2069_v16 }
  0x29   : > { %329 = vst [vmem:[#allocation2 + $0x8] sm:$0xff] %v2069_v16  ;;  %330 = vst [vmem:[#allocation2 + $0x20] sm:$0xff] %v2069_v16 }
  0x2a   : > { %331 = vst [vmem:[#allocation2 + $0x28] sm:$0xff] %v2069_v16  ;;  %332 = vst [vmem:[#allocation2 + $0x38] sm:$0xff] %v2069_v16 }
  0x2b PF: > { %v1837_v17 = vld [vmem:[%s2158_s7 + $0x74] ss:$8 sps:$4 sm:$0xff]   ;;  %v1841_v19 = vld [vmem:[%s2158_s7 + $0x70] ss:$8 sps:$4 sm:$0xff]   ;;  %v1843_v21 = vld [vmem:[%s2158_s7 + $0x64] ss:$8 sps:$4 sm:$0xff]  }
  0x2c   : > { %v1839_v18 = vld [vmem:[%s2158_s7 + $0x174] ss:$8 sps:$4 sm:$0xff]   ;;  %1205 = vmatprep.subr.bf16.mxu0 %v1837_v17  ;;  %v1842_v20 = vld [vmem:[%s2158_s7 + $0x170] ss:$8 sps:$4 sm:$0xff]   ;;  %v1845_v22 = vld [vmem:[%s2158_s7 + $0x164] ss:$8 sps:$4 sm:$0xff]  }
  0x2d   : > { %1258 = vmatprep.subr.bf16.mxu1 %v1839_v18  ;;  %1206 = vmatpush1.bf16.msra.mxu0 %v1841_v19  ;;  %v1847_v23 = vld [vmem:[%s2158_s7 + $0x60] ss:$8 sps:$4 sm:$0xff]   ;;  %v1849_v25 = vld [vmem:[%s2158_s7 + $0x54] ss:$8 sps:$4 sm:$0xff]   ;;  %v1853_v27 = vld [vmem:[%s2158_s7 + $0x50] ss:$8 sps:$4 sm:$0xff]  }
  0x2e   : > { %1259 = vmatpush1.bf16.msra.mxu1 %v1842_v20  ;;  %1207 = vmatprep.subr.bf16.mxu0 %v1843_v21  ;;  %v1848_v24 = vld [vmem:[%s2158_s7 + $0x160] ss:$8 sps:$4 sm:$0xff]   ;;  %v1851_v26 = vld [vmem:[%s2158_s7 + $0x154] ss:$8 sps:$4 sm:$0xff]   ;;  %v1854_v28 = vld [vmem:[%s2158_s7 + $0x150] ss:$8 sps:$4 sm:$0xff]  }
  0x2f   : > { %1260 = vmatprep.subr.bf16.mxu1 %v1845_v22  ;;  %v1855_v29 = vld [vmem:[%s2158_s7 + $0x44] ss:$8 sps:$4 sm:$0xff]   ;;  %v1859_v31 = vld [vmem:[%s2158_s7 + $0x40] ss:$8 sps:$4 sm:$0xff]   ;;  %v1861_v33 = vld [vmem:[%s2158_s7 + $0x34] ss:$8 sps:$4 sm:$0xff]  }
  0x30   : > { %v1857_v30 = vld [vmem:[%s2158_s7 + $0x144] ss:$8 sps:$4 sm:$0xff]   ;;  %v1860_v32 = vld [vmem:[%s2158_s7 + $0x140] ss:$8 sps:$4 sm:$0xff]   ;;  %v1863_v34 = vld [vmem:[%s2158_s7 + $0x134] ss:$8 sps:$4 sm:$0xff]  }
  0x31   : > { %1208 = vmatpush1.bf16.msra.mxu0 %v1847_v23  ;;  %v1865_v35 = vld [vmem:[%s2158_s7 + $0x30] ss:$8 sps:$4 sm:$0xff]   ;;  %v1867_v37 = vld [vmem:[%s2158_s7 + $0x24] ss:$8 sps:$4 sm:$0xff]   ;;  %v1871_v39 = vld [vmem:[%s2158_s7 + $0x20] ss:$8 sps:$4 sm:$0xff]  }
  0x32   : > { %1261 = vmatpush1.bf16.msra.mxu1 %v1848_v24  ;;  %1209 = vmatprep.subr.bf16.mxu0 %v1849_v25  ;;  %v1866_v36 = vld [vmem:[%s2158_s7 + $0x130] ss:$8 sps:$4 sm:$0xff]   ;;  %v1869_v38 = vld [vmem:[%s2158_s7 + $0x124] ss:$8 sps:$4 sm:$0xff]   ;;  %v1872_v40 = vld [vmem:[%s2158_s7 + $0x120] ss:$8 sps:$4 sm:$0xff]  }
  0x33   : > { %1262 = vmatprep.subr.bf16.mxu1 %v1851_v26  ;;  %v1873_v41 = vld [vmem:[%s2158_s7 + $0x14] ss:$8 sps:$4 sm:$0xff]   ;;  %v1877_v43 = vld [vmem:[%s2158_s7 + $0x10] ss:$8 sps:$4 sm:$0xff]   ;;  %v1879_v45 = vld [vmem:[%s2158_s7 + $0x4] ss:$8 sps:$4 sm:$0xff]  }
  0x34   : > { %v1875_v42 = vld [vmem:[%s2158_s7 + $0x114] ss:$8 sps:$4 sm:$0xff]   ;;  %v1878_v44 = vld [vmem:[%s2158_s7 + $0x110] ss:$8 sps:$4 sm:$0xff]   ;;  %v1881_v46 = vld [vmem:[%s2158_s7 + $0x104] ss:$8 sps:$4 sm:$0xff]  }
  0x35   : > { %1210 = vmatpush1.bf16.msra.mxu0 %v1853_v27  ;;  %v1883_v47 = vld [vmem:[%s2158_s7] ss:$8 sps:$4 sm:$0xff]   ;;  %v1885_v49 = vld [vmem:[%s2158_s7 + $0xf4] ss:$8 sps:$4 sm:$0xff]   ;;  %v1889_v51 = vld [vmem:[%s2158_s7 + $0xf0] ss:$8 sps:$4 sm:$0xff]  }
  0x36   : > { %1263 = vmatpush1.bf16.msra.mxu1 %v1854_v28  ;;  %1211 = vmatprep.subr.bf16.mxu0 %v1855_v29  ;;  %v1884_v48 = vld [vmem:[%s2158_s7 + $0x100] ss:$8 sps:$4 sm:$0xff]   ;;  %v1887_v50 = vld [vmem:[%s2158_s7 + $0x1f4] ss:$8 sps:$4 sm:$0xff]   ;;  %v1890_v52 = vld [vmem:[%s2158_s7 + $0x1f0] ss:$8 sps:$4 sm:$0xff]  }
  0x37   : > { %1264 = vmatprep.subr.bf16.mxu1 %v1857_v30  ;;  %v1891_v53 = vld [vmem:[%s2158_s7 + $0xe4] ss:$8 sps:$4 sm:$0xff]   ;;  %v1895_v55 = vld [vmem:[%s2158_s7 + $0xe0] ss:$8 sps:$4 sm:$0xff]   ;;  %v1897_v57 = vld [vmem:[%s2158_s7 + $0xd4] ss:$8 sps:$4 sm:$0xff]  }
  0x38   : > { %v1893_v54 = vld [vmem:[%s2158_s7 + $0x1e4] ss:$8 sps:$4 sm:$0xff]   ;;  %v1896_v56 = vld [vmem:[%s2158_s7 + $0x1e0] ss:$8 sps:$4 sm:$0xff]   ;;  %v1899_v58 = vld [vmem:[%s2158_s7 + $0x1d4] ss:$8 sps:$4 sm:$0xff]  }
  0x39   : > { %1212 = vmatpush1.bf16.msra.mxu0 %v1859_v31  ;;  %v1901_v59 = vld [vmem:[%s2158_s7 + $0xd0] ss:$8 sps:$4 sm:$0xff]   ;;  %v1903_v61 = vld [vmem:[%s2158_s7 + $0xc4] ss:$8 sps:$4 sm:$0xff]   ;;  %v1907_v63 = vld [vmem:[%s2158_s7 + $0xc0] ss:$8 sps:$4 sm:$0xff]  }
  0x3a   : > { %1265 = vmatpush1.bf16.msra.mxu1 %v1860_v32  ;;  %1213 = vmatprep.subr.bf16.mxu0 %v1861_v33  ;;  %v1902_v60 = vld [vmem:[%s2158_s7 + $0x1d0] ss:$8 sps:$4 sm:$0xff]   ;;  %v1905_v62 = vld [vmem:[%s2158_s7 + $0x1c4] ss:$8 sps:$4 sm:$0xff]   ;;  %v1908_v0 = vld [vmem:[%s2158_s7 + $0x1c0] ss:$8 sps:$4 sm:$0xff]  }
  0x3b   : > { %1266 = vmatprep.subr.bf16.mxu1 %v1863_v34  ;;  %v341_v1 = vld [vmem:[%s2160_s8] sm:$0xff]  ;;  %v342_v3 = vld [vmem:[%s2160_s8 + $0x8] sm:$0xff]  ;;  %v1909_v5 = vld [vmem:[%s2158_s7 + $0xb4] ss:$8 sps:$4 sm:$0xff]   ;;  %p1781_p11 = scmp.ne.s32.totalorder %s2059_s14, 1 }
  0x3c   : > { %v345_v2 = vld [vmem:[%s2160_s8 + $0x20] sm:$0xff]  ;;  %v346_v4 = vld [vmem:[%s2160_s8 + $0x28] sm:$0xff]  ;;  %v1911_v7 = vld [vmem:[%s2158_s7 + $0x1b4] ss:$8 sps:$4 sm:$0xff]  }
  0x3d   : > { %1214 = vmatpush1.bf16.msra.mxu0 %v1865_v35  ;;  %v1638_v6 = vcombine.high %v341_v1, %v345_v2  ;;  %v1640_v8 = vcombine.high %v342_v3, %v346_v4  ;;  %v1913_v9 = vld [vmem:[%s2158_s7 + $0xb0] ss:$8 sps:$4 sm:$0xff]   ;;  %v1915_v11 = vld [vmem:[%s2158_s7 + $0xa4] ss:$8 sps:$4 sm:$0xff]   ;;  %v1919_v13 = vld [vmem:[%s2158_s7 + $0xa0] ss:$8 sps:$4 sm:$0xff]   ;;  %v1637_v25 = vcombine.low %v341_v1, %v345_v2  ;;  %v1639_v26 = vcombine.low %v342_v3, %v346_v4 }
  0x3e   : > { %1267 = vmatpush1.bf16.msra.mxu1 %v1866_v36  ;;  %1215 = vmatprep.subr.bf16.mxu0 %v1867_v37  ;;  %v1914_v10 = vld [vmem:[%s2158_s7 + $0x1b0] ss:$8 sps:$4 sm:$0xff]   ;;  %v1917_v12 = vld [vmem:[%s2158_s7 + $0x1a4] ss:$8 sps:$4 sm:$0xff]   ;;  %v1920_v14 = vld [vmem:[%s2158_s7 + $0x1a0] ss:$8 sps:$4 sm:$0xff]  }
  0x3f   : > { %1268 = vmatprep.subr.bf16.mxu1 %v1869_v38  ;;  %1237 = vmatprep.mubr.bf16.mxu0 %v1638_v6  ;;  %v1921_v15 = vld [vmem:[%s2158_s7 + $0x94] ss:$8 sps:$4 sm:$0xff]   ;;  %v1925_v17 = vld [vmem:[%s2158_s7 + $0x90] ss:$8 sps:$4 sm:$0xff]   ;;  %v1927_v19 = vld [vmem:[%s2158_s7 + $0x84] ss:$8 sps:$4 sm:$0xff]  }
  0x40   : > { %1290 = vmatprep.mubr.bf16.mxu1 %v1640_v8  ;;  %v1923_v16 = vld [vmem:[%s2158_s7 + $0x194] ss:$8 sps:$4 sm:$0xff]   ;;  %v1926_v18 = vld [vmem:[%s2158_s7 + $0x190] ss:$8 sps:$4 sm:$0xff]   ;;  %v1929_v20 = vld [vmem:[%s2158_s7 + $0x184] ss:$8 sps:$4 sm:$0xff]  }
  0x41   : > { %1216 = vmatpush1.bf16.msra.mxu0 %v1871_v39  ;;  %v1931_v21 = vld [vmem:[%s2158_s7 + $0x80] ss:$8 sps:$4 sm:$0xff]   ;;  %v1935_v23 = vld [vmem:[%s2158_s7 + $0x274] ss:$8 sps:$4 sm:$0xff]   ;;  %v1933_v27 = vld [vmem:[%s2158_s7 + $0x270] ss:$8 sps:$4 sm:$0xff]  }
  0x42   : > { %1269 = vmatpush1.bf16.msra.mxu1 %v1872_v40  ;;  %1217 = vmatprep.subr.bf16.mxu0 %v1873_v41  ;;  %v1932_v22 = vld [vmem:[%s2158_s7 + $0x180] ss:$8 sps:$4 sm:$0xff]   ;;  %v1938_v24 = vld [vmem:[%s2158_s7 + $0x374] ss:$8 sps:$4 sm:$0xff]   ;;  %v1936_v28 = vld [vmem:[%s2158_s7 + $0x370] ss:$8 sps:$4 sm:$0xff]  }
  0x43   : > { %1270 = vmatprep.subr.bf16.mxu1 %v1875_v42  ;;  %v1941_v29 = vld [vmem:[%s2158_s7 + $0x264] ss:$8 sps:$4 sm:$0xff]   ;;  %v1939_v31 = vld [vmem:[%s2158_s7 + $0x260] ss:$8 sps:$4 sm:$0xff]   ;;  %v1947_v33 = vld [vmem:[%s2158_s7 + $0x254] ss:$8 sps:$4 sm:$0xff]  }
  0x44   : > { %v1944_v30 = vld [vmem:[%s2158_s7 + $0x364] ss:$8 sps:$4 sm:$0xff]   ;;  %v1942_v32 = vld [vmem:[%s2158_s7 + $0x360] ss:$8 sps:$4 sm:$0xff]   ;;  %v1950_v34 = vld [vmem:[%s2158_s7 + $0x354] ss:$8 sps:$4 sm:$0xff]  }
  0x45   : > { %1218 = vmatpush1.bf16.msra.mxu0 %v1877_v43  ;;  %v1945_v35 = vld [vmem:[%s2158_s7 + $0x250] ss:$8 sps:$4 sm:$0xff]   ;;  %v1953_v37 = vld [vmem:[%s2158_s7 + $0x244] ss:$8 sps:$4 sm:$0xff]   ;;  %v1951_v39 = vld [vmem:[%s2158_s7 + $0x240] ss:$8 sps:$4 sm:$0xff]  }
  0x46   : > { %1271 = vmatpush1.bf16.msra.mxu1 %v1878_v44  ;;  %1219 = vmatprep.subr.bf16.mxu0 %v1879_v45  ;;  %v1948_v36 = vld [vmem:[%s2158_s7 + $0x350] ss:$8 sps:$4 sm:$0xff]   ;;  %v1956_v38 = vld [vmem:[%s2158_s7 + $0x344] ss:$8 sps:$4 sm:$0xff]   ;;  %v1954_v40 = vld [vmem:[%s2158_s7 + $0x340] ss:$8 sps:$4 sm:$0xff]  }
  0x47   : > { %1272 = vmatprep.subr.bf16.mxu1 %v1881_v46  ;;  %v1959_v41 = vld [vmem:[%s2158_s7 + $0x234] ss:$8 sps:$4 sm:$0xff]   ;;  %v1957_v43 = vld [vmem:[%s2158_s7 + $0x230] ss:$8 sps:$4 sm:$0xff]   ;;  %v349_v45 = vld [vmem:[%s2160_s8 + $0x40] sm:$0xff] }
  0x48   : > { %v1962_v42 = vld [vmem:[%s2158_s7 + $0x334] ss:$8 sps:$4 sm:$0xff]   ;;  %v1960_v44 = vld [vmem:[%s2158_s7 + $0x330] ss:$8 sps:$4 sm:$0xff]   ;;  %v353_v46 = vld [vmem:[%s2160_s8 + $0x60] sm:$0xff] }
  0x49   : > { %1220 = vmatpush1.bf16.msra.mxu0 %v1883_v47  ;;  %v350_v47 = vld [vmem:[%s2160_s8 + $0x48] sm:$0xff]  ;;  %v2277_v3 = vld [vmem:[%s2160_s8 + $0x38] sm:$0xff] }
  0x4a   : > { %1273 = vmatpush1.bf16.msra.mxu1 %v1884_v48  ;;  %1221 = vmatprep.subr.bf16.mxu0 %v1885_v49  ;;  %v354_v48 = vld [vmem:[%s2160_s8 + $0x68] sm:$0xff]  ;;  %v1986_v8 = vld [vmem:[%s2158_s7 + $0x3f4] ss:$8 sps:$4 sm:$0xff]  }
  0x4b   : > { %1274 = vmatprep.subr.bf16.mxu1 %v1887_v50  ;;  %v1965_v49 = vld [vmem:[%s2158_s7 + $0x224] ss:$8 sps:$4 sm:$0xff]   ;;  %v1646_v50 = vcombine.high %v349_v45, %v353_v46  ;;  %v1978_v6 = vld [vmem:[%s2158_s7 + $0x300] ss:$8 sps:$4 sm:$0xff]  }
  0x4c   : > { %v1980_v1 = vld [vmem:[%s2158_s7 + $0x304] ss:$8 sps:$4 sm:$0xff]  }
  0x4d   : > { %1222 = vmatpush2.bf16.msra.mxu0 %v1889_v51  ;;  %v1648_v51 = vcombine.high %v350_v47, %v354_v48 }
  0x4e   : > { %1275 = vmatpush2.bf16.msra.mxu1 %v1890_v52  ;;  %1223 = vmatprep.subr.bf16.mxu0 %v1891_v53  ;;  %v1645_v52 = vcombine.low %v349_v45, %v353_v46  ;;  %v1968_v53 = vld [vmem:[%s2158_s7 + $0x324] ss:$8 sps:$4 sm:$0xff]  }
  0x4f   : > { %1276 = vmatprep.subr.bf16.mxu1 %v1893_v54  ;;  %v1647_v54 = vcombine.low %v350_v47, %v354_v48 }
  0x51   : > { %1224 = vmatpush2.bf16.msra.mxu0 %v1895_v55  ;;  %v1963_v55 = vld [vmem:[%s2158_s7 + $0x220] ss:$8 sps:$4 sm:$0xff]  }
  0x52   : > { %1277 = vmatpush2.bf16.msra.mxu1 %v1896_v56  ;;  %1225 = vmatprep.subr.bf16.mxu0 %v1897_v57  ;;  %v1966_v56 = vld [vmem:[%s2158_s7 + $0x320] ss:$8 sps:$4 sm:$0xff]   ;;  %v1971_v57 = vld [vmem:[%s2158_s7 + $0x214] ss:$8 sps:$4 sm:$0xff]  }
  0x53   : > { %1278 = vmatprep.subr.bf16.mxu1 %v1899_v58  ;;  %v1974_v58 = vld [vmem:[%s2158_s7 + $0x314] ss:$8 sps:$4 sm:$0xff]  }
  0x55   : > { %1226 = vmatpush2.bf16.msra.mxu0 %v1901_v59  ;;  %v1969_v59 = vld [vmem:[%s2158_s7 + $0x210] ss:$8 sps:$4 sm:$0xff]  }
  0x56   : > { %1279 = vmatpush2.bf16.msra.mxu1 %v1902_v60  ;;  %1227 = vmatprep.subr.bf16.mxu0 %v1903_v61  ;;  %v1972_v60 = vld [vmem:[%s2158_s7 + $0x310] ss:$8 sps:$4 sm:$0xff]  }
  0x57   : > { %1280 = vmatprep.subr.bf16.mxu1 %v1905_v62  ;;  %v2264_v61 = vld [vmem:[%s2160_s8 + $0x10] sm:$0xff] }
  0x58   : > { %v2267_v62 = vld [vmem:[%s2160_s8 + $0x30] sm:$0xff] }
  0x59   : > { %1228 = vmatpush2.bf16.msra.mxu0 %v1907_v63  ;;  %v2270_v63 = vld [vmem:[%s2160_s8 + $0x18] sm:$0xff]  ;;  %v1642_v2 = vcombine.high %v2264_v61, %v2267_v62 }
  0x5a   : > { %1281 = vmatpush2.bf16.msra.mxu1 %v1908_v0  ;;  %1229 = vmatprep.subr.bf16.mxu0 %v1909_v5  ;;  %v1977_v0 = vld [vmem:[%s2158_s7 + $0x204] ss:$8 sps:$4 sm:$0xff]   ;;  %v1644_v4 = vcombine.high %v2270_v63, %v2277_v3  ;;  %v1975_v5 = vld [vmem:[%s2158_s7 + $0x200] ss:$8 sps:$4 sm:$0xff]  }
  0x5b   : > { %1282 = vmatprep.subr.bf16.mxu1 %v1911_v7  ;;  %v1983_v7 = vld [vmem:[%s2158_s7 + $0x2f4] ss:$8 sps:$4 sm:$0xff]  }
  0x5d   : > { %1230 = vmatpush2.bf16.msra.mxu0 %v1913_v9  ;;  %v1981_v9 = vld [vmem:[%s2158_s7 + $0x2f0] ss:$8 sps:$4 sm:$0xff]  }
  0x5e   : > { %1283 = vmatpush2.bf16.msra.mxu1 %v1914_v10  ;;  %1231 = vmatprep.subr.bf16.mxu0 %v1915_v11  ;;  %v1984_v10 = vld [vmem:[%s2158_s7 + $0x3f0] ss:$8 sps:$4 sm:$0xff]   ;;  %v1989_v11 = vld [vmem:[%s2158_s7 + $0x2e4] ss:$8 sps:$4 sm:$0xff]  }
  0x5f   : > { %1284 = vmatprep.subr.bf16.mxu1 %v1917_v12  ;;  %v1992_v12 = vld [vmem:[%s2158_s7 + $0x3e4] ss:$8 sps:$4 sm:$0xff]  }
  0x61   : > { %1232 = vmatpush2.bf16.msra.mxu0 %v1919_v13  ;;  %v1987_v13 = vld [vmem:[%s2158_s7 + $0x2e0] ss:$8 sps:$4 sm:$0xff]  }
  0x62   : > { %1285 = vmatpush2.bf16.msra.mxu1 %v1920_v14  ;;  %1233 = vmatprep.subr.bf16.mxu0 %v1921_v15  ;;  %v1990_v14 = vld [vmem:[%s2158_s7 + $0x3e0] ss:$8 sps:$4 sm:$0xff]   ;;  %v1995_v15 = vld [vmem:[%s2158_s7 + $0x2d4] ss:$8 sps:$4 sm:$0xff]  }
  0x63   : > { %1286 = vmatprep.subr.bf16.mxu1 %v1923_v16  ;;  %v1998_v16 = vld [vmem:[%s2158_s7 + $0x3d4] ss:$8 sps:$4 sm:$0xff]  }
  0x65   : > { %1234 = vmatpush2.bf16.msra.mxu0 %v1925_v17  ;;  %v1993_v17 = vld [vmem:[%s2158_s7 + $0x2d0] ss:$8 sps:$4 sm:$0xff]  }
  0x66   : > { %1287 = vmatpush2.bf16.msra.mxu1 %v1926_v18  ;;  %1235 = vmatprep.subr.bf16.mxu0 %v1927_v19  ;;  %v1996_v18 = vld [vmem:[%s2158_s7 + $0x3d0] ss:$8 sps:$4 sm:$0xff]   ;;  %v2001_v19 = vld [vmem:[%s2158_s7 + $0x2c4] ss:$8 sps:$4 sm:$0xff]  }
  0x67   : > { %1288 = vmatprep.subr.bf16.mxu1 %v1929_v20  ;;  %v2004_v20 = vld [vmem:[%s2158_s7 + $0x3c4] ss:$8 sps:$4 sm:$0xff]  }
  0x69   : > { %1236 = vmatpush2.bf16.msra.mxu0 %v1931_v21  ;;  %v1999_v21 = vld [vmem:[%s2158_s7 + $0x2c0] ss:$8 sps:$4 sm:$0xff]  }
  0x6a   : > { %1289 = vmatpush2.bf16.msra.mxu1 %v1932_v22  ;;  %1311 = vmatprep.subr.bf16.mxu0 %v1935_v23  ;;  %v2002_v22 = vld [vmem:[%s2158_s7 + $0x3c0] ss:$8 sps:$4 sm:$0xff]   ;;  %v2007_v23 = vld [vmem:[%s2158_s7 + $0x2b4] ss:$8 sps:$4 sm:$0xff]  }
  0x6b   : > { %1364 = vmatprep.subr.bf16.mxu1 %v1938_v24  ;;  %v2010_v24 = vld [vmem:[%s2158_s7 + $0x3b4] ss:$8 sps:$4 sm:$0xff]  }
  0x6c   : > { %1238 = vmatmul.mubr.bf16.vlgmr.msra.gmra.mxu0 %v1637_v25  ;;  %v2005_v25 = vld [vmem:[%s2158_s7 + $0x2b0] ss:$8 sps:$4 sm:$0xff]  }
  0x6d   : > { %1291 = vmatmul.mubr.bf16.vlgmr.msra.gmra.mxu1 %v1639_v26  ;;  %1312 = vmatpush1.bf16.msra.mxu0 %v1933_v27  ;;  %v2008_v26 = vld [vmem:[%s2158_s7 + $0x3b0] ss:$8 sps:$4 sm:$0xff]   ;;  %v2013_v27 = vld [vmem:[%s2158_s7 + $0x2a4] ss:$8 sps:$4 sm:$0xff]  }
  0x6e   : > { %1365 = vmatpush1.bf16.msra.mxu1 %v1936_v28  ;;  %1313 = vmatprep.subr.bf16.mxu0 %v1941_v29  ;;  %v2016_v28 = vld [vmem:[%s2158_s7 + $0x3a4] ss:$8 sps:$4 sm:$0xff]   ;;  %v2011_v29 = vld [vmem:[%s2158_s7 + $0x2a0] ss:$8 sps:$4 sm:$0xff]  }
  0x6f   : > { %1366 = vmatprep.subr.bf16.mxu1 %v1944_v30  ;;  %1247 = vmatprep.mubr.bf16.mxu0 %v1646_v50  ;;  %v2014_v30 = vld [vmem:[%s2158_s7 + $0x3a0] ss:$8 sps:$4 sm:$0xff]  }
  0x70   : > { %1300 = vmatprep.mubr.bf16.mxu1 %v1648_v51 }
  0x71   : > { %1314 = vmatpush1.bf16.msra.mxu0 %v1939_v31  ;;  %v2019_v31 = vld [vmem:[%s2158_s7 + $0x294] ss:$8 sps:$4 sm:$0xff]  }
  0x72   : > { %1367 = vmatpush1.bf16.msra.mxu1 %v1942_v32  ;;  %1315 = vmatprep.subr.bf16.mxu0 %v1947_v33  ;;  %v2022_v32 = vld [vmem:[%s2158_s7 + $0x394] ss:$8 sps:$4 sm:$0xff]   ;;  %v2017_v33 = vld [vmem:[%s2158_s7 + $0x290] ss:$8 sps:$4 sm:$0xff]  }
  0x73   : > { %1368 = vmatprep.subr.bf16.mxu1 %v1950_v34  ;;  %v2020_v34 = vld [vmem:[%s2158_s7 + $0x390] ss:$8 sps:$4 sm:$0xff]  }
  0x74   : > { %1248 = vmatmul.mubr.bf16.gmra.mxu0 %v1645_v52 }
  0x75   : > { %1316 = vmatpush1.bf16.msra.mxu0 %v1945_v35  ;;  %1301 = vmatmul.mubr.bf16.gmra.mxu1 %v1647_v54  ;;  %v2025_v35 = vld [vmem:[%s2158_s7 + $0x284] ss:$8 sps:$4 sm:$0xff]  }
  0x76   : > { %1369 = vmatpush1.bf16.msra.mxu1 %v1948_v36  ;;  %1317 = vmatprep.subr.bf16.mxu0 %v1953_v37  ;;  %v2028_v36 = vld [vmem:[%s2158_s7 + $0x384] ss:$8 sps:$4 sm:$0xff]   ;;  %v2023_v37 = vld [vmem:[%s2158_s7 + $0x280] ss:$8 sps:$4 sm:$0xff]  }
  0x77   : > { %1370 = vmatprep.subr.bf16.mxu1 %v1956_v38  ;;  %1343 = vmatprep.mubr.bf16.mxu0 %v1642_v2  ;;  %v2026_v38 = vld [vmem:[%s2158_s7 + $0x380] ss:$8 sps:$4 sm:$0xff]  }
  0x78   : > { %1396 = vmatprep.mubr.bf16.mxu1 %v1644_v4 }
  0x79   : > { %1318 = vmatpush1.bf16.msra.mxu0 %v1951_v39  ;;  %v351_v39 = vld [vmem:[%s2160_s8 + $0x50] sm:$0xff] }
  0x7a   : > { %1371 = vmatpush1.bf16.msra.mxu1 %v1954_v40  ;;  %1319 = vmatprep.subr.bf16.mxu0 %v1959_v41  ;;  %v355_v40 = vld [vmem:[%s2160_s8 + $0x70] sm:$0xff]  ;;  %v352_v41 = vld [vmem:[%s2160_s8 + $0x58] sm:$0xff] }
  0x7b   : > { %1372 = vmatprep.subr.bf16.mxu1 %v1962_v42  ;;  %v356_v42 = vld [vmem:[%s2160_s8 + $0x78] sm:$0xff]  ;;  %v1650_v45 = vcombine.high %v351_v39, %v355_v40  ;;  %v1649_v47 = vcombine.low %v351_v39, %v355_v40  ;;  %v338_v40 = vld [vmem:[#allocation2 + $0x20] sm:$0xff] }
  0x7c   : > { %v1652_v46 = vcombine.high %v352_v41, %v356_v42  ;;  %v1651_v48 = vcombine.low %v352_v41, %v356_v42 }
  0x7d   : > { %1320 = vmatpush1.bf16.msra.mxu0 %v1957_v43  ;;  %v1641_v43 = vcombine.low %v2264_v61, %v2267_v62 }
  0x7e   : > { %1373 = vmatpush1.bf16.msra.mxu1 %v1960_v44  ;;  %1321 = vmatprep.subr.bf16.mxu0 %v1965_v49  ;;  %v1643_v44 = vcombine.low %v2270_v63, %v2277_v3 }
  0x7f   : > { %1374 = vmatprep.subr.bf16.mxu1 %v1968_v53 }
  0x81   : > { %1322 = vmatpush1.bf16.msra.mxu0 %v1963_v55 }
  0x82   : > { %1375 = vmatpush1.bf16.msra.mxu1 %v1966_v56  ;;  %1323 = vmatprep.subr.bf16.mxu0 %v1971_v57 }
  0x83   : > { %1376 = vmatprep.subr.bf16.mxu1 %v1974_v58 }
  0x85   : > { %1324 = vmatpush1.bf16.msra.mxu0 %v1969_v59 }
  0x86   : > { %1377 = vmatpush1.bf16.msra.mxu1 %v1972_v60  ;;  %1325 = vmatprep.subr.bf16.mxu0 %v1977_v0 }
  0x87   : > { %1378 = vmatprep.subr.bf16.mxu1 %v1980_v1 }
  0x89   : > { %1326 = vmatpush1.bf16.msra.mxu0 %v1975_v5 }
  0x8a   : > { %1379 = vmatpush1.bf16.msra.mxu1 %v1978_v6  ;;  %1327 = vmatprep.subr.bf16.mxu0 %v1983_v7  ;;  %v333_v6 = vld [vmem:[#allocation2 + $0x30] sm:$0xff] }
  0x8b   : > { %1380 = vmatprep.subr.bf16.mxu1 %v1986_v8 }
  0x8d   : > { %1328 = vmatpush2.bf16.msra.mxu0 %v1981_v9 }
  0x8e   : > { %1381 = vmatpush2.bf16.msra.mxu1 %v1984_v10  ;;  %1329 = vmatprep.subr.bf16.mxu0 %v1989_v11 }
  0x8f   : > { %1382 = vmatprep.subr.bf16.mxu1 %v1992_v12  ;;  %v334_v12 = vld [vmem:[#allocation2] sm:$0xff] }
  0x91   : > { %1330 = vmatpush2.bf16.msra.mxu0 %v1987_v13 }
  0x92   : > { %1383 = vmatpush2.bf16.msra.mxu1 %v1990_v14  ;;  %1331 = vmatprep.subr.bf16.mxu0 %v1995_v15 }
  0x93   : > { %1384 = vmatprep.subr.bf16.mxu1 %v1998_v16 }
  0x95   : > { %1332 = vmatpush2.bf16.msra.mxu0 %v1993_v17 }
  0x96   : > { %1385 = vmatpush2.bf16.msra.mxu1 %v1996_v18  ;;  %1333 = vmatprep.subr.bf16.mxu0 %v2001_v19  ;;  %v335_v19 = vld [vmem:[#allocation2 + $0x18] sm:$0xff] }
  0x97   : > { %1386 = vmatprep.subr.bf16.mxu1 %v2004_v20 }
  0x99   : > { %1334 = vmatpush2.bf16.msra.mxu0 %v1999_v21 }
  0x9a   : > { %1387 = vmatpush2.bf16.msra.mxu1 %v2002_v22  ;;  %1335 = vmatprep.subr.bf16.mxu0 %v2007_v23 }
  0x9b   : > { %1388 = vmatprep.subr.bf16.mxu1 %v2010_v24 }
  0x9d   : > { %1336 = vmatpush2.bf16.msra.mxu0 %v2005_v25 }
  0x9e   : > { %1389 = vmatpush2.bf16.msra.mxu1 %v2008_v26  ;;  %1337 = vmatprep.subr.bf16.mxu0 %v2013_v27  ;;  %v336_v26 = vld [vmem:[#allocation2 + $0x10] sm:$0xff] }
  0x9f   : > { %1390 = vmatprep.subr.bf16.mxu1 %v2016_v28 }
  0xa1   : > { %1338 = vmatpush2.bf16.msra.mxu0 %v2011_v29 }
  0xa2   : > { %1391 = vmatpush2.bf16.msra.mxu1 %v2014_v30  ;;  %1339 = vmatprep.subr.bf16.mxu0 %v2019_v31 }
  0xa3   : > { %1392 = vmatprep.subr.bf16.mxu1 %v2022_v32 }
  0xa5   : > { %1340 = vmatpush2.bf16.msra.mxu0 %v2017_v33  ;;  %v337_v33 = vld [vmem:[#allocation2 + $0x8] sm:$0xff] }
  0xa6   : > { %1393 = vmatpush2.bf16.msra.mxu1 %v2020_v34  ;;  %1341 = vmatprep.subr.bf16.mxu0 %v2025_v35 }
  0xa7   : > { %1394 = vmatprep.subr.bf16.mxu1 %v2028_v36 }
  0xa9   : > { %1342 = vmatpush2.bf16.msra.mxu0 %v2023_v37 }
  0xaa   : > { %1395 = vmatpush2.bf16.msra.mxu1 %v2026_v38 }
  0xac   : > { %1344 = vmatmul.mubr.bf16.vlgmr.msra.gmra.mxu0 %v1641_v43 }
  0xad   : > { %1397 = vmatmul.mubr.bf16.vlgmr.msra.gmra.mxu1 %v1643_v44  ;;  %1353 = vmatprep.mubr.bf16.mxu0 %v1650_v45 }
  0xae   : > { %1406 = vmatprep.mubr.bf16.mxu1 %v1652_v46 }
  0xb4   : > { %1354 = vmatmul.mubr.bf16.gmra.mxu0 %v1649_v47  ;;  %v339_v47 = vld [vmem:[#allocation2 + $0x28] sm:$0xff] }
  0xb5   : > { %1407 = vmatmul.mubr.bf16.gmra.mxu1 %v1651_v48 }
 0x12c   : > { %v1239_v49 = vpop.f32.mrf.mxu0 }
 0x12d   : > { %v1292_v50 = vpop.f32.mrf.mxu1 }
 0x12e   : > { %v1241_v51 = vpop.f32.mrf.mxu0  ;;  %v1293_v1 = vadd.f32 %v1292_v50, %v1239_v49 }
 0x12f   : > { %v1294_v52 = vpop.f32.mrf.mxu1 }
 0x130   : > { %v1243_v53 = vpop.f32.mrf.mxu0  ;;  %v1295_v4 = vadd.f32 %v1294_v52, %v1241_v51  ;;  %v340_v52 = vld [vmem:[#allocation2 + $0x38] sm:$0xff] }
 0x131   : > { %v1296_v54 = vpop.f32.mrf.mxu1 }
 0x132   : > { %v1245_v55 = vpop.f32.mrf.mxu0  ;;  %v1297_v9 = vadd.f32 %v1296_v54, %v1243_v53 }
 0x133   : > { %v1298_v56 = vpop.f32.mrf.mxu1 }
 0x134   : > { %v1249_v57 = vpop.f32.mrf.mxu0  ;;  %v1299_v15 = vadd.f32 %v1298_v56, %v1245_v55 }
 0x135   : > { %v1302_v58 = vpop.f32.mrf.mxu1 }
 0x136   : > { %v1251_v59 = vpop.f32.mrf.mxu0  ;;  %v1303_v22 = vadd.f32 %v1302_v58, %v1249_v57 }
 0x137   : > { %v1304_v60 = vpop.f32.mrf.mxu1 }
 0x138   : > { %v1253_v61 = vpop.f32.mrf.mxu0  ;;  %v1305_v29 = vadd.f32 %v1304_v60, %v1251_v59 }
 0x139   : > { %v1306_v62 = vpop.f32.mrf.mxu1 }
 0x13a   : > { %v1255_v63 = vpop.f32.mrf.mxu0  ;;  %v1307_v36 = vadd.f32 %v1306_v62, %v1253_v61 }
 0x13b   : > { %v1308_v0 = vpop.f32.mrf.mxu1 }
 0x13c   : > { %v1309_v43 = vadd.f32 %v1308_v0, %v1255_v63 }
 0x16c   : > { %v1345_v2 = vpop.f32.mrf.mxu0 }
 0x16d   : > { %v1398_v3 = vpop.f32.mrf.mxu1  ;;  %v1346_v5 = vadd.f32 %v1345_v2, %v1293_v1 }
 0x16e   : > { %v1347_v7 = vpop.f32.mrf.mxu0 }
 0x16f   : > { %v1400_v8 = vpop.f32.mrf.mxu1  ;;  %v1399_v10 = vadd.f32 %v1398_v3, %v1346_v5  ;;  %v1348_v11 = vadd.f32 %v1347_v7, %v1295_v4 }
 0x170   : > { %v1349_v13 = vpop.f32.mrf.mxu0 }
 0x171   : > { %v1402_v14 = vpop.f32.mrf.mxu1  ;;  %v1417_v16 = vadd.f32 %v1399_v10, %v333_v6  ;;  %v1401_v17 = vadd.f32 %v1400_v8, %v1348_v11  ;;  %v1350_v18 = vadd.f32 %v1349_v13, %v1297_v9 }
 0x172   : > { %v1351_v20 = vpop.f32.mrf.mxu0 }
 0x173   : > { %v1404_v21 = vpop.f32.mrf.mxu1  ;;  %1425 = vst [vmem:[#allocation2 + $0x30] sm:$0xff] %v1417_v16  ;;  %v1418_v23 = vadd.f32 %v1401_v17, %v334_v12  ;;  %v1403_v24 = vadd.f32 %v1402_v14, %v1350_v18  ;;  %v1352_v25 = vadd.f32 %v1351_v20, %v1299_v15 }
 0x174   : > { %v1355_v27 = vpop.f32.mrf.mxu0 }
 0x175   : > { %v1408_v28 = vpop.f32.mrf.mxu1  ;;  %1426 = vst [vmem:[#allocation2] sm:$0xff] %v1418_v23  ;;  %v1419_v30 = vadd.f32 %v1403_v24, %v335_v19  ;;  %v1405_v31 = vadd.f32 %v1404_v21, %v1352_v25  ;;  %v1356_v32 = vadd.f32 %v1355_v27, %v1303_v22 }
 0x176   : > { %v1357_v34 = vpop.f32.mrf.mxu0 }
 0x177   : > { %v1410_v35 = vpop.f32.mrf.mxu1  ;;  %1427 = vst [vmem:[#allocation2 + $0x18] sm:$0xff] %v1419_v30  ;;  %v1420_v37 = vadd.f32 %v1405_v31, %v336_v26  ;;  %v1409_v38 = vadd.f32 %v1408_v28, %v1356_v32  ;;  %v1358_v39 = vadd.f32 %v1357_v34, %v1305_v29 }
 0x178   : > { %v1359_v41 = vpop.f32.mrf.mxu0 }
 0x179   : > { %v1412_v42 = vpop.f32.mrf.mxu1  ;;  %1428 = vst [vmem:[#allocation2 + $0x10] sm:$0xff] %v1420_v37  ;;  %v1421_v44 = vadd.f32 %v1409_v38, %v337_v33  ;;  %v1411_v45 = vadd.f32 %v1410_v35, %v1358_v39  ;;  %v1360_v46 = vadd.f32 %v1359_v41, %v1307_v36 }
 0x17a   : > { %v1361_v48 = vpop.f32.mrf.mxu0 }
 0x17b   : > { %1429 = vst [vmem:[#allocation2 + $0x8] sm:$0xff] %v1421_v44  ;;  %v1422_v49 = vadd.f32 %v1411_v45, %v338_v40  ;;  %v1413_v50 = vadd.f32 %v1412_v42, %v1360_v46  ;;  %v1362_v51 = vadd.f32 %v1361_v48, %v1309_v43  ;;  %v1414_v53 = vpop.f32.mrf.mxu1 }
 0x17d   : > { %1430 = vst [vmem:[#allocation2 + $0x20] sm:$0xff] %v1422_v49  ;;  %v1423_v54 = vadd.f32 %v1413_v50, %v339_v47  ;;  %v1415_v55 = vadd.f32 %v1414_v53, %v1362_v51  ;;  %1436 = sbr.rel (%p1781_p11) target bundleno = 402 (0x192), region = 63 }
 0x17f   : > { %1431 = vst [vmem:[#allocation2 + $0x28] sm:$0xff] %v1423_v54  ;;  %v1424_v56 = vadd.f32 %v1415_v55, %v340_v52 }
 0x181   : > { %1432 = vst [vmem:[#allocation2 + $0x38] sm:$0xff] %v1424_v56 }
 0x182   : > { %v1447_v57 = vlaneseq  ;;  %v1445_v59 = vld [vmem:[%s2356_s2] sm:$0x3]  ;;  %v1437_v60 = vld [vmem:[#allocation2 + $0x30] sm:$0xff]  ;;  %v1439_v0 = vld [vmem:[#allocation2 + $0x18] sm:$0xff] }
 0x183   : > { %v1438_v61 = vld [vmem:[#allocation2] sm:$0xff]  ;;  %v1440_v1 = vld [vmem:[#allocation2 + $0x10] sm:$0xff]  ;;  %v1441_v2 = vld [vmem:[#allocation2 + $0x8] sm:$0xff] }
 0x184   : > { %v1448_v58 = vshrl.u32 %v1447_v57, 7  ;;  %v1442_v5 = vld [vmem:[#allocation2 + $0x20] sm:$0xff] }
 0x186   : > { %v1449_v62 = vsub.s32 0, %v1448_v58  ;;  %v1453_v63 = vsub.s32 1, %v1448_v58  ;;  %v1443_v6 = vld [vmem:[#allocation2 + $0x28] sm:$0xff] }
 0x188   : > { %v1450_v3 = vrot.slane %v1445_v59, %v1449_v62  ;;  %v1454_v4 = vrot.slane %v1445_v59, %v1453_v63  ;;  %v1444_v7 = vld [vmem:[#allocation2 + $0x38] sm:$0xff] }
 0x18a   : > { %v1457_v8 = vadd.f32 %v1450_v3, %v1437_v60  ;;  %v1458_v9 = vadd.f32 %v1454_v4, %v1438_v61  ;;  %v1459_v10 = vadd.f32 %v1450_v3, %v1439_v0  ;;  %v1460_v11 = vadd.f32 %v1454_v4, %v1440_v1 }
 0x18b   : > { %v1461_v12 = vadd.f32 %v1450_v3, %v1441_v2  ;;  %v1462_v13 = vadd.f32 %v1454_v4, %v1442_v5  ;;  %v1463_v14 = vadd.f32 %v1450_v3, %v1443_v6  ;;  %v1464_v15 = vadd.f32 %v1454_v4, %v1444_v7 }
 0x18c   : > { %v1465_v16 = vmax.f32 %v1457_v8, 0.0  ;;  %v1466_v17 = vmax.f32 %v1458_v9, 0.0  ;;  %v1467_v18 = vmax.f32 %v1459_v10, 0.0  ;;  %v1468_v19 = vmax.f32 %v1460_v11, 0.0 }
 0x18d   : > { %v1469_v20 = vmax.f32 %v1461_v12, 0.0  ;;  %v1470_v21 = vmax.f32 %v1462_v13, 0.0  ;;  %v1471_v22 = vmax.f32 %v1463_v14, 0.0  ;;  %v1472_v23 = vmax.f32 %v1464_v15, 0.0 }
 0x18e   : > { %v1792_v24 = vpack.c.bf16 %v1466_v17, %v1465_v16  ;;  %v1793_v25 = vpack.c.bf16 %v1468_v19, %v1467_v18 }
 0x18f   : > { %v1794_v26 = vpack.c.bf16 %v1470_v21, %v1469_v20  ;;  %v1795_v27 = vpack.c.bf16 %v1472_v23, %v1471_v22 }
 0x190   : > { %1497 = vst [vmem:[%s2357_s3] sm:$0xff] %v1792_v24  ;;  %1498 = vst [vmem:[%s2357_s3 + $0x8] sm:$0xff] %v1793_v25 }
 0x191   : > { %1499 = vst [vmem:[%s2357_s3 + $0x10] sm:$0xff] %v1794_v26  ;;  %1500 = vst [vmem:[%s2357_s3 + $0x18] sm:$0xff] %v1795_v27 }
 0x192 PF: > { %s13_s16 = sadd.s32 1, %s2067_s16   ;;  %s2358_s12 = smov %s2055_s13 }
 0x193   : > { %p10_p12 = scmp.ge.s32.totalorder %s13_s16, 4   ;;  %s2359_s13 = smov %s2125_s20 }
 0x194   : > { %s2360_s14 = smov %s2063_s15  ;;  %s2361_s15 = smov %s2363_s17 }
 0x195   :  { %12 = sbr.rel (!%p10_p12) target bundleno = 3 (0x3), region = 104 }

// kernel: vae_forward.14
= control target key start
LH: loop header
LB: loop body
LE: loop exit
PB: predicated region body
PF: predicated region fallthrough
CT: control target
= control target key end

     0   :  { %s1686_s18 = smov 0   ;;  %s1872_s0 = inlined_call_operand.vmem [shape: bf16[8,4096], index: 0, kind: input, shape index: {}]   ;;  %s1873_s1 = inlined_call_operand.vmem [shape: bf16[4096,256], index: 1, kind: input, shape index: {}]   ;;  %s1874_s2 = inlined_call_operand.vmem [shape: f32[1,256], index: 2, kind: input, shape index: {}]   ;;  %s1875_s3 = inlined_call_operand.vmem [shape: f32[8,128], index: 3, kind: input, shape index: {}]   ;;  %s1876_s4 = inlined_call_operand.vmem [shape: f32[8,256], index: 4, kind: output, shape index: {0}]   ;;  %s1877_s5 = inlined_call_operand.vmem [shape: f32[8,128], index: 5, kind: output, shape index: {1}]  }
   0x1 LB: > { %s1692_s19 = sadd.s32 4294967295, %s1653_s18   ;;  %p1289_p0 = scmp.ge.s32.totalorder %s1653_s18, 1  ;;  %s1653_s18 = sphi %s1686_s18, %s16_s18  }
   0x2   : > { %p193_p1 = scmp.lt.s32.totalorder %s1653_s18, 5 }
   0x4   : > { %p194_p2 = pnand %p1289_p0, %p193_p1 }
   0x5   : > { %s1290_s20 = sshll.u32 (!%p194_p2), %s1692_s19, 3  ;;  %s1292_s21 = sshll.u32 (!%p194_p2), %s1692_s19, 7 }
   0x6   : > { %197 = sbr.rel (%p194_p2) target bundleno = 385 (0x181), region = 36  ;;  %p223_p3 = scmp.lt.s32.totalorder (!%p194_p2), %s1290_s20, 31 }
   0x7   : > { %p229_p4 = scmp.lt.s32.totalorder (!%p194_p2), %s1292_s21, 511  ;;  %p1295_p5 = scmp.ne.s32.totalorder (!%p194_p2), %s1692_s19, 0 }
   0xb   : > { %s1879_s20 = smov (!%p223_p3, %s1290_s20), 31  ;;  %s1881_s21 = smov (!%p229_p4, %s1292_s21), 511 }
   0xc   : > { %s1291_s22 = sshll.u32 %s1879_s20, 2  ;;  %s1435_s26 = sshll.u32 %s1881_s21, 3 }
   0xd   : > { %s1701_s25 = scalar_lea.vmem %s1872_s0, %s1291_s22  ;;  %s1706_s29 = scalar_lea.vmem %s1873_s1, %s1435_s26 }
   0xe   : > { %238 = sbr.rel (%p1295_p5) target bundleno = 21 (0x15), region = 40 }
  0x13   : > { %v1655_v0 = vmov 0.0  }
  0x14   : > { %239 = vst [vmem:[#allocation2] sm:$0xff] %v1655_v0  ;;  %240 = vst [vmem:[#allocation2 + $0x8] sm:$0xff] %v1655_v0 }
  0x15 PF: > { %v1445_v1 = vld [vmem:[%s1706_s29 + $0x74] ss:$8 sps:$4 sm:$0xff]   ;;  %v1449_v3 = vld [vmem:[%s1706_s29 + $0x70] ss:$8 sps:$4 sm:$0xff]   ;;  %v1451_v5 = vld [vmem:[%s1706_s29 + $0x64] ss:$8 sps:$4 sm:$0xff]  }
  0x16   : > { %v1447_v2 = vld [vmem:[%s1706_s29 + $0x174] ss:$8 sps:$4 sm:$0xff]   ;;  %1043 = vmatprep.subr.bf16.mxu0 %v1445_v1  ;;  %v1450_v4 = vld [vmem:[%s1706_s29 + $0x170] ss:$8 sps:$4 sm:$0xff]   ;;  %v1453_v6 = vld [vmem:[%s1706_s29 + $0x164] ss:$8 sps:$4 sm:$0xff]  }
  0x17   : > { %1084 = vmatprep.subr.bf16.mxu1 %v1447_v2  ;;  %1044 = vmatpush1.bf16.msra.mxu0 %v1449_v3  ;;  %v1455_v7 = vld [vmem:[%s1706_s29 + $0x60] ss:$8 sps:$4 sm:$0xff]   ;;  %v1457_v9 = vld [vmem:[%s1706_s29 + $0x54] ss:$8 sps:$4 sm:$0xff]   ;;  %v1461_v11 = vld [vmem:[%s1706_s29 + $0x50] ss:$8 sps:$4 sm:$0xff]  }
  0x18   : > { %1085 = vmatpush1.bf16.msra.mxu1 %v1450_v4  ;;  %1045 = vmatprep.subr.bf16.mxu0 %v1451_v5  ;;  %v1456_v8 = vld [vmem:[%s1706_s29 + $0x160] ss:$8 sps:$4 sm:$0xff]   ;;  %v1459_v10 = vld [vmem:[%s1706_s29 + $0x154] ss:$8 sps:$4 sm:$0xff]   ;;  %v1462_v12 = vld [vmem:[%s1706_s29 + $0x150] ss:$8 sps:$4 sm:$0xff]  }
  0x19   : > { %1086 = vmatprep.subr.bf16.mxu1 %v1453_v6  ;;  %v1463_v13 = vld [vmem:[%s1706_s29 + $0x44] ss:$8 sps:$4 sm:$0xff]   ;;  %v1467_v15 = vld [vmem:[%s1706_s29 + $0x40] ss:$8 sps:$4 sm:$0xff]   ;;  %v1469_v17 = vld [vmem:[%s1706_s29 + $0x34] ss:$8 sps:$4 sm:$0xff]  }
  0x1a   : > { %v1465_v14 = vld [vmem:[%s1706_s29 + $0x144] ss:$8 sps:$4 sm:$0xff]   ;;  %v1468_v16 = vld [vmem:[%s1706_s29 + $0x140] ss:$8 sps:$4 sm:$0xff]   ;;  %v1471_v18 = vld [vmem:[%s1706_s29 + $0x134] ss:$8 sps:$4 sm:$0xff]  }
  0x1b   : > { %1046 = vmatpush1.bf16.msra.mxu0 %v1455_v7  ;;  %v1473_v19 = vld [vmem:[%s1706_s29 + $0x30] ss:$8 sps:$4 sm:$0xff]   ;;  %v1475_v21 = vld [vmem:[%s1706_s29 + $0x24] ss:$8 sps:$4 sm:$0xff]   ;;  %v1479_v23 = vld [vmem:[%s1706_s29 + $0x20] ss:$8 sps:$4 sm:$0xff]  }
  0x1c   : > { %1087 = vmatpush1.bf16.msra.mxu1 %v1456_v8  ;;  %1047 = vmatprep.subr.bf16.mxu0 %v1457_v9  ;;  %v1474_v20 = vld [vmem:[%s1706_s29 + $0x130] ss:$8 sps:$4 sm:$0xff]   ;;  %v1477_v22 = vld [vmem:[%s1706_s29 + $0x124] ss:$8 sps:$4 sm:$0xff]   ;;  %v1480_v24 = vld [vmem:[%s1706_s29 + $0x120] ss:$8 sps:$4 sm:$0xff]  }
  0x1d   : > { %1088 = vmatprep.subr.bf16.mxu1 %v1459_v10  ;;  %v1481_v25 = vld [vmem:[%s1706_s29 + $0x14] ss:$8 sps:$4 sm:$0xff]   ;;  %v1485_v27 = vld [vmem:[%s1706_s29 + $0x10] ss:$8 sps:$4 sm:$0xff]   ;;  %v1487_v29 = vld [vmem:[%s1706_s29 + $0x4] ss:$8 sps:$4 sm:$0xff]  }
  0x1e   : > { %v1483_v26 = vld [vmem:[%s1706_s29 + $0x114] ss:$8 sps:$4 sm:$0xff]   ;;  %v1486_v28 = vld [vmem:[%s1706_s29 + $0x110] ss:$8 sps:$4 sm:$0xff]   ;;  %v1489_v30 = vld [vmem:[%s1706_s29 + $0x104] ss:$8 sps:$4 sm:$0xff]  }
  0x1f   : > { %1048 = vmatpush1.bf16.msra.mxu0 %v1461_v11  ;;  %v1491_v31 = vld [vmem:[%s1706_s29] ss:$8 sps:$4 sm:$0xff]   ;;  %v1493_v33 = vld [vmem:[%s1706_s29 + $0xf4] ss:$8 sps:$4 sm:$0xff]   ;;  %v1497_v35 = vld [vmem:[%s1706_s29 + $0xf0] ss:$8 sps:$4 sm:$0xff]  }
  0x20   : > { %1089 = vmatpush1.bf16.msra.mxu1 %v1462_v12  ;;  %1049 = vmatprep.subr.bf16.mxu0 %v1463_v13  ;;  %v1492_v32 = vld [vmem:[%s1706_s29 + $0x100] ss:$8 sps:$4 sm:$0xff]   ;;  %v1495_v34 = vld [vmem:[%s1706_s29 + $0x1f4] ss:$8 sps:$4 sm:$0xff]   ;;  %v1498_v36 = vld [vmem:[%s1706_s29 + $0x1f0] ss:$8 sps:$4 sm:$0xff]  }
  0x21   : > { %1090 = vmatprep.subr.bf16.mxu1 %v1465_v14  ;;  %v1499_v37 = vld [vmem:[%s1706_s29 + $0xe4] ss:$8 sps:$4 sm:$0xff]   ;;  %v1503_v39 = vld [vmem:[%s1706_s29 + $0xe0] ss:$8 sps:$4 sm:$0xff]   ;;  %v1505_v41 = vld [vmem:[%s1706_s29 + $0xd4] ss:$8 sps:$4 sm:$0xff]  }
  0x22   : > { %v1501_v38 = vld [vmem:[%s1706_s29 + $0x1e4] ss:$8 sps:$4 sm:$0xff]   ;;  %v1504_v40 = vld [vmem:[%s1706_s29 + $0x1e0] ss:$8 sps:$4 sm:$0xff]   ;;  %v1507_v42 = vld [vmem:[%s1706_s29 + $0x1d4] ss:$8 sps:$4 sm:$0xff]  }
  0x23   : > { %1050 = vmatpush1.bf16.msra.mxu0 %v1467_v15  ;;  %v1509_v43 = vld [vmem:[%s1706_s29 + $0xd0] ss:$8 sps:$4 sm:$0xff]   ;;  %v1511_v45 = vld [vmem:[%s1706_s29 + $0xc4] ss:$8 sps:$4 sm:$0xff]   ;;  %v1515_v50 = vld [vmem:[%s1706_s29 + $0xc0] ss:$8 sps:$4 sm:$0xff]  }
  0x24   : > { %1091 = vmatpush1.bf16.msra.mxu1 %v1468_v16  ;;  %1051 = vmatprep.subr.bf16.mxu0 %v1469_v17  ;;  %v1510_v44 = vld [vmem:[%s1706_s29 + $0x1d0] ss:$8 sps:$4 sm:$0xff]   ;;  %v1513_v46 = vld [vmem:[%s1706_s29 + $0x1c4] ss:$8 sps:$4 sm:$0xff]   ;;  %v1516_v51 = vld [vmem:[%s1706_s29 + $0x1c0] ss:$8 sps:$4 sm:$0xff]  }
  0x25   : > { %1092 = vmatprep.subr.bf16.mxu1 %v1471_v18  ;;  %v243_v47 = vld [vmem:[%s1701_s25] sm:$0xff]  ;;  %v244_v49 = vld [vmem:[%s1701_s25 + $0x8] sm:$0xff]  ;;  %v1517_v53 = vld [vmem:[%s1706_s29 + $0xb4] ss:$8 sps:$4 sm:$0xff]   ;;  %p1432_p6 = scmp.ne.s32.totalorder %s1692_s19, 3 }
  0x26   : > { %v1297_v48 = vcombine.high %v243_v47, %v243_v47  ;;  %v1299_v52 = vcombine.high %v244_v49, %v244_v49  ;;  %v1519_v54 = vld [vmem:[%s1706_s29 + $0x1b4] ss:$8 sps:$4 sm:$0xff]   ;;  %v1521_v55 = vld [vmem:[%s1706_s29 + $0xb0] ss:$8 sps:$4 sm:$0xff]   ;;  %v1523_v57 = vld [vmem:[%s1706_s29 + $0xa4] ss:$8 sps:$4 sm:$0xff]   ;;  %v1296_v7 = vcombine.low %v243_v47, %v243_v47  ;;  %v1298_v8 = vcombine.low %v244_v49, %v244_v49 }
  0x27   : > { %1052 = vmatpush1.bf16.msra.mxu0 %v1473_v19  ;;  %v1522_v56 = vld [vmem:[%s1706_s29 + $0x1b0] ss:$8 sps:$4 sm:$0xff]   ;;  %v1525_v58 = vld [vmem:[%s1706_s29 + $0x1a4] ss:$8 sps:$4 sm:$0xff]   ;;  %v1527_v59 = vld [vmem:[%s1706_s29 + $0xa0] ss:$8 sps:$4 sm:$0xff]  }
  0x28   : > { %1093 = vmatpush1.bf16.msra.mxu1 %v1474_v20  ;;  %1053 = vmatprep.subr.bf16.mxu0 %v1475_v21  ;;  %v1528_v60 = vld [vmem:[%s1706_s29 + $0x1a0] ss:$8 sps:$4 sm:$0xff]   ;;  %v1529_v61 = vld [vmem:[%s1706_s29 + $0x94] ss:$8 sps:$4 sm:$0xff]   ;;  %v1533_v63 = vld [vmem:[%s1706_s29 + $0x90] ss:$8 sps:$4 sm:$0xff]  }
  0x29   : > { %1094 = vmatprep.subr.bf16.mxu1 %v1477_v22  ;;  %1075 = vmatprep.mubr.bf16.mxu0 %v1297_v48  ;;  %v1531_v62 = vld [vmem:[%s1706_s29 + $0x194] ss:$8 sps:$4 sm:$0xff]   ;;  %v1534_v0 = vld [vmem:[%s1706_s29 + $0x190] ss:$8 sps:$4 sm:$0xff]   ;;  %v1535_v1 = vld [vmem:[%s1706_s29 + $0x84] ss:$8 sps:$4 sm:$0xff]  }
  0x2a   : > { %1116 = vmatprep.mubr.bf16.mxu1 %v1299_v52  ;;  %v1537_v2 = vld [vmem:[%s1706_s29 + $0x184] ss:$8 sps:$4 sm:$0xff]   ;;  %v1539_v3 = vld [vmem:[%s1706_s29 + $0x80] ss:$8 sps:$4 sm:$0xff]   ;;  %v1547_v5 = vld [vmem:[%s1706_s29 + $0x274] ss:$8 sps:$4 sm:$0xff]  }
  0x2b   : > { %1054 = vmatpush1.bf16.msra.mxu0 %v1479_v23  ;;  %v1540_v4 = vld [vmem:[%s1706_s29 + $0x180] ss:$8 sps:$4 sm:$0xff]   ;;  %v1550_v6 = vld [vmem:[%s1706_s29 + $0x374] ss:$8 sps:$4 sm:$0xff]   ;;  %v1545_v9 = vld [vmem:[%s1706_s29 + $0x270] ss:$8 sps:$4 sm:$0xff]  }
  0x2c   : > { %1095 = vmatpush1.bf16.msra.mxu1 %v1480_v24  ;;  %1055 = vmatprep.subr.bf16.mxu0 %v1481_v25  ;;  %v1548_v10 = vld [vmem:[%s1706_s29 + $0x370] ss:$8 sps:$4 sm:$0xff]   ;;  %v1553_v11 = vld [vmem:[%s1706_s29 + $0x264] ss:$8 sps:$4 sm:$0xff]   ;;  %v1551_v13 = vld [vmem:[%s1706_s29 + $0x260] ss:$8 sps:$4 sm:$0xff]  }
  0x2d   : > { %1096 = vmatprep.subr.bf16.mxu1 %v1483_v26  ;;  %v1556_v12 = vld [vmem:[%s1706_s29 + $0x364] ss:$8 sps:$4 sm:$0xff]   ;;  %v1554_v14 = vld [vmem:[%s1706_s29 + $0x360] ss:$8 sps:$4 sm:$0xff]   ;;  %v1559_v15 = vld [vmem:[%s1706_s29 + $0x254] ss:$8 sps:$4 sm:$0xff]  }
  0x2e   : > { %v1562_v16 = vld [vmem:[%s1706_s29 + $0x354] ss:$8 sps:$4 sm:$0xff]   ;;  %v1557_v17 = vld [vmem:[%s1706_s29 + $0x250] ss:$8 sps:$4 sm:$0xff]   ;;  %v1565_v19 = vld [vmem:[%s1706_s29 + $0x244] ss:$8 sps:$4 sm:$0xff]  }
  0x2f   : > { %1056 = vmatpush1.bf16.msra.mxu0 %v1485_v27  ;;  %v1560_v18 = vld [vmem:[%s1706_s29 + $0x350] ss:$8 sps:$4 sm:$0xff]   ;;  %v1568_v20 = vld [vmem:[%s1706_s29 + $0x344] ss:$8 sps:$4 sm:$0xff]   ;;  %v1563_v21 = vld [vmem:[%s1706_s29 + $0x240] ss:$8 sps:$4 sm:$0xff]  }
  0x30   : > { %1097 = vmatpush1.bf16.msra.mxu1 %v1486_v28  ;;  %1057 = vmatprep.subr.bf16.mxu0 %v1487_v29  ;;  %v1566_v22 = vld [vmem:[%s1706_s29 + $0x340] ss:$8 sps:$4 sm:$0xff]   ;;  %v1571_v23 = vld [vmem:[%s1706_s29 + $0x234] ss:$8 sps:$4 sm:$0xff]   ;;  %v1569_v25 = vld [vmem:[%s1706_s29 + $0x230] ss:$8 sps:$4 sm:$0xff]  }
  0x31   : > { %1098 = vmatprep.subr.bf16.mxu1 %v1489_v30  ;;  %v1574_v24 = vld [vmem:[%s1706_s29 + $0x334] ss:$8 sps:$4 sm:$0xff]   ;;  %v1572_v26 = vld [vmem:[%s1706_s29 + $0x330] ss:$8 sps:$4 sm:$0xff]   ;;  %v1577_v27 = vld [vmem:[%s1706_s29 + $0x224] ss:$8 sps:$4 sm:$0xff]  }
  0x32   : > { %v1580_v28 = vld [vmem:[%s1706_s29 + $0x324] ss:$8 sps:$4 sm:$0xff]   ;;  %v1575_v29 = vld [vmem:[%s1706_s29 + $0x220] ss:$8 sps:$4 sm:$0xff]   ;;  %v1610_v52 = vld [vmem:[%s1706_s29 + $0x3d4] ss:$8 sps:$4 sm:$0xff]  }
  0x33   : > { %1058 = vmatpush1.bf16.msra.mxu0 %v1491_v31  ;;  %v1578_v30 = vld [vmem:[%s1706_s29 + $0x320] ss:$8 sps:$4 sm:$0xff]   ;;  %v1583_v31 = vld [vmem:[%s1706_s29 + $0x214] ss:$8 sps:$4 sm:$0xff]   ;;  %v1601_v47 = vld [vmem:[%s1706_s29 + $0x2e4] ss:$8 sps:$4 sm:$0xff]  }
  0x34   : > { %1099 = vmatpush1.bf16.msra.mxu1 %v1492_v32  ;;  %1059 = vmatprep.subr.bf16.mxu0 %v1493_v33  ;;  %v1586_v32 = vld [vmem:[%s1706_s29 + $0x314] ss:$8 sps:$4 sm:$0xff]   ;;  %v1604_v48 = vld [vmem:[%s1706_s29 + $0x3e4] ss:$8 sps:$4 sm:$0xff]   ;;  %v1599_v49 = vld [vmem:[%s1706_s29 + $0x2e0] ss:$8 sps:$4 sm:$0xff]  }
  0x35   : > { %1100 = vmatprep.subr.bf16.mxu1 %v1495_v34  ;;  %v1802_v33 = vld [vmem:[%s1701_s25 + $0x10] sm:$0xff]  ;;  %v1805_v34 = vld [vmem:[%s1701_s25 + $0x18] sm:$0xff] }
  0x37   : > { %1060 = vmatpush2.bf16.msra.mxu0 %v1497_v35  ;;  %v1301_v35 = vcombine.high %v1802_v33, %v1802_v33 }
  0x38   : > { %1101 = vmatpush2.bf16.msra.mxu1 %v1498_v36  ;;  %1061 = vmatprep.subr.bf16.mxu0 %v1499_v37  ;;  %v1303_v36 = vcombine.high %v1805_v34, %v1805_v34  ;;  %v1581_v37 = vld [vmem:[%s1706_s29 + $0x210] ss:$8 sps:$4 sm:$0xff]  }
  0x39   : > { %1102 = vmatprep.subr.bf16.mxu1 %v1501_v38  ;;  %v1584_v38 = vld [vmem:[%s1706_s29 + $0x310] ss:$8 sps:$4 sm:$0xff]  }
  0x3b   : > { %1062 = vmatpush2.bf16.msra.mxu0 %v1503_v39  ;;  %v1589_v39 = vld [vmem:[%s1706_s29 + $0x204] ss:$8 sps:$4 sm:$0xff]  }
  0x3c   : > { %1103 = vmatpush2.bf16.msra.mxu1 %v1504_v40  ;;  %1063 = vmatprep.subr.bf16.mxu0 %v1505_v41  ;;  %v1592_v40 = vld [vmem:[%s1706_s29 + $0x304] ss:$8 sps:$4 sm:$0xff]   ;;  %v1587_v41 = vld [vmem:[%s1706_s29 + $0x200] ss:$8 sps:$4 sm:$0xff]  }
  0x3d   : > { %1104 = vmatprep.subr.bf16.mxu1 %v1507_v42  ;;  %v1590_v42 = vld [vmem:[%s1706_s29 + $0x300] ss:$8 sps:$4 sm:$0xff]  }
  0x3f   : > { %1064 = vmatpush2.bf16.msra.mxu0 %v1509_v43  ;;  %v1595_v43 = vld [vmem:[%s1706_s29 + $0x2f4] ss:$8 sps:$4 sm:$0xff]  }
  0x40   : > { %1105 = vmatpush2.bf16.msra.mxu1 %v1510_v44  ;;  %1065 = vmatprep.subr.bf16.mxu0 %v1511_v45  ;;  %v1598_v44 = vld [vmem:[%s1706_s29 + $0x3f4] ss:$8 sps:$4 sm:$0xff]   ;;  %v1593_v45 = vld [vmem:[%s1706_s29 + $0x2f0] ss:$8 sps:$4 sm:$0xff]  }
  0x41   : > { %1106 = vmatprep.subr.bf16.mxu1 %v1513_v46  ;;  %v1596_v46 = vld [vmem:[%s1706_s29 + $0x3f0] ss:$8 sps:$4 sm:$0xff]  }
  0x43   : > { %1066 = vmatpush2.bf16.msra.mxu0 %v1515_v50  ;;  %v1602_v50 = vld [vmem:[%s1706_s29 + $0x3e0] ss:$8 sps:$4 sm:$0xff]  }
  0x44   : > { %1107 = vmatpush2.bf16.msra.mxu1 %v1516_v51  ;;  %1067 = vmatprep.subr.bf16.mxu0 %v1517_v53  ;;  %v1607_v51 = vld [vmem:[%s1706_s29 + $0x2d4] ss:$8 sps:$4 sm:$0xff]   ;;  %v1605_v53 = vld [vmem:[%s1706_s29 + $0x2d0] ss:$8 sps:$4 sm:$0xff]  }
  0x45   : > { %1108 = vmatprep.subr.bf16.mxu1 %v1519_v54  ;;  %v1608_v54 = vld [vmem:[%s1706_s29 + $0x3d0] ss:$8 sps:$4 sm:$0xff]  }
  0x47   : > { %1068 = vmatpush2.bf16.msra.mxu0 %v1521_v55  ;;  %v1613_v55 = vld [vmem:[%s1706_s29 + $0x2c4] ss:$8 sps:$4 sm:$0xff]  }
  0x48   : > { %1109 = vmatpush2.bf16.msra.mxu1 %v1522_v56  ;;  %1069 = vmatprep.subr.bf16.mxu0 %v1523_v57  ;;  %v1616_v56 = vld [vmem:[%s1706_s29 + $0x3c4] ss:$8 sps:$4 sm:$0xff]   ;;  %v1611_v57 = vld [vmem:[%s1706_s29 + $0x2c0] ss:$8 sps:$4 sm:$0xff]  }
  0x49   : > { %1110 = vmatprep.subr.bf16.mxu1 %v1525_v58  ;;  %v1614_v58 = vld [vmem:[%s1706_s29 + $0x3c0] ss:$8 sps:$4 sm:$0xff]  }
  0x4b   : > { %1070 = vmatpush2.bf16.msra.mxu0 %v1527_v59  ;;  %v1619_v59 = vld [vmem:[%s1706_s29 + $0x2b4] ss:$8 sps:$4 sm:$0xff]  }
  0x4c   : > { %1111 = vmatpush2.bf16.msra.mxu1 %v1528_v60  ;;  %1071 = vmatprep.subr.bf16.mxu0 %v1529_v61  ;;  %v1622_v60 = vld [vmem:[%s1706_s29 + $0x3b4] ss:$8 sps:$4 sm:$0xff]   ;;  %v1617_v61 = vld [vmem:[%s1706_s29 + $0x2b0] ss:$8 sps:$4 sm:$0xff]  }
  0x4d   : > { %1112 = vmatprep.subr.bf16.mxu1 %v1531_v62  ;;  %v1620_v62 = vld [vmem:[%s1706_s29 + $0x3b0] ss:$8 sps:$4 sm:$0xff]  }
  0x4f   : > { %1072 = vmatpush2.bf16.msra.mxu0 %v1533_v63  ;;  %v1625_v63 = vld [vmem:[%s1706_s29 + $0x2a4] ss:$8 sps:$4 sm:$0xff]  }
  0x50   : > { %1113 = vmatpush2.bf16.msra.mxu1 %v1534_v0  ;;  %1073 = vmatprep.subr.bf16.mxu0 %v1535_v1  ;;  %v1628_v0 = vld [vmem:[%s1706_s29 + $0x3a4] ss:$8 sps:$4 sm:$0xff]   ;;  %v1623_v1 = vld [vmem:[%s1706_s29 + $0x2a0] ss:$8 sps:$4 sm:$0xff]  }
  0x51   : > { %1114 = vmatprep.subr.bf16.mxu1 %v1537_v2  ;;  %v1626_v2 = vld [vmem:[%s1706_s29 + $0x3a0] ss:$8 sps:$4 sm:$0xff]  }
  0x53   : > { %1074 = vmatpush2.bf16.msra.mxu0 %v1539_v3  ;;  %v1631_v3 = vld [vmem:[%s1706_s29 + $0x294] ss:$8 sps:$4 sm:$0xff]  }
  0x54   : > { %1115 = vmatpush2.bf16.msra.mxu1 %v1540_v4  ;;  %1125 = vmatprep.subr.bf16.mxu0 %v1547_v5  ;;  %v1634_v4 = vld [vmem:[%s1706_s29 + $0x394] ss:$8 sps:$4 sm:$0xff]   ;;  %v1629_v5 = vld [vmem:[%s1706_s29 + $0x290] ss:$8 sps:$4 sm:$0xff]  }
  0x55   : > { %1166 = vmatprep.subr.bf16.mxu1 %v1550_v6  ;;  %v1632_v6 = vld [vmem:[%s1706_s29 + $0x390] ss:$8 sps:$4 sm:$0xff]  }
  0x56   : > { %1076 = vmatmul.mubr.bf16.vlgmr.msra.gmra.mxu0 %v1296_v7  ;;  %v1637_v7 = vld [vmem:[%s1706_s29 + $0x284] ss:$8 sps:$4 sm:$0xff]  }
  0x57   : > { %1117 = vmatmul.mubr.bf16.vlgmr.msra.gmra.mxu1 %v1298_v8  ;;  %1126 = vmatpush1.bf16.msra.mxu0 %v1545_v9  ;;  %v1640_v8 = vld [vmem:[%s1706_s29 + $0x384] ss:$8 sps:$4 sm:$0xff]   ;;  %v1635_v9 = vld [vmem:[%s1706_s29 + $0x280] ss:$8 sps:$4 sm:$0xff]  }
  0x58   : > { %1167 = vmatpush1.bf16.msra.mxu1 %v1548_v10  ;;  %1127 = vmatprep.subr.bf16.mxu0 %v1553_v11  ;;  %v1638_v10 = vld [vmem:[%s1706_s29 + $0x380] ss:$8 sps:$4 sm:$0xff]   ;;  %v1300_v11 = vcombine.low %v1802_v33, %v1802_v33 }
  0x59   : > { %1168 = vmatprep.subr.bf16.mxu1 %v1556_v12  ;;  %1157 = vmatprep.mubr.bf16.mxu0 %v1301_v35  ;;  %v1302_v12 = vcombine.low %v1805_v34, %v1805_v34 }
  0x5a   : > { %1198 = vmatprep.mubr.bf16.mxu1 %v1303_v36 }
  0x5b   : > { %1128 = vmatpush1.bf16.msra.mxu0 %v1551_v13 }
  0x5c   : > { %1169 = vmatpush1.bf16.msra.mxu1 %v1554_v14  ;;  %1129 = vmatprep.subr.bf16.mxu0 %v1559_v15 }
  0x5d   : > { %1170 = vmatprep.subr.bf16.mxu1 %v1562_v16 }
  0x5f   : > { %1130 = vmatpush1.bf16.msra.mxu0 %v1557_v17 }
  0x60   : > { %1171 = vmatpush1.bf16.msra.mxu1 %v1560_v18  ;;  %1131 = vmatprep.subr.bf16.mxu0 %v1565_v19 }
  0x61   : > { %1172 = vmatprep.subr.bf16.mxu1 %v1568_v20 }
  0x63   : > { %1132 = vmatpush1.bf16.msra.mxu0 %v1563_v21 }
  0x64   : > { %1173 = vmatpush1.bf16.msra.mxu1 %v1566_v22  ;;  %1133 = vmatprep.subr.bf16.mxu0 %v1571_v23 }
  0x65   : > { %1174 = vmatprep.subr.bf16.mxu1 %v1574_v24 }
  0x67   : > { %1134 = vmatpush1.bf16.msra.mxu0 %v1569_v25 }
  0x68   : > { %1175 = vmatpush1.bf16.msra.mxu1 %v1572_v26  ;;  %1135 = vmatprep.subr.bf16.mxu0 %v1577_v27  ;;  %v241_v26 = vld [vmem:[#allocation2] sm:$0xff] }
  0x69   : > { %1176 = vmatprep.subr.bf16.mxu1 %v1580_v28 }
  0x6b   : > { %1136 = vmatpush1.bf16.msra.mxu0 %v1575_v29 }
  0x6c   : > { %1177 = vmatpush1.bf16.msra.mxu1 %v1578_v30  ;;  %1137 = vmatprep.subr.bf16.mxu0 %v1583_v31  ;;  %v242_v31 = vld [vmem:[#allocation2 + $0x8] sm:$0xff] }
  0x6d   : > { %1178 = vmatprep.subr.bf16.mxu1 %v1586_v32 }
  0x6f   : > { %1138 = vmatpush1.bf16.msra.mxu0 %v1581_v37 }
  0x70   : > { %1179 = vmatpush1.bf16.msra.mxu1 %v1584_v38  ;;  %1139 = vmatprep.subr.bf16.mxu0 %v1589_v39 }
  0x71   : > { %1180 = vmatprep.subr.bf16.mxu1 %v1592_v40 }
  0x73   : > { %1140 = vmatpush1.bf16.msra.mxu0 %v1587_v41 }
  0x74   : > { %1181 = vmatpush1.bf16.msra.mxu1 %v1590_v42  ;;  %1141 = vmatprep.subr.bf16.mxu0 %v1595_v43 }
  0x75   : > { %1182 = vmatprep.subr.bf16.mxu1 %v1598_v44 }
  0x77   : > { %1142 = vmatpush2.bf16.msra.mxu0 %v1593_v45 }
  0x78   : > { %1183 = vmatpush2.bf16.msra.mxu1 %v1596_v46  ;;  %1143 = vmatprep.subr.bf16.mxu0 %v1601_v47 }
  0x79   : > { %1184 = vmatprep.subr.bf16.mxu1 %v1604_v48 }
  0x7b   : > { %1144 = vmatpush2.bf16.msra.mxu0 %v1599_v49 }
  0x7c   : > { %1185 = vmatpush2.bf16.msra.mxu1 %v1602_v50  ;;  %1145 = vmatprep.subr.bf16.mxu0 %v1607_v51 }
  0x7d   : > { %1186 = vmatprep.subr.bf16.mxu1 %v1610_v52 }
  0x7f   : > { %1146 = vmatpush2.bf16.msra.mxu0 %v1605_v53 }
  0x80   : > { %1187 = vmatpush2.bf16.msra.mxu1 %v1608_v54  ;;  %1147 = vmatprep.subr.bf16.mxu0 %v1613_v55 }
  0x81   : > { %1188 = vmatprep.subr.bf16.mxu1 %v1616_v56 }
  0x83   : > { %1148 = vmatpush2.bf16.msra.mxu0 %v1611_v57 }
  0x84   : > { %1189 = vmatpush2.bf16.msra.mxu1 %v1614_v58  ;;  %1149 = vmatprep.subr.bf16.mxu0 %v1619_v59 }
  0x85   : > { %1190 = vmatprep.subr.bf16.mxu1 %v1622_v60 }
  0x87   : > { %1150 = vmatpush2.bf16.msra.mxu0 %v1617_v61 }
  0x88   : > { %1191 = vmatpush2.bf16.msra.mxu1 %v1620_v62  ;;  %1151 = vmatprep.subr.bf16.mxu0 %v1625_v63 }
  0x89   : > { %1192 = vmatprep.subr.bf16.mxu1 %v1628_v0 }
  0x8b   : > { %1152 = vmatpush2.bf16.msra.mxu0 %v1623_v1 }
  0x8c   : > { %1193 = vmatpush2.bf16.msra.mxu1 %v1626_v2  ;;  %1153 = vmatprep.subr.bf16.mxu0 %v1631_v3 }
  0x8d   : > { %1194 = vmatprep.subr.bf16.mxu1 %v1634_v4 }
  0x8f   : > { %1154 = vmatpush2.bf16.msra.mxu0 %v1629_v5 }
  0x90   : > { %1195 = vmatpush2.bf16.msra.mxu1 %v1632_v6  ;;  %1155 = vmatprep.subr.bf16.mxu0 %v1637_v7 }
  0x91   : > { %1196 = vmatprep.subr.bf16.mxu1 %v1640_v8 }
  0x93   : > { %1156 = vmatpush2.bf16.msra.mxu0 %v1635_v9 }
  0x94   : > { %1197 = vmatpush2.bf16.msra.mxu1 %v1638_v10 }
  0x96   : > { %1158 = vmatmul.mubr.bf16.vlgmr.msra.gmra.mxu0 %v1300_v11 }
  0x97   : > { %1199 = vmatmul.mubr.bf16.vlgmr.msra.gmra.mxu1 %v1302_v12 }
 0x116   : > { %v1077_v13 = vpop.f32.mrf.mxu0 }
 0x117   : > { %v1118_v14 = vpop.f32.mrf.mxu1 }
 0x118   : > { %v1079_v15 = vpop.f32.mrf.mxu0  ;;  %v1119_v21 = vadd.f32 %v1118_v14, %v1077_v13 }
 0x119   : > { %v1120_v16 = vpop.f32.mrf.mxu1 }
 0x11a   : > { %v1081_v17 = vpop.f32.mrf.mxu0  ;;  %v1121_v24 = vadd.f32 %v1120_v16, %v1079_v15 }
 0x11b   : > { %v1122_v18 = vpop.f32.mrf.mxu1 }
 0x11c   : > { %v1082_v19 = vpop.f32.mrf.mxu0 }
 0x11d   : > { %v1123_v20 = vpop.f32.mrf.mxu1 }
 0x156   : > { %v1159_v22 = vpop.f32.mrf.mxu0 }
 0x157   : > { %v1200_v23 = vpop.f32.mrf.mxu1  ;;  %v1160_v25 = vadd.f32 %v1159_v22, %v1119_v21 }
 0x158   : > { %v1161_v27 = vpop.f32.mrf.mxu0 }
 0x159   : > { %v1202_v28 = vpop.f32.mrf.mxu1  ;;  %v1201_v29 = vadd.f32 %v1200_v23, %v1160_v25  ;;  %v1162_v30 = vadd.f32 %v1161_v27, %v1121_v24 }
 0x15a   : > { %v1163_v32 = vpop.f32.mrf.mxu0 }
 0x15b   : > { %v1204_v33 = vpop.f32.mrf.mxu1  ;;  %v1207_v34 = vadd.f32 %v1201_v29, %v241_v26  ;;  %v1203_v35 = vadd.f32 %v1202_v28, %v1162_v30  ;;  %1214 = sbr.rel (%p1432_p6) target bundleno = 385 (0x181), region = 44 }
 0x15c   : > { %v1164_v36 = vpop.f32.mrf.mxu0 }
 0x15d   : > { %v1205_v37 = vpop.f32.mrf.mxu1  ;;  %1209 = vst [vmem:[#allocation2] sm:$0xff] %v1207_v34  ;;  %v1208_v38 = vadd.f32 %v1203_v35, %v242_v31 }
 0x15f   : > { %1210 = vst [vmem:[#allocation2 + $0x8] sm:$0xff] %v1208_v38 }
 0x160   : > { %v1219_v39 = vlaneseq  ;;  %v1217_v41 = vld [vmem:[%s1874_s2] sm:$0x3] }
 0x161   : > { %v1233_v52 = vld [vmem:[%s1875_s3] sm:$0xff] }
 0x162   : > { %v1220_v40 = vshrl.u32 %v1219_v39, 7 }
 0x164   : > { %v1221_v42 = vsub.s32 0, %v1220_v40  ;;  %v1225_v43 = vsub.s32 1, %v1220_v40  ;;  %v1215_v44 = vld [vmem:[#allocation2] sm:$0xff] }
 0x166   : > { %v1216_v45 = vld [vmem:[#allocation2 + $0x8] sm:$0xff]  ;;  %v1222_v46 = vrot.slane %v1217_v41, %v1221_v42  ;;  %v1226_v47 = vrot.slane %v1217_v41, %v1225_v43 }
 0x168   : > { %v1229_v48 = vadd.f32 %v1222_v46, %v1215_v44  ;;  %v1230_v49 = vadd.f32 %v1226_v47, %v1216_v45 }
 0x16a   : > { %1231 = vst [vmem:[%s1876_s4] sm:$0xff] %v1229_v48  ;;  %1232 = vst [vmem:[%s1876_s4 + $0x8] sm:$0xff] %v1230_v49  ;;  %v1234_v50 = vmul.f32 0.5, %v1230_v49 }
 0x16c   : > { %v1235_v51 = vmul.f32 1.442695, %v1234_v50 }
 0x16e   : > { %1645 = vpow2.f32 %v1235_v51 }
 0x17b   : > { %v1646_v53 = vpop.eup %1645 }
 0x17c   : > { %v1237_v54 = vmul.f32 %v1646_v53, %v1233_v52 }
 0x17e   : > { %v1238_v55 = vadd.f32 %v1237_v54, %v1229_v48 }
 0x180   : > { %1239 = vst [vmem:[%s1877_s5] sm:$0xff] %v1238_v55 }
 0x181 PF: > { %s16_s18 = sadd.s32 1, %s1653_s18  }
 0x182   : > { %p13_p7 = scmp.ge.s32.totalorder %s16_s18, 6  }
 0x184   :  { %15 = sbr.rel (!%p13_p7) target bundleno = 1 (0x1), region = 81 }

// kernel: vae_forward.15
= control target key start
LH: loop header
LB: loop body
LE: loop exit
PB: predicated region body
PF: predicated region fallthrough
CT: control target
= control target key end

     0   :  { %s810_s12 = smov 0   ;;  %s812_s13 = smov 0   ;;  %s899_s0 = inlined_call_operand.vmem [shape: bf16[8,128], index: 0, kind: input, shape index: {}]   ;;  %s900_s1 = inlined_call_operand.vmem [shape: bf16[128,4096], index: 1, kind: input, shape index: {}]   ;;  %s901_s2 = inlined_call_operand.vmem [shape: f32[1,4096], index: 2, kind: input, shape index: {}]   ;;  %s902_s3 = inlined_call_operand.vmem [shape: bf16[8,4096], index: 3, kind: output, shape index: {}]  }
   0x1   :  { %s814_s14 = smov 0   ;;  %s816_s15 = smov 0  }
   0x2   :  { %s818_s16 = smov 0  }
   0x3 LB: > { %s28_s17 = sadd.s32 1, %s783_s15  ;;  %p76_p1 = scmp.ne.s32.totalorder %s775_s13, %s771_s12  ;;  %s787_s16 = sphi %s818_s16, %s13_s16   ;;  %s783_s15 = sphi %s816_s15, %s906_s15   ;;  %s779_s14 = sphi %s814_s14, %s905_s14   ;;  %s775_s13 = sphi %s812_s13, %s904_s13   ;;  %s771_s12 = sphi %s810_s12, %s903_s12  }
   0x4   : > { %p30_p0 = scmp.ge.s32.totalorder %s28_s17, 16  ;;  %p77_p2 = scmp.eq.s32.totalorder %s787_s16, 0 }
   0x5   : > { %s69_s19 = sadd.s32 1, %s775_s13  ;;  %p654_p5 = scmp.ge.s32.totalorder %s787_s16, 16 }
   0x6   : > { %s908_s17 = smov (%p30_p0, %s28_s17), 0  ;;  %p78_p3 = por %p77_p2, %p76_p1 }
   0x7   : > { %s65_s18 = ssub.s32 %s783_s15, %s908_s17  ;;  %166 = sbr.rel (%p654_p5) target bundleno = 32 (0x20), region = 20 }
   0x8   : > { %p67_p4 = scmp.eq.s32.totalorder %s65_s18, 0 }
   0xa   : > { %s845_s20 = scalar_select %p67_p4, %s775_s13, %s69_s19  }
   0xc   : > { %169 = sbr.rel (!%p78_p3) target bundleno = 32 (0x20), region = 24  ;;  %s171_s21 = sand.u32 (%p78_p3), 1, %s775_s13  }
   0xd   : > { %s682_s22 = sshll.u32 (%p78_p3), %s783_s15, 3  ;;  %s655_s23 = sshll.u32 (%p78_p3), %s171_s21, 7 }
   0xe   : > { %s853_s26 = scalar_lea.vmem (%p78_p3), %s900_s1, %s682_s22  ;;  %s173_s27 = scalar_lea.vmem (%p78_p3), [#allocation3], %s655_s23 }
   0xf   : > { %v238_v0 = vld [vmem:[%s853_s26] sm:$0xff] (%p78_p3) }
  0x10   : > { %v240_v1 = vld [vmem:[%s853_s26 + $0x80] sm:$0xff] (%p78_p3)  ;;  %239 = vst [vmem:[%s173_s27] sm:$0xff] (%p78_p3), %v238_v0 }
  0x11   : > { %v242_v2 = vld [vmem:[%s853_s26 + $0x100] sm:$0xff]  ;;  %241 = vst [vmem:[%s173_s27 + $0x8] sm:$0xff] %v240_v1 }
  0x12   : > { %243 = vst [vmem:[%s173_s27 + $0x10] sm:$0xff] %v242_v2  ;;  %v244_v3 = vld [vmem:[%s853_s26 + $0x180] sm:$0xff] }
  0x13   : > { %v246_v4 = vld [vmem:[%s853_s26 + $0x200] sm:$0xff]  ;;  %245 = vst [vmem:[%s173_s27 + $0x18] sm:$0xff] %v244_v3 }
  0x14   : > { %v248_v5 = vld [vmem:[%s853_s26 + $0x280] sm:$0xff]  ;;  %247 = vst [vmem:[%s173_s27 + $0x20] sm:$0xff] %v246_v4 }
  0x15   : > { %249 = vst [vmem:[%s173_s27 + $0x28] sm:$0xff] %v248_v5  ;;  %v250_v6 = vld [vmem:[%s853_s26 + $0x300] sm:$0xff] }
  0x16   : > { %v252_v7 = vld [vmem:[%s853_s26 + $0x380] sm:$0xff]  ;;  %251 = vst [vmem:[%s173_s27 + $0x30] sm:$0xff] %v250_v6 }
  0x17   : > { %v254_v8 = vld [vmem:[%s853_s26 + $0x400] sm:$0xff]  ;;  %253 = vst [vmem:[%s173_s27 + $0x38] sm:$0xff] %v252_v7 }
  0x18   : > { %255 = vst [vmem:[%s173_s27 + $0x40] sm:$0xff] %v254_v8  ;;  %v256_v9 = vld [vmem:[%s853_s26 + $0x480] sm:$0xff] }
  0x19   : > { %v258_v10 = vld [vmem:[%s853_s26 + $0x500] sm:$0xff]  ;;  %257 = vst [vmem:[%s173_s27 + $0x48] sm:$0xff] %v256_v9 }
  0x1a   : > { %v260_v11 = vld [vmem:[%s853_s26 + $0x580] sm:$0xff]  ;;  %259 = vst [vmem:[%s173_s27 + $0x50] sm:$0xff] %v258_v10 }
  0x1b   : > { %261 = vst [vmem:[%s173_s27 + $0x58] sm:$0xff] %v260_v11  ;;  %v262_v12 = vld [vmem:[%s853_s26 + $0x600] sm:$0xff] }
  0x1c   : > { %v264_v13 = vld [vmem:[%s853_s26 + $0x680] sm:$0xff]  ;;  %263 = vst [vmem:[%s173_s27 + $0x60] sm:$0xff] %v262_v12 }
  0x1d   : > { %v266_v14 = vld [vmem:[%s853_s26 + $0x700] sm:$0xff]  ;;  %265 = vst [vmem:[%s173_s27 + $0x68] sm:$0xff] %v264_v13 }
  0x1e   : > { %267 = vst [vmem:[%s173_s27 + $0x70] sm:$0xff] %v266_v14  ;;  %v268_v15 = vld [vmem:[%s853_s26 + $0x780] sm:$0xff] }
  0x1f   : > { %269 = vst [vmem:[%s173_s27 + $0x78] sm:$0xff] %v268_v15 }
  0x20 PF: > { %p658_p6 = scmp.ge.s32.totalorder %s787_s16, 1  ;;  %p282_p7 = scmp.lt.s32.totalorder %s787_s16, 17 }
  0x22   : > { %p283_p8 = pnand %p658_p6, %p282_p7 }
  0x23   : > { %s289_s28 = sand.u32 (!%p283_p8), 1, %s771_s12   ;;  %s660_s6 = sshll.u32 (!%p283_p8), %s779_s14, 1 }
  0x24   : > { %286 = sbr.rel (%p283_p8) target bundleno = 274 (0x112), region = 66  ;;  %s659_s29 = sshll.u32 (!%p283_p8), %s289_s28, 7 }
  0x25   : > { %s291_s30 = scalar_lea.vmem (!%p283_p8), [#allocation3], %s659_s29  ;;  %p337_p9 = scmp.lt.s32.totalorder (!%p283_p8), %s660_s6, 31 }
  0x29   : > { %v789_v16 = vmov 0   ;;  %v725_v17 = vld [vmem:[%s291_s30 + $0x74] ss:$8 sps:$4 sm:$0xff]   ;;  %v727_v18 = vld [vmem:[%s291_s30 + $0x70] ss:$8 sps:$4 sm:$0xff]   ;;  %v509_v34 = vlaneseq  ;;  %s910_s6 = smov (!%p337_p9, %s660_s6), 31 }
  0x2a   : > { %489 = vmatprep.mubr.bf16.mxu0 %v789_v16  ;;  %457 = vmatprep.subr.bf16.mxu0 %v725_v17  ;;  %v728_v19 = vld [vmem:[%s291_s30 + $0x64] ss:$8 sps:$4 sm:$0xff]   ;;  %v730_v20 = vld [vmem:[%s291_s30 + $0x60] ss:$8 sps:$4 sm:$0xff]   ;;  %v731_v21 = vld [vmem:[%s291_s30 + $0x54] ss:$8 sps:$4 sm:$0xff]   ;;  %s339_s9 = scalar_lea.vmem %s901_s2, %s910_s6 }
  0x2b   : > { %458 = vmatpush1.bf16.msra.mxu0 %v727_v18  ;;  %v733_v22 = vld [vmem:[%s291_s30 + $0x50] ss:$8 sps:$4 sm:$0xff]   ;;  %v734_v23 = vld [vmem:[%s291_s30 + $0x44] ss:$8 sps:$4 sm:$0xff]   ;;  %v736_v24 = vld [vmem:[%s291_s30 + $0x40] ss:$8 sps:$4 sm:$0xff]  }
  0x2c   : > { %459 = vmatprep.subr.bf16.mxu0 %v728_v19  ;;  %v737_v25 = vld [vmem:[%s291_s30 + $0x34] ss:$8 sps:$4 sm:$0xff]   ;;  %v739_v26 = vld [vmem:[%s291_s30 + $0x30] ss:$8 sps:$4 sm:$0xff]   ;;  %v740_v27 = vld [vmem:[%s291_s30 + $0x24] ss:$8 sps:$4 sm:$0xff]  }
  0x2d   : > { %v742_v28 = vld [vmem:[%s291_s30 + $0x20] ss:$8 sps:$4 sm:$0xff]   ;;  %v743_v29 = vld [vmem:[%s291_s30 + $0x14] ss:$8 sps:$4 sm:$0xff]   ;;  %v745_v30 = vld [vmem:[%s291_s30 + $0x10] ss:$8 sps:$4 sm:$0xff]  }
  0x2e   : > { %v746_v31 = vld [vmem:[%s291_s30 + $0x4] ss:$8 sps:$4 sm:$0xff]   ;;  %v748_v32 = vld [vmem:[%s291_s30] ss:$8 sps:$4 sm:$0xff]   ;;  %v510_v35 = vshrl.u32 %v509_v34, 7  ;;  %s662_s10 = sshll.u32 %s910_s6, 2 }
  0x2f   : > { %460 = vmatpush1.bf16.msra.mxu0 %v730_v20  ;;  %v360_v33 = vld [vmem:[%s899_s0] sm:$0xf]  ;;  %s349_s14 = scalar_lea.vmem %s902_s3, %s662_s10 }
  0x30   : > { %461 = vmatprep.subr.bf16.mxu0 %v731_v21  ;;  %v511_v36 = vsub.s32 0, %v510_v35  ;;  %v515_v37 = vsub.s32 1, %v510_v35  ;;  %v507_v38 = vld [vmem:[%s339_s9] sm:$0x3] }
  0x32   : > { %v512_v39 = vrot.slane %v507_v38, %v511_v36  ;;  %v516_v40 = vrot.slane %v507_v38, %v515_v37 }
  0x33   : > { %462 = vmatpush1.bf16.msra.mxu0 %v733_v22 }
  0x34   : > { %463 = vmatprep.subr.bf16.mxu0 %v734_v23 }
  0x37   : > { %464 = vmatpush1.bf16.msra.mxu0 %v736_v24 }
  0x38   : > { %465 = vmatprep.subr.bf16.mxu0 %v737_v25 }
  0x3b   : > { %466 = vmatpush1.bf16.msra.mxu0 %v739_v26 }
  0x3c   : > { %467 = vmatprep.subr.bf16.mxu0 %v740_v27 }
  0x3f   : > { %468 = vmatpush1.bf16.msra.mxu0 %v742_v28 }
  0x40   : > { %469 = vmatprep.subr.bf16.mxu0 %v743_v29 }
  0x43   : > { %470 = vmatpush1.bf16.msra.mxu0 %v745_v30 }
  0x44   : > { %471 = vmatprep.subr.bf16.mxu0 %v746_v31 }
  0x47   : > { %472 = vmatpush1.bf16.msra.mxu0 %v748_v32 }
  0x4a   : > { %490 = vmatmul.mubr.bf16.vlgmr.msra.gmra.mxu0 %v360_v33 }
 0x10a   : > { %v491_v41 = vpop.f32.mrf.mxu0 }
 0x10b   : > { %v519_v43 = vadd.f32 %v512_v39, %v491_v41 }
 0x10c   : > { %v493_v42 = vpop.f32.mrf.mxu0 }
 0x10d   : > { %v520_v44 = vadd.f32 %v516_v40, %v493_v42 }
 0x10e   : > { %v495_v45 = vpop.f32.mrf.mxu0 }
 0x10f   : > { %v683_v46 = vpack.c.bf16 %v520_v44, %v519_v43 }
 0x110   : > { %v496_v47 = vpop.f32.mrf.mxu0 }
 0x111   : > { %529 = vst [vmem:[%s349_s14] sm:$0xff] %v683_v46 }
 0x112 PF: > { %s13_s16 = sadd.s32 1, %s787_s16   ;;  %s903_s12 = smov %s775_s13 }
 0x113   : > { %p10_p10 = scmp.ge.s32.totalorder %s13_s16, 18   ;;  %s904_s13 = smov %s845_s20 }
 0x114   : > { %s905_s14 = smov %s783_s15  ;;  %s906_s15 = smov %s908_s17 }
 0x115   :  { %12 = sbr.rel (!%p10_p10) target bundleno = 3 (0x3), region = 119 }

// kernel: vae_forward.16
= control target key start
LH: loop header
LB: loop body
LE: loop exit
PB: predicated region body
PF: predicated region fallthrough
CT: control target
= control target key end

     0   :  { %s1632_s0 = inlined_call_operand.vmem [shape: bf16[32,2304], index: 0, kind: input, shape index: {}]   ;;  %s1633_s1 = inlined_call_operand.vmem [shape: bf16[2304,512], index: 1, kind: input, shape index: {}]   ;;  %s1634_s2 = inlined_call_operand.vmem [shape: f32[1,512], index: 2, kind: input, shape index: {}]   ;;  %s1635_s3 = inlined_call_operand.vmem [shape: bf16[32,512], index: 3, kind: output, shape index: {}]  }
   0x1   :  { %1637 = sst [smem:[#allocation7_spill]] %s1632_s0 }
   0x2   :  { %1638 = sst [smem:[#allocation8_spill]] %s1633_s1 }
   0x3   :  { %s1342_s12 = smov 0   ;;  %s1344_s13 = smov 0  }
   0x4   :  { %s1346_s14 = smov 0   ;;  %s1348_s15 = smov 0  }
   0x5   :  { %s1350_s16 = smov 0   ;;  %s1352_s17 = smov 0  }
   0x6   :  { %s1354_s18 = smov 0   ;;  %s1356_s19 = smov 0  }
   0x7   :  { %s1358_s20 = smov 0   ;;  %s1360_s21 = smov 0  }
   0x8   :  { %s1362_s22 = smov 0  }
   0x9 LB: > { %s987_s23 = sadd.s32 4294967295, %s1319_s22   ;;  %s25_s24 = sadd.s32 1, %s1311_s20  ;;  %s1319_s22 = sphi %s1362_s22, %s13_s22   ;;  %s1315_s21 = sphi %s1360_s21, %s1655_s21   ;;  %s1311_s20 = sphi %s1358_s20, %s1654_s20   ;;  %s1307_s19 = sphi %s1356_s19, %s1653_s19   ;;  %s1303_s18 = sphi %s1354_s18, %s1652_s18   ;;  %s1299_s17 = sphi %s1352_s17, %s1651_s17   ;;  %s1295_s16 = sphi %s1350_s16, %s1650_s16   ;;  %s1291_s15 = sphi %s1348_s15, %s1649_s15   ;;  %s1287_s14 = sphi %s1346_s14, %s1648_s14   ;;  %s1283_s13 = sphi %s1344_s13, %s1647_s13   ;;  %s1279_s12 = sphi %s1342_s12, %s1646_s12  }
   0xa   : > { %p26_p0 = scmp.ge.s32.totalorder %s25_s24, 9  ;;  %s28_s25 = sadd.s32 1, %s1315_s21 }
   0xb   : > { %s41_s26 = sadd.s32 1, %s1299_s17  ;;  %p48_p1 = scmp.ne.s32.totalorder %s1299_s17, %s1295_s16 }
   0xc   : > { %s1657_s24 = smov (%p26_p0, %s25_s24), 0  ;;  %s1659_s25 = smov (!%p26_p0, %s28_s25), %s1315_s21 }
   0xd   : > { %s37_s27 = ssub.s32 %s1311_s20, %s1657_s24  ;;  %p49_p2 = scmp.eq.s32.totalorder %s1319_s22, 0 }
   0xe   : > { %p30_p3 = scmp.ge.s32.totalorder %s1659_s25, 2  ;;  %p39_p4 = scmp.eq.s32.totalorder %s37_s27, 0 }
   0xf   : > { %p1409_p5 = por %p49_p2, %p48_p1  ;;  %s69_s29 = sadd.s32 1, %s1291_s15 }
  0x10   : > { %s1661_s25 = smov (%p30_p3, %s1659_s25), 0  ;;  %p76_p6 = scmp.ne.s32.totalorder %s1291_s15, %s1287_s14 }
  0x11   : > { %1640 = sst [smem:[#allocation6_spill]] %s1661_s25  ;;  %s65_s4 = ssub.s32 %s1315_s21, %s1661_s25 }
  0x12   : > { %s1417_s30 = scalar_select %p39_p4, %s1299_s17, %s41_s26  }
  0x13   : > { %s66_s5 = sor.u32 %s65_s4, %s37_s27  ;;  %p121_p7 = scmp.eq.s32.totalorder %s65_s4, 0 }
  0x14   : > { %p67_p8 = scmp.eq.s32.totalorder %s66_s5, 0  ;;  %p1423_p9 = por %p76_p6, %p49_p2 }
  0x15   : > { %s123_s7 = sadd.s32 1, %s1283_s13  ;;  %p133_p10 = scmp.ne.s32.totalorder %s1283_s13, %s1279_s12 }
  0x16   : > { %s1431_s8 = scalar_select %p67_p8, %s1291_s15, %s69_s29  }
  0x17   : > { %s1434_s9 = scalar_select %p121_p7, %s1283_s13, %s123_s7  }
  0x18   : > { %p134_p11 = scmp.eq.s32.totalorder %s987_s23, 17  ;;  %p990_p13 = scmp.ge.s32.totalorder %s1319_s22, 18 }
  0x1a   : > { %p1436_p12 = por %p134_p11, %p133_p10  ;;  %156 = sbr.rel (%p990_p13) target bundleno = 69 (0x45), region = 16 }
  0x1f   : > { %159 = sbr.rel (!%p1409_p5) target bundleno = 43 (0x2b), region = 20  ;;  %s161_s11 = sand.u32 (%p1409_p5), 1, %s1299_s17  }
  0x20   : > { %s1051_s26 = sshll.u32 (%p1409_p5), %s1311_s20, 3  ;;  %s991_s27 = sshll.u32 (%p1409_p5), %s161_s11, 5 }
  0x21   : > { %s1643_s0 = sld [smem:[#allocation7_spill]] (%p1409_p5)  ;;  %s163_s23 = scalar_lea.vmem (%p1409_p5), [#allocation3], %s991_s27 }
  0x27   : > { %s169_s5 = scalar_lea.vmem %s1643_s0, %s1051_s26 }
  0x28   : > { %v204_v0 = vld [vmem:[%s169_s5] sm:$0xff]  ;;  %v206_v1 = vld [vmem:[%s169_s5 + $0x48] sm:$0xff]  ;;  %v208_v2 = vld [vmem:[%s169_s5 + $0x90] sm:$0xff] }
  0x29   : > { %205 = vst [vmem:[%s163_s23] sm:$0xff] %v204_v0  ;;  %207 = vst [vmem:[%s163_s23 + $0x8] sm:$0xff] %v206_v1  ;;  %v210_v3 = vld [vmem:[%s169_s5 + $0xd8] sm:$0xff] }
  0x2a   : > { %209 = vst [vmem:[%s163_s23 + $0x10] sm:$0xff] %v208_v2  ;;  %211 = vst [vmem:[%s163_s23 + $0x18] sm:$0xff] %v210_v3 }
  0x2b PF: > { %217 = sbr.rel (!%p1423_p9) target bundleno = 69 (0x45), region = 58  ;;  %s219_s28 = sand.u32 (%p1423_p9), 1, %s1291_s15  }
  0x2c   : > { %s996_s7 = sshll.u32 (%p1423_p9), %s1315_s21, 1  ;;  %s994_s11 = sshll.u32 (%p1423_p9), %s219_s28, 8 }
  0x2d   : > { %s1052_s26 = sshll.u32 (%p1423_p9), %s1311_s20, 7  ;;  %s1644_s1 = sld [smem:[#allocation8_spill]] (%p1423_p9) }
  0x2e   : > { %s225_s29 = sadd.s32 (%p1423_p9), %s1052_s26, %s996_s7  ;;  %s1461_s6 = scalar_lea.vmem (%p1423_p9), [#allocation4], %s994_s11 }
  0x2f   : > { %s998_s4 = sshll.u32 (%p1423_p9), %s225_s29, 2 }
  0x33   : > { %s1456_s25 = scalar_lea.vmem %s1644_s1, %s998_s4 }
  0x34   : > { %v318_v4 = vld [vmem:[%s1456_s25] sm:$0xff]  ;;  %v320_v5 = vld [vmem:[%s1456_s25 + $0x10] sm:$0xff] }
  0x35   : > { %v322_v6 = vld [vmem:[%s1456_s25 + $0x20] sm:$0xff]  ;;  %319 = vst [vmem:[%s1461_s6] sm:$0xff] %v318_v4  ;;  %321 = vst [vmem:[%s1461_s6 + $0x8] sm:$0xff] %v320_v5  ;;  %v324_v7 = vld [vmem:[%s1456_s25 + $0x30] sm:$0xff] }
  0x36   : > { %323 = vst [vmem:[%s1461_s6 + $0x10] sm:$0xff] %v322_v6  ;;  %v326_v8 = vld [vmem:[%s1456_s25 + $0x40] sm:$0xff]  ;;  %v328_v9 = vld [vmem:[%s1456_s25 + $0x50] sm:$0xff]  ;;  %325 = vst [vmem:[%s1461_s6 + $0x18] sm:$0xff] %v324_v7 }
  0x37   : > { %327 = vst [vmem:[%s1461_s6 + $0x20] sm:$0xff] %v326_v8  ;;  %329 = vst [vmem:[%s1461_s6 + $0x28] sm:$0xff] %v328_v9  ;;  %v330_v10 = vld [vmem:[%s1456_s25 + $0x60] sm:$0xff]  ;;  %v332_v11 = vld [vmem:[%s1456_s25 + $0x70] sm:$0xff] }
  0x38   : > { %v334_v12 = vld [vmem:[%s1456_s25 + $0x80] sm:$0xff]  ;;  %331 = vst [vmem:[%s1461_s6 + $0x30] sm:$0xff] %v330_v10  ;;  %333 = vst [vmem:[%s1461_s6 + $0x38] sm:$0xff] %v332_v11  ;;  %v336_v13 = vld [vmem:[%s1456_s25 + $0x90] sm:$0xff] }
  0x39   : > { %335 = vst [vmem:[%s1461_s6 + $0x40] sm:$0xff] %v334_v12  ;;  %v338_v14 = vld [vmem:[%s1456_s25 + $0xa0] sm:$0xff]  ;;  %v340_v15 = vld [vmem:[%s1456_s25 + $0xb0] sm:$0xff]  ;;  %337 = vst [vmem:[%s1461_s6 + $0x48] sm:$0xff] %v336_v13 }
  0x3a   : > { %339 = vst [vmem:[%s1461_s6 + $0x50] sm:$0xff] %v338_v14  ;;  %341 = vst [vmem:[%s1461_s6 + $0x58] sm:$0xff] %v340_v15  ;;  %v342_v16 = vld [vmem:[%s1456_s25 + $0xc0] sm:$0xff]  ;;  %v344_v17 = vld [vmem:[%s1456_s25 + $0xd0] sm:$0xff] }
  0x3b   : > { %v346_v18 = vld [vmem:[%s1456_s25 + $0xe0] sm:$0xff]  ;;  %343 = vst [vmem:[%s1461_s6 + $0x60] sm:$0xff] %v342_v16  ;;  %345 = vst [vmem:[%s1461_s6 + $0x68] sm:$0xff] %v344_v17  ;;  %v348_v19 = vld [vmem:[%s1456_s25 + $0xf0] sm:$0xff] }
  0x3c   : > { %347 = vst [vmem:[%s1461_s6 + $0x70] sm:$0xff] %v346_v18  ;;  %v350_v20 = vld [vmem:[%s1456_s25 + $0x100] sm:$0xff]  ;;  %v352_v21 = vld [vmem:[%s1456_s25 + $0x110] sm:$0xff]  ;;  %349 = vst [vmem:[%s1461_s6 + $0x78] sm:$0xff] %v348_v19 }
  0x3d   : > { %351 = vst [vmem:[%s1461_s6 + $0x80] sm:$0xff] %v350_v20  ;;  %353 = vst [vmem:[%s1461_s6 + $0x88] sm:$0xff] %v352_v21  ;;  %v354_v22 = vld [vmem:[%s1456_s25 + $0x120] sm:$0xff]  ;;  %v356_v23 = vld [vmem:[%s1456_s25 + $0x130] sm:$0xff] }
  0x3e   : > { %v358_v24 = vld [vmem:[%s1456_s25 + $0x140] sm:$0xff]  ;;  %355 = vst [vmem:[%s1461_s6 + $0x90] sm:$0xff] %v354_v22  ;;  %357 = vst [vmem:[%s1461_s6 + $0x98] sm:$0xff] %v356_v23  ;;  %v360_v25 = vld [vmem:[%s1456_s25 + $0x150] sm:$0xff] }
  0x3f   : > { %359 = vst [vmem:[%s1461_s6 + $0xa0] sm:$0xff] %v358_v24  ;;  %v362_v26 = vld [vmem:[%s1456_s25 + $0x160] sm:$0xff]  ;;  %v364_v27 = vld [vmem:[%s1456_s25 + $0x170] sm:$0xff]  ;;  %361 = vst [vmem:[%s1461_s6 + $0xa8] sm:$0xff] %v360_v25 }
  0x40   : > { %363 = vst [vmem:[%s1461_s6 + $0xb0] sm:$0xff] %v362_v26  ;;  %365 = vst [vmem:[%s1461_s6 + $0xb8] sm:$0xff] %v364_v27  ;;  %v366_v28 = vld [vmem:[%s1456_s25 + $0x180] sm:$0xff]  ;;  %v368_v29 = vld [vmem:[%s1456_s25 + $0x190] sm:$0xff] }
  0x41   : > { %v370_v30 = vld [vmem:[%s1456_s25 + $0x1a0] sm:$0xff]  ;;  %367 = vst [vmem:[%s1461_s6 + $0xc0] sm:$0xff] %v366_v28  ;;  %369 = vst [vmem:[%s1461_s6 + $0xc8] sm:$0xff] %v368_v29  ;;  %v372_v31 = vld [vmem:[%s1456_s25 + $0x1b0] sm:$0xff] }
  0x42   : > { %371 = vst [vmem:[%s1461_s6 + $0xd0] sm:$0xff] %v370_v30  ;;  %v374_v32 = vld [vmem:[%s1456_s25 + $0x1c0] sm:$0xff]  ;;  %v376_v33 = vld [vmem:[%s1456_s25 + $0x1d0] sm:$0xff]  ;;  %373 = vst [vmem:[%s1461_s6 + $0xd8] sm:$0xff] %v372_v31 }
  0x43   : > { %375 = vst [vmem:[%s1461_s6 + $0xe0] sm:$0xff] %v374_v32  ;;  %377 = vst [vmem:[%s1461_s6 + $0xe8] sm:$0xff] %v376_v33  ;;  %v378_v34 = vld [vmem:[%s1456_s25 + $0x1e0] sm:$0xff]  ;;  %v380_v35 = vld [vmem:[%s1456_s25 + $0x1f0] sm:$0xff] }
  0x44   : > { %379 = vst [vmem:[%s1461_s6 + $0xf0] sm:$0xff] %v378_v34  ;;  %381 = vst [vmem:[%s1461_s6 + $0xf8] sm:$0xff] %v380_v35 }
  0x45 PF: > { %p999_p0 = scmp.ge.s32.totalorder %s1319_s22, 1  ;;  %p394_p1 = scmp.lt.s32.totalorder %s1319_s22, 19 }
  0x47   : > { %p395_p2 = pnand %p999_p0, %p394_p1 }
  0x48   : > { %s401_s0 = sand.u32 (!%p395_p2), 1, %s1295_s16   ;;  %s408_s5 = sand.u32 (!%p395_p2), 1, %s1287_s14  }
  0x49   : > { %398 = sbr.rel (%p395_p2) target bundleno = 381 (0x17d), region = 100  ;;  %s1000_s23 = sshll.u32 (!%p395_p2), %s401_s0, 5 }
  0x4a   : > { %s1001_s28 = sshll.u32 (!%p395_p2), %s408_s5, 8  ;;  %s435_s7 = sand.u32 (!%p395_p2), 1, %s1279_s12  }
  0x4b   : > { %s1003_s25 = sshll.u32 (!%p395_p2), %s1307_s19, 1  ;;  %s1002_s11 = sshll.u32 (!%p395_p2), %s435_s7, 5 }
  0x4c   : > { %p443_p3 = scmp.lt.s32.totalorder (!%p395_p2), %s1003_s25, 3  ;;  %s1536_s27 = scalar_lea.vmem (!%p395_p2), [#allocation3], %s1000_s23 }
  0x4d   : > { %s1538_s6 = scalar_lea.vmem (!%p395_p2), [#allocation4], %s1001_s28  ;;  %s1540_s1 = scalar_lea.vmem (!%p395_p2), [#allocation5], %s1002_s11 }
  0x4e   : > { %s1663_s25 = smov (!%p443_p3, %s1003_s25), 3  ;;  %p1004_p4 = scmp.ne.s32.totalorder %s1303_s18, 0 }
  0x4f   : > { %s445_s4 = scalar_lea.vmem %s1634_s2, %s1663_s25 }
  0x50   : > { %452 = sbr.rel (%p1004_p4) target bundleno = 90 (0x5a), region = 112 }
  0x55   : > { %v1321_v36 = vmov 0.0  }
  0x56   : > { %453 = vst [vmem:[#allocation2 + $0x30] sm:$0xff] %v1321_v36  ;;  %454 = vst [vmem:[#allocation2] sm:$0xff] %v1321_v36 }
  0x57   : > { %455 = vst [vmem:[#allocation2 + $0x18] sm:$0xff] %v1321_v36  ;;  %456 = vst [vmem:[#allocation2 + $0x10] sm:$0xff] %v1321_v36 }
  0x58   : > { %457 = vst [vmem:[#allocation2 + $0x8] sm:$0xff] %v1321_v36  ;;  %458 = vst [vmem:[#allocation2 + $0x20] sm:$0xff] %v1321_v36 }
  0x59   : > { %459 = vst [vmem:[#allocation2 + $0x28] sm:$0xff] %v1321_v36  ;;  %460 = vst [vmem:[#allocation2 + $0x38] sm:$0xff] %v1321_v36 }
  0x5a PF: > { %v1179_v37 = vld [vmem:[%s1538_s6 + $0x74] ss:$8 sps:$4 sm:$0xff]   ;;  %v1181_v38 = vld [vmem:[%s1538_s6 + $0x70] ss:$8 sps:$4 sm:$0xff]   ;;  %v1182_v39 = vld [vmem:[%s1538_s6 + $0x64] ss:$8 sps:$4 sm:$0xff]  }
  0x5b   : > { %685 = vmatprep.subr.bf16.mxu0 %v1179_v37  ;;  %1058 = vmatprep.subr.bf16.mxu1 %v1179_v37  ;;  %v1184_v40 = vld [vmem:[%s1538_s6 + $0x60] ss:$8 sps:$4 sm:$0xff]   ;;  %v1185_v41 = vld [vmem:[%s1538_s6 + $0x54] ss:$8 sps:$4 sm:$0xff]   ;;  %v1187_v42 = vld [vmem:[%s1538_s6 + $0x50] ss:$8 sps:$4 sm:$0xff]  }
  0x5c   : > { %686 = vmatpush1.bf16.msra.mxu0 %v1181_v38  ;;  %1074 = vmatpush1.bf16.msra.mxu1 %v1181_v38  ;;  %v1188_v43 = vld [vmem:[%s1538_s6 + $0x44] ss:$8 sps:$4 sm:$0xff]   ;;  %v1190_v44 = vld [vmem:[%s1538_s6 + $0x40] ss:$8 sps:$4 sm:$0xff]   ;;  %v1191_v45 = vld [vmem:[%s1538_s6 + $0x34] ss:$8 sps:$4 sm:$0xff]  }
  0x5d   : > { %687 = vmatprep.subr.bf16.mxu0 %v1182_v39  ;;  %1059 = vmatprep.subr.bf16.mxu1 %v1182_v39  ;;  %v1193_v46 = vld [vmem:[%s1538_s6 + $0x30] ss:$8 sps:$4 sm:$0xff]   ;;  %v1194_v47 = vld [vmem:[%s1538_s6 + $0x24] ss:$8 sps:$4 sm:$0xff]   ;;  %v1196_v48 = vld [vmem:[%s1538_s6 + $0x20] ss:$8 sps:$4 sm:$0xff]  }
  0x5e   : > { %v1197_v49 = vld [vmem:[%s1538_s6 + $0x14] ss:$8 sps:$4 sm:$0xff]   ;;  %v1229_v50 = vld [vmem:[%s1536_s27 + $0x4] ss:$8 sps:$4 sm:$0xff]   ;;  %v1199_v51 = vld [vmem:[%s1538_s6 + $0x10] ss:$8 sps:$4 sm:$0xff]  }
  0x5f   : > { %v1232_v52 = vld [vmem:[%s1536_s27 + $0x14] ss:$8 sps:$4 sm:$0xff]   ;;  %v1200_v53 = vld [vmem:[%s1538_s6 + $0x4] ss:$8 sps:$4 sm:$0xff]   ;;  %717 = vmatprep.mubr.bf16.mxu0 %v1229_v50  ;;  %v1202_v54 = vld [vmem:[%s1538_s6] ss:$8 sps:$4 sm:$0xff]  }
  0x60   : > { %688 = vmatpush1.bf16.msra.mxu0 %v1184_v40  ;;  %1075 = vmatpush1.bf16.msra.mxu1 %v1184_v40  ;;  %v1203_v55 = vld [vmem:[%s1538_s6 + $0xf4] ss:$8 sps:$4 sm:$0xff]   ;;  %v1205_v56 = vld [vmem:[%s1538_s6 + $0xf0] ss:$8 sps:$4 sm:$0xff]   ;;  %v1206_v57 = vld [vmem:[%s1538_s6 + $0xe4] ss:$8 sps:$4 sm:$0xff]  }
  0x61   : > { %689 = vmatprep.subr.bf16.mxu0 %v1185_v41  ;;  %1060 = vmatprep.subr.bf16.mxu1 %v1185_v41  ;;  %v1208_v58 = vld [vmem:[%s1538_s6 + $0xe0] ss:$8 sps:$4 sm:$0xff]   ;;  %v1209_v59 = vld [vmem:[%s1538_s6 + $0xd4] ss:$8 sps:$4 sm:$0xff]   ;;  %v1211_v60 = vld [vmem:[%s1538_s6 + $0xd0] ss:$8 sps:$4 sm:$0xff]  }
  0x62   : > { %727 = vmatprep.mubr.bf16.mxu1 %v1232_v52  ;;  %v1212_v61 = vld [vmem:[%s1538_s6 + $0xc4] ss:$8 sps:$4 sm:$0xff]   ;;  %v1214_v62 = vld [vmem:[%s1538_s6 + $0xc0] ss:$8 sps:$4 sm:$0xff]   ;;  %v1215_v63 = vld [vmem:[%s1538_s6 + $0xb4] ss:$8 sps:$4 sm:$0xff]  }
  0x63   : > { %v1217_v0 = vld [vmem:[%s1538_s6 + $0xb0] ss:$8 sps:$4 sm:$0xff]   ;;  %v1218_v1 = vld [vmem:[%s1538_s6 + $0xa4] ss:$8 sps:$4 sm:$0xff]   ;;  %v1220_v2 = vld [vmem:[%s1538_s6 + $0xa0] ss:$8 sps:$4 sm:$0xff]  }
  0x64   : > { %690 = vmatpush1.bf16.msra.mxu0 %v1187_v42  ;;  %1076 = vmatpush1.bf16.msra.mxu1 %v1187_v42  ;;  %v1221_v3 = vld [vmem:[%s1538_s6 + $0x94] ss:$8 sps:$4 sm:$0xff]   ;;  %v1223_v4 = vld [vmem:[%s1538_s6 + $0x90] ss:$8 sps:$4 sm:$0xff]   ;;  %v1224_v5 = vld [vmem:[%s1538_s6 + $0x84] ss:$8 sps:$4 sm:$0xff]  }
  0x65   : > { %691 = vmatprep.subr.bf16.mxu0 %v1188_v43  ;;  %1061 = vmatprep.subr.bf16.mxu1 %v1188_v43  ;;  %v1226_v6 = vld [vmem:[%s1538_s6 + $0x80] ss:$8 sps:$4 sm:$0xff]   ;;  %v1230_v8 = vld [vmem:[%s1536_s27 + $0x10] ss:$8 sps:$4 sm:$0xff]   ;;  %p1041_p5 = scmp.ne.s32.totalorder %s1303_s18, 8 }
  0x66   : > { %v1227_v7 = vld [vmem:[%s1536_s27] ss:$8 sps:$4 sm:$0xff]   ;;  %v461_v9 = vld [vmem:[#allocation2 + $0x30] sm:$0xff]  ;;  %v463_v19 = vld [vmem:[#allocation2 + $0x18] sm:$0xff] }
  0x67   : > { %v465_v10 = vld [vmem:[#allocation2 + $0x8] sm:$0xff]  ;;  %v462_v13 = vld [vmem:[#allocation2] sm:$0xff]  ;;  %v464_v25 = vld [vmem:[#allocation2 + $0x10] sm:$0xff] }
  0x68   : > { %692 = vmatpush1.bf16.msra.mxu0 %v1190_v44  ;;  %1077 = vmatpush1.bf16.msra.mxu1 %v1190_v44  ;;  %v466_v14 = vld [vmem:[#allocation2 + $0x20] sm:$0xff]  ;;  %v467_v20 = vld [vmem:[#allocation2 + $0x28] sm:$0xff]  ;;  %v468_v26 = vld [vmem:[#allocation2 + $0x38] sm:$0xff] }
  0x69   : > { %693 = vmatprep.subr.bf16.mxu0 %v1191_v45  ;;  %1062 = vmatprep.subr.bf16.mxu1 %v1191_v45 }
  0x6c   : > { %694 = vmatpush1.bf16.msra.mxu0 %v1193_v46  ;;  %1078 = vmatpush1.bf16.msra.mxu1 %v1193_v46 }
  0x6d   : > { %695 = vmatprep.subr.bf16.mxu0 %v1194_v47  ;;  %1063 = vmatprep.subr.bf16.mxu1 %v1194_v47 }
  0x70   : > { %696 = vmatpush1.bf16.msra.mxu0 %v1196_v48  ;;  %1079 = vmatpush1.bf16.msra.mxu1 %v1196_v48 }
  0x71   : > { %697 = vmatprep.subr.bf16.mxu0 %v1197_v49  ;;  %1064 = vmatprep.subr.bf16.mxu1 %v1197_v49 }
  0x74   : > { %698 = vmatpush1.bf16.msra.mxu0 %v1199_v51  ;;  %1080 = vmatpush1.bf16.msra.mxu1 %v1199_v51 }
  0x75   : > { %699 = vmatprep.subr.bf16.mxu0 %v1200_v53  ;;  %1065 = vmatprep.subr.bf16.mxu1 %v1200_v53 }
  0x78   : > { %700 = vmatpush1.bf16.msra.mxu0 %v1202_v54  ;;  %1081 = vmatpush1.bf16.msra.mxu1 %v1202_v54 }
  0x79   : > { %701 = vmatprep.subr.bf16.mxu0 %v1203_v55  ;;  %1066 = vmatprep.subr.bf16.mxu1 %v1203_v55 }
  0x7c   : > { %702 = vmatpush2.bf16.msra.mxu0 %v1205_v56  ;;  %1082 = vmatpush2.bf16.msra.mxu1 %v1205_v56 }
  0x7d   : > { %703 = vmatprep.subr.bf16.mxu0 %v1206_v57  ;;  %1067 = vmatprep.subr.bf16.mxu1 %v1206_v57 }
  0x80   : > { %704 = vmatpush2.bf16.msra.mxu0 %v1208_v58  ;;  %1083 = vmatpush2.bf16.msra.mxu1 %v1208_v58 }
  0x81   : > { %705 = vmatprep.subr.bf16.mxu0 %v1209_v59  ;;  %1068 = vmatprep.subr.bf16.mxu1 %v1209_v59 }
  0x84   : > { %706 = vmatpush2.bf16.msra.mxu0 %v1211_v60  ;;  %1084 = vmatpush2.bf16.msra.mxu1 %v1211_v60 }
  0x85   : > { %707 = vmatprep.subr.bf16.mxu0 %v1212_v61  ;;  %1069 = vmatprep.subr.bf16.mxu1 %v1212_v61 }
  0x88   : > { %708 = vmatpush2.bf16.msra.mxu0 %v1214_v62  ;;  %1085 = vmatpush2.bf16.msra.mxu1 %v1214_v62 }
  0x89   : > { %709 = vmatprep.subr.bf16.mxu0 %v1215_v63  ;;  %1070 = vmatprep.subr.bf16.mxu1 %v1215_v63 }
  0x8c   : > { %710 = vmatpush2.bf16.msra.mxu0 %v1217_v0  ;;  %1086 = vmatpush2.bf16.msra.mxu1 %v1217_v0 }
  0x8d   : > { %711 = vmatprep.subr.bf16.mxu0 %v1218_v1  ;;  %1071 = vmatprep.subr.bf16.mxu1 %v1218_v1 }
  0x90   : > { %712 = vmatpush2.bf16.msra.mxu0 %v1220_v2  ;;  %1087 = vmatpush2.bf16.msra.mxu1 %v1220_v2 }
  0x91   : > { %713 = vmatprep.subr.bf16.mxu0 %v1221_v3  ;;  %1072 = vmatprep.subr.bf16.mxu1 %v1221_v3 }
  0x94   : > { %714 = vmatpush2.bf16.msra.mxu0 %v1223_v4  ;;  %1088 = vmatpush2.bf16.msra.mxu1 %v1223_v4 }
  0x95   : > { %715 = vmatprep.subr.bf16.mxu0 %v1224_v5  ;;  %1073 = vmatprep.subr.bf16.mxu1 %v1224_v5 }
  0x98   : > { %716 = vmatpush2.bf16.msra.mxu0 %v1226_v6  ;;  %1089 = vmatpush2.bf16.msra.mxu1 %v1226_v6 }
  0x9b   : > { %718 = vmatmul.mubr.bf16.vlgmr.msra.gmra.mxu0 %v1227_v7  ;;  %728 = vmatmul.mubr.bf16.vlgmr.msra.gmra.mxu1 %v1230_v8 }
 0x15b   : > { %v719_v11 = vpop.f32.mrf.mxu0  ;;  %v729_v12 = vpop.f32.mrf.mxu1 }
 0x15c   : > { %v738_v15 = vadd.f32 %v719_v11, %v461_v9  ;;  %v742_v16 = vadd.f32 %v729_v12, %v465_v10 }
 0x15d   : > { %v721_v17 = vpop.f32.mrf.mxu0  ;;  %v731_v18 = vpop.f32.mrf.mxu1 }
 0x15e   : > { %746 = vst [vmem:[#allocation2 + $0x30] sm:$0xff] %v738_v15  ;;  %750 = vst [vmem:[#allocation2 + $0x8] sm:$0xff] %v742_v16  ;;  %v739_v21 = vadd.f32 %v721_v17, %v462_v13  ;;  %v743_v22 = vadd.f32 %v731_v18, %v466_v14 }
 0x15f   : > { %v723_v23 = vpop.f32.mrf.mxu0  ;;  %v733_v24 = vpop.f32.mrf.mxu1 }
 0x160   : > { %747 = vst [vmem:[#allocation2] sm:$0xff] %v739_v21  ;;  %751 = vst [vmem:[#allocation2 + $0x20] sm:$0xff] %v743_v22  ;;  %v740_v27 = vadd.f32 %v723_v23, %v463_v19  ;;  %v744_v28 = vadd.f32 %v733_v24, %v467_v20  ;;  %757 = sbr.rel (%p1041_p5) target bundleno = 373 (0x175), region = 116 }
 0x161   : > { %v725_v29 = vpop.f32.mrf.mxu0  ;;  %v735_v30 = vpop.f32.mrf.mxu1 }
 0x162   : > { %748 = vst [vmem:[#allocation2 + $0x18] sm:$0xff] %v740_v27  ;;  %752 = vst [vmem:[#allocation2 + $0x28] sm:$0xff] %v744_v28  ;;  %v741_v31 = vadd.f32 %v725_v29, %v464_v25  ;;  %v745_v32 = vadd.f32 %v735_v30, %v468_v26 }
 0x164   : > { %749 = vst [vmem:[#allocation2 + $0x10] sm:$0xff] %v741_v31  ;;  %753 = vst [vmem:[#allocation2 + $0x38] sm:$0xff] %v745_v32 }
 0x165   : > { %v768_v33 = vlaneseq  ;;  %v766_v35 = vld [vmem:[%s445_s4] sm:$0x3]  ;;  %v758_v36 = vld [vmem:[#allocation2 + $0x30] sm:$0xff]  ;;  %v762_v42 = vld [vmem:[#allocation2 + $0x8] sm:$0xff] }
 0x167   : > { %v769_v34 = vshrl.u32 %v768_v33, 7  ;;  %v759_v37 = vld [vmem:[#allocation2] sm:$0xff] }
 0x168   : > { %v763_v45 = vld [vmem:[#allocation2 + $0x20] sm:$0xff] }
 0x169   : > { %v770_v38 = vsub.s32 0, %v769_v34  ;;  %v774_v39 = vsub.s32 1, %v769_v34  ;;  %v760_v40 = vld [vmem:[#allocation2 + $0x18] sm:$0xff]  ;;  %v764_v46 = vld [vmem:[#allocation2 + $0x28] sm:$0xff] }
 0x16b   : > { %v761_v41 = vld [vmem:[#allocation2 + $0x10] sm:$0xff]  ;;  %v771_v43 = vrot.slane %v766_v35, %v770_v38  ;;  %v775_v44 = vrot.slane %v766_v35, %v774_v39  ;;  %v765_v47 = vld [vmem:[#allocation2 + $0x38] sm:$0xff] }
 0x16d   : > { %v778_v48 = vadd.f32 %v771_v43, %v758_v36  ;;  %v779_v49 = vadd.f32 %v775_v44, %v759_v37  ;;  %v780_v50 = vadd.f32 %v771_v43, %v760_v40  ;;  %v781_v51 = vadd.f32 %v775_v44, %v761_v41 }
 0x16e   : > { %v782_v52 = vadd.f32 %v771_v43, %v762_v42  ;;  %v783_v53 = vadd.f32 %v775_v44, %v763_v45  ;;  %v784_v54 = vadd.f32 %v771_v43, %v764_v46  ;;  %v785_v55 = vadd.f32 %v775_v44, %v765_v47 }
 0x16f   : > { %v786_v56 = vmax.f32 %v778_v48, 0.0  ;;  %v787_v57 = vmax.f32 %v779_v49, 0.0  ;;  %v788_v58 = vmax.f32 %v780_v50, 0.0  ;;  %v789_v59 = vmax.f32 %v781_v51, 0.0 }
 0x170   : > { %v790_v60 = vmax.f32 %v782_v52, 0.0  ;;  %v791_v61 = vmax.f32 %v783_v53, 0.0  ;;  %v792_v62 = vmax.f32 %v784_v54, 0.0  ;;  %v793_v63 = vmax.f32 %v785_v55, 0.0 }
 0x171   : > { %v1053_v0 = vpack.c.bf16 %v787_v57, %v786_v56  ;;  %v1054_v1 = vpack.c.bf16 %v789_v59, %v788_v58 }
 0x172   : > { %v1055_v2 = vpack.c.bf16 %v791_v61, %v790_v60  ;;  %v1056_v3 = vpack.c.bf16 %v793_v63, %v792_v62 }
 0x173   : > { %818 = vst [vmem:[%s1540_s1] sm:$0xff] %v1053_v0  ;;  %819 = vst [vmem:[%s1540_s1 + $0x8] sm:$0xff] %v1054_v1 }
 0x174   : > { %820 = vst [vmem:[%s1540_s1 + $0x10] sm:$0xff] %v1055_v2  ;;  %821 = vst [vmem:[%s1540_s1 + $0x18] sm:$0xff] %v1056_v3 }
 0x175 PF: > { %828 = sbr.rel (!%p1436_p12) target bundleno = 381 (0x17d), region = 120  ;;  %s1057_s16 = sshll.u32 (%p1436_p12), %s1307_s19, 3 }
 0x176   : > { %s834_s5 = scalar_lea.vmem (%p1436_p12), %s1635_s3, %s1057_s16 }
 0x17a   : > { %v869_v4 = vld [vmem:[%s1540_s1] sm:$0xff]  ;;  %v871_v5 = vld [vmem:[%s1540_s1 + $0x8] sm:$0xff] }
 0x17b   : > { %v873_v6 = vld [vmem:[%s1540_s1 + $0x10] sm:$0xff]  ;;  %v875_v7 = vld [vmem:[%s1540_s1 + $0x18] sm:$0xff]  ;;  %870 = vst [vmem:[%s834_s5] sm:$0xff] %v869_v4  ;;  %872 = vst [vmem:[%s834_s5 + $0x10] sm:$0xff] %v871_v5 }
 0x17c   : > { %874 = vst [vmem:[%s834_s5 + $0x20] sm:$0xff] %v873_v6  ;;  %876 = vst [vmem:[%s834_s5 + $0x30] sm:$0xff] %v875_v7 }
 0x17d PF: > { %s13_s22 = sadd.s32 1, %s1319_s22   ;;  %s1645_s10 = sld [smem:[#allocation6_spill]] }
 0x17e   : > { %p10_p6 = scmp.ge.s32.totalorder %s13_s22, 20   ;;  %s1646_s12 = smov %s1283_s13 }
 0x17f   : > { %s1647_s13 = smov %s1434_s9  ;;  %s1648_s14 = smov %s1291_s15 }
 0x180   : > { %s1649_s15 = smov %s1431_s8  ;;  %s1650_s16 = smov %s1299_s17 }
 0x181   : > { %s1651_s17 = smov %s1417_s30  ;;  %s1652_s18 = smov %s1311_s20 }
 0x182   : > { %s1653_s19 = smov %s1315_s21  ;;  %s1654_s20 = smov %s1657_s24 }
 0x183   : > { %s1655_s21 = smov %s1645_s10  ;;  %12 = sbr.rel (!%p10_p6) target bundleno = 9 (0x9), region = 200 }

// kernel: vae_forward.17
= control target key start
LH: loop header
LB: loop body
LE: loop exit
PB: predicated region body
PF: predicated region fallthrough
CT: control target
= control target key end

     0   :  { %s1351_s12 = smov 0   ;;  %s1353_s13 = smov 0   ;;  %s1559_s0 = inlined_call_operand.vmem [shape: bf16[128,1152], index: 0, kind: input, shape index: {}]   ;;  %s1560_s1 = inlined_call_operand.vmem [shape: bf16[1152,256], index: 1, kind: input, shape index: {}]   ;;  %s1561_s2 = inlined_call_operand.vmem [shape: f32[1,256], index: 2, kind: input, shape index: {}]   ;;  %s1562_s3 = inlined_call_operand.vmem [shape: bf16[128,256], index: 3, kind: output, shape index: {}]  }
   0x1   :  { %s1355_s14 = smov 0   ;;  %s1357_s15 = smov 0  }
   0x2   :  { %s1359_s16 = smov 0  }
   0x3 LB: > { %s25_s17 = sadd.s32 1, %s1323_s15  ;;  %p48_p1 = scmp.ne.s32.totalorder %s1315_s13, %s1311_s12  ;;  %s1327_s16 = sphi %s1359_s16, %s13_s16   ;;  %s1323_s15 = sphi %s1357_s15, %s1566_s15   ;;  %s1319_s14 = sphi %s1355_s14, %s1565_s14   ;;  %s1315_s13 = sphi %s1353_s13, %s1564_s13   ;;  %s1311_s12 = sphi %s1351_s12, %s1563_s12  }
   0x4   : > { %p26_p0 = scmp.ge.s32.totalorder %s25_s17, 9  ;;  %p49_p2 = scmp.eq.s32.totalorder %s1327_s16, 0 }
   0x5   : > { %s41_s19 = sadd.s32 1, %s1315_s13  ;;  %p1128_p5 = scmp.ge.s32.totalorder %s1327_s16, 9 }
   0x6   : > { %s1568_s17 = smov (%p26_p0, %s25_s17), 0  ;;  %p50_p3 = por %p49_p2, %p48_p1 }
   0x7   : > { %s37_s18 = ssub.s32 %s1323_s15, %s1568_s17  ;;  %164 = sbr.rel (%p1128_p5) target bundleno = 26 (0x1a), region = 20 }
   0x8   : > { %p39_p4 = scmp.eq.s32.totalorder %s37_s18, 0 }
   0xa   : > { %s1386_s20 = scalar_select %p39_p4, %s1315_s13, %s41_s19  }
   0xc   : > { %167 = sbr.rel (!%p50_p3) target bundleno = 26 (0x1a), region = 24  ;;  %s169_s21 = sand.u32 (%p50_p3), 1, %s1315_s13  }
   0xd   : > { %s1130_s22 = sshll.u32 (%p50_p3), %s1323_s15, 2  ;;  %s1129_s23 = sshll.u32 (%p50_p3), %s169_s21, 6 }
   0xe   : > { %s1394_s26 = scalar_lea.vmem (%p50_p3), %s1559_s0, %s1130_s22  ;;  %s171_s27 = scalar_lea.vmem (%p50_p3), [#allocation3], %s1129_s23 }
   0xf   : > { %v193_v0 = vld [vmem:[%s1394_s26] sm:$0xf] (%p50_p3)  ;;  %v195_v1 = vld [vmem:[%s1394_s26 + $0x24] sm:$0xf] (%p50_p3)  ;;  %v197_v2 = vld [vmem:[%s1394_s26 + $0x48] sm:$0xf] (%p50_p3) }
  0x10   : > { %194 = vst [vmem:[%s171_s27] sm:$0xf] (%p50_p3), %v193_v0  ;;  %196 = vst [vmem:[%s171_s27 + $0x4] sm:$0xf] (%p50_p3), %v195_v1  ;;  %v199_v3 = vld [vmem:[%s1394_s26 + $0x6c] sm:$0xf] (%p50_p3) }
  0x11   : > { %v201_v4 = vld [vmem:[%s1394_s26 + $0x90] sm:$0xf]  ;;  %198 = vst [vmem:[%s171_s27 + $0x8] sm:$0xf] %v197_v2  ;;  %200 = vst [vmem:[%s171_s27 + $0xc] sm:$0xf] %v199_v3 }
  0x12   : > { %202 = vst [vmem:[%s171_s27 + $0x10] sm:$0xf] %v201_v4  ;;  %v203_v5 = vld [vmem:[%s1394_s26 + $0xb4] sm:$0xf]  ;;  %v205_v6 = vld [vmem:[%s1394_s26 + $0xd8] sm:$0xf] }
  0x13   : > { %v207_v7 = vld [vmem:[%s1394_s26 + $0xfc] sm:$0xf]  ;;  %204 = vst [vmem:[%s171_s27 + $0x14] sm:$0xf] %v203_v5  ;;  %206 = vst [vmem:[%s171_s27 + $0x18] sm:$0xf] %v205_v6 }
  0x14   : > { %208 = vst [vmem:[%s171_s27 + $0x1c] sm:$0xf] %v207_v7  ;;  %v209_v8 = vld [vmem:[%s1394_s26 + $0x120] sm:$0xf]  ;;  %v211_v9 = vld [vmem:[%s1394_s26 + $0x144] sm:$0xf] }
  0x15   : > { %v213_v10 = vld [vmem:[%s1394_s26 + $0x168] sm:$0xf]  ;;  %210 = vst [vmem:[%s171_s27 + $0x20] sm:$0xf] %v209_v8  ;;  %212 = vst [vmem:[%s171_s27 + $0x24] sm:$0xf] %v211_v9 }
  0x16   : > { %214 = vst [vmem:[%s171_s27 + $0x28] sm:$0xf] %v213_v10  ;;  %v215_v11 = vld [vmem:[%s1394_s26 + $0x18c] sm:$0xf]  ;;  %v217_v12 = vld [vmem:[%s1394_s26 + $0x1b0] sm:$0xf] }
  0x17   : > { %v219_v13 = vld [vmem:[%s1394_s26 + $0x1d4] sm:$0xf]  ;;  %216 = vst [vmem:[%s171_s27 + $0x2c] sm:$0xf] %v215_v11  ;;  %218 = vst [vmem:[%s171_s27 + $0x30] sm:$0xf] %v217_v12 }
  0x18   : > { %220 = vst [vmem:[%s171_s27 + $0x34] sm:$0xf] %v219_v13  ;;  %v221_v14 = vld [vmem:[%s1394_s26 + $0x1f8] sm:$0xf]  ;;  %v223_v15 = vld [vmem:[%s1394_s26 + $0x21c] sm:$0xf] }
  0x19   : > { %222 = vst [vmem:[%s171_s27 + $0x38] sm:$0xf] %v221_v14  ;;  %224 = vst [vmem:[%s171_s27 + $0x3c] sm:$0xf] %v223_v15 }
  0x1a PF: > { %p1131_p6 = scmp.ge.s32.totalorder %s1327_s16, 1  ;;  %p294_p7 = scmp.lt.s32.totalorder %s1327_s16, 10 }
  0x1c   : > { %p295_p8 = pnand %p1131_p6, %p294_p7 }
  0x1d   : > { %s301_s28 = sand.u32 (!%p295_p8), 1, %s1311_s12   ;;  %s1133_s29 = sshll.u32 (!%p295_p8), %s1319_s14, 4 }
  0x1e   : > { %298 = sbr.rel (%p295_p8) target bundleno = 349 (0x15d), region = 69  ;;  %s1132_s30 = sshll.u32 (!%p295_p8), %s301_s28, 6 }
  0x1f   : > { %p346_p9 = scmp.lt.s32.totalorder (!%p295_p8), %s1133_s29, 143  ;;  %s1421_s8 = scalar_lea.vmem (!%p295_p8), [#allocation3], %s1132_s30 }
  0x20   : > { %p1136_p10 = scmp.ne.s32.totalorder (!%p295_p8), %s1319_s14, 0 }
  0x23   : > { %s1570_s29 = smov (!%p346_p9, %s1133_s29), 143  ;;  %377 = sbr.rel (%p1136_p10) target bundleno = 57 (0x39), region = 77 }
  0x24   : > { %s1182_s4 = sshll.u32 %s1570_s29, 3 }
  0x25   : > { %s1419_s7 = scalar_lea.vmem %s1560_s1, %s1182_s4 }
  0x28   : > { %v1329_v16 = vmov 0.0  }
  0x29   : > { %378 = vst [vmem:[#allocation2 + $0xb0] sm:$0xff] %v1329_v16  ;;  %379 = vst [vmem:[#allocation2] sm:$0xff] %v1329_v16 }
  0x2a   : > { %380 = vst [vmem:[#allocation2 + $0xd8] sm:$0xff] %v1329_v16  ;;  %381 = vst [vmem:[#allocation2 + $0x18] sm:$0xff] %v1329_v16 }
  0x2b   : > { %382 = vst [vmem:[#allocation2 + $0x50] sm:$0xff] %v1329_v16  ;;  %383 = vst [vmem:[#allocation2 + $0x68] sm:$0xff] %v1329_v16 }
  0x2c   : > { %384 = vst [vmem:[#allocation2 + $0x30] sm:$0xff] %v1329_v16  ;;  %385 = vst [vmem:[#allocation2 + $0x48] sm:$0xff] %v1329_v16 }
  0x2d   : > { %386 = vst [vmem:[#allocation2 + $0x80] sm:$0xff] %v1329_v16  ;;  %387 = vst [vmem:[#allocation2 + $0x88] sm:$0xff] %v1329_v16 }
  0x2e   : > { %388 = vst [vmem:[#allocation2 + $0xe8] sm:$0xff] %v1329_v16  ;;  %389 = vst [vmem:[#allocation2 + $0xb8] sm:$0xff] %v1329_v16 }
  0x2f   : > { %390 = vst [vmem:[#allocation2 + $0x60] sm:$0xff] %v1329_v16  ;;  %391 = vst [vmem:[#allocation2 + $0xf0] sm:$0xff] %v1329_v16 }
  0x30   : > { %392 = vst [vmem:[#allocation2 + $0x8] sm:$0xff] %v1329_v16  ;;  %393 = vst [vmem:[#allocation2 + $0x78] sm:$0xff] %v1329_v16 }
  0x31   : > { %394 = vst [vmem:[#allocation2 + $0x38] sm:$0xff] %v1329_v16  ;;  %395 = vst [vmem:[#allocation2 + $0x58] sm:$0xff] %v1329_v16 }
  0x32   : > { %396 = vst [vmem:[#allocation2 + $0x40] sm:$0xff] %v1329_v16  ;;  %397 = vst [vmem:[#allocation2 + $0xc8] sm:$0xff] %v1329_v16 }
  0x33   : > { %398 = vst [vmem:[#allocation2 + $0xe0] sm:$0xff] %v1329_v16  ;;  %399 = vst [vmem:[#allocation2 + $0x90] sm:$0xff] %v1329_v16 }
  0x34   : > { %400 = vst [vmem:[#allocation2 + $0x70] sm:$0xff] %v1329_v16  ;;  %401 = vst [vmem:[#allocation2 + $0xc0] sm:$0xff] %v1329_v16 }
  0x35   : > { %402 = vst [vmem:[#allocation2 + $0xa8] sm:$0xff] %v1329_v16  ;;  %403 = vst [vmem:[#allocation2 + $0xd0] sm:$0xff] %v1329_v16 }
  0x36   : > { %404 = vst [vmem:[#allocation2 + $0x10] sm:$0xff] %v1329_v16  ;;  %405 = vst [vmem:[#allocation2 + $0x28] sm:$0xff] %v1329_v16 }
  0x37   : > { %406 = vst [vmem:[#allocation2 + $0xa0] sm:$0xff] %v1329_v16  ;;  %407 = vst [vmem:[#allocation2 + $0xf8] sm:$0xff] %v1329_v16 }
  0x38   : > { %408 = vst [vmem:[#allocation2 + $0x20] sm:$0xff] %v1329_v16  ;;  %409 = vst [vmem:[#allocation2 + $0x98] sm:$0xff] %v1329_v16 }
  0x39 PF: > { %v1257_v17 = vld [vmem:[%s1419_s7 + $0x74] ss:$8 sps:$4 sm:$0xff]   ;;  %v1259_v18 = vld [vmem:[%s1419_s7 + $0x70] ss:$8 sps:$4 sm:$0xff]   ;;  %v1330_v19 = vmov 0   ;;  %v1281_v34 = vld [vmem:[%s1421_s8] sm:$0xff]  }
  0x3a   : > { %634 = vmatprep.mubr.bf16.mxu0 %v1330_v19  ;;  %674 = vmatprep.mubr.bf16.mxu1 %v1330_v19  ;;  %v1260_v20 = vld [vmem:[%s1419_s7 + $0x64] ss:$8 sps:$4 sm:$0xff]   ;;  %v1262_v21 = vld [vmem:[%s1419_s7 + $0x60] ss:$8 sps:$4 sm:$0xff]   ;;  %v1263_v22 = vld [vmem:[%s1419_s7 + $0x54] ss:$8 sps:$4 sm:$0xff]  }
  0x3b   : > { %602 = vmatprep.subr.bf16.mxu0 %v1257_v17  ;;  %1199 = vmatprep.subr.bf16.mxu1 %v1257_v17  ;;  %v1265_v23 = vld [vmem:[%s1419_s7 + $0x50] ss:$8 sps:$4 sm:$0xff]   ;;  %v1266_v24 = vld [vmem:[%s1419_s7 + $0x44] ss:$8 sps:$4 sm:$0xff]   ;;  %v1268_v25 = vld [vmem:[%s1419_s7 + $0x40] ss:$8 sps:$4 sm:$0xff]  }
  0x3c   : > { %603 = vmatpush1.bf16.msra.mxu0 %v1259_v18  ;;  %1207 = vmatpush1.bf16.msra.mxu1 %v1259_v18  ;;  %v1269_v26 = vld [vmem:[%s1419_s7 + $0x34] ss:$8 sps:$4 sm:$0xff]   ;;  %v1271_v27 = vld [vmem:[%s1419_s7 + $0x30] ss:$8 sps:$4 sm:$0xff]   ;;  %v1272_v28 = vld [vmem:[%s1419_s7 + $0x24] ss:$8 sps:$4 sm:$0xff]  }
  0x3d   : > { %604 = vmatprep.subr.bf16.mxu0 %v1260_v20  ;;  %1200 = vmatprep.subr.bf16.mxu1 %v1260_v20  ;;  %v1274_v29 = vld [vmem:[%s1419_s7 + $0x20] ss:$8 sps:$4 sm:$0xff]   ;;  %v1275_v30 = vld [vmem:[%s1419_s7 + $0x14] ss:$8 sps:$4 sm:$0xff]   ;;  %v1277_v31 = vld [vmem:[%s1419_s7 + $0x10] ss:$8 sps:$4 sm:$0xff]  }
  0x3e   : > { %v1278_v32 = vld [vmem:[%s1419_s7 + $0x4] ss:$8 sps:$4 sm:$0xff]   ;;  %v1280_v33 = vld [vmem:[%s1419_s7] ss:$8 sps:$4 sm:$0xff]   ;;  %v1285_v38 = vld [vmem:[%s1421_s8 + $0x10] sm:$0xff]   ;;  %p1161_p11 = scmp.ne.s32.totalorder %s1319_s14, 8 }
  0x3f   : > { %v1282_v35 = vld [vmem:[%s1421_s8 + $0x20] sm:$0xff]   ;;  %v1283_v36 = vld [vmem:[%s1421_s8 + $0x8] sm:$0xff]   ;;  %v1286_v39 = vld [vmem:[%s1421_s8 + $0x30] sm:$0xff]  }
  0x40   : > { %605 = vmatpush1.bf16.msra.mxu0 %v1262_v21  ;;  %1208 = vmatpush1.bf16.msra.mxu1 %v1262_v21  ;;  %v1284_v37 = vld [vmem:[%s1421_s8 + $0x28] sm:$0xff]   ;;  %v1287_v40 = vld [vmem:[%s1421_s8 + $0x18] sm:$0xff]   ;;  %v410_v42 = vld [vmem:[#allocation2 + $0xb0] sm:$0xff] }
  0x41   : > { %606 = vmatprep.subr.bf16.mxu0 %v1263_v22  ;;  %1201 = vmatprep.subr.bf16.mxu1 %v1263_v22  ;;  %v1288_v41 = vld [vmem:[%s1421_s8 + $0x38] sm:$0xff]   ;;  %v411_v46 = vld [vmem:[#allocation2] sm:$0xff]  ;;  %v429_v59 = vld [vmem:[#allocation2 + $0xc8] sm:$0xff] }
  0x42   : > { %v426_v43 = vld [vmem:[#allocation2 + $0x38] sm:$0xff]  ;;  %v428_v53 = vld [vmem:[#allocation2 + $0x40] sm:$0xff]  ;;  %v414_v0 = vld [vmem:[#allocation2 + $0x50] sm:$0xff] }
  0x43   : > { %v427_v47 = vld [vmem:[#allocation2 + $0x58] sm:$0xff]  ;;  %v430_v1 = vld [vmem:[#allocation2 + $0xe0] sm:$0xff]  ;;  %v415_v6 = vld [vmem:[#allocation2 + $0x68] sm:$0xff] }
  0x44   : > { %607 = vmatpush1.bf16.msra.mxu0 %v1265_v23  ;;  %1209 = vmatpush1.bf16.msra.mxu1 %v1265_v23  ;;  %v412_v52 = vld [vmem:[#allocation2 + $0xd8] sm:$0xff]  ;;  %v431_v7 = vld [vmem:[#allocation2 + $0x90] sm:$0xff]  ;;  %v417_v18 = vld [vmem:[#allocation2 + $0x48] sm:$0xff] }
  0x45   : > { %608 = vmatprep.subr.bf16.mxu0 %v1266_v24  ;;  %1202 = vmatprep.subr.bf16.mxu1 %v1266_v24  ;;  %v413_v58 = vld [vmem:[#allocation2 + $0x18] sm:$0xff]  ;;  %v416_v12 = vld [vmem:[#allocation2 + $0x30] sm:$0xff]  ;;  %v418_v24 = vld [vmem:[#allocation2 + $0x80] sm:$0xff] }
  0x46   : > { %v432_v13 = vld [vmem:[#allocation2 + $0x70] sm:$0xff] }
  0x48   : > { %609 = vmatpush1.bf16.msra.mxu0 %v1268_v25  ;;  %1210 = vmatpush1.bf16.msra.mxu1 %v1268_v25  ;;  %v434_v25 = vld [vmem:[#allocation2 + $0xa8] sm:$0xff] }
  0x49   : > { %610 = vmatprep.subr.bf16.mxu0 %v1269_v26  ;;  %1203 = vmatprep.subr.bf16.mxu1 %v1269_v26 }
  0x4c   : > { %611 = vmatpush1.bf16.msra.mxu0 %v1271_v27  ;;  %1211 = vmatpush1.bf16.msra.mxu1 %v1271_v27 }
  0x4d   : > { %612 = vmatprep.subr.bf16.mxu0 %v1272_v28  ;;  %1204 = vmatprep.subr.bf16.mxu1 %v1272_v28 }
  0x50   : > { %613 = vmatpush1.bf16.msra.mxu0 %v1274_v29  ;;  %1212 = vmatpush1.bf16.msra.mxu1 %v1274_v29 }
  0x51   : > { %614 = vmatprep.subr.bf16.mxu0 %v1275_v30  ;;  %1205 = vmatprep.subr.bf16.mxu1 %v1275_v30  ;;  %v419_v30 = vld [vmem:[#allocation2 + $0x88] sm:$0xff] }
  0x54   : > { %615 = vmatpush1.bf16.msra.mxu0 %v1277_v31  ;;  %1213 = vmatpush1.bf16.msra.mxu1 %v1277_v31  ;;  %v435_v31 = vld [vmem:[#allocation2 + $0xd0] sm:$0xff] }
  0x55   : > { %616 = vmatprep.subr.bf16.mxu0 %v1278_v32  ;;  %1206 = vmatprep.subr.bf16.mxu1 %v1278_v32 }
  0x58   : > { %617 = vmatpush1.bf16.msra.mxu0 %v1280_v33  ;;  %1214 = vmatpush1.bf16.msra.mxu1 %v1280_v33 }
  0x5b   : > { %635 = vmatmul.mubr.bf16.vlgmr.msra.gmra.mxu0 %v1281_v34  ;;  %675 = vmatmul.mubr.bf16.vlgmr.msra.gmra.mxu1 %v1282_v35 }
  0x5c   : > { %644 = vmatprep.mubr.bf16.mxu0 %v1330_v19  ;;  %684 = vmatprep.mubr.bf16.mxu1 %v1330_v19 }
  0x63   : > { %645 = vmatmul.mubr.bf16.gmra.mxu0 %v1283_v36  ;;  %685 = vmatmul.mubr.bf16.gmra.mxu1 %v1284_v37  ;;  %v420_v36 = vld [vmem:[#allocation2 + $0xe8] sm:$0xff]  ;;  %v436_v37 = vld [vmem:[#allocation2 + $0x10] sm:$0xff] }
  0x64   : > { %654 = vmatprep.mubr.bf16.mxu0 %v1330_v19  ;;  %694 = vmatprep.mubr.bf16.mxu1 %v1330_v19 }
  0x6b   : > { %655 = vmatmul.mubr.bf16.gmra.mxu0 %v1285_v38  ;;  %695 = vmatmul.mubr.bf16.gmra.mxu1 %v1286_v39 }
  0x6c   : > { %664 = vmatprep.mubr.bf16.mxu0 %v1330_v19  ;;  %704 = vmatprep.mubr.bf16.mxu1 %v1330_v19  ;;  %v433_v19 = vld [vmem:[#allocation2 + $0xc0] sm:$0xff] }
  0x73   : > { %665 = vmatmul.mubr.bf16.gmra.mxu0 %v1287_v40  ;;  %705 = vmatmul.mubr.bf16.gmra.mxu1 %v1288_v41 }
 0x11b   : > { %v636_v44 = vpop.f32.mrf.mxu0  ;;  %v676_v45 = vpop.f32.mrf.mxu1 }
 0x11c   : > { %v715_v48 = vadd.f32 %v636_v44, %v410_v42  ;;  %v731_v49 = vadd.f32 %v676_v45, %v426_v43  ;;  %v421_v42 = vld [vmem:[#allocation2 + $0xb8] sm:$0xff]  ;;  %v437_v43 = vld [vmem:[#allocation2 + $0x28] sm:$0xff] }
 0x11d   : > { %v638_v50 = vpop.f32.mrf.mxu0  ;;  %v678_v51 = vpop.f32.mrf.mxu1 }
 0x11e   : > { %747 = vst [vmem:[#allocation2 + $0xb0] sm:$0xff] %v715_v48  ;;  %763 = vst [vmem:[#allocation2 + $0x38] sm:$0xff] %v731_v49  ;;  %v716_v54 = vadd.f32 %v638_v50, %v411_v46  ;;  %v732_v55 = vadd.f32 %v678_v51, %v427_v47  ;;  %v422_v48 = vld [vmem:[#allocation2 + $0x60] sm:$0xff] }
 0x11f   : > { %v640_v56 = vpop.f32.mrf.mxu0  ;;  %v680_v57 = vpop.f32.mrf.mxu1  ;;  %v438_v49 = vld [vmem:[#allocation2 + $0xa0] sm:$0xff] }
 0x120   : > { %748 = vst [vmem:[#allocation2] sm:$0xff] %v716_v54  ;;  %764 = vst [vmem:[#allocation2 + $0x58] sm:$0xff] %v732_v55  ;;  %v717_v60 = vadd.f32 %v640_v56, %v412_v52  ;;  %v733_v61 = vadd.f32 %v680_v57, %v428_v53  ;;  %v423_v54 = vld [vmem:[#allocation2 + $0xf0] sm:$0xff]  ;;  %v439_v55 = vld [vmem:[#allocation2 + $0xf8] sm:$0xff] }
 0x121   : > { %v642_v62 = vpop.f32.mrf.mxu0  ;;  %v682_v63 = vpop.f32.mrf.mxu1 }
 0x122   : > { %749 = vst [vmem:[#allocation2 + $0xd8] sm:$0xff] %v717_v60  ;;  %765 = vst [vmem:[#allocation2 + $0x40] sm:$0xff] %v733_v61  ;;  %v718_v2 = vadd.f32 %v642_v62, %v413_v58  ;;  %v734_v3 = vadd.f32 %v682_v63, %v429_v59  ;;  %v424_v60 = vld [vmem:[#allocation2 + $0x8] sm:$0xff]  ;;  %v440_v61 = vld [vmem:[#allocation2 + $0x20] sm:$0xff] }
 0x123   : > { %v646_v4 = vpop.f32.mrf.mxu0  ;;  %v686_v5 = vpop.f32.mrf.mxu1 }
 0x124   : > { %750 = vst [vmem:[#allocation2 + $0x18] sm:$0xff] %v718_v2  ;;  %766 = vst [vmem:[#allocation2 + $0xc8] sm:$0xff] %v734_v3  ;;  %v719_v8 = vadd.f32 %v646_v4, %v414_v0  ;;  %v735_v9 = vadd.f32 %v686_v5, %v430_v1  ;;  %v425_v2 = vld [vmem:[#allocation2 + $0x78] sm:$0xff] }
 0x125   : > { %v648_v10 = vpop.f32.mrf.mxu0  ;;  %v688_v11 = vpop.f32.mrf.mxu1  ;;  %v441_v3 = vld [vmem:[#allocation2 + $0x98] sm:$0xff] }
 0x126   : > { %751 = vst [vmem:[#allocation2 + $0x50] sm:$0xff] %v719_v8  ;;  %767 = vst [vmem:[#allocation2 + $0xe0] sm:$0xff] %v735_v9  ;;  %v720_v14 = vadd.f32 %v648_v10, %v415_v6  ;;  %v736_v15 = vadd.f32 %v688_v11, %v431_v7 }
 0x127   : > { %v650_v16 = vpop.f32.mrf.mxu0  ;;  %v690_v17 = vpop.f32.mrf.mxu1 }
 0x128   : > { %752 = vst [vmem:[#allocation2 + $0x68] sm:$0xff] %v720_v14  ;;  %768 = vst [vmem:[#allocation2 + $0x90] sm:$0xff] %v736_v15  ;;  %v721_v20 = vadd.f32 %v650_v16, %v416_v12  ;;  %v737_v21 = vadd.f32 %v690_v17, %v432_v13 }
 0x129   : > { %v652_v22 = vpop.f32.mrf.mxu0  ;;  %v692_v23 = vpop.f32.mrf.mxu1 }
 0x12a   : > { %753 = vst [vmem:[#allocation2 + $0x30] sm:$0xff] %v721_v20  ;;  %769 = vst [vmem:[#allocation2 + $0x70] sm:$0xff] %v737_v21  ;;  %v722_v26 = vadd.f32 %v652_v22, %v417_v18  ;;  %v738_v27 = vadd.f32 %v692_v23, %v433_v19 }
 0x12b   : > { %v656_v28 = vpop.f32.mrf.mxu0  ;;  %v696_v29 = vpop.f32.mrf.mxu1 }
 0x12c   : > { %754 = vst [vmem:[#allocation2 + $0x48] sm:$0xff] %v722_v26  ;;  %770 = vst [vmem:[#allocation2 + $0xc0] sm:$0xff] %v738_v27  ;;  %v723_v32 = vadd.f32 %v656_v28, %v418_v24  ;;  %v739_v33 = vadd.f32 %v696_v29, %v434_v25 }
 0x12d   : > { %v658_v34 = vpop.f32.mrf.mxu0  ;;  %v698_v35 = vpop.f32.mrf.mxu1 }
 0x12e   : > { %755 = vst [vmem:[#allocation2 + $0x80] sm:$0xff] %v723_v32  ;;  %771 = vst [vmem:[#allocation2 + $0xa8] sm:$0xff] %v739_v33  ;;  %v724_v38 = vadd.f32 %v658_v34, %v419_v30  ;;  %v740_v39 = vadd.f32 %v698_v35, %v435_v31 }
 0x12f   : > { %v660_v40 = vpop.f32.mrf.mxu0  ;;  %v700_v41 = vpop.f32.mrf.mxu1 }
 0x130   : > { %756 = vst [vmem:[#allocation2 + $0x88] sm:$0xff] %v724_v38  ;;  %772 = vst [vmem:[#allocation2 + $0xd0] sm:$0xff] %v740_v39  ;;  %v725_v44 = vadd.f32 %v660_v40, %v420_v36  ;;  %v741_v45 = vadd.f32 %v700_v41, %v436_v37 }
 0x131   : > { %v662_v46 = vpop.f32.mrf.mxu0  ;;  %v702_v47 = vpop.f32.mrf.mxu1 }
 0x132   : > { %757 = vst [vmem:[#allocation2 + $0xe8] sm:$0xff] %v725_v44  ;;  %773 = vst [vmem:[#allocation2 + $0x10] sm:$0xff] %v741_v45  ;;  %v726_v50 = vadd.f32 %v662_v46, %v421_v42  ;;  %v742_v51 = vadd.f32 %v702_v47, %v437_v43 }
 0x133   : > { %v666_v52 = vpop.f32.mrf.mxu0  ;;  %v706_v53 = vpop.f32.mrf.mxu1 }
 0x134   : > { %758 = vst [vmem:[#allocation2 + $0xb8] sm:$0xff] %v726_v50  ;;  %774 = vst [vmem:[#allocation2 + $0x28] sm:$0xff] %v742_v51  ;;  %v727_v56 = vadd.f32 %v666_v52, %v422_v48  ;;  %v743_v57 = vadd.f32 %v706_v53, %v438_v49 }
 0x135   : > { %v668_v58 = vpop.f32.mrf.mxu0  ;;  %v708_v59 = vpop.f32.mrf.mxu1 }
 0x136   : > { %759 = vst [vmem:[#allocation2 + $0x60] sm:$0xff] %v727_v56  ;;  %775 = vst [vmem:[#allocation2 + $0xa0] sm:$0xff] %v743_v57  ;;  %v728_v62 = vadd.f32 %v668_v58, %v423_v54  ;;  %v744_v63 = vadd.f32 %v708_v59, %v439_v55 }
 0x137   : > { %v670_v0 = vpop.f32.mrf.mxu0  ;;  %v710_v1 = vpop.f32.mrf.mxu1 }
 0x138   : > { %760 = vst [vmem:[#allocation2 + $0xf0] sm:$0xff] %v728_v62  ;;  %776 = vst [vmem:[#allocation2 + $0xf8] sm:$0xff] %v744_v63  ;;  %v729_v4 = vadd.f32 %v670_v0, %v424_v60  ;;  %v745_v5 = vadd.f32 %v710_v1, %v440_v61  ;;  %782 = sbr.rel (%p1161_p11) target bundleno = 349 (0x15d), region = 81 }
 0x139   : > { %v672_v6 = vpop.f32.mrf.mxu0  ;;  %v712_v7 = vpop.f32.mrf.mxu1 }
 0x13a   : > { %761 = vst [vmem:[#allocation2 + $0x8] sm:$0xff] %v729_v4  ;;  %777 = vst [vmem:[#allocation2 + $0x20] sm:$0xff] %v745_v5  ;;  %v730_v8 = vadd.f32 %v672_v6, %v425_v2  ;;  %v746_v9 = vadd.f32 %v712_v7, %v441_v3 }
 0x13c   : > { %762 = vst [vmem:[#allocation2 + $0x78] sm:$0xff] %v730_v8  ;;  %778 = vst [vmem:[#allocation2 + $0x98] sm:$0xff] %v746_v9 }
 0x13d   : > { %v817_v10 = vlaneseq  ;;  %v815_v12 = vld [vmem:[%s1561_s2] sm:$0x3]  ;;  %v783_v13 = vld [vmem:[#allocation2 + $0xb0] sm:$0xff]  ;;  %v785_v17 = vld [vmem:[#allocation2 + $0xd8] sm:$0xff] }
 0x13e   : > { %v784_v14 = vld [vmem:[#allocation2] sm:$0xff]  ;;  %v786_v18 = vld [vmem:[#allocation2 + $0x18] sm:$0xff]  ;;  %v787_v19 = vld [vmem:[#allocation2 + $0x50] sm:$0xff] }
 0x13f   : > { %v818_v11 = vshrl.u32 %v817_v10, 7  ;;  %v788_v22 = vld [vmem:[#allocation2 + $0x68] sm:$0xff]  ;;  %v789_v23 = vld [vmem:[#allocation2 + $0x30] sm:$0xff]  ;;  %v791_v33 = vld [vmem:[#allocation2 + $0x80] sm:$0xff] }
 0x140   : > { %v790_v24 = vld [vmem:[#allocation2 + $0x48] sm:$0xff]  ;;  %v794_v40 = vld [vmem:[#allocation2 + $0xb8] sm:$0xff]  ;;  %v795_v45 = vld [vmem:[#allocation2 + $0x60] sm:$0xff] }
 0x141   : > { %v819_v15 = vsub.s32 0, %v818_v11  ;;  %v823_v16 = vsub.s32 1, %v818_v11  ;;  %v792_v34 = vld [vmem:[#allocation2 + $0x88] sm:$0xff]  ;;  %v796_v46 = vld [vmem:[#allocation2 + $0xf0] sm:$0xff]  ;;  %v799_v57 = vld [vmem:[#allocation2 + $0x38] sm:$0xff] }
 0x142   : > { %v793_v39 = vld [vmem:[#allocation2 + $0xe8] sm:$0xff]  ;;  %v800_v62 = vld [vmem:[#allocation2 + $0x58] sm:$0xff]  ;;  %v801_v3 = vld [vmem:[#allocation2 + $0x40] sm:$0xff] }
 0x143   : > { %v1460_v20 = vrot.slane %v815_v12, %v819_v15  ;;  %v1462_v21 = vrot.slane %v815_v12, %v823_v16  ;;  %v797_v51 = vld [vmem:[#allocation2 + $0x8] sm:$0xff]  ;;  %v798_v52 = vld [vmem:[#allocation2 + $0x78] sm:$0xff]  ;;  %v803_v9 = vld [vmem:[#allocation2 + $0xe0] sm:$0xff] }
 0x144   : > { %v802_v4 = vld [vmem:[#allocation2 + $0xc8] sm:$0xff]  ;;  %v804_v10 = vld [vmem:[#allocation2 + $0x90] sm:$0xff]  ;;  %v806_v16 = vld [vmem:[#allocation2 + $0xc0] sm:$0xff] }
 0x145   : > { %v827_v25 = vadd.f32 %v1460_v20, %v783_v13  ;;  %v828_v26 = vadd.f32 %v1462_v21, %v784_v14  ;;  %v829_v27 = vadd.f32 %v1460_v20, %v785_v17  ;;  %v830_v28 = vadd.f32 %v1462_v21, %v786_v18  ;;  %v805_v15 = vld [vmem:[#allocation2 + $0x70] sm:$0xff] }
 0x146   : > { %v831_v29 = vadd.f32 %v1460_v20, %v787_v19  ;;  %v832_v30 = vadd.f32 %v1462_v21, %v788_v22  ;;  %v833_v31 = vadd.f32 %v1460_v20, %v789_v23  ;;  %v834_v32 = vadd.f32 %v1462_v21, %v790_v24  ;;  %v807_v23 = vld [vmem:[#allocation2 + $0xa8] sm:$0xff] }
 0x147   : > { %v859_v35 = vmax.f32 %v827_v25, 0.0  ;;  %v860_v36 = vmax.f32 %v828_v26, 0.0  ;;  %v861_v37 = vmax.f32 %v829_v27, 0.0  ;;  %v862_v38 = vmax.f32 %v830_v28, 0.0  ;;  %v808_v28 = vld [vmem:[#allocation2 + $0xd0] sm:$0xff] }
 0x148   : > { %v863_v41 = vmax.f32 %v831_v29, 0.0  ;;  %v864_v42 = vmax.f32 %v832_v30, 0.0  ;;  %v865_v43 = vmax.f32 %v833_v31, 0.0  ;;  %v866_v44 = vmax.f32 %v834_v32, 0.0 }
 0x149   : > { %v1183_v47 = vpack.c.bf16 %v860_v36, %v859_v35  ;;  %v1184_v48 = vpack.c.bf16 %v862_v38, %v861_v37  ;;  %v835_v49 = vadd.f32 %v1460_v20, %v791_v33  ;;  %v836_v50 = vadd.f32 %v1462_v21, %v792_v34  ;;  %v809_v33 = vld [vmem:[#allocation2 + $0x10] sm:$0xff]  ;;  %v810_v34 = vld [vmem:[#allocation2 + $0x28] sm:$0xff] }
 0x14a   : > { %v1185_v53 = vpack.c.bf16 %v864_v42, %v863_v41  ;;  %v1186_v54 = vpack.c.bf16 %v866_v44, %v865_v43  ;;  %v837_v55 = vadd.f32 %v1460_v20, %v793_v39  ;;  %v838_v56 = vadd.f32 %v1462_v21, %v794_v40  ;;  %v811_v39 = vld [vmem:[#allocation2 + $0xa0] sm:$0xff]  ;;  %v812_v40 = vld [vmem:[#allocation2 + $0xf8] sm:$0xff] }
 0x14b   : > { %987 = vst [vmem:[%s1562_s3] sm:$0xff] %v1183_v47  ;;  %988 = vst [vmem:[%s1562_s3 + $0x8] sm:$0xff] %v1184_v48  ;;  %v867_v58 = vmax.f32 %v835_v49, 0.0  ;;  %v868_v59 = vmax.f32 %v836_v50, 0.0  ;;  %v839_v60 = vadd.f32 %v1460_v20, %v795_v45  ;;  %v840_v61 = vadd.f32 %v1462_v21, %v796_v46  ;;  %v813_v45 = vld [vmem:[#allocation2 + $0x20] sm:$0xff]  ;;  %v814_v46 = vld [vmem:[#allocation2 + $0x98] sm:$0xff] }
 0x14c   : > { %989 = vst [vmem:[%s1562_s3 + $0x10] sm:$0xff] %v1185_v53  ;;  %990 = vst [vmem:[%s1562_s3 + $0x18] sm:$0xff] %v1186_v54  ;;  %v869_v63 = vmax.f32 %v837_v55, 0.0  ;;  %v870_v0 = vmax.f32 %v838_v56, 0.0  ;;  %v841_v1 = vadd.f32 %v1460_v20, %v797_v51  ;;  %v842_v2 = vadd.f32 %v1462_v21, %v798_v52 }
 0x14d   : > { %v1187_v5 = vpack.c.bf16 %v868_v59, %v867_v58  ;;  %v871_v6 = vmax.f32 %v839_v60, 0.0  ;;  %v872_v7 = vmax.f32 %v840_v61, 0.0  ;;  %v843_v8 = vadd.f32 %v1460_v20, %v799_v57 }
 0x14e   : > { %v1188_v11 = vpack.c.bf16 %v870_v0, %v869_v63  ;;  %v873_v12 = vmax.f32 %v841_v1, 0.0  ;;  %v874_v13 = vmax.f32 %v842_v2, 0.0  ;;  %v844_v14 = vadd.f32 %v1462_v21, %v800_v62 }
 0x14f   : > { %991 = vst [vmem:[%s1562_s3 + $0x20] sm:$0xff] %v1187_v5  ;;  %v1189_v17 = vpack.c.bf16 %v872_v7, %v871_v6  ;;  %v875_v18 = vmax.f32 %v843_v8, 0.0  ;;  %v845_v19 = vadd.f32 %v1460_v20, %v801_v3  ;;  %v846_v22 = vadd.f32 %v1462_v21, %v802_v4 }
 0x150   : > { %992 = vst [vmem:[%s1562_s3 + $0x28] sm:$0xff] %v1188_v11  ;;  %v1190_v24 = vpack.c.bf16 %v874_v13, %v873_v12  ;;  %v876_v25 = vmax.f32 %v844_v14, 0.0  ;;  %v847_v26 = vadd.f32 %v1460_v20, %v803_v9  ;;  %v848_v27 = vadd.f32 %v1462_v21, %v804_v10 }
 0x151   : > { %993 = vst [vmem:[%s1562_s3 + $0x30] sm:$0xff] %v1189_v17  ;;  %v877_v29 = vmax.f32 %v845_v19, 0.0  ;;  %v878_v30 = vmax.f32 %v846_v22, 0.0  ;;  %v849_v31 = vadd.f32 %v1460_v20, %v805_v15  ;;  %v850_v32 = vadd.f32 %v1462_v21, %v806_v16 }
 0x152   : > { %994 = vst [vmem:[%s1562_s3 + $0x38] sm:$0xff] %v1190_v24  ;;  %v1191_v35 = vpack.c.bf16 %v876_v25, %v875_v18  ;;  %v879_v36 = vmax.f32 %v847_v26, 0.0  ;;  %v880_v37 = vmax.f32 %v848_v27, 0.0  ;;  %v851_v38 = vadd.f32 %v1460_v20, %v807_v23 }
 0x153   : > { %v1192_v41 = vpack.c.bf16 %v878_v30, %v877_v29  ;;  %v881_v42 = vmax.f32 %v849_v31, 0.0  ;;  %v882_v43 = vmax.f32 %v850_v32, 0.0  ;;  %v852_v44 = vadd.f32 %v1462_v21, %v808_v28 }
 0x154   : > { %995 = vst [vmem:[%s1562_s3 + $0x40] sm:$0xff] %v1191_v35  ;;  %v1193_v47 = vpack.c.bf16 %v880_v37, %v879_v36  ;;  %v883_v48 = vmax.f32 %v851_v38, 0.0  ;;  %v853_v49 = vadd.f32 %v1460_v20, %v809_v33  ;;  %v854_v50 = vadd.f32 %v1462_v21, %v810_v34 }
 0x155   : > { %996 = vst [vmem:[%s1562_s3 + $0x48] sm:$0xff] %v1192_v41  ;;  %v1194_v51 = vpack.c.bf16 %v882_v43, %v881_v42  ;;  %v884_v52 = vmax.f32 %v852_v44, 0.0  ;;  %v855_v53 = vadd.f32 %v1460_v20, %v811_v39  ;;  %v856_v54 = vadd.f32 %v1462_v21, %v812_v40 }
 0x156   : > { %997 = vst [vmem:[%s1562_s3 + $0x50] sm:$0xff] %v1193_v47  ;;  %v885_v55 = vmax.f32 %v853_v49, 0.0  ;;  %v886_v56 = vmax.f32 %v854_v50, 0.0  ;;  %v857_v57 = vadd.f32 %v1460_v20, %v813_v45  ;;  %v858_v58 = vadd.f32 %v1462_v21, %v814_v46 }
 0x157   : > { %998 = vst [vmem:[%s1562_s3 + $0x58] sm:$0xff] %v1194_v51  ;;  %v1195_v59 = vpack.c.bf16 %v884_v52, %v883_v48  ;;  %v887_v60 = vmax.f32 %v855_v53, 0.0  ;;  %v888_v61 = vmax.f32 %v856_v54, 0.0 }
 0x158   : > { %v1196_v62 = vpack.c.bf16 %v886_v56, %v885_v55  ;;  %v889_v63 = vmax.f32 %v857_v57, 0.0  ;;  %v890_v0 = vmax.f32 %v858_v58, 0.0 }
 0x159   : > { %999 = vst [vmem:[%s1562_s3 + $0x60] sm:$0xff] %v1195_v59  ;;  %v1197_v1 = vpack.c.bf16 %v888_v61, %v887_v60 }
 0x15a   : > { %1000 = vst [vmem:[%s1562_s3 + $0x68] sm:$0xff] %v1196_v62  ;;  %v1198_v20 = vpack.c.bf16 %v890_v0, %v889_v63 }
 0x15b   : > { %1001 = vst [vmem:[%s1562_s3 + $0x70] sm:$0xff] %v1197_v1 }
 0x15c   : > { %1002 = vst [vmem:[%s1562_s3 + $0x78] sm:$0xff] %v1198_v20 }
 0x15d PF: > { %s13_s16 = sadd.s32 1, %s1327_s16   ;;  %s1563_s12 = smov %s1315_s13 }
 0x15e   : > { %p10_p12 = scmp.ge.s32.totalorder %s13_s16, 11   ;;  %s1564_s13 = smov %s1386_s20 }
 0x15f   : > { %s1565_s14 = smov %s1323_s15  ;;  %s1566_s15 = smov %s1568_s17 }
 0x160   :  { %12 = sbr.rel (!%p10_p12) target bundleno = 3 (0x3), region = 122 }

// kernel: vae_forward.18
= control target key start
LH: loop header
LB: loop body
LE: loop exit
PB: predicated region body
PF: predicated region fallthrough
CT: control target
= control target key end

     0   :  { %s1738_s12 = smov 0   ;;  %s1740_s13 = smov 0   ;;  %s1983_s0 = inlined_call_operand.vmem [shape: bf16[512,640], index: 0, kind: input, shape index: {}]   ;;  %s1984_s1 = inlined_call_operand.vmem [shape: bf16[640,128], index: 1, kind: input, shape index: {}]   ;;  %s1985_s2 = inlined_call_operand.vmem [shape: f32[1,128], index: 2, kind: input, shape index: {}]   ;;  %s1986_s3 = inlined_call_operand.vmem [shape: bf16[512,128], index: 3, kind: output, shape index: {}]  }
   0x1   :  { %s1742_s14 = smov 0   ;;  %s1744_s15 = smov 0  }
   0x2   :  { %s1746_s16 = smov 0   ;;  %s1748_s17 = smov 0  }
   0x3   :  { %s1750_s18 = smov 0  }
   0x4 LB: > { %s25_s19 = sadd.s32 1, %s1707_s16  ;;  %s32_s20 = sadd.s32 1, %s1711_s17  ;;  %s1715_s18 = sphi %s1750_s18, %s13_s18   ;;  %s1711_s17 = sphi %s1748_s17, %s1992_s17   ;;  %s1707_s16 = sphi %s1746_s16, %s1991_s16   ;;  %s1703_s15 = sphi %s1744_s15, %s1990_s15   ;;  %s1699_s14 = sphi %s1742_s14, %s1989_s14   ;;  %s1695_s13 = sphi %s1740_s13, %s1988_s13   ;;  %s1691_s12 = sphi %s1738_s12, %s1987_s12  }
   0x5   : > { %p26_p0 = scmp.ge.s32.totalorder %s25_s19, 5  ;;  %p48_p1 = scmp.ne.s32.totalorder %s1695_s13, %s1691_s12 }
   0x6   : > { %p49_p2 = scmp.eq.s32.totalorder %s1715_s18, 0  ;;  %s41_s24 = sadd.s32 1, %s1695_s13 }
   0x7   : > { %s1994_s19 = smov (%p26_p0, %s25_s19), 0  ;;  %s1996_s20 = smov (!%p26_p0, %s32_s20), %s1711_s17 }
   0x8   : > { %p50_p3 = por %p49_p2, %p48_p1  ;;  %p34_p4 = scmp.ge.s32.totalorder %s1996_s20, 2 }
   0x9   : > { %s37_s21 = ssub.s32 %s1707_s16, %s1994_s19  ;;  %p1292_p6 = scmp.ge.s32.totalorder %s1715_s18, 10 }
   0xa   : > { %s1998_s20 = smov (%p34_p4, %s1996_s20), 0 }
   0xb   : > { %s36_s22 = ssub.s32 %s1711_s17, %s1998_s20  ;;  %162 = sbr.rel (%p1292_p6) target bundleno = 44 (0x2c), region = 20 }
   0xc   : > { %s38_s23 = sor.u32 %s37_s21, %s36_s22 }
   0xd   : > { %p39_p5 = scmp.eq.s32.totalorder %s38_s23, 0 }
   0xf   : > { %s1789_s25 = scalar_select %p39_p5, %s1695_s13, %s41_s24  }
  0x10   : > { %165 = sbr.rel (!%p50_p3) target bundleno = 44 (0x2c), region = 24  ;;  %s167_s26 = sand.u32 (%p50_p3), 1, %s1695_s13  }
  0x11   : > { %s1579_s27 = smul.u32 (%p50_p3), 160, %s1711_s17  ;;  %s1293_s28 = sshll.u32 (%p50_p3), %s167_s26, 7 }
  0x12   : > { %s1803_s7 = scalar_lea.vmem (%p50_p3), [#allocation3], %s1293_s28 }
  0x13   : > { %s172_s29 = sadd.s32 (%p50_p3), %s1707_s16, %s1579_s27 }
  0x14   : > { %s1296_s30 = sshll.u32 (%p50_p3), %s172_s29, 2 }
  0x15   : > { %s1798_s6 = scalar_lea.vmem %s1983_s0, %s1296_s30 }
  0x16   : > { %v191_v0 = vld [vmem:[%s1798_s6] sm:$0xf]  ;;  %v193_v1 = vld [vmem:[%s1798_s6 + $0x14] sm:$0xf]  ;;  %v195_v2 = vld [vmem:[%s1798_s6 + $0x28] sm:$0xf] }
  0x17   : > { %192 = vst [vmem:[%s1803_s7] sm:$0xf] %v191_v0  ;;  %194 = vst [vmem:[%s1803_s7 + $0x4] sm:$0xf] %v193_v1  ;;  %v197_v3 = vld [vmem:[%s1798_s6 + $0x3c] sm:$0xf] }
  0x18   : > { %196 = vst [vmem:[%s1803_s7 + $0x8] sm:$0xf] %v195_v2  ;;  %v199_v4 = vld [vmem:[%s1798_s6 + $0x50] sm:$0xf]  ;;  %v201_v5 = vld [vmem:[%s1798_s6 + $0x64] sm:$0xf] }
  0x19   : > { %198 = vst [vmem:[%s1803_s7 + $0xc] sm:$0xf] %v197_v3  ;;  %200 = vst [vmem:[%s1803_s7 + $0x10] sm:$0xf] %v199_v4  ;;  %v203_v6 = vld [vmem:[%s1798_s6 + $0x78] sm:$0xf] }
  0x1a   : > { %202 = vst [vmem:[%s1803_s7 + $0x14] sm:$0xf] %v201_v5  ;;  %v205_v7 = vld [vmem:[%s1798_s6 + $0x8c] sm:$0xf]  ;;  %v207_v8 = vld [vmem:[%s1798_s6 + $0xa0] sm:$0xf] }
  0x1b   : > { %204 = vst [vmem:[%s1803_s7 + $0x18] sm:$0xf] %v203_v6  ;;  %206 = vst [vmem:[%s1803_s7 + $0x1c] sm:$0xf] %v205_v7  ;;  %v209_v9 = vld [vmem:[%s1798_s6 + $0xb4] sm:$0xf] }
  0x1c   : > { %208 = vst [vmem:[%s1803_s7 + $0x20] sm:$0xf] %v207_v8  ;;  %v211_v10 = vld [vmem:[%s1798_s6 + $0xc8] sm:$0xf]  ;;  %v213_v11 = vld [vmem:[%s1798_s6 + $0xdc] sm:$0xf] }
  0x1d   : > { %210 = vst [vmem:[%s1803_s7 + $0x24] sm:$0xf] %v209_v9  ;;  %212 = vst [vmem:[%s1803_s7 + $0x28] sm:$0xf] %v211_v10  ;;  %v215_v12 = vld [vmem:[%s1798_s6 + $0xf0] sm:$0xf] }
  0x1e   : > { %214 = vst [vmem:[%s1803_s7 + $0x2c] sm:$0xf] %v213_v11  ;;  %v217_v13 = vld [vmem:[%s1798_s6 + $0x104] sm:$0xf]  ;;  %v219_v14 = vld [vmem:[%s1798_s6 + $0x118] sm:$0xf] }
  0x1f   : > { %216 = vst [vmem:[%s1803_s7 + $0x30] sm:$0xf] %v215_v12  ;;  %218 = vst [vmem:[%s1803_s7 + $0x34] sm:$0xf] %v217_v13  ;;  %v221_v15 = vld [vmem:[%s1798_s6 + $0x12c] sm:$0xf] }
  0x20   : > { %220 = vst [vmem:[%s1803_s7 + $0x38] sm:$0xf] %v219_v14  ;;  %v223_v16 = vld [vmem:[%s1798_s6 + $0x140] sm:$0xf]  ;;  %v225_v17 = vld [vmem:[%s1798_s6 + $0x154] sm:$0xf] }
  0x21   : > { %222 = vst [vmem:[%s1803_s7 + $0x3c] sm:$0xf] %v221_v15  ;;  %224 = vst [vmem:[%s1803_s7 + $0x40] sm:$0xf] %v223_v16  ;;  %v227_v18 = vld [vmem:[%s1798_s6 + $0x168] sm:$0xf] }
  0x22   : > { %226 = vst [vmem:[%s1803_s7 + $0x44] sm:$0xf] %v225_v17  ;;  %v229_v19 = vld [vmem:[%s1798_s6 + $0x17c] sm:$0xf]  ;;  %v231_v20 = vld [vmem:[%s1798_s6 + $0x190] sm:$0xf] }
  0x23   : > { %228 = vst [vmem:[%s1803_s7 + $0x48] sm:$0xf] %v227_v18  ;;  %230 = vst [vmem:[%s1803_s7 + $0x4c] sm:$0xf] %v229_v19  ;;  %v233_v21 = vld [vmem:[%s1798_s6 + $0x1a4] sm:$0xf] }
  0x24   : > { %232 = vst [vmem:[%s1803_s7 + $0x50] sm:$0xf] %v231_v20  ;;  %v235_v22 = vld [vmem:[%s1798_s6 + $0x1b8] sm:$0xf]  ;;  %v237_v23 = vld [vmem:[%s1798_s6 + $0x1cc] sm:$0xf] }
  0x25   : > { %234 = vst [vmem:[%s1803_s7 + $0x54] sm:$0xf] %v233_v21  ;;  %236 = vst [vmem:[%s1803_s7 + $0x58] sm:$0xf] %v235_v22  ;;  %v239_v24 = vld [vmem:[%s1798_s6 + $0x1e0] sm:$0xf] }
  0x26   : > { %238 = vst [vmem:[%s1803_s7 + $0x5c] sm:$0xf] %v237_v23  ;;  %v241_v25 = vld [vmem:[%s1798_s6 + $0x1f4] sm:$0xf]  ;;  %v243_v26 = vld [vmem:[%s1798_s6 + $0x208] sm:$0xf] }
  0x27   : > { %240 = vst [vmem:[%s1803_s7 + $0x60] sm:$0xf] %v239_v24  ;;  %242 = vst [vmem:[%s1803_s7 + $0x64] sm:$0xf] %v241_v25  ;;  %v245_v27 = vld [vmem:[%s1798_s6 + $0x21c] sm:$0xf] }
  0x28   : > { %244 = vst [vmem:[%s1803_s7 + $0x68] sm:$0xf] %v243_v26  ;;  %v247_v28 = vld [vmem:[%s1798_s6 + $0x230] sm:$0xf]  ;;  %v249_v29 = vld [vmem:[%s1798_s6 + $0x244] sm:$0xf] }
  0x29   : > { %246 = vst [vmem:[%s1803_s7 + $0x6c] sm:$0xf] %v245_v27  ;;  %248 = vst [vmem:[%s1803_s7 + $0x70] sm:$0xf] %v247_v28  ;;  %v251_v30 = vld [vmem:[%s1798_s6 + $0x258] sm:$0xf] }
  0x2a   : > { %250 = vst [vmem:[%s1803_s7 + $0x74] sm:$0xf] %v249_v29  ;;  %v253_v31 = vld [vmem:[%s1798_s6 + $0x26c] sm:$0xf]  ;;  %252 = vst [vmem:[%s1803_s7 + $0x78] sm:$0xf] %v251_v30 }
  0x2b   : > { %254 = vst [vmem:[%s1803_s7 + $0x7c] sm:$0xf] %v253_v31 }
  0x2c PF: > { %p1297_p7 = scmp.ge.s32.totalorder %s1715_s18, 1  ;;  %p353_p8 = scmp.lt.s32.totalorder %s1715_s18, 11 }
  0x2e   : > { %p354_p9 = pnand %p1297_p7, %p353_p8 }
  0x2f   : > { %s360_s8 = sand.u32 (!%p354_p9), 1, %s1691_s12   ;;  %s1299_s9 = sshll.u32 (!%p354_p9), %s1699_s14, 4 }
  0x30   : > { %357 = sbr.rel (%p354_p9) target bundleno = 363 (0x16b), region = 69  ;;  %s1298_s10 = sshll.u32 (!%p354_p9), %s360_s8, 7 }
  0x31   : > { %p399_p10 = scmp.lt.s32.totalorder (!%p354_p9), %s1299_s9, 79  ;;  %s1301_s11 = sshll.u32 (!%p354_p9), %s1703_s15, 5 }
  0x32   : > { %p411_p11 = scmp.lt.s32.totalorder (!%p354_p9), %s1301_s11, 63  ;;  %s1881_s12 = scalar_lea.vmem (!%p354_p9), [#allocation3], %s1298_s10 }
  0x33   : > { %p1303_p12 = scmp.ne.s32.totalorder (!%p354_p9), %s1699_s14, 0 }
  0x35   : > { %s2000_s9 = smov (!%p399_p10, %s1299_s9), 79  ;;  %s2002_s11 = smov (!%p411_p11, %s1301_s11), 63 }
  0x36   : > { %s1300_s21 = sshll.u32 %s2000_s9, 2  ;;  %s1302_s26 = sshll.u32 %s2002_s11, 2 }
  0x37   : > { %s1874_s24 = scalar_lea.vmem %s1984_s1, %s1300_s21  ;;  %s1879_s29 = scalar_lea.vmem %s1986_s3, %s1302_s26 }
  0x38   : > { %423 = sbr.rel (%p1303_p12) target bundleno = 78 (0x4e), region = 77 }
  0x3d   : > { %v1717_v32 = vmov 0.0  }
  0x3e   : > { %424 = vst [vmem:[#allocation2 + $0xb0] sm:$0xff] %v1717_v32  ;;  %425 = vst [vmem:[#allocation2] sm:$0xff] %v1717_v32 }
  0x3f   : > { %426 = vst [vmem:[#allocation2 + $0xd8] sm:$0xff] %v1717_v32  ;;  %427 = vst [vmem:[#allocation2 + $0x18] sm:$0xff] %v1717_v32 }
  0x40   : > { %428 = vst [vmem:[#allocation2 + $0x50] sm:$0xff] %v1717_v32  ;;  %429 = vst [vmem:[#allocation2 + $0x68] sm:$0xff] %v1717_v32 }
  0x41   : > { %430 = vst [vmem:[#allocation2 + $0x30] sm:$0xff] %v1717_v32  ;;  %431 = vst [vmem:[#allocation2 + $0x48] sm:$0xff] %v1717_v32 }
  0x42   : > { %432 = vst [vmem:[#allocation2 + $0x80] sm:$0xff] %v1717_v32  ;;  %433 = vst [vmem:[#allocation2 + $0x88] sm:$0xff] %v1717_v32 }
  0x43   : > { %434 = vst [vmem:[#allocation2 + $0xe8] sm:$0xff] %v1717_v32  ;;  %435 = vst [vmem:[#allocation2 + $0xb8] sm:$0xff] %v1717_v32 }
  0x44   : > { %436 = vst [vmem:[#allocation2 + $0x60] sm:$0xff] %v1717_v32  ;;  %437 = vst [vmem:[#allocation2 + $0xf0] sm:$0xff] %v1717_v32 }
  0x45   : > { %438 = vst [vmem:[#allocation2 + $0x8] sm:$0xff] %v1717_v32  ;;  %439 = vst [vmem:[#allocation2 + $0x78] sm:$0xff] %v1717_v32 }
  0x46   : > { %440 = vst [vmem:[#allocation2 + $0x38] sm:$0xff] %v1717_v32  ;;  %441 = vst [vmem:[#allocation2 + $0x58] sm:$0xff] %v1717_v32 }
  0x47   : > { %442 = vst [vmem:[#allocation2 + $0x40] sm:$0xff] %v1717_v32  ;;  %443 = vst [vmem:[#allocation2 + $0xc8] sm:$0xff] %v1717_v32 }
  0x48   : > { %444 = vst [vmem:[#allocation2 + $0xe0] sm:$0xff] %v1717_v32  ;;  %445 = vst [vmem:[#allocation2 + $0x90] sm:$0xff] %v1717_v32 }
  0x49   : > { %446 = vst [vmem:[#allocation2 + $0x70] sm:$0xff] %v1717_v32  ;;  %447 = vst [vmem:[#allocation2 + $0xc0] sm:$0xff] %v1717_v32 }
  0x4a   : > { %448 = vst [vmem:[#allocation2 + $0xa8] sm:$0xff] %v1717_v32  ;;  %449 = vst [vmem:[#allocation2 + $0xd0] sm:$0xff] %v1717_v32 }
  0x4b   : > { %450 = vst [vmem:[#allocation2 + $0x10] sm:$0xff] %v1717_v32  ;;  %451 = vst [vmem:[#allocation2 + $0x28] sm:$0xff] %v1717_v32 }
  0x4c   : > { %452 = vst [vmem:[#allocation2 + $0xa0] sm:$0xff] %v1717_v32  ;;  %453 = vst [vmem:[#allocation2 + $0xf8] sm:$0xff] %v1717_v32 }
  0x4d   : > { %454 = vst [vmem:[#allocation2 + $0x20] sm:$0xff] %v1717_v32  ;;  %455 = vst [vmem:[#allocation2 + $0x98] sm:$0xff] %v1717_v32 }
  0x4e PF: > { %v1637_v33 = vld [vmem:[%s1874_s24 + $0x38] sm:$0xff]   ;;  %v1638_v34 = vld [vmem:[%s1874_s24 + $0x30] sm:$0xff]   ;;  %v1639_v35 = vld [vmem:[%s1874_s24 + $0x28] sm:$0xff]   ;;  %p1328_p13 = scmp.ne.s32.totalorder %s1699_s14, 4 }
  0x4f   : > { %1515 = vmatprep.subr.bf16.mxu0 %v1637_v33  ;;  %1563 = vmatprep.subr.bf16.mxu1 %v1637_v33  ;;  %v1640_v36 = vld [vmem:[%s1874_s24 + $0x20] sm:$0xff]   ;;  %v1641_v39 = vld [vmem:[%s1874_s24 + $0x18] sm:$0xff]   ;;  %v1642_v40 = vld [vmem:[%s1874_s24 + $0x10] sm:$0xff]  }
  0x50   : > { %1516 = vmatpush3.bf16.msra.mxu0 %v1637_v33  ;;  %1571 = vmatpush3.bf16.msra.mxu1 %v1637_v33  ;;  %v1645_v37 = vld [vmem:[%s1881_s12] sm:$0xff]   ;;  %v1643_v41 = vld [vmem:[%s1874_s24 + $0x8] sm:$0xff]   ;;  %v1649_v45 = vld [vmem:[%s1881_s12 + $0x10] sm:$0xff]  }
  0x51   : > { %1517 = vmatprep.subr.bf16.mxu0 %v1638_v34  ;;  %1564 = vmatprep.subr.bf16.mxu1 %v1638_v34  ;;  %v1646_v38 = vld [vmem:[%s1881_s12 + $0x40] sm:$0xff]   ;;  %v1647_v43 = vld [vmem:[%s1881_s12 + $0x8] sm:$0xff]   ;;  %v1650_v46 = vld [vmem:[%s1881_s12 + $0x50] sm:$0xff]  }
  0x52   : > { %1531 = vmatprep.mubr.bf16.mxu0 %v1645_v37  ;;  %1547 = vmatprep.mubr.bf16.mxu1 %v1646_v38  ;;  %v1644_v42 = vld [vmem:[%s1874_s24] sm:$0xff]   ;;  %v1648_v44 = vld [vmem:[%s1881_s12 + $0x48] sm:$0xff]   ;;  %v1651_v47 = vld [vmem:[%s1881_s12 + $0x18] sm:$0xff]  }
  0x53   : > { %v1652_v48 = vld [vmem:[%s1881_s12 + $0x58] sm:$0xff]   ;;  %v1653_v49 = vld [vmem:[%s1881_s12 + $0x20] sm:$0xff]   ;;  %v1655_v51 = vld [vmem:[%s1881_s12 + $0x28] sm:$0xff]  }
  0x54   : > { %1518 = vmatpush3.bf16.msra.mxu0 %v1638_v34  ;;  %1572 = vmatpush3.bf16.msra.mxu1 %v1638_v34  ;;  %v1654_v50 = vld [vmem:[%s1881_s12 + $0x60] sm:$0xff]   ;;  %v1656_v52 = vld [vmem:[%s1881_s12 + $0x68] sm:$0xff]   ;;  %v1657_v53 = vld [vmem:[%s1881_s12 + $0x30] sm:$0xff]  }
  0x55   : > { %1519 = vmatprep.subr.bf16.mxu0 %v1639_v35  ;;  %1565 = vmatprep.subr.bf16.mxu1 %v1639_v35  ;;  %v1658_v54 = vld [vmem:[%s1881_s12 + $0x70] sm:$0xff]   ;;  %v1659_v55 = vld [vmem:[%s1881_s12 + $0x38] sm:$0xff]   ;;  %v474_v58 = vld [vmem:[#allocation2 + $0x40] sm:$0xff] }
  0x56   : > { %v1660_v56 = vld [vmem:[%s1881_s12 + $0x78] sm:$0xff]   ;;  %v456_v61 = vld [vmem:[#allocation2 + $0xb0] sm:$0xff]  ;;  %v475_v4 = vld [vmem:[#allocation2 + $0xc8] sm:$0xff] }
  0x57   : > { %v458_v57 = vld [vmem:[#allocation2 + $0xd8] sm:$0xff]  ;;  %v457_v9 = vld [vmem:[#allocation2] sm:$0xff]  ;;  %v462_v15 = vld [vmem:[#allocation2 + $0x30] sm:$0xff] }
  0x58   : > { %1520 = vmatpush3.bf16.msra.mxu0 %v1639_v35  ;;  %1573 = vmatpush3.bf16.msra.mxu1 %v1639_v35  ;;  %v472_v62 = vld [vmem:[#allocation2 + $0x38] sm:$0xff]  ;;  %v478_v16 = vld [vmem:[#allocation2 + $0x70] sm:$0xff]  ;;  %v476_v22 = vld [vmem:[#allocation2 + $0xe0] sm:$0xff] }
  0x59   : > { %1521 = vmatprep.subr.bf16.mxu0 %v1640_v36  ;;  %1566 = vmatprep.subr.bf16.mxu1 %v1640_v36  ;;  %v459_v3 = vld [vmem:[#allocation2 + $0x18] sm:$0xff]  ;;  %v460_v21 = vld [vmem:[#allocation2 + $0x50] sm:$0xff]  ;;  %v463_v27 = vld [vmem:[#allocation2 + $0x48] sm:$0xff] }
  0x5a   : > { %v473_v10 = vld [vmem:[#allocation2 + $0x58] sm:$0xff]  ;;  %v479_v28 = vld [vmem:[#allocation2 + $0xc0] sm:$0xff]  ;;  %v461_v33 = vld [vmem:[#allocation2 + $0x68] sm:$0xff] }
  0x5b   : > { %v477_v34 = vld [vmem:[#allocation2 + $0x90] sm:$0xff] }
  0x5c   : > { %1522 = vmatpush3.bf16.msra.mxu0 %v1640_v36  ;;  %1574 = vmatpush3.bf16.msra.mxu1 %v1640_v36 }
  0x5d   : > { %1523 = vmatprep.subr.bf16.mxu0 %v1641_v39  ;;  %1567 = vmatprep.subr.bf16.mxu1 %v1641_v39 }
  0x60   : > { %1524 = vmatpush3.bf16.msra.mxu0 %v1641_v39  ;;  %1575 = vmatpush3.bf16.msra.mxu1 %v1641_v39  ;;  %v466_v39 = vld [vmem:[#allocation2 + $0xe8] sm:$0xff] }
  0x61   : > { %1525 = vmatprep.subr.bf16.mxu0 %v1642_v40  ;;  %1568 = vmatprep.subr.bf16.mxu1 %v1642_v40 }
  0x64   : > { %1526 = vmatpush3.bf16.msra.mxu0 %v1642_v40  ;;  %1576 = vmatpush3.bf16.msra.mxu1 %v1642_v40  ;;  %v482_v40 = vld [vmem:[#allocation2 + $0x10] sm:$0xff] }
  0x65   : > { %1527 = vmatprep.subr.bf16.mxu0 %v1643_v41  ;;  %1569 = vmatprep.subr.bf16.mxu1 %v1643_v41 }
  0x68   : > { %1528 = vmatpush3.bf16.msra.mxu0 %v1643_v41  ;;  %1577 = vmatpush3.bf16.msra.mxu1 %v1643_v41 }
  0x69   : > { %1529 = vmatprep.subr.bf16.mxu0 %v1644_v42  ;;  %1570 = vmatprep.subr.bf16.mxu1 %v1644_v42 }
  0x6c   : > { %1530 = vmatpush3.bf16.msra.mxu0 %v1644_v42  ;;  %1578 = vmatpush3.bf16.msra.mxu1 %v1644_v42 }
  0x6f   : > { %1532 = vmatmul.mubr.bf16.vlgmr.msra.gmra.mxu0 %v1647_v43  ;;  %1548 = vmatmul.mubr.bf16.vlgmr.msra.gmra.mxu1 %v1648_v44 }
  0x70   : > { %1535 = vmatprep.mubr.bf16.mxu0 %v1649_v45  ;;  %1551 = vmatprep.mubr.bf16.mxu1 %v1650_v46  ;;  %v464_v45 = vld [vmem:[#allocation2 + $0x80] sm:$0xff]  ;;  %v480_v46 = vld [vmem:[#allocation2 + $0xa8] sm:$0xff] }
  0x77   : > { %1536 = vmatmul.mubr.bf16.gmra.mxu0 %v1651_v47  ;;  %1552 = vmatmul.mubr.bf16.gmra.mxu1 %v1652_v48 }
  0x78   : > { %1539 = vmatprep.mubr.bf16.mxu0 %v1653_v49  ;;  %1555 = vmatprep.mubr.bf16.mxu1 %v1654_v50 }
  0x7f   : > { %1540 = vmatmul.mubr.bf16.gmra.mxu0 %v1655_v51  ;;  %1556 = vmatmul.mubr.bf16.gmra.mxu1 %v1656_v52  ;;  %v467_v51 = vld [vmem:[#allocation2 + $0xb8] sm:$0xff]  ;;  %v483_v52 = vld [vmem:[#allocation2 + $0x28] sm:$0xff] }
  0x80   : > { %1543 = vmatprep.mubr.bf16.mxu0 %v1657_v53  ;;  %1559 = vmatprep.mubr.bf16.mxu1 %v1658_v54 }
  0x87   : > { %1544 = vmatmul.mubr.bf16.gmra.mxu0 %v1659_v55  ;;  %1560 = vmatmul.mubr.bf16.gmra.mxu1 %v1660_v56 }
 0x12f   : > { %v1533_v59 = vpop.f32.mrf.mxu0  ;;  %v1549_v60 = vpop.f32.mrf.mxu1 }
 0x130   : > { %v843_v63 = vadd.f32 %v1533_v59, %v458_v57  ;;  %v859_v0 = vadd.f32 %v1549_v60, %v474_v58  ;;  %v465_v57 = vld [vmem:[#allocation2 + $0x88] sm:$0xff]  ;;  %v481_v58 = vld [vmem:[#allocation2 + $0xd0] sm:$0xff] }
 0x131   : > { %v714_v1 = vpop.f32.mrf.mxu0  ;;  %v778_v2 = vpop.f32.mrf.mxu1 }
 0x132   : > { %875 = vst [vmem:[#allocation2 + $0xd8] sm:$0xff] %v843_v63  ;;  %891 = vst [vmem:[#allocation2 + $0x40] sm:$0xff] %v859_v0  ;;  %v841_v5 = vadd.f32 %v714_v1, %v456_v61  ;;  %v857_v6 = vadd.f32 %v778_v2, %v472_v62  ;;  %v470_v63 = vld [vmem:[#allocation2 + $0x8] sm:$0xff]  ;;  %v486_v0 = vld [vmem:[#allocation2 + $0x20] sm:$0xff] }
 0x133   : > { %v1534_v7 = vpop.f32.mrf.mxu0  ;;  %v1550_v8 = vpop.f32.mrf.mxu1 }
 0x134   : > { %873 = vst [vmem:[#allocation2 + $0xb0] sm:$0xff] %v841_v5  ;;  %889 = vst [vmem:[#allocation2 + $0x38] sm:$0xff] %v857_v6  ;;  %v844_v11 = vadd.f32 %v1534_v7, %v459_v3  ;;  %v860_v12 = vadd.f32 %v1550_v8, %v475_v4  ;;  %v468_v5 = vld [vmem:[#allocation2 + $0x60] sm:$0xff] }
 0x135   : > { %v717_v13 = vpop.f32.mrf.mxu0  ;;  %v781_v14 = vpop.f32.mrf.mxu1  ;;  %v484_v6 = vld [vmem:[#allocation2 + $0xa0] sm:$0xff] }
 0x136   : > { %876 = vst [vmem:[#allocation2 + $0x18] sm:$0xff] %v844_v11  ;;  %892 = vst [vmem:[#allocation2 + $0xc8] sm:$0xff] %v860_v12  ;;  %v842_v17 = vadd.f32 %v717_v13, %v457_v9  ;;  %v858_v18 = vadd.f32 %v781_v14, %v473_v10  ;;  %v471_v11 = vld [vmem:[#allocation2 + $0x78] sm:$0xff] }
 0x137   : > { %v1537_v19 = vpop.f32.mrf.mxu0  ;;  %v1553_v20 = vpop.f32.mrf.mxu1  ;;  %v487_v12 = vld [vmem:[#allocation2 + $0x98] sm:$0xff] }
 0x138   : > { %874 = vst [vmem:[#allocation2] sm:$0xff] %v842_v17  ;;  %890 = vst [vmem:[#allocation2 + $0x58] sm:$0xff] %v858_v18  ;;  %v847_v23 = vadd.f32 %v1537_v19, %v462_v15  ;;  %v863_v24 = vadd.f32 %v1553_v20, %v478_v16  ;;  %v469_v17 = vld [vmem:[#allocation2 + $0xf0] sm:$0xff]  ;;  %v485_v18 = vld [vmem:[#allocation2 + $0xf8] sm:$0xff] }
 0x139   : > { %v730_v25 = vpop.f32.mrf.mxu0  ;;  %v794_v26 = vpop.f32.mrf.mxu1 }
 0x13a   : > { %879 = vst [vmem:[#allocation2 + $0x30] sm:$0xff] %v847_v23  ;;  %895 = vst [vmem:[#allocation2 + $0x70] sm:$0xff] %v863_v24  ;;  %v845_v29 = vadd.f32 %v730_v25, %v460_v21  ;;  %v861_v30 = vadd.f32 %v794_v26, %v476_v22 }
 0x13b   : > { %v1538_v31 = vpop.f32.mrf.mxu0  ;;  %v1554_v32 = vpop.f32.mrf.mxu1 }
 0x13c   : > { %877 = vst [vmem:[#allocation2 + $0x50] sm:$0xff] %v845_v29  ;;  %893 = vst [vmem:[#allocation2 + $0xe0] sm:$0xff] %v861_v30  ;;  %v848_v35 = vadd.f32 %v1538_v31, %v463_v27  ;;  %v864_v36 = vadd.f32 %v1554_v32, %v479_v28 }
 0x13d   : > { %v733_v37 = vpop.f32.mrf.mxu0  ;;  %v797_v38 = vpop.f32.mrf.mxu1 }
 0x13e   : > { %880 = vst [vmem:[#allocation2 + $0x48] sm:$0xff] %v848_v35  ;;  %896 = vst [vmem:[#allocation2 + $0xc0] sm:$0xff] %v864_v36  ;;  %v846_v41 = vadd.f32 %v733_v37, %v461_v33  ;;  %v862_v42 = vadd.f32 %v797_v38, %v477_v34 }
 0x13f   : > { %v1541_v43 = vpop.f32.mrf.mxu0  ;;  %v1557_v44 = vpop.f32.mrf.mxu1 }
 0x140   : > { %878 = vst [vmem:[#allocation2 + $0x68] sm:$0xff] %v846_v41  ;;  %894 = vst [vmem:[#allocation2 + $0x90] sm:$0xff] %v862_v42  ;;  %v851_v47 = vadd.f32 %v1541_v43, %v466_v39  ;;  %v867_v48 = vadd.f32 %v1557_v44, %v482_v40 }
 0x141   : > { %v746_v49 = vpop.f32.mrf.mxu0  ;;  %v810_v50 = vpop.f32.mrf.mxu1 }
 0x142   : > { %883 = vst [vmem:[#allocation2 + $0xe8] sm:$0xff] %v851_v47  ;;  %899 = vst [vmem:[#allocation2 + $0x10] sm:$0xff] %v867_v48  ;;  %v849_v53 = vadd.f32 %v746_v49, %v464_v45  ;;  %v865_v54 = vadd.f32 %v810_v50, %v480_v46 }
 0x143   : > { %v1542_v55 = vpop.f32.mrf.mxu0  ;;  %v1558_v56 = vpop.f32.mrf.mxu1 }
 0x144   : > { %881 = vst [vmem:[#allocation2 + $0x80] sm:$0xff] %v849_v53  ;;  %897 = vst [vmem:[#allocation2 + $0xa8] sm:$0xff] %v865_v54  ;;  %v852_v59 = vadd.f32 %v1542_v55, %v467_v51  ;;  %v868_v60 = vadd.f32 %v1558_v56, %v483_v52 }
 0x145   : > { %v749_v61 = vpop.f32.mrf.mxu0  ;;  %v813_v62 = vpop.f32.mrf.mxu1 }
 0x146   : > { %884 = vst [vmem:[#allocation2 + $0xb8] sm:$0xff] %v852_v59  ;;  %900 = vst [vmem:[#allocation2 + $0x28] sm:$0xff] %v868_v60  ;;  %v850_v1 = vadd.f32 %v749_v61, %v465_v57  ;;  %v866_v2 = vadd.f32 %v813_v62, %v481_v58 }
 0x147   : > { %v1545_v3 = vpop.f32.mrf.mxu0  ;;  %v1561_v4 = vpop.f32.mrf.mxu1 }
 0x148   : > { %882 = vst [vmem:[#allocation2 + $0x88] sm:$0xff] %v850_v1  ;;  %898 = vst [vmem:[#allocation2 + $0xd0] sm:$0xff] %v866_v2  ;;  %v855_v7 = vadd.f32 %v1545_v3, %v470_v63  ;;  %v871_v8 = vadd.f32 %v1561_v4, %v486_v0 }
 0x149   : > { %v762_v9 = vpop.f32.mrf.mxu0  ;;  %v826_v10 = vpop.f32.mrf.mxu1 }
 0x14a   : > { %887 = vst [vmem:[#allocation2 + $0x8] sm:$0xff] %v855_v7  ;;  %903 = vst [vmem:[#allocation2 + $0x20] sm:$0xff] %v871_v8  ;;  %v853_v13 = vadd.f32 %v762_v9, %v468_v5  ;;  %v869_v14 = vadd.f32 %v826_v10, %v484_v6 }
 0x14b   : > { %v1546_v15 = vpop.f32.mrf.mxu0  ;;  %v1562_v16 = vpop.f32.mrf.mxu1 }
 0x14c   : > { %885 = vst [vmem:[#allocation2 + $0x60] sm:$0xff] %v853_v13  ;;  %901 = vst [vmem:[#allocation2 + $0xa0] sm:$0xff] %v869_v14  ;;  %v856_v19 = vadd.f32 %v1546_v15, %v471_v11  ;;  %v872_v20 = vadd.f32 %v1562_v16, %v487_v12  ;;  %908 = sbr.rel (%p1328_p13) target bundleno = 363 (0x16b), region = 81 }
 0x14d   : > { %v765_v21 = vpop.f32.mrf.mxu0  ;;  %v829_v22 = vpop.f32.mrf.mxu1 }
 0x14e   : > { %888 = vst [vmem:[#allocation2 + $0x78] sm:$0xff] %v856_v19  ;;  %904 = vst [vmem:[#allocation2 + $0x98] sm:$0xff] %v872_v20  ;;  %v854_v23 = vadd.f32 %v765_v21, %v469_v17  ;;  %v870_v24 = vadd.f32 %v829_v22, %v485_v18 }
 0x150   : > { %886 = vst [vmem:[#allocation2 + $0xf0] sm:$0xff] %v854_v23  ;;  %902 = vst [vmem:[#allocation2 + $0xf8] sm:$0xff] %v870_v24 }
 0x151   : > { %v909_v25 = vld [vmem:[#allocation2 + $0xb0] sm:$0xff]  ;;  %v910_v26 = vld [vmem:[#allocation2] sm:$0xff]  ;;  %v911_v30 = vld [vmem:[#allocation2 + $0xd8] sm:$0xff] }
 0x152   : > { %v1912_v27 = vld [vmem:[%s1985_s2] ss:$0 sm:$0xff]  ;;  %v912_v31 = vld [vmem:[#allocation2 + $0x18] sm:$0xff]  ;;  %v913_v32 = vld [vmem:[#allocation2 + $0x50] sm:$0xff] }
 0x153   : > { %v948_v28 = vadd.f32 %v1912_v27, %v909_v25  ;;  %v949_v29 = vadd.f32 %v1912_v27, %v910_v26  ;;  %v950_v33 = vadd.f32 %v1912_v27, %v911_v30  ;;  %v951_v34 = vadd.f32 %v1912_v27, %v912_v31  ;;  %v914_v35 = vld [vmem:[#allocation2 + $0x68] sm:$0xff]  ;;  %v915_v37 = vld [vmem:[#allocation2 + $0x30] sm:$0xff]  ;;  %v917_v43 = vld [vmem:[#allocation2 + $0x80] sm:$0xff] }
 0x154   : > { %v952_v36 = vadd.f32 %v1912_v27, %v913_v32  ;;  %v916_v38 = vld [vmem:[#allocation2 + $0x48] sm:$0xff]  ;;  %v953_v41 = vadd.f32 %v1912_v27, %v914_v35  ;;  %v954_v42 = vadd.f32 %v1912_v27, %v915_v37  ;;  %v920_v50 = vld [vmem:[#allocation2 + $0xb8] sm:$0xff]  ;;  %v921_v51 = vld [vmem:[#allocation2 + $0x60] sm:$0xff]  ;;  %v956_v55 = vadd.f32 %v1912_v27, %v917_v43 }
 0x155   : > { %v980_v39 = vmax.f32 %v948_v28, 0.0  ;;  %v981_v40 = vmax.f32 %v949_v29, 0.0  ;;  %v918_v44 = vld [vmem:[#allocation2 + $0x88] sm:$0xff]  ;;  %v982_v46 = vmax.f32 %v950_v33, 0.0  ;;  %v983_v47 = vmax.f32 %v951_v34, 0.0  ;;  %v924_v62 = vld [vmem:[#allocation2 + $0x78] sm:$0xff] }
 0x156   : > { %v919_v45 = vld [vmem:[#allocation2 + $0xe8] sm:$0xff]  ;;  %v984_v48 = vmax.f32 %v952_v36, 0.0  ;;  %v955_v49 = vadd.f32 %v1912_v27, %v916_v38  ;;  %v985_v53 = vmax.f32 %v953_v41, 0.0  ;;  %v986_v54 = vmax.f32 %v954_v42, 0.0  ;;  %v925_v3 = vld [vmem:[#allocation2 + $0x38] sm:$0xff]  ;;  %v927_v9 = vld [vmem:[#allocation2 + $0x40] sm:$0xff] }
 0x157   : > { %v1399_v52 = vpack.c.bf16 %v981_v40, %v980_v39  ;;  %v922_v56 = vld [vmem:[#allocation2 + $0xf0] sm:$0xff]  ;;  %v1404_v57 = vpack.c.bf16 %v983_v47, %v982_v46  ;;  %v957_v59 = vadd.f32 %v1912_v27, %v918_v44  ;;  %v958_v60 = vadd.f32 %v1912_v27, %v919_v45  ;;  %v923_v61 = vld [vmem:[#allocation2 + $0x8] sm:$0xff]  ;;  %v926_v4 = vld [vmem:[#allocation2 + $0x58] sm:$0xff] }
 0x158   : > { %v987_v58 = vmax.f32 %v955_v49, 0.0  ;;  %v1409_v63 = vpack.c.bf16 %v985_v53, %v984_v48  ;;  %v988_v0 = vmax.f32 %v956_v55, 0.0  ;;  %v959_v1 = vadd.f32 %v1912_v27, %v920_v50  ;;  %v928_v14 = vld [vmem:[#allocation2 + $0xc8] sm:$0xff]  ;;  %v929_v19 = vld [vmem:[#allocation2 + $0xe0] sm:$0xff]  ;;  %v930_v20 = vld [vmem:[#allocation2 + $0x90] sm:$0xff] }
 0x159   : > { %1400 = vst [vmem:[%s1879_s29] sm:$0xff] %v1399_v52   ;;  %v960_v2 = vadd.f32 %v1912_v27, %v921_v51  ;;  %1476 = vst [vmem:[%s1879_s29 + $0x8] sm:$0xff] %v1404_v57   ;;  %v989_v6 = vmax.f32 %v957_v59, 0.0  ;;  %v990_v7 = vmax.f32 %v958_v60, 0.0  ;;  %v961_v8 = vadd.f32 %v1912_v27, %v922_v56  ;;  %v931_v25 = vld [vmem:[#allocation2 + $0x70] sm:$0xff]  ;;  %v932_v26 = vld [vmem:[#allocation2 + $0xc0] sm:$0xff] }
 0x15a   : > { %v1414_v5 = vpack.c.bf16 %v987_v58, %v986_v54  ;;  %1477 = vst [vmem:[%s1879_s29 + $0x10] sm:$0xff] %v1409_v63   ;;  %v991_v10 = vmax.f32 %v959_v1, 0.0  ;;  %v962_v12 = vadd.f32 %v1912_v27, %v923_v61  ;;  %v963_v13 = vadd.f32 %v1912_v27, %v924_v62  ;;  %v933_v32 = vld [vmem:[#allocation2 + $0xa8] sm:$0xff]  ;;  %v934_v33 = vld [vmem:[#allocation2 + $0xd0] sm:$0xff]  ;;  %v937_v48 = vld [vmem:[#allocation2 + $0xa0] sm:$0xff] }
 0x15b   : > { %v992_v11 = vmax.f32 %v960_v2, 0.0  ;;  %v1419_v15 = vpack.c.bf16 %v989_v6, %v988_v0  ;;  %v993_v16 = vmax.f32 %v961_v8, 0.0  ;;  %v964_v17 = vadd.f32 %v1912_v27, %v925_v3  ;;  %v935_v38 = vld [vmem:[#allocation2 + $0x10] sm:$0xff]  ;;  %v936_v43 = vld [vmem:[#allocation2 + $0x28] sm:$0xff]  ;;  %v938_v49 = vld [vmem:[#allocation2 + $0xf8] sm:$0xff] }
 0x15c   : > { %1478 = vst [vmem:[%s1879_s29 + $0x18] sm:$0xff] %v1414_v5   ;;  %v965_v18 = vadd.f32 %v1912_v27, %v926_v4  ;;  %v1424_v21 = vpack.c.bf16 %v991_v10, %v990_v7  ;;  %v994_v22 = vmax.f32 %v962_v12, 0.0  ;;  %v995_v23 = vmax.f32 %v963_v13, 0.0  ;;  %v939_v54 = vld [vmem:[#allocation2 + $0x20] sm:$0xff]  ;;  %v940_v55 = vld [vmem:[#allocation2 + $0x98] sm:$0xff] }
 0x15d   : > { %v966_v24 = vadd.f32 %v1912_v27, %v927_v9  ;;  %1479 = vst [vmem:[%s1879_s29 + $0x20] sm:$0xff] %v1419_v15   ;;  %v1429_v28 = vpack.c.bf16 %v993_v16, %v992_v11  ;;  %v996_v29 = vmax.f32 %v964_v17, 0.0  ;;  %v967_v31 = vadd.f32 %v1912_v27, %v928_v14 }
 0x15e   : > { %v997_v30 = vmax.f32 %v965_v18, 0.0  ;;  %1480 = vst [vmem:[%s1879_s29 + $0x28] sm:$0xff] %v1424_v21   ;;  %v1434_v34 = vpack.c.bf16 %v995_v23, %v994_v22  ;;  %v968_v36 = vadd.f32 %v1912_v27, %v929_v19  ;;  %v969_v37 = vadd.f32 %v1912_v27, %v930_v20 }
 0x15f   : > { %v998_v35 = vmax.f32 %v966_v24, 0.0  ;;  %1481 = vst [vmem:[%s1879_s29 + $0x30] sm:$0xff] %v1429_v28   ;;  %v999_v40 = vmax.f32 %v967_v31, 0.0  ;;  %v970_v41 = vadd.f32 %v1912_v27, %v931_v25  ;;  %v971_v42 = vadd.f32 %v1912_v27, %v932_v26 }
 0x160   : > { %v1439_v39 = vpack.c.bf16 %v997_v30, %v996_v29  ;;  %1482 = vst [vmem:[%s1879_s29 + $0x38] sm:$0xff] %v1434_v34   ;;  %v1000_v44 = vmax.f32 %v968_v36, 0.0  ;;  %v1001_v45 = vmax.f32 %v969_v37, 0.0  ;;  %v972_v46 = vadd.f32 %v1912_v27, %v933_v32 }
 0x161   : > { %v973_v47 = vadd.f32 %v1912_v27, %v934_v33  ;;  %v1444_v50 = vpack.c.bf16 %v999_v40, %v998_v35  ;;  %v1002_v51 = vmax.f32 %v970_v41, 0.0  ;;  %v1003_v52 = vmax.f32 %v971_v42, 0.0 }
 0x162   : > { %1483 = vst [vmem:[%s1879_s29 + $0x40] sm:$0xff] %v1439_v39   ;;  %v974_v53 = vadd.f32 %v1912_v27, %v935_v38  ;;  %v1449_v56 = vpack.c.bf16 %v1001_v45, %v1000_v44  ;;  %v1004_v57 = vmax.f32 %v972_v46, 0.0  ;;  %v975_v59 = vadd.f32 %v1912_v27, %v936_v43 }
 0x163   : > { %v1005_v58 = vmax.f32 %v973_v47, 0.0  ;;  %1484 = vst [vmem:[%s1879_s29 + $0x48] sm:$0xff] %v1444_v50   ;;  %v1454_v60 = vpack.c.bf16 %v1003_v52, %v1002_v51  ;;  %v976_v62 = vadd.f32 %v1912_v27, %v937_v48  ;;  %v977_v63 = vadd.f32 %v1912_v27, %v938_v49 }
 0x164   : > { %v1006_v61 = vmax.f32 %v974_v53, 0.0  ;;  %1485 = vst [vmem:[%s1879_s29 + $0x50] sm:$0xff] %v1449_v56   ;;  %v1007_v1 = vmax.f32 %v975_v59, 0.0  ;;  %v978_v2 = vadd.f32 %v1912_v27, %v939_v54  ;;  %v979_v3 = vadd.f32 %v1912_v27, %v940_v55 }
 0x165   : > { %v1459_v0 = vpack.c.bf16 %v1005_v58, %v1004_v57  ;;  %1486 = vst [vmem:[%s1879_s29 + $0x58] sm:$0xff] %v1454_v60   ;;  %v1008_v4 = vmax.f32 %v976_v62, 0.0  ;;  %v1009_v5 = vmax.f32 %v977_v63, 0.0 }
 0x166   : > { %v1464_v6 = vpack.c.bf16 %v1007_v1, %v1006_v61  ;;  %v1010_v7 = vmax.f32 %v978_v2, 0.0  ;;  %v1011_v8 = vmax.f32 %v979_v3, 0.0 }
 0x167   : > { %1487 = vst [vmem:[%s1879_s29 + $0x60] sm:$0xff] %v1459_v0   ;;  %v1469_v9 = vpack.c.bf16 %v1009_v5, %v1008_v4 }
 0x168   : > { %1488 = vst [vmem:[%s1879_s29 + $0x68] sm:$0xff] %v1464_v6   ;;  %v1474_v10 = vpack.c.bf16 %v1011_v8, %v1010_v7 }
 0x169   : > { %1489 = vst [vmem:[%s1879_s29 + $0x70] sm:$0xff] %v1469_v9  }
 0x16a   : > { %1490 = vst [vmem:[%s1879_s29 + $0x78] sm:$0xff] %v1474_v10  }
 0x16b PF: > { %s13_s18 = sadd.s32 1, %s1715_s18   ;;  %s1987_s12 = smov %s1695_s13 }
 0x16c   : > { %p10_p0 = scmp.ge.s32.totalorder %s13_s18, 12   ;;  %s1988_s13 = smov %s1789_s25 }
 0x16d   : > { %s1989_s14 = smov %s1707_s16  ;;  %s1990_s15 = smov %s1711_s17 }
 0x16e   : > { %s1991_s16 = smov %s1994_s19  ;;  %s1992_s17 = smov %s1998_s20 }
 0x16f   :  { %12 = sbr.rel (!%p10_p0) target bundleno = 4 (0x4), region = 122 }

// kernel: vae_forward.19
= control target key start
LH: loop header
LB: loop body
LE: loop exit
PB: predicated region body
PF: predicated region fallthrough
CT: control target
= control target key end

     0   :  { %s1771_s12 = smov 0   ;;  %s1773_s13 = smov 0   ;;  %s2032_s0 = inlined_call_operand.vmem [shape: bf16[2048,384], index: 0, kind: input, shape index: {}]   ;;  %s2033_s1 = inlined_call_operand.vmem [shape: bf16[384,128], index: 1, kind: input, shape index: {}]   ;;  %s2034_s2 = inlined_call_operand.vmem [shape: f32[1,128], index: 2, kind: input, shape index: {}]   ;;  %s2035_s3 = inlined_call_operand.vmem [shape: f32[2048,128], index: 3, kind: output, shape index: {}]  }
   0x1   :  { %s1775_s14 = smov 0   ;;  %s1777_s15 = smov 0  }
   0x2   :  { %s1779_s16 = smov 0   ;;  %s1781_s17 = smov 0  }
   0x3   :  { %s1783_s18 = smov 0  }
   0x4 LB: > { %s25_s19 = sadd.s32 1, %s1740_s16  ;;  %s32_s20 = sadd.s32 1, %s1744_s17  ;;  %s1748_s18 = sphi %s1783_s18, %s13_s18   ;;  %s1744_s17 = sphi %s1781_s17, %s2041_s17   ;;  %s1740_s16 = sphi %s1779_s16, %s2040_s16   ;;  %s1736_s15 = sphi %s1777_s15, %s2039_s15   ;;  %s1732_s14 = sphi %s1775_s14, %s2038_s14   ;;  %s1728_s13 = sphi %s1773_s13, %s2037_s13   ;;  %s1724_s12 = sphi %s1771_s12, %s2036_s12  }
   0x5   : > { %p26_p0 = scmp.ge.s32.totalorder %s25_s19, 3  ;;  %p48_p1 = scmp.ne.s32.totalorder %s1728_s13, %s1724_s12 }
   0x6   : > { %p49_p2 = scmp.eq.s32.totalorder %s1748_s18, 0  ;;  %s41_s24 = sadd.s32 1, %s1728_s13 }
   0x7   : > { %s2043_s19 = smov (%p26_p0, %s25_s19), 0  ;;  %s2045_s20 = smov (!%p26_p0, %s32_s20), %s1744_s17 }
   0x8   : > { %p50_p3 = por %p49_p2, %p48_p1  ;;  %p34_p4 = scmp.ge.s32.totalorder %s2045_s20, 8 }
   0x9   : > { %s37_s21 = ssub.s32 %s1740_s16, %s2043_s19  ;;  %p1324_p6 = scmp.ge.s32.totalorder %s1748_s18, 24 }
   0xa   : > { %s2047_s20 = smov (%p34_p4, %s2045_s20), 0 }
   0xb   : > { %s36_s22 = ssub.s32 %s1744_s17, %s2047_s20  ;;  %162 = sbr.rel (%p1324_p6) target bundleno = 44 (0x2c), region = 20 }
   0xc   : > { %s38_s23 = sor.u32 %s37_s21, %s36_s22 }
   0xd   : > { %p39_p5 = scmp.eq.s32.totalorder %s38_s23, 0 }
   0xf   : > { %s1822_s25 = scalar_select %p39_p5, %s1728_s13, %s41_s24  }
  0x10   : > { %165 = sbr.rel (!%p50_p3) target bundleno = 44 (0x2c), region = 24  ;;  %s167_s26 = sand.u32 (%p50_p3), 1, %s1728_s13  }
  0x11   : > { %s1484_s27 = smul.u32 (%p50_p3), 96, %s1744_s17  ;;  %s1325_s28 = sshll.u32 (%p50_p3), %s167_s26, 7 }
  0x12   : > { %s1836_s7 = scalar_lea.vmem (%p50_p3), [#allocation3], %s1325_s28 }
  0x13   : > { %s172_s29 = sadd.s32 (%p50_p3), %s1740_s16, %s1484_s27 }
  0x14   : > { %s1328_s30 = sshll.u32 (%p50_p3), %s172_s29, 2 }
  0x15   : > { %s1831_s6 = scalar_lea.vmem %s2032_s0, %s1328_s30 }
  0x16   : > { %v191_v0 = vld [vmem:[%s1831_s6] sm:$0xf]  ;;  %v193_v1 = vld [vmem:[%s1831_s6 + $0xc] sm:$0xf]  ;;  %v195_v2 = vld [vmem:[%s1831_s6 + $0x18] sm:$0xf] }
  0x17   : > { %192 = vst [vmem:[%s1836_s7] sm:$0xf] %v191_v0  ;;  %194 = vst [vmem:[%s1836_s7 + $0x4] sm:$0xf] %v193_v1  ;;  %v197_v3 = vld [vmem:[%s1831_s6 + $0x24] sm:$0xf] }
  0x18   : > { %196 = vst [vmem:[%s1836_s7 + $0x8] sm:$0xf] %v195_v2  ;;  %v199_v4 = vld [vmem:[%s1831_s6 + $0x30] sm:$0xf]  ;;  %v201_v5 = vld [vmem:[%s1831_s6 + $0x3c] sm:$0xf] }
  0x19   : > { %198 = vst [vmem:[%s1836_s7 + $0xc] sm:$0xf] %v197_v3  ;;  %200 = vst [vmem:[%s1836_s7 + $0x10] sm:$0xf] %v199_v4  ;;  %v203_v6 = vld [vmem:[%s1831_s6 + $0x48] sm:$0xf] }
  0x1a   : > { %202 = vst [vmem:[%s1836_s7 + $0x14] sm:$0xf] %v201_v5  ;;  %v205_v7 = vld [vmem:[%s1831_s6 + $0x54] sm:$0xf]  ;;  %v207_v8 = vld [vmem:[%s1831_s6 + $0x60] sm:$0xf] }
  0x1b   : > { %204 = vst [vmem:[%s1836_s7 + $0x18] sm:$0xf] %v203_v6  ;;  %206 = vst [vmem:[%s1836_s7 + $0x1c] sm:$0xf] %v205_v7  ;;  %v209_v9 = vld [vmem:[%s1831_s6 + $0x6c] sm:$0xf] }
  0x1c   : > { %208 = vst [vmem:[%s1836_s7 + $0x20] sm:$0xf] %v207_v8  ;;  %v211_v10 = vld [vmem:[%s1831_s6 + $0x78] sm:$0xf]  ;;  %v213_v11 = vld [vmem:[%s1831_s6 + $0x84] sm:$0xf] }
  0x1d   : > { %210 = vst [vmem:[%s1836_s7 + $0x24] sm:$0xf] %v209_v9  ;;  %212 = vst [vmem:[%s1836_s7 + $0x28] sm:$0xf] %v211_v10  ;;  %v215_v12 = vld [vmem:[%s1831_s6 + $0x90] sm:$0xf] }
  0x1e   : > { %214 = vst [vmem:[%s1836_s7 + $0x2c] sm:$0xf] %v213_v11  ;;  %v217_v13 = vld [vmem:[%s1831_s6 + $0x9c] sm:$0xf]  ;;  %v219_v14 = vld [vmem:[%s1831_s6 + $0xa8] sm:$0xf] }
  0x1f   : > { %216 = vst [vmem:[%s1836_s7 + $0x30] sm:$0xf] %v215_v12  ;;  %218 = vst [vmem:[%s1836_s7 + $0x34] sm:$0xf] %v217_v13  ;;  %v221_v15 = vld [vmem:[%s1831_s6 + $0xb4] sm:$0xf] }
  0x20   : > { %220 = vst [vmem:[%s1836_s7 + $0x38] sm:$0xf] %v219_v14  ;;  %v223_v16 = vld [vmem:[%s1831_s6 + $0xc0] sm:$0xf]  ;;  %v225_v17 = vld [vmem:[%s1831_s6 + $0xcc] sm:$0xf] }
  0x21   : > { %222 = vst [vmem:[%s1836_s7 + $0x3c] sm:$0xf] %v221_v15  ;;  %224 = vst [vmem:[%s1836_s7 + $0x40] sm:$0xf] %v223_v16  ;;  %v227_v18 = vld [vmem:[%s1831_s6 + $0xd8] sm:$0xf] }
  0x22   : > { %226 = vst [vmem:[%s1836_s7 + $0x44] sm:$0xf] %v225_v17  ;;  %v229_v19 = vld [vmem:[%s1831_s6 + $0xe4] sm:$0xf]  ;;  %v231_v20 = vld [vmem:[%s1831_s6 + $0xf0] sm:$0xf] }
  0x23   : > { %228 = vst [vmem:[%s1836_s7 + $0x48] sm:$0xf] %v227_v18  ;;  %230 = vst [vmem:[%s1836_s7 + $0x4c] sm:$0xf] %v229_v19  ;;  %v233_v21 = vld [vmem:[%s1831_s6 + $0xfc] sm:$0xf] }
  0x24   : > { %232 = vst [vmem:[%s1836_s7 + $0x50] sm:$0xf] %v231_v20  ;;  %v235_v22 = vld [vmem:[%s1831_s6 + $0x108] sm:$0xf]  ;;  %v237_v23 = vld [vmem:[%s1831_s6 + $0x114] sm:$0xf] }
  0x25   : > { %234 = vst [vmem:[%s1836_s7 + $0x54] sm:$0xf] %v233_v21  ;;  %236 = vst [vmem:[%s1836_s7 + $0x58] sm:$0xf] %v235_v22  ;;  %v239_v24 = vld [vmem:[%s1831_s6 + $0x120] sm:$0xf] }
  0x26   : > { %238 = vst [vmem:[%s1836_s7 + $0x5c] sm:$0xf] %v237_v23  ;;  %v241_v25 = vld [vmem:[%s1831_s6 + $0x12c] sm:$0xf]  ;;  %v243_v26 = vld [vmem:[%s1831_s6 + $0x138] sm:$0xf] }
  0x27   : > { %240 = vst [vmem:[%s1836_s7 + $0x60] sm:$0xf] %v239_v24  ;;  %242 = vst [vmem:[%s1836_s7 + $0x64] sm:$0xf] %v241_v25  ;;  %v245_v27 = vld [vmem:[%s1831_s6 + $0x144] sm:$0xf] }
  0x28   : > { %244 = vst [vmem:[%s1836_s7 + $0x68] sm:$0xf] %v243_v26  ;;  %v247_v28 = vld [vmem:[%s1831_s6 + $0x150] sm:$0xf]  ;;  %v249_v29 = vld [vmem:[%s1831_s6 + $0x15c] sm:$0xf] }
  0x29   : > { %246 = vst [vmem:[%s1836_s7 + $0x6c] sm:$0xf] %v245_v27  ;;  %248 = vst [vmem:[%s1836_s7 + $0x70] sm:$0xf] %v247_v28  ;;  %v251_v30 = vld [vmem:[%s1831_s6 + $0x168] sm:$0xf] }
  0x2a   : > { %250 = vst [vmem:[%s1836_s7 + $0x74] sm:$0xf] %v249_v29  ;;  %v253_v31 = vld [vmem:[%s1831_s6 + $0x174] sm:$0xf]  ;;  %252 = vst [vmem:[%s1836_s7 + $0x78] sm:$0xf] %v251_v30 }
  0x2b   : > { %254 = vst [vmem:[%s1836_s7 + $0x7c] sm:$0xf] %v253_v31 }
  0x2c PF: > { %p1329_p7 = scmp.ge.s32.totalorder %s1748_s18, 1  ;;  %p353_p8 = scmp.lt.s32.totalorder %s1748_s18, 25 }
  0x2e   : > { %p354_p9 = pnand %p1329_p7, %p353_p8 }
  0x2f   : > { %s360_s8 = sand.u32 (!%p354_p9), 1, %s1724_s12   ;;  %s1331_s9 = sshll.u32 (!%p354_p9), %s1732_s14, 4 }
  0x30   : > { %357 = sbr.rel (%p354_p9) target bundleno = 420 (0x1a4), region = 69  ;;  %s1330_s10 = sshll.u32 (!%p354_p9), %s360_s8, 7 }
  0x31   : > { %p399_p10 = scmp.lt.s32.totalorder (!%p354_p9), %s1331_s9, 47  ;;  %s1333_s11 = sshll.u32 (!%p354_p9), %s1736_s15, 5 }
  0x32   : > { %p411_p11 = scmp.lt.s32.totalorder (!%p354_p9), %s1333_s11, 255  ;;  %s1914_s12 = scalar_lea.vmem (!%p354_p9), [#allocation3], %s1330_s10 }
  0x33   : > { %p1335_p12 = scmp.ne.s32.totalorder (!%p354_p9), %s1732_s14, 0 }
  0x35   : > { %s2049_s9 = smov (!%p399_p10, %s1331_s9), 47  ;;  %s2051_s11 = smov (!%p411_p11, %s1333_s11), 255 }
  0x36   : > { %s1332_s21 = sshll.u32 %s2049_s9, 2  ;;  %s1334_s26 = sshll.u32 %s2051_s11, 3 }
  0x37   : > { %s1907_s24 = scalar_lea.vmem %s2033_s1, %s1332_s21  ;;  %s1912_s29 = scalar_lea.vmem %s2035_s3, %s1334_s26 }
  0x38   : > { %423 = sbr.rel (%p1335_p12) target bundleno = 78 (0x4e), region = 77 }
  0x3d   : > { %v1750_v32 = vmov 0.0  }
  0x3e   : > { %424 = vst [vmem:[#allocation2 + $0xb0] sm:$0xff] %v1750_v32  ;;  %425 = vst [vmem:[#allocation2] sm:$0xff] %v1750_v32 }
  0x3f   : > { %426 = vst [vmem:[#allocation2 + $0xd8] sm:$0xff] %v1750_v32  ;;  %427 = vst [vmem:[#allocation2 + $0x18] sm:$0xff] %v1750_v32 }
  0x40   : > { %428 = vst [vmem:[#allocation2 + $0x50] sm:$0xff] %v1750_v32  ;;  %429 = vst [vmem:[#allocation2 + $0x68] sm:$0xff] %v1750_v32 }
  0x41   : > { %430 = vst [vmem:[#allocation2 + $0x30] sm:$0xff] %v1750_v32  ;;  %431 = vst [vmem:[#allocation2 + $0x48] sm:$0xff] %v1750_v32 }
  0x42   : > { %432 = vst [vmem:[#allocation2 + $0x80] sm:$0xff] %v1750_v32  ;;  %433 = vst [vmem:[#allocation2 + $0x88] sm:$0xff] %v1750_v32 }
  0x43   : > { %434 = vst [vmem:[#allocation2 + $0xe8] sm:$0xff] %v1750_v32  ;;  %435 = vst [vmem:[#allocation2 + $0xb8] sm:$0xff] %v1750_v32 }
  0x44   : > { %436 = vst [vmem:[#allocation2 + $0x60] sm:$0xff] %v1750_v32  ;;  %437 = vst [vmem:[#allocation2 + $0xf0] sm:$0xff] %v1750_v32 }
  0x45   : > { %438 = vst [vmem:[#allocation2 + $0x8] sm:$0xff] %v1750_v32  ;;  %439 = vst [vmem:[#allocation2 + $0x78] sm:$0xff] %v1750_v32 }
  0x46   : > { %440 = vst [vmem:[#allocation2 + $0x38] sm:$0xff] %v1750_v32  ;;  %441 = vst [vmem:[#allocation2 + $0x58] sm:$0xff] %v1750_v32 }
  0x47   : > { %442 = vst [vmem:[#allocation2 + $0x40] sm:$0xff] %v1750_v32  ;;  %443 = vst [vmem:[#allocation2 + $0xc8] sm:$0xff] %v1750_v32 }
  0x48   : > { %444 = vst [vmem:[#allocation2 + $0xe0] sm:$0xff] %v1750_v32  ;;  %445 = vst [vmem:[#allocation2 + $0x90] sm:$0xff] %v1750_v32 }
  0x49   : > { %446 = vst [vmem:[#allocation2 + $0x70] sm:$0xff] %v1750_v32  ;;  %447 = vst [vmem:[#allocation2 + $0xc0] sm:$0xff] %v1750_v32 }
  0x4a   : > { %448 = vst [vmem:[#allocation2 + $0xa8] sm:$0xff] %v1750_v32  ;;  %449 = vst [vmem:[#allocation2 + $0xd0] sm:$0xff] %v1750_v32 }
  0x4b   : > { %450 = vst [vmem:[#allocation2 + $0x10] sm:$0xff] %v1750_v32  ;;  %451 = vst [vmem:[#allocation2 + $0x28] sm:$0xff] %v1750_v32 }
  0x4c   : > { %452 = vst [vmem:[#allocation2 + $0xa0] sm:$0xff] %v1750_v32  ;;  %453 = vst [vmem:[#allocation2 + $0xf8] sm:$0xff] %v1750_v32 }
  0x4d   : > { %454 = vst [vmem:[#allocation2 + $0x20] sm:$0xff] %v1750_v32  ;;  %455 = vst [vmem:[#allocation2 + $0x98] sm:$0xff] %v1750_v32 }
  0x4e PF: > { %v1542_v33 = vld [vmem:[%s1907_s24 + $0x38] sm:$0xff]   ;;  %v1543_v34 = vld [vmem:[%s1907_s24 + $0x30] sm:$0xff]   ;;  %v1544_v35 = vld [vmem:[%s1907_s24 + $0x28] sm:$0xff]   ;;  %p1360_p13 = scmp.ne.s32.totalorder %s1732_s14, 2 }
  0x4f   : > { %1420 = vmatprep.subr.bf16.mxu0 %v1542_v33  ;;  %1468 = vmatprep.subr.bf16.mxu1 %v1542_v33  ;;  %v1545_v36 = vld [vmem:[%s1907_s24 + $0x20] sm:$0xff]   ;;  %v1546_v39 = vld [vmem:[%s1907_s24 + $0x18] sm:$0xff]   ;;  %v1547_v40 = vld [vmem:[%s1907_s24 + $0x10] sm:$0xff]  }
  0x50   : > { %1421 = vmatpush3.bf16.msra.mxu0 %v1542_v33  ;;  %1476 = vmatpush3.bf16.msra.mxu1 %v1542_v33  ;;  %v1550_v37 = vld [vmem:[%s1914_s12] sm:$0xff]   ;;  %v1548_v41 = vld [vmem:[%s1907_s24 + $0x8] sm:$0xff]   ;;  %v1554_v45 = vld [vmem:[%s1914_s12 + $0x10] sm:$0xff]  }
  0x51   : > { %1422 = vmatprep.subr.bf16.mxu0 %v1543_v34  ;;  %1469 = vmatprep.subr.bf16.mxu1 %v1543_v34  ;;  %v1551_v38 = vld [vmem:[%s1914_s12 + $0x40] sm:$0xff]   ;;  %v1552_v43 = vld [vmem:[%s1914_s12 + $0x8] sm:$0xff]   ;;  %v1555_v46 = vld [vmem:[%s1914_s12 + $0x50] sm:$0xff]  }
  0x52   : > { %1436 = vmatprep.mubr.bf16.mxu0 %v1550_v37  ;;  %1452 = vmatprep.mubr.bf16.mxu1 %v1551_v38  ;;  %v1549_v42 = vld [vmem:[%s1907_s24] sm:$0xff]   ;;  %v1553_v44 = vld [vmem:[%s1914_s12 + $0x48] sm:$0xff]   ;;  %v1556_v47 = vld [vmem:[%s1914_s12 + $0x18] sm:$0xff]  }
  0x53   : > { %v1557_v48 = vld [vmem:[%s1914_s12 + $0x58] sm:$0xff]   ;;  %v1558_v49 = vld [vmem:[%s1914_s12 + $0x20] sm:$0xff]   ;;  %v1560_v51 = vld [vmem:[%s1914_s12 + $0x28] sm:$0xff]  }
  0x54   : > { %1423 = vmatpush3.bf16.msra.mxu0 %v1543_v34  ;;  %1477 = vmatpush3.bf16.msra.mxu1 %v1543_v34  ;;  %v1559_v50 = vld [vmem:[%s1914_s12 + $0x60] sm:$0xff]   ;;  %v1561_v52 = vld [vmem:[%s1914_s12 + $0x68] sm:$0xff]   ;;  %v1562_v53 = vld [vmem:[%s1914_s12 + $0x30] sm:$0xff]  }
  0x55   : > { %1424 = vmatprep.subr.bf16.mxu0 %v1544_v35  ;;  %1470 = vmatprep.subr.bf16.mxu1 %v1544_v35  ;;  %v1563_v54 = vld [vmem:[%s1914_s12 + $0x70] sm:$0xff]   ;;  %v1564_v55 = vld [vmem:[%s1914_s12 + $0x38] sm:$0xff]   ;;  %v474_v58 = vld [vmem:[#allocation2 + $0x40] sm:$0xff] }
  0x56   : > { %v1565_v56 = vld [vmem:[%s1914_s12 + $0x78] sm:$0xff]   ;;  %v456_v61 = vld [vmem:[#allocation2 + $0xb0] sm:$0xff]  ;;  %v475_v4 = vld [vmem:[#allocation2 + $0xc8] sm:$0xff] }
  0x57   : > { %v458_v57 = vld [vmem:[#allocation2 + $0xd8] sm:$0xff]  ;;  %v457_v9 = vld [vmem:[#allocation2] sm:$0xff]  ;;  %v462_v15 = vld [vmem:[#allocation2 + $0x30] sm:$0xff] }
  0x58   : > { %1425 = vmatpush3.bf16.msra.mxu0 %v1544_v35  ;;  %1478 = vmatpush3.bf16.msra.mxu1 %v1544_v35  ;;  %v472_v62 = vld [vmem:[#allocation2 + $0x38] sm:$0xff]  ;;  %v478_v16 = vld [vmem:[#allocation2 + $0x70] sm:$0xff]  ;;  %v476_v22 = vld [vmem:[#allocation2 + $0xe0] sm:$0xff] }
  0x59   : > { %1426 = vmatprep.subr.bf16.mxu0 %v1545_v36  ;;  %1471 = vmatprep.subr.bf16.mxu1 %v1545_v36  ;;  %v459_v3 = vld [vmem:[#allocation2 + $0x18] sm:$0xff]  ;;  %v460_v21 = vld [vmem:[#allocation2 + $0x50] sm:$0xff]  ;;  %v463_v27 = vld [vmem:[#allocation2 + $0x48] sm:$0xff] }
  0x5a   : > { %v473_v10 = vld [vmem:[#allocation2 + $0x58] sm:$0xff]  ;;  %v479_v28 = vld [vmem:[#allocation2 + $0xc0] sm:$0xff]  ;;  %v461_v33 = vld [vmem:[#allocation2 + $0x68] sm:$0xff] }
  0x5b   : > { %v477_v34 = vld [vmem:[#allocation2 + $0x90] sm:$0xff] }
  0x5c   : > { %1427 = vmatpush3.bf16.msra.mxu0 %v1545_v36  ;;  %1479 = vmatpush3.bf16.msra.mxu1 %v1545_v36 }
  0x5d   : > { %1428 = vmatprep.subr.bf16.mxu0 %v1546_v39  ;;  %1472 = vmatprep.subr.bf16.mxu1 %v1546_v39 }
  0x60   : > { %1429 = vmatpush3.bf16.msra.mxu0 %v1546_v39  ;;  %1480 = vmatpush3.bf16.msra.mxu1 %v1546_v39  ;;  %v466_v39 = vld [vmem:[#allocation2 + $0xe8] sm:$0xff] }
  0x61   : > { %1430 = vmatprep.subr.bf16.mxu0 %v1547_v40  ;;  %1473 = vmatprep.subr.bf16.mxu1 %v1547_v40 }
  0x64   : > { %1431 = vmatpush3.bf16.msra.mxu0 %v1547_v40  ;;  %1481 = vmatpush3.bf16.msra.mxu1 %v1547_v40  ;;  %v482_v40 = vld [vmem:[#allocation2 + $0x10] sm:$0xff] }
  0x65   : > { %1432 = vmatprep.subr.bf16.mxu0 %v1548_v41  ;;  %1474 = vmatprep.subr.bf16.mxu1 %v1548_v41 }
  0x68   : > { %1433 = vmatpush3.bf16.msra.mxu0 %v1548_v41  ;;  %1482 = vmatpush3.bf16.msra.mxu1 %v1548_v41 }
  0x69   : > { %1434 = vmatprep.subr.bf16.mxu0 %v1549_v42  ;;  %1475 = vmatprep.subr.bf16.mxu1 %v1549_v42 }
  0x6c   : > { %1435 = vmatpush3.bf16.msra.mxu0 %v1549_v42  ;;  %1483 = vmatpush3.bf16.msra.mxu1 %v1549_v42 }
  0x6f   : > { %1437 = vmatmul.mubr.bf16.vlgmr.msra.gmra.mxu0 %v1552_v43  ;;  %1453 = vmatmul.mubr.bf16.vlgmr.msra.gmra.mxu1 %v1553_v44 }
  0x70   : > { %1440 = vmatprep.mubr.bf16.mxu0 %v1554_v45  ;;  %1456 = vmatprep.mubr.bf16.mxu1 %v1555_v46  ;;  %v464_v45 = vld [vmem:[#allocation2 + $0x80] sm:$0xff]  ;;  %v480_v46 = vld [vmem:[#allocation2 + $0xa8] sm:$0xff] }
  0x77   : > { %1441 = vmatmul.mubr.bf16.gmra.mxu0 %v1556_v47  ;;  %1457 = vmatmul.mubr.bf16.gmra.mxu1 %v1557_v48 }
  0x78   : > { %1444 = vmatprep.mubr.bf16.mxu0 %v1558_v49  ;;  %1460 = vmatprep.mubr.bf16.mxu1 %v1559_v50 }
  0x7f   : > { %1445 = vmatmul.mubr.bf16.gmra.mxu0 %v1560_v51  ;;  %1461 = vmatmul.mubr.bf16.gmra.mxu1 %v1561_v52  ;;  %v467_v51 = vld [vmem:[#allocation2 + $0xb8] sm:$0xff]  ;;  %v483_v52 = vld [vmem:[#allocation2 + $0x28] sm:$0xff] }
  0x80   : > { %1448 = vmatprep.mubr.bf16.mxu0 %v1562_v53  ;;  %1464 = vmatprep.mubr.bf16.mxu1 %v1563_v54 }
  0x87   : > { %1449 = vmatmul.mubr.bf16.gmra.mxu0 %v1564_v55  ;;  %1465 = vmatmul.mubr.bf16.gmra.mxu1 %v1565_v56 }
 0x12f   : > { %v1438_v59 = vpop.f32.mrf.mxu0  ;;  %v1454_v60 = vpop.f32.mrf.mxu1 }
 0x130   : > { %v843_v63 = vadd.f32 %v1438_v59, %v458_v57  ;;  %v859_v0 = vadd.f32 %v1454_v60, %v474_v58  ;;  %v465_v57 = vld [vmem:[#allocation2 + $0x88] sm:$0xff]  ;;  %v481_v58 = vld [vmem:[#allocation2 + $0xd0] sm:$0xff] }
 0x131   : > { %v714_v1 = vpop.f32.mrf.mxu0  ;;  %v778_v2 = vpop.f32.mrf.mxu1 }
 0x132   : > { %875 = vst [vmem:[#allocation2 + $0xd8] sm:$0xff] %v843_v63  ;;  %891 = vst [vmem:[#allocation2 + $0x40] sm:$0xff] %v859_v0  ;;  %v841_v5 = vadd.f32 %v714_v1, %v456_v61  ;;  %v857_v6 = vadd.f32 %v778_v2, %v472_v62  ;;  %v470_v63 = vld [vmem:[#allocation2 + $0x8] sm:$0xff]  ;;  %v486_v0 = vld [vmem:[#allocation2 + $0x20] sm:$0xff] }
 0x133   : > { %v1439_v7 = vpop.f32.mrf.mxu0  ;;  %v1455_v8 = vpop.f32.mrf.mxu1 }
 0x134   : > { %873 = vst [vmem:[#allocation2 + $0xb0] sm:$0xff] %v841_v5  ;;  %889 = vst [vmem:[#allocation2 + $0x38] sm:$0xff] %v857_v6  ;;  %v844_v11 = vadd.f32 %v1439_v7, %v459_v3  ;;  %v860_v12 = vadd.f32 %v1455_v8, %v475_v4  ;;  %v468_v5 = vld [vmem:[#allocation2 + $0x60] sm:$0xff] }
 0x135   : > { %v717_v13 = vpop.f32.mrf.mxu0  ;;  %v781_v14 = vpop.f32.mrf.mxu1  ;;  %v484_v6 = vld [vmem:[#allocation2 + $0xa0] sm:$0xff] }
 0x136   : > { %876 = vst [vmem:[#allocation2 + $0x18] sm:$0xff] %v844_v11  ;;  %892 = vst [vmem:[#allocation2 + $0xc8] sm:$0xff] %v860_v12  ;;  %v842_v17 = vadd.f32 %v717_v13, %v457_v9  ;;  %v858_v18 = vadd.f32 %v781_v14, %v473_v10  ;;  %v471_v11 = vld [vmem:[#allocation2 + $0x78] sm:$0xff] }
 0x137   : > { %v1442_v19 = vpop.f32.mrf.mxu0  ;;  %v1458_v20 = vpop.f32.mrf.mxu1  ;;  %v487_v12 = vld [vmem:[#allocation2 + $0x98] sm:$0xff] }
 0x138   : > { %874 = vst [vmem:[#allocation2] sm:$0xff] %v842_v17  ;;  %890 = vst [vmem:[#allocation2 + $0x58] sm:$0xff] %v858_v18  ;;  %v847_v23 = vadd.f32 %v1442_v19, %v462_v15  ;;  %v863_v24 = vadd.f32 %v1458_v20, %v478_v16  ;;  %v469_v17 = vld [vmem:[#allocation2 + $0xf0] sm:$0xff]  ;;  %v485_v18 = vld [vmem:[#allocation2 + $0xf8] sm:$0xff] }
 0x139   : > { %v730_v25 = vpop.f32.mrf.mxu0  ;;  %v794_v26 = vpop.f32.mrf.mxu1 }
 0x13a   : > { %879 = vst [vmem:[#allocation2 + $0x30] sm:$0xff] %v847_v23  ;;  %895 = vst [vmem:[#allocation2 + $0x70] sm:$0xff] %v863_v24  ;;  %v845_v29 = vadd.f32 %v730_v25, %v460_v21  ;;  %v861_v30 = vadd.f32 %v794_v26, %v476_v22 }
 0x13b   : > { %v1443_v31 = vpop.f32.mrf.mxu0  ;;  %v1459_v32 = vpop.f32.mrf.mxu1 }
 0x13c   : > { %877 = vst [vmem:[#allocation2 + $0x50] sm:$0xff] %v845_v29  ;;  %893 = vst [vmem:[#allocation2 + $0xe0] sm:$0xff] %v861_v30  ;;  %v848_v35 = vadd.f32 %v1443_v31, %v463_v27  ;;  %v864_v36 = vadd.f32 %v1459_v32, %v479_v28 }
 0x13d   : > { %v733_v37 = vpop.f32.mrf.mxu0  ;;  %v797_v38 = vpop.f32.mrf.mxu1 }
 0x13e   : > { %880 = vst [vmem:[#allocation2 + $0x48] sm:$0xff] %v848_v35  ;;  %896 = vst [vmem:[#allocation2 + $0xc0] sm:$0xff] %v864_v36  ;;  %v846_v41 = vadd.f32 %v733_v37, %v461_v33  ;;  %v862_v42 = vadd.f32 %v797_v38, %v477_v34 }
 0x13f   : > { %v1446_v43 = vpop.f32.mrf.mxu0  ;;  %v1462_v44 = vpop.f32.mrf.mxu1 }
 0x140   : > { %878 = vst [vmem:[#allocation2 + $0x68] sm:$0xff] %v846_v41  ;;  %894 = vst [vmem:[#allocation2 + $0x90] sm:$0xff] %v862_v42  ;;  %v851_v47 = vadd.f32 %v1446_v43, %v466_v39  ;;  %v867_v48 = vadd.f32 %v1462_v44, %v482_v40 }
 0x141   : > { %v746_v49 = vpop.f32.mrf.mxu0  ;;  %v810_v50 = vpop.f32.mrf.mxu1 }
 0x142   : > { %883 = vst [vmem:[#allocation2 + $0xe8] sm:$0xff] %v851_v47  ;;  %899 = vst [vmem:[#allocation2 + $0x10] sm:$0xff] %v867_v48  ;;  %v849_v53 = vadd.f32 %v746_v49, %v464_v45  ;;  %v865_v54 = vadd.f32 %v810_v50, %v480_v46 }
 0x143   : > { %v1447_v55 = vpop.f32.mrf.mxu0  ;;  %v1463_v56 = vpop.f32.mrf.mxu1 }
 0x144   : > { %881 = vst [vmem:[#allocation2 + $0x80] sm:$0xff] %v849_v53  ;;  %897 = vst [vmem:[#allocation2 + $0xa8] sm:$0xff] %v865_v54  ;;  %v852_v59 = vadd.f32 %v1447_v55, %v467_v51  ;;  %v868_v60 = vadd.f32 %v1463_v56, %v483_v52 }
 0x145   : > { %v749_v61 = vpop.f32.mrf.mxu0  ;;  %v813_v62 = vpop.f32.mrf.mxu1 }
 0x146   : > { %884 = vst [vmem:[#allocation2 + $0xb8] sm:$0xff] %v852_v59  ;;  %900 = vst [vmem:[#allocation2 + $0x28] sm:$0xff] %v868_v60  ;;  %v850_v1 = vadd.f32 %v749_v61, %v465_v57  ;;  %v866_v2 = vadd.f32 %v813_v62, %v481_v58 }
 0x147   : > { %v1450_v3 = vpop.f32.mrf.mxu0  ;;  %v1466_v4 = vpop.f32.mrf.mxu1 }
 0x148   : > { %882 = vst [vmem:[#allocation2 + $0x88] sm:$0xff] %v850_v1  ;;  %898 = vst [vmem:[#allocation2 + $0xd0] sm:$0xff] %v866_v2  ;;  %v855_v7 = vadd.f32 %v1450_v3, %v470_v63  ;;  %v871_v8 = vadd.f32 %v1466_v4, %v486_v0 }
 0x149   : > { %v762_v9 = vpop.f32.mrf.mxu0  ;;  %v826_v10 = vpop.f32.mrf.mxu1 }
 0x14a   : > { %887 = vst [vmem:[#allocation2 + $0x8] sm:$0xff] %v855_v7  ;;  %903 = vst [vmem:[#allocation2 + $0x20] sm:$0xff] %v871_v8  ;;  %v853_v13 = vadd.f32 %v762_v9, %v468_v5  ;;  %v869_v14 = vadd.f32 %v826_v10, %v484_v6 }
 0x14b   : > { %v1451_v15 = vpop.f32.mrf.mxu0  ;;  %v1467_v16 = vpop.f32.mrf.mxu1 }
 0x14c   : > { %885 = vst [vmem:[#allocation2 + $0x60] sm:$0xff] %v853_v13  ;;  %901 = vst [vmem:[#allocation2 + $0xa0] sm:$0xff] %v869_v14  ;;  %v856_v19 = vadd.f32 %v1451_v15, %v471_v11  ;;  %v872_v20 = vadd.f32 %v1467_v16, %v487_v12  ;;  %908 = sbr.rel (%p1360_p13) target bundleno = 420 (0x1a4), region = 81 }
 0x14d   : > { %v765_v21 = vpop.f32.mrf.mxu0  ;;  %v829_v22 = vpop.f32.mrf.mxu1 }
 0x14e   : > { %888 = vst [vmem:[#allocation2 + $0x78] sm:$0xff] %v856_v19  ;;  %904 = vst [vmem:[#allocation2 + $0x98] sm:$0xff] %v872_v20  ;;  %v854_v23 = vadd.f32 %v765_v21, %v469_v17  ;;  %v870_v24 = vadd.f32 %v829_v22, %v485_v18 }
 0x150   : > { %886 = vst [vmem:[#allocation2 + $0xf0] sm:$0xff] %v854_v23  ;;  %902 = vst [vmem:[#allocation2 + $0xf8] sm:$0xff] %v870_v24 }
 0x151   : > { %v909_v25 = vld [vmem:[#allocation2 + $0xb0] sm:$0xff]  ;;  %v1945_v26 = vld [vmem:[%s2034_s2] ss:$0 sm:$0xff]  ;;  %v911_v30 = vld [vmem:[#allocation2 + $0xd8] sm:$0xff] }
 0x152   : > { %v910_v27 = vld [vmem:[#allocation2] sm:$0xff]  ;;  %v948_v28 = vadd.f32 %v1945_v26, %v909_v25  ;;  %v912_v31 = vld [vmem:[#allocation2 + $0x18] sm:$0xff]  ;;  %v913_v32 = vld [vmem:[#allocation2 + $0x50] sm:$0xff]  ;;  %v950_v33 = vadd.f32 %v1945_v26, %v911_v30 }
 0x153   : > { %v949_v29 = vadd.f32 %v1945_v26, %v910_v27  ;;  %v951_v34 = vadd.f32 %v1945_v26, %v912_v31  ;;  %v952_v35 = vadd.f32 %v1945_v26, %v913_v32  ;;  %v914_v36 = vld [vmem:[#allocation2 + $0x68] sm:$0xff]  ;;  %v915_v37 = vld [vmem:[#allocation2 + $0x30] sm:$0xff]  ;;  %v917_v43 = vld [vmem:[#allocation2 + $0x80] sm:$0xff] }
 0x154   : > { %v916_v38 = vld [vmem:[#allocation2 + $0x48] sm:$0xff]  ;;  %v1362_v39 = vmul.f32 -1.442695, %v948_v28  ;;  %v953_v41 = vadd.f32 %v1945_v26, %v914_v36  ;;  %v954_v42 = vadd.f32 %v1945_v26, %v915_v37  ;;  %v1364_v45 = vmul.f32 -1.442695, %v950_v33  ;;  %v920_v51 = vld [vmem:[#allocation2 + $0xb8] sm:$0xff] }
 0x155   : > { %v1363_v40 = vmul.f32 -1.442695, %v949_v29  ;;  %v918_v44 = vld [vmem:[#allocation2 + $0x88] sm:$0xff]  ;;  %v1365_v46 = vmul.f32 -1.442695, %v951_v34  ;;  %v955_v47 = vadd.f32 %v1945_v26, %v916_v38  ;;  %v956_v49 = vadd.f32 %v1945_v26, %v917_v43  ;;  %v921_v54 = vld [vmem:[#allocation2 + $0x60] sm:$0xff] }
 0x156   : > { %1566 = vpow2.f32 %v1362_v39  ;;  %v1366_v48 = vmul.f32 -1.442695, %v952_v35  ;;  %v919_v50 = vld [vmem:[#allocation2 + $0xe8] sm:$0xff]  ;;  %v1367_v52 = vmul.f32 -1.442695, %v953_v41  ;;  %v957_v53 = vadd.f32 %v1945_v26, %v918_v44  ;;  %v924_v63 = vld [vmem:[#allocation2 + $0x78] sm:$0xff] }
 0x157   : > { %1568 = vpow2.f32 %v1363_v40  ;;  %v1368_v55 = vmul.f32 -1.442695, %v954_v42  ;;  %v958_v56 = vadd.f32 %v1945_v26, %v919_v50  ;;  %v922_v57 = vld [vmem:[#allocation2 + $0xf0] sm:$0xff]  ;;  %v1369_v58 = vmul.f32 -1.442695, %v955_v47  ;;  %v923_v60 = vld [vmem:[#allocation2 + $0x8] sm:$0xff] }
 0x158   : > { %1570 = vpow2.f32 %v1364_v45  ;;  %v959_v59 = vadd.f32 %v1945_v26, %v920_v51  ;;  %v1370_v61 = vmul.f32 -1.442695, %v956_v49  ;;  %v960_v62 = vadd.f32 %v1945_v26, %v921_v54  ;;  %v925_v28 = vld [vmem:[#allocation2 + $0x38] sm:$0xff]  ;;  %v927_v34 = vld [vmem:[#allocation2 + $0x40] sm:$0xff]  ;;  %v928_v38 = vld [vmem:[#allocation2 + $0xc8] sm:$0xff] }
 0x159   : > { %1572 = vpow2.f32 %v1365_v46  ;;  %v1371_v0 = vmul.f32 -1.442695, %v957_v53  ;;  %v961_v1 = vadd.f32 %v1945_v26, %v922_v57  ;;  %v1372_v2 = vmul.f32 -1.442695, %v958_v56  ;;  %v926_v31 = vld [vmem:[#allocation2 + $0x58] sm:$0xff]  ;;  %v929_v42 = vld [vmem:[#allocation2 + $0xe0] sm:$0xff] }
 0x15a   : > { %1574 = vpow2.f32 %v1366_v48  ;;  %v962_v3 = vadd.f32 %v1945_v26, %v923_v60  ;;  %v1373_v4 = vmul.f32 -1.442695, %v959_v59  ;;  %v963_v5 = vadd.f32 %v1945_v26, %v924_v63  ;;  %v930_v46 = vld [vmem:[#allocation2 + $0x90] sm:$0xff]  ;;  %v933_v60 = vld [vmem:[#allocation2 + $0xa8] sm:$0xff] }
 0x15b   : > { %1576 = vpow2.f32 %v1367_v52  ;;  %v1374_v6 = vmul.f32 -1.442695, %v960_v62  ;;  %v1375_v7 = vmul.f32 -1.442695, %v961_v1  ;;  %v964_v37 = vadd.f32 %v1945_v26, %v925_v28  ;;  %v931_v50 = vld [vmem:[#allocation2 + $0x70] sm:$0xff] }
 0x15c   : > { %1578 = vpow2.f32 %v1368_v55  ;;  %v1376_v8 = vmul.f32 -1.442695, %v962_v3  ;;  %v1377_v9 = vmul.f32 -1.442695, %v963_v5  ;;  %v965_v41 = vadd.f32 %v1945_v26, %v926_v31  ;;  %v932_v55 = vld [vmem:[#allocation2 + $0xc0] sm:$0xff] }
 0x15d   : > { %1580 = vpow2.f32 %v1369_v58  ;;  %v966_v45 = vadd.f32 %v1945_v26, %v927_v34  ;;  %v967_v49 = vadd.f32 %v1945_v26, %v928_v38  ;;  %v1378_v53 = vmul.f32 -1.442695, %v964_v37 }
 0x15e   : > { %1582 = vpow2.f32 %v1370_v61  ;;  %v968_v54 = vadd.f32 %v1945_v26, %v929_v42  ;;  %v1379_v58 = vmul.f32 -1.442695, %v965_v41  ;;  %v969_v59 = vadd.f32 %v1945_v26, %v930_v46 }
 0x15f   : > { %1584 = vpow2.f32 %v1371_v0  ;;  %v1380_v62 = vmul.f32 -1.442695, %v966_v45  ;;  %v970_v63 = vadd.f32 %v1945_v26, %v931_v50  ;;  %v934_v0 = vld [vmem:[#allocation2 + $0xd0] sm:$0xff]  ;;  %v971_v3 = vadd.f32 %v1945_v26, %v932_v55 }
 0x160   : > { %1586 = vpow2.f32 %v1372_v2  ;;  %v1381_v2 = vmul.f32 -1.442695, %v967_v49 }
 0x161   : > { %1588 = vpow2.f32 %v1373_v4  ;;  %v935_v4 = vld [vmem:[#allocation2 + $0x10] sm:$0xff] }
 0x162   : > { %1590 = vpow2.f32 %v1374_v6  ;;  %v1382_v6 = vmul.f32 -1.442695, %v968_v54 }
 0x163   : > { %v1567_v10 = vpop.eup %1566  ;;  %1592 = vpow2.f32 %v1375_v7  ;;  %v972_v7 = vadd.f32 %v1945_v26, %v933_v60 }
 0x164   : > { %v1569_v11 = vpop.eup %1568  ;;  %v1076_v12 = vadd.f32 1.0, %v1567_v10  ;;  %1594 = vpow2.f32 %v1376_v8  ;;  %v936_v8 = vld [vmem:[#allocation2 + $0x28] sm:$0xff]  ;;  %v1383_v10 = vmul.f32 -1.442695, %v969_v59 }
 0x165   : > { %v1571_v13 = vpop.eup %1570  ;;  %v1077_v14 = vadd.f32 1.0, %v1569_v11  ;;  %1596 = vpow2.f32 %v1377_v9  ;;  %v973_v11 = vadd.f32 %v1945_v26, %v934_v0 }
 0x166   : > { %v1573_v15 = vpop.eup %1572  ;;  %1598 = vrcp.f32 %v1076_v12  ;;  %v1078_v16 = vadd.f32 1.0, %v1571_v13  ;;  %v937_v12 = vld [vmem:[#allocation2 + $0xa0] sm:$0xff] }
 0x167   : > { %v1575_v17 = vpop.eup %1574  ;;  %1600 = vrcp.f32 %v1077_v14  ;;  %v1079_v18 = vadd.f32 1.0, %v1573_v15  ;;  %v1384_v14 = vmul.f32 -1.442695, %v970_v63  ;;  %v974_v15 = vadd.f32 %v1945_v26, %v935_v4 }
 0x168   : > { %v1577_v19 = vpop.eup %1576  ;;  %1602 = vrcp.f32 %v1078_v16  ;;  %v1080_v20 = vadd.f32 1.0, %v1575_v17  ;;  %v938_v16 = vld [vmem:[#allocation2 + $0xf8] sm:$0xff] }
 0x169   : > { %v1579_v21 = vpop.eup %1578  ;;  %1604 = vrcp.f32 %v1079_v18  ;;  %v1081_v22 = vadd.f32 1.0, %v1577_v19  ;;  %v1385_v18 = vmul.f32 -1.442695, %v971_v3  ;;  %v975_v19 = vadd.f32 %v1945_v26, %v936_v8 }
 0x16a   : > { %v1581_v23 = vpop.eup %1580  ;;  %1606 = vrcp.f32 %v1080_v20  ;;  %v1082_v24 = vadd.f32 1.0, %v1579_v21  ;;  %v939_v20 = vld [vmem:[#allocation2 + $0x20] sm:$0xff]  ;;  %v977_v28 = vadd.f32 %v1945_v26, %v938_v16 }
 0x16b   : > { %v1583_v25 = vpop.eup %1582  ;;  %1608 = vrcp.f32 %v1081_v22  ;;  %v1083_v27 = vadd.f32 1.0, %v1581_v23  ;;  %v1386_v22 = vmul.f32 -1.442695, %v972_v7  ;;  %v976_v23 = vadd.f32 %v1945_v26, %v937_v12 }
 0x16c   : > { %v1585_v29 = vpop.eup %1584  ;;  %1610 = vrcp.f32 %v1082_v24  ;;  %v1084_v30 = vadd.f32 1.0, %v1583_v25  ;;  %v940_v24 = vld [vmem:[#allocation2 + $0x98] sm:$0xff]  ;;  %v978_v31 = vadd.f32 %v1945_v26, %v939_v20  ;;  %v1391_v38 = vmul.f32 -1.442695, %v977_v28 }
 0x16d   : > { %v1587_v32 = vpop.eup %1586  ;;  %1612 = vrcp.f32 %v1083_v27  ;;  %v1085_v33 = vadd.f32 1.0, %v1585_v29  ;;  %v1387_v27 = vmul.f32 -1.442695, %v973_v11  ;;  %v979_v34 = vadd.f32 %v1945_v26, %v940_v24 }
 0x16e   : > { %v1589_v35 = vpop.eup %1588  ;;  %1614 = vrcp.f32 %v1084_v30  ;;  %v1086_v36 = vadd.f32 1.0, %v1587_v32  ;;  %v1388_v30 = vmul.f32 -1.442695, %v974_v15 }
 0x16f   : > { %v1591_v39 = vpop.eup %1590  ;;  %1616 = vrcp.f32 %v1085_v33  ;;  %v1087_v40 = vadd.f32 1.0, %v1589_v35  ;;  %v1389_v33 = vmul.f32 -1.442695, %v975_v19  ;;  %v1393_v42 = vmul.f32 -1.442695, %v979_v34 }
 0x170   : > { %v1593_v43 = vpop.eup %1592  ;;  %1618 = vrcp.f32 %v1086_v36  ;;  %v1088_v44 = vadd.f32 1.0, %v1591_v39  ;;  %v1390_v36 = vmul.f32 -1.442695, %v976_v23 }
 0x171   : > { %v1595_v47 = vpop.eup %1594  ;;  %1620 = vrcp.f32 %v1087_v40  ;;  %v1089_v48 = vadd.f32 1.0, %v1593_v43  ;;  %v1392_v40 = vmul.f32 -1.442695, %v978_v31 }
 0x172   : > { %v1597_v51 = vpop.eup %1596  ;;  %1622 = vrcp.f32 %v1088_v44  ;;  %v1090_v52 = vadd.f32 1.0, %v1595_v47 }
 0x173   : > { %v1599_v56 = vpop.eup %1598  ;;  %1624 = vrcp.f32 %v1089_v48  ;;  %v1091_v57 = vadd.f32 1.0, %v1597_v51 }
 0x174   : > { %v1601_v61 = vpop.eup %1600  ;;  %1172 = vst [vmem:[%s1912_s29] sm:$0xff] %v1599_v56  ;;  %1626 = vrcp.f32 %v1090_v52 }
 0x175   : > { %v1603_v1 = vpop.eup %1602  ;;  %1173 = vst [vmem:[%s1912_s29 + $0x8] sm:$0xff] %v1601_v61  ;;  %1628 = vrcp.f32 %v1091_v57 }
 0x176   : > { %v1605_v5 = vpop.eup %1604  ;;  %1174 = vst [vmem:[%s1912_s29 + $0x10] sm:$0xff] %v1603_v1  ;;  %1630 = vpow2.f32 %v1378_v53 }
 0x177   : > { %v1607_v9 = vpop.eup %1606  ;;  %1175 = vst [vmem:[%s1912_s29 + $0x18] sm:$0xff] %v1605_v5  ;;  %1632 = vpow2.f32 %v1379_v58 }
 0x178   : > { %v1609_v13 = vpop.eup %1608  ;;  %1176 = vst [vmem:[%s1912_s29 + $0x20] sm:$0xff] %v1607_v9  ;;  %1634 = vpow2.f32 %v1380_v62 }
 0x179   : > { %v1611_v17 = vpop.eup %1610  ;;  %1177 = vst [vmem:[%s1912_s29 + $0x28] sm:$0xff] %v1609_v13  ;;  %1636 = vpow2.f32 %v1381_v2 }
 0x17a   : > { %v1613_v21 = vpop.eup %1612  ;;  %1178 = vst [vmem:[%s1912_s29 + $0x30] sm:$0xff] %v1611_v17  ;;  %1638 = vpow2.f32 %v1382_v6 }
 0x17b   : > { %v1615_v25 = vpop.eup %1614  ;;  %1179 = vst [vmem:[%s1912_s29 + $0x38] sm:$0xff] %v1613_v21  ;;  %1640 = vpow2.f32 %v1383_v10 }
 0x17c   : > { %v1617_v29 = vpop.eup %1616  ;;  %1180 = vst [vmem:[%s1912_s29 + $0x40] sm:$0xff] %v1615_v25  ;;  %1642 = vpow2.f32 %v1384_v14 }
 0x17d   : > { %v1619_v32 = vpop.eup %1618  ;;  %1181 = vst [vmem:[%s1912_s29 + $0x48] sm:$0xff] %v1617_v29  ;;  %1644 = vpow2.f32 %v1385_v18 }
 0x17e   : > { %v1621_v35 = vpop.eup %1620  ;;  %1182 = vst [vmem:[%s1912_s29 + $0x50] sm:$0xff] %v1619_v32  ;;  %1646 = vpow2.f32 %v1386_v22 }
 0x17f   : > { %v1623_v37 = vpop.eup %1622  ;;  %1183 = vst [vmem:[%s1912_s29 + $0x58] sm:$0xff] %v1621_v35  ;;  %1648 = vpow2.f32 %v1387_v27 }
 0x180   : > { %v1625_v39 = vpop.eup %1624  ;;  %1184 = vst [vmem:[%s1912_s29 + $0x60] sm:$0xff] %v1623_v37  ;;  %1650 = vpow2.f32 %v1388_v30 }
 0x181   : > { %v1627_v41 = vpop.eup %1626  ;;  %1185 = vst [vmem:[%s1912_s29 + $0x68] sm:$0xff] %v1625_v39  ;;  %1652 = vpow2.f32 %v1389_v33 }
 0x182   : > { %v1629_v43 = vpop.eup %1628  ;;  %1186 = vst [vmem:[%s1912_s29 + $0x70] sm:$0xff] %v1627_v41  ;;  %1654 = vpow2.f32 %v1390_v36 }
 0x183   : > { %v1631_v26 = vpop.eup %1630  ;;  %1187 = vst [vmem:[%s1912_s29 + $0x78] sm:$0xff] %v1629_v43  ;;  %1656 = vpow2.f32 %v1391_v38 }
 0x184   : > { %v1633_v44 = vpop.eup %1632  ;;  %v1092_v45 = vadd.f32 1.0, %v1631_v26  ;;  %1658 = vpow2.f32 %v1392_v40 }
 0x185   : > { %v1635_v46 = vpop.eup %1634  ;;  %v1093_v47 = vadd.f32 1.0, %v1633_v44  ;;  %1660 = vpow2.f32 %v1393_v42 }
 0x186   : > { %v1637_v48 = vpop.eup %1636  ;;  %1662 = vrcp.f32 %v1092_v45  ;;  %v1094_v49 = vadd.f32 1.0, %v1635_v46 }
 0x187   : > { %v1639_v50 = vpop.eup %1638  ;;  %1664 = vrcp.f32 %v1093_v47  ;;  %v1095_v51 = vadd.f32 1.0, %v1637_v48 }
 0x188   : > { %v1641_v52 = vpop.eup %1640  ;;  %1666 = vrcp.f32 %v1094_v49  ;;  %v1096_v53 = vadd.f32 1.0, %v1639_v50 }
 0x189   : > { %v1643_v54 = vpop.eup %1642  ;;  %1668 = vrcp.f32 %v1095_v51  ;;  %v1097_v55 = vadd.f32 1.0, %v1641_v52 }
 0x18a   : > { %v1645_v56 = vpop.eup %1644  ;;  %1670 = vrcp.f32 %v1096_v53  ;;  %v1098_v57 = vadd.f32 1.0, %v1643_v54 }
 0x18b   : > { %v1647_v58 = vpop.eup %1646  ;;  %1672 = vrcp.f32 %v1097_v55  ;;  %v1099_v59 = vadd.f32 1.0, %v1645_v56 }
 0x18c   : > { %v1649_v60 = vpop.eup %1648  ;;  %1674 = vrcp.f32 %v1098_v57  ;;  %v1100_v61 = vadd.f32 1.0, %v1647_v58 }
 0x18d   : > { %v1651_v62 = vpop.eup %1650  ;;  %1676 = vrcp.f32 %v1099_v59  ;;  %v1101_v63 = vadd.f32 1.0, %v1649_v60 }
 0x18e   : > { %v1653_v0 = vpop.eup %1652  ;;  %1678 = vrcp.f32 %v1100_v61  ;;  %v1102_v1 = vadd.f32 1.0, %v1651_v62 }
 0x18f   : > { %v1655_v2 = vpop.eup %1654  ;;  %1680 = vrcp.f32 %v1101_v63  ;;  %v1103_v3 = vadd.f32 1.0, %v1653_v0 }
 0x190   : > { %v1657_v4 = vpop.eup %1656  ;;  %1682 = vrcp.f32 %v1102_v1  ;;  %v1104_v5 = vadd.f32 1.0, %v1655_v2 }
 0x191   : > { %v1659_v6 = vpop.eup %1658  ;;  %1684 = vrcp.f32 %v1103_v3  ;;  %v1105_v7 = vadd.f32 1.0, %v1657_v4 }
 0x192   : > { %v1661_v8 = vpop.eup %1660  ;;  %1686 = vrcp.f32 %v1104_v5  ;;  %v1106_v9 = vadd.f32 1.0, %v1659_v6 }
 0x193   : > { %v1663_v10 = vpop.eup %1662  ;;  %1688 = vrcp.f32 %v1105_v7  ;;  %v1107_v11 = vadd.f32 1.0, %v1661_v8 }
 0x194   : > { %v1665_v12 = vpop.eup %1664  ;;  %1188 = vst [vmem:[%s1912_s29 + $0x80] sm:$0xff] %v1663_v10  ;;  %1690 = vrcp.f32 %v1106_v9 }
 0x195   : > { %v1667_v13 = vpop.eup %1666  ;;  %1189 = vst [vmem:[%s1912_s29 + $0x88] sm:$0xff] %v1665_v12  ;;  %1692 = vrcp.f32 %v1107_v11 }
 0x196   : > { %v1669_v14 = vpop.eup %1668  ;;  %1190 = vst [vmem:[%s1912_s29 + $0x90] sm:$0xff] %v1667_v13 }
 0x197   : > { %v1671_v15 = vpop.eup %1670  ;;  %1191 = vst [vmem:[%s1912_s29 + $0x98] sm:$0xff] %v1669_v14 }
 0x198   : > { %v1673_v16 = vpop.eup %1672  ;;  %1192 = vst [vmem:[%s1912_s29 + $0xa0] sm:$0xff] %v1671_v15 }
 0x199   : > { %v1675_v17 = vpop.eup %1674  ;;  %1193 = vst [vmem:[%s1912_s29 + $0xa8] sm:$0xff] %v1673_v16 }
 0x19a   : > { %v1677_v18 = vpop.eup %1676  ;;  %1194 = vst [vmem:[%s1912_s29 + $0xb0] sm:$0xff] %v1675_v17 }
 0x19b   : > { %v1679_v19 = vpop.eup %1678  ;;  %1195 = vst [vmem:[%s1912_s29 + $0xb8] sm:$0xff] %v1677_v18 }
 0x19c   : > { %v1681_v20 = vpop.eup %1680  ;;  %1196 = vst [vmem:[%s1912_s29 + $0xc0] sm:$0xff] %v1679_v19 }
 0x19d   : > { %v1683_v21 = vpop.eup %1682  ;;  %1197 = vst [vmem:[%s1912_s29 + $0xc8] sm:$0xff] %v1681_v20 }
 0x19e   : > { %v1685_v22 = vpop.eup %1684  ;;  %1198 = vst [vmem:[%s1912_s29 + $0xd0] sm:$0xff] %v1683_v21 }
 0x19f   : > { %v1687_v23 = vpop.eup %1686  ;;  %1199 = vst [vmem:[%s1912_s29 + $0xd8] sm:$0xff] %v1685_v22 }
 0x1a0   : > { %v1689_v24 = vpop.eup %1688  ;;  %1200 = vst [vmem:[%s1912_s29 + $0xe0] sm:$0xff] %v1687_v23 }
 0x1a1   : > { %v1691_v25 = vpop.eup %1690  ;;  %1201 = vst [vmem:[%s1912_s29 + $0xe8] sm:$0xff] %v1689_v24 }
 0x1a2   : > { %v1693_v27 = vpop.eup %1692  ;;  %1202 = vst [vmem:[%s1912_s29 + $0xf0] sm:$0xff] %v1691_v25 }
 0x1a3   : > { %1203 = vst [vmem:[%s1912_s29 + $0xf8] sm:$0xff] %v1693_v27 }
 0x1a4 PF: > { %s13_s18 = sadd.s32 1, %s1748_s18   ;;  %s2036_s12 = smov %s1728_s13 }
 0x1a5   : > { %p10_p0 = scmp.ge.s32.totalorder %s13_s18, 26   ;;  %s2037_s13 = smov %s1822_s25 }
 0x1a6   : > { %s2038_s14 = smov %s1740_s16  ;;  %s2039_s15 = smov %s1744_s17 }
 0x1a7   : > { %s2040_s16 = smov %s2043_s19  ;;  %s2041_s17 = smov %s2047_s20 }
 0x1a8   :  { %12 = sbr.rel (!%p10_p0) target bundleno = 4 (0x4), region = 122 }

</bundles_post_ra>
